<compile_context>
chip_gen: v5e
topology: v5e:2x2
jax: 0.10.0
libtpu: 0.0.40
codegen_flags: <defaults>
</compile_context>

<pallas_src>
import functools

import jax
import jax.numpy as jnp
from jax import lax
from jax.experimental import pallas as pl
from jax.experimental.pallas import tpu as pltpu


def _round_up(x, m):
    return (x + m - 1) // m * m


def _vmem_limit_bytes():
    # Larger budget on v5e/v6e (128 MiB physical VMEM), capped on v7x (64 MiB).
    try:
        cap = getattr(pltpu.get_tpu_info(), "vmem_capacity_bytes", None)
        if cap is not None and cap >= 100 * 1024 * 1024:
            return 80 * 1024 * 1024
    except Exception:
        pass
    return 48 * 1024 * 1024


_VMEM_LIMIT = _vmem_limit_bytes()
_CDT = jnp.bfloat16  # storage / MXU-operand dtype for activations & weights


# --------------------------------------------------------------------------
# Kernel: fused 3x3 spatial conv (im2col, one deep-K MXU dot) + masked
# per-frame GroupNorm partial statistics.  Optional prologue applies the
# previous block's folded GN affine + SiLU + mask to the input, so block-1's
# normalized activations never round-trip through HBM.
#
# Frame layout (shared by every activation tensor):
#   (B*F, R8, Cp)  with R8 = round_up((H+2)*(W+2), 8), Cp = round_up(C, 128);
#   row r = flattened padded-frame position r; pad rows/cols and rows >= R
#   hold exact zeros.
# --------------------------------------------------------------------------
def _make_conv_gn_stats_kernel(*, taps, R8, G, fused_gn, out_dtype):
    def conv_body(xin, w_ref, mask, h_ref, st_ref):
        cin = xin.shape[-1]
        # Transient zero guard rows (top & bottom) so every tap offset is a
        # non-negative static slice and the store covers the full block.
        zg = jnp.zeros((G, cin), xin.dtype)
        xz = jnp.concatenate([zg, xin, zg], axis=0)          # (R8 + 2G, Cin_p)
        # In-VMEM im2col: (R8, 9*Cin_p) slab, one MXU matmul with K = 9*Cin_p.
        slab = jnp.concatenate([xz[t:t + R8, :] for t in taps], axis=-1)
        acc = jnp.dot(slab, w_ref[...], preferred_element_type=jnp.float32)
        out = jnp.where(mask, acc, 0.0)       # exact zeros at pad positions
        h_ref[0] = out.astype(out_dtype)      # single lane/sublane-dense store
        # Masked per-channel partial sums (bias folded on host, stats in f32).
        s = jnp.sum(out, axis=0, keepdims=True)
        sq = jnp.sum(out * out, axis=0, keepdims=True)
        st_ref[0] = jnp.concatenate([s, sq], axis=0)

    if fused_gn:
        def kernel(x_ref, w_ref, m_ref, a_ref, b_ref, h_ref, st_ref):
            mask = m_ref[...] > 0.0
            # block-1 GN-apply (folded affine) + SiLU + mask prologue.
            y = x_ref[0].astype(jnp.float32) * a_ref[0] + b_ref[0]
            y = y * (1.0 / (1.0 + jnp.exp(-y)))
            y = jnp.where(mask, y, 0.0)
            conv_body(y.astype(_CDT), w_ref, mask, h_ref, st_ref)
    else:
        def kernel(x_ref, w_ref, m_ref, h_ref, st_ref):
            mask = m_ref[...] > 0.0
            conv_body(x_ref[0], w_ref, mask, h_ref, st_ref)

    return kernel


def conv3x3_gn_stats(x, w, mask, a=None, b=None, *, B, Fr, taps, R8, G):
    """x: (B*Fr, R8, Cin_p) bf16; w: (9*Cin_p, Cout_p) bf16; mask: (R8, 1) f32.
    Optional a/b: (B, 1, Cin_p) folded GN affine applied to x before the conv.
    Returns (h: (B*Fr, R8, Cout_p) bf16, stats: (B*Fr, 2, Cout_p) f32)."""
    BF, _, cin_p = x.shape
    k, cout_p = w.shape
    fused = a is not None
    kernel = _make_conv_gn_stats_kernel(taps=taps, R8=R8, G=G,
                                        fused_gn=fused, out_dtype=_CDT)
    in_specs = [
        pl.BlockSpec((1, R8, cin_p), lambda bb, ff: (bb * Fr + ff, 0, 0)),
        pl.BlockSpec((k, cout_p), lambda bb, ff: (0, 0)),
        pl.BlockSpec((R8, 1), lambda bb, ff: (0, 0)),
    ]
    args = [x, w, mask]
    if fused:
        in_specs += [pl.BlockSpec((1, 1, cin_p), lambda bb, ff: (bb, 0, 0)),
                     pl.BlockSpec((1, 1, cin_p), lambda bb, ff: (bb, 0, 0))]
        args += [a, b]
    return pl.pallas_call(
        kernel,
        out_shape=(jax.ShapeDtypeStruct((BF, R8, cout_p), _CDT),
                   jax.ShapeDtypeStruct((BF, 2, cout_p), jnp.float32)),
        grid=(B, Fr),
        in_specs=in_specs,
        out_specs=(
            pl.BlockSpec((1, R8, cout_p), lambda bb, ff: (bb * Fr + ff, 0, 0)),
            pl.BlockSpec((1, 2, cout_p), lambda bb, ff: (bb * Fr + ff, 0, 0)),
        ),
        compiler_params=pltpu.CompilerParams(
            dimension_semantics=("parallel", "parallel"),
            vmem_limit_bytes=_VMEM_LIMIT),
    )(*args)


# --------------------------------------------------------------------------
# Kernel: block-2 GroupNorm-apply (folded affine) + SiLU fused with the
# 1x1x1 residual conv + add.
# Note: pad positions of the output hold the residual bias (x is zero there);
# harmless because the padded frame is cropped on the host, but do NOT reuse
# this output in the padded-frame layout as a conv input.
# --------------------------------------------------------------------------
def _gn_silu_res_kernel(h_ref, a_ref, b_ref, m_ref, x_ref, w_ref, rb_ref, o_ref):
    y = h_ref[0].astype(jnp.float32) * a_ref[0] + b_ref[0]
    y = y * (1.0 / (1.0 + jnp.exp(-y)))
    y = jnp.where(m_ref[...] > 0.0, y, 0.0)
    res = jnp.dot(x_ref[0], w_ref[...], preferred_element_type=jnp.float32)
    o_ref[0] = (y + res + rb_ref[...]).astype(o_ref.dtype)


def gn_silu_residual(h, a, b, mask, xres, wr, br, *, B, Fr):
    BF, R8, cout_p = h.shape
    cin_p = xres.shape[-1]
    return pl.pallas_call(
        _gn_silu_res_kernel,
        out_shape=jax.ShapeDtypeStruct((BF, R8, cout_p), jnp.float32),
        grid=(B, Fr),
        in_specs=[
            pl.BlockSpec((1, R8, cout_p), lambda bb, ff: (bb * Fr + ff, 0, 0)),
            pl.BlockSpec((1, 1, cout_p), lambda bb, ff: (bb, 0, 0)),
            pl.BlockSpec((1, 1, cout_p), lambda bb, ff: (bb, 0, 0)),
            pl.BlockSpec((R8, 1), lambda bb, ff: (0, 0)),
            pl.BlockSpec((1, R8, cin_p), lambda bb, ff: (bb * Fr + ff, 0, 0)),
            pl.BlockSpec((cin_p, cout_p), lambda bb, ff: (0, 0)),
            pl.BlockSpec((1, cout_p), lambda bb, ff: (0, 0)),
        ],
        out_specs=pl.BlockSpec((1, R8, cout_p),
                               lambda bb, ff: (bb * Fr + ff, 0, 0)),
        compiler_params=pltpu.CompilerParams(
            dimension_semantics=("parallel", "parallel"),
            vmem_limit_bytes=_VMEM_LIMIT),
    )(h, a, b, mask, xres, wr, br)


# --------------------------------------------------------------------------
# Host-side O(B*C) GroupNorm finalize + affine fold: y = h*a + b.
# `stats` are per-frame sums of the BIAS-FREE conv output; the conv bias is
# folded here exactly (GroupNorm of h'+bias == adjusted stats of h').
# --------------------------------------------------------------------------
def _fold_gn_affine(stats, bias, gamma, beta, scale, shift, *, B, Fr, groups,
                    n_true, c_real, c_pad, eps):
    st = stats.reshape(B, Fr, 2, c_pad).sum(axis=1)[:, :, :c_real]   # (B,2,C)
    s_nb, sq_nb = st[:, 0, :], st[:, 1, :]
    n = float(n_true)
    s = s_nb + n * bias[None, :]
    sq = sq_nb + 2.0 * bias[None, :] * s_nb + n * (bias ** 2)[None, :]
    cs = c_real // groups
    s_g = s.reshape(B, groups, cs).sum(-1)
    sq_g = sq.reshape(B, groups, cs).sum(-1)
    cnt = n * cs
    mean_g = s_g / cnt
    var_g = jnp.maximum(sq_g / cnt - mean_g * mean_g, 0.0)
    inv_g = lax.rsqrt(var_g + eps)
    mu = jnp.repeat(mean_g, cs, axis=1)
    inv = jnp.repeat(inv_g, cs, axis=1)
    ga = inv * gamma[None, :]
    a = ga * (scale + 1.0)
    b = (beta[None, :] + (bias[None, :] - mu) * ga) * (scale + 1.0) + shift
    # padded channels stay identically zero (zero weights -> zero h, a=b=0)
    a = jnp.pad(a, ((0, 0), (0, c_pad - c_real))).reshape(B, 1, c_pad)
    b = jnp.pad(b, ((0, 0), (0, c_pad - c_real))).reshape(B, 1, c_pad)
    return a.astype(jnp.float32), b.astype(jnp.float32)


# --------------------------------------------------------------------------
# Full ResnetBlock forward
# --------------------------------------------------------------------------
def resnet_block_forward(params, x, time_emb, groups=8, eps=1e-5):
    """x: (B, Cin, F, H, W) NCDHW; time_emb: (B, T). Returns (B, Cout, F, H, W)."""
    B, Cin, Fr, H, W = x.shape
    Cout = params["w1"].shape[-1]
    Hp, Wp = H + 2, W + 2
    R = Hp * Wp
    R8 = _round_up(R, 8)
    G = Wp + 1
    taps = tuple(di * Wp + dj for di in range(3) for dj in range(3))
    Cin_p = max(128, _round_up(Cin, 128))
    Cout_p = max(128, _round_up(Cout, 128))

    # channels-last, zero-padded, frame-flattened, lane/sublane-padded, bf16
    x_cl = jnp.transpose(x, (0, 2, 3, 4, 1)).astype(jnp.float32)
    xp = jnp.pad(x_cl, ((0, 0), (0, 0), (1, 1), (1, 1), (0, 0)))
    xp = xp.reshape(B * Fr, R, Cin)
    xp = jnp.pad(xp, ((0, 0), (0, R8 - R), (0, Cin_p - Cin))).astype(_CDT)

    # true-pixel mask over stored rows
    pos = jnp.arange(R8)
    hh, ww = pos // Wp, pos % Wp
    mask = ((pos < R) & (hh >= 1) & (hh <= H) & (ww >= 1) & (ww <= W))
    mask = mask.astype(jnp.float32).reshape(R8, 1)

    # conv weights: (3,3,Cin,Cout) -> padded (9*Cin_p, Cout_p), bf16
    def pack_w(w, ci, ci_p, co, co_p):
        wz = jnp.zeros((3, 3, ci_p, co_p), jnp.float32).at[:, :, :ci, :co].set(w)
        return wz.reshape(9 * ci_p, co_p).astype(_CDT)

    w1 = pack_w(params["w1"], Cin, Cin_p, Cout, Cout_p)
    w2 = pack_w(params["w2"], Cout, Cout_p, Cout, Cout_p)
    wr = (jnp.zeros((Cin_p, Cout_p), jnp.float32)
          .at[:Cin, :Cout].set(params["wr"]).astype(_CDT))
    br = jnp.pad(params["br"], (0, Cout_p - Cout)).reshape(1, Cout_p)
    br = br.astype(jnp.float32)

    # time-embedding MLP (SiLU -> Linear): tiny, plain XLA
    t = time_emb.astype(jnp.float32)
    emb = (t * jax.nn.sigmoid(t)) @ params["wm"] + params["bm"]
    scale, shift = emb[:, :Cout], emb[:, Cout:]

    n_true = Fr * H * W

    # ---- block1: conv(1,3,3) + per-frame GN stats -------------------------
    h1, st1 = conv3x3_gn_stats(xp, w1, mask, B=B, Fr=Fr, taps=taps, R8=R8, G=G)
    a1, b1 = _fold_gn_affine(st1, params["b1"], params["g1"], params["be1"],
                             scale, shift, B=B, Fr=Fr, groups=groups,
                             n_true=n_true, c_real=Cout, c_pad=Cout_p, eps=eps)

    # ---- block2: (GN1-apply + SiLU prologue) + conv(1,3,3) + GN2 stats ----
    h2, st2 = conv3x3_gn_stats(h1, w2, mask, a1, b1,
                               B=B, Fr=Fr, taps=taps, R8=R8, G=G)
    zer = jnp.zeros((B, Cout), jnp.float32)
    a2, b2 = _fold_gn_affine(st2, params["b2"], params["g2"], params["be2"],
                             zer, zer, B=B, Fr=Fr, groups=groups,
                             n_true=n_true, c_real=Cout, c_pad=Cout_p, eps=eps)

    # ---- GN2-apply + SiLU fused with 1x1x1 residual conv + add ------------
    out_p = gn_silu_residual(h2, a2, b2, mask, xp, wr, br, B=B, Fr=Fr)

    out = out_p[:, :R, :Cout].reshape(B, Fr, Hp, Wp, Cout)[:, :, 1:H + 1, 1:W + 1, :]
    return jnp.transpose(out, (0, 4, 1, 2, 3))


# --------------------------------------------------------------------------
# Pure-JAX reference (verification only)
# --------------------------------------------------------------------------
def reference_forward(params, x, time_emb, groups=8):
    B, Cin, Fr, H, W = x.shape
    Cout = params["w1"].shape[-1]
    xc = jnp.transpose(x, (0, 2, 3, 4, 1)).astype(jnp.float32)

    def conv(a, w, b):
        y = lax.conv_general_dilated(
            a, w[None], window_strides=(1, 1, 1),
            padding=((0, 0), (1, 1), (1, 1)),
            dimension_numbers=("NDHWC", "DHWIO", "NDHWC"))
        return y + b

    def gnorm(h, gamma, beta):
        cs = Cout // groups
        hg = h.reshape(B, Fr, H, W, groups, cs)
        mu = hg.mean(axis=(1, 2, 3, 5), keepdims=True)
        var = ((hg - mu) ** 2).mean(axis=(1, 2, 3, 5), keepdims=True)
        hn = ((hg - mu) / jnp.sqrt(var + 1e-5)).reshape(B, Fr, H, W, Cout)
        return hn * gamma + beta

    silu = lambda v: v * jax.nn.sigmoid(v)

    emb = silu(time_emb.astype(jnp.float32)) @ params["wm"] + params["bm"]
    scale = emb[:, :Cout].reshape(B, 1, 1, 1, Cout)
    shift = emb[:, Cout:].reshape(B, 1, 1, 1, Cout)

    h = conv(xc, params["w1"], params["b1"])
    h = silu(gnorm(h, params["g1"], params["be1"]) * (scale + 1.0) + shift)
    h = conv(h, params["w2"], params["b2"])
    h = silu(gnorm(h, params["g2"], params["be2"]))
    out = h + (xc @ params["wr"] + params["br"])
    return jnp.transpose(out, (0, 4, 1, 2, 3))


# --------------------------------------------------------------------------
if __name__ == "__main__":
    B, dim, dim_out = 2, 4, 16
    Fr, H, W = 3, 16, 16
    time_emb_dim, groups = 32, 8

    ks = jax.random.split(jax.random.PRNGKey(0), 14)
    params = {
        # block1 conv weight (kh, kw, Cin, Cout) == torch Conv3d weight[co, ci, 0, kh, kw]
        "w1": 0.1 * jax.random.normal(ks[0], (3, 3, dim, dim_out), jnp.float32),
        "b1": 0.1 * jax.random.normal(ks[1], (dim_out,), jnp.float32),
        "g1": jnp.ones((dim_out,), jnp.float32) + 0.05 * jax.random.normal(ks[2], (dim_out,)),
        "be1": 0.05 * jax.random.normal(ks[3], (dim_out,), jnp.float32),
        "w2": 0.1 * jax.random.normal(ks[4], (3, 3, dim_out, dim_out), jnp.float32),
        "b2": 0.1 * jax.random.normal(ks[5], (dim_out,), jnp.float32),
        "g2": jnp.ones((dim_out,), jnp.float32) + 0.05 * jax.random.normal(ks[6], (dim_out,)),
        "be2": 0.05 * jax.random.normal(ks[7], (dim_out,), jnp.float32),
        # time MLP: Linear(time_emb_dim, 2*dim_out)
        "wm": 0.1 * jax.random.normal(ks[8], (time_emb_dim, 2 * dim_out), jnp.float32),
        "bm": 0.1 * jax.random.normal(ks[9], (2 * dim_out,), jnp.float32),
        # residual 1x1x1 conv (dim != dim_out)
        "wr": 0.1 * jax.random.normal(ks[10], (dim, dim_out), jnp.float32),
        "br": 0.1 * jax.random.normal(ks[11], (dim_out,), jnp.float32),
    }
    x = jax.random.normal(ks[12], (B, dim, Fr, H, W), jnp.float32)
    t_emb = jax.random.normal(ks[13], (B, time_emb_dim), jnp.float32)

    fwd = jax.jit(functools.partial(resnet_block_forward, groups=groups))
    out = jax.block_until_ready(fwd(params, x, t_emb))
    ref = jax.block_until_ready(reference_forward(params, x, t_emb, groups=groups))

    assert out.shape == (B, dim_out, Fr, H, W), out.shape
    max_err = float(jnp.max(jnp.abs(out - ref)))
    # bf16-stored intermediates with f32 accumulation; tolerance sized accordingly
    assert max_err < 6e-2, f"mismatch vs reference: {max_err}"
    print("KERNEL_OK")
</pallas_src>

<mosaic_0001>
module attributes {stable_mosaic.version = 11 : i64} {
  func.func @kernel(%arg0: i32, %arg1: i32, %arg2: memref<1x328x128xbf16, #tpu.memory_space<vmem>>, %arg3: memref<1152x128xbf16, #tpu.memory_space<vmem>>, %arg4: memref<328x1xf32, #tpu.memory_space<vmem>>, %arg5: memref<1x328x128xbf16, #tpu.memory_space<vmem>>, %arg6: memref<1x2x128xf32, #tpu.memory_space<vmem>>) attributes {dimension_semantics = [#tpu.dimension_semantics<parallel>, #tpu.dimension_semantics<parallel>], iteration_bounds = array<i64: 2, 3>, scalar_prefetch = 0 : i64, scratch_operands = 0 : i64, tpu.core_type = #tpu.core_type<tc>, window_params = [{transform_indices = @transform_0, window_bounds = array<i64: 1, 328, 128>}, {pipeline_mode = #tpu.pipeline_mode<synchronous>, transform_indices = @transform_1, window_bounds = array<i64: 1152, 128>}, {pipeline_mode = #tpu.pipeline_mode<synchronous>, transform_indices = @transform_2, window_bounds = array<i64: 328, 1>}, {transform_indices = @transform_3, window_bounds = array<i64: 1, 328, 128>}, {transform_indices = @transform_4, window_bounds = array<i64: 1, 2, 128>}]} {
    %c0 = arith.constant 0 : index
    %c0_0 = arith.constant 0 : index
    %0 = vector.load %arg4[%c0, %c0_0] : memref<328x1xf32, #tpu.memory_space<vmem>>, vector<328x1xf32>
    %cst = arith.constant 0.000000e+00 : f32
    %1 = vector.broadcast %cst : f32 to vector<328x1xf32>
    %2 = arith.cmpf ogt, %0, %1 : vector<328x1xf32>
    %c0_1 = arith.constant 0 : index
    %c0_2 = arith.constant 0 : index
    %c0_3 = arith.constant 0 : index
    %3 = vector.load %arg2[%c0_1, %c0_2, %c0_3] : memref<1x328x128xbf16, #tpu.memory_space<vmem>>, vector<1x328x128xbf16>
    %4 = vector.shape_cast %3 : vector<1x328x128xbf16> to vector<328x128xbf16>
    %cst_4 = arith.constant 0.000000e+00 : bf16
    %5 = vector.broadcast %cst_4 : bf16 to vector<19x128xbf16>
    %6 = tpu.concatenate %5, %4, %5 in 0 : vector<19x128xbf16>, vector<328x128xbf16>, vector<19x128xbf16> -> vector<366x128xbf16>
    %7 = vector.extract_strided_slice %6 {offsets = [0, 0], sizes = [328, 128], strides = [1, 1]} : vector<366x128xbf16> to vector<328x128xbf16>
    %8 = vector.extract_strided_slice %6 {offsets = [1, 0], sizes = [328, 128], strides = [1, 1]} : vector<366x128xbf16> to vector<328x128xbf16>
    %9 = vector.extract_strided_slice %6 {offsets = [2, 0], sizes = [328, 128], strides = [1, 1]} : vector<366x128xbf16> to vector<328x128xbf16>
    %10 = vector.extract_strided_slice %6 {offsets = [18, 0], sizes = [328, 128], strides = [1, 1]} : vector<366x128xbf16> to vector<328x128xbf16>
    %11 = vector.extract_strided_slice %6 {offsets = [19, 0], sizes = [328, 128], strides = [1, 1]} : vector<366x128xbf16> to vector<328x128xbf16>
    %12 = vector.extract_strided_slice %6 {offsets = [20, 0], sizes = [328, 128], strides = [1, 1]} : vector<366x128xbf16> to vector<328x128xbf16>
    %13 = vector.extract_strided_slice %6 {offsets = [36, 0], sizes = [328, 128], strides = [1, 1]} : vector<366x128xbf16> to vector<328x128xbf16>
    %14 = vector.extract_strided_slice %6 {offsets = [37, 0], sizes = [328, 128], strides = [1, 1]} : vector<366x128xbf16> to vector<328x128xbf16>
    %15 = vector.extract_strided_slice %6 {offsets = [38, 0], sizes = [328, 128], strides = [1, 1]} : vector<366x128xbf16> to vector<328x128xbf16>
    %16 = tpu.concatenate %7, %8, %9, %10, %11, %12, %13, %14, %15 in 1 : vector<328x128xbf16>, vector<328x128xbf16>, vector<328x128xbf16>, vector<328x128xbf16>, vector<328x128xbf16>, vector<328x128xbf16>, vector<328x128xbf16>, vector<328x128xbf16>, vector<328x128xbf16> -> vector<328x1152xbf16>
    %c0_5 = arith.constant 0 : index
    %c0_6 = arith.constant 0 : index
    %17 = vector.load %arg3[%c0_5, %c0_6] : memref<1152x128xbf16, #tpu.memory_space<vmem>>, vector<1152x128xbf16>
    %cst_7 = arith.constant dense<0.000000e+00> : vector<328x128xf32>
    %18 = tpu.matmul %16, %17, %cst_7 {dimension_numbers = #tpu.dot_dimension_numbers<[1], [0], [0], [1], [0, 0, 1, 1], [], []>} : vector<328x1152xbf16>, vector<1152x128xbf16>, vector<328x128xf32> -> vector<328x128xf32>
    %cst_8 = arith.constant 0.000000e+00 : f32
    %19 = vector.shape_cast %2 : vector<328x1xi1> to vector<328x1xi1>
    %20 = vector.broadcast %19 : vector<328x1xi1> to vector<328x128xi1>
    %21 = vector.broadcast %cst_8 : f32 to vector<328x128xf32>
    %22 = arith.select %20, %18, %21 : vector<328x128xi1>, vector<328x128xf32>
    %23 = arith.truncf %22 : vector<328x128xf32> to vector<328x128xbf16>
    %c0_9 = arith.constant 0 : index
    %c0_10 = arith.constant 0 : index
    %c0_11 = arith.constant 0 : index
    %24 = vector.load %arg5[%c0_9, %c0_10, %c0_11] : memref<1x328x128xbf16, #tpu.memory_space<vmem>>, vector<1x328x128xbf16>
    %25 = vector.shape_cast %24 : vector<1x328x128xbf16> to vector<328x128xbf16>
    %26 = vector.shape_cast %23 : vector<328x128xbf16> to vector<1x328x128xbf16>
    tpu.vector_store %arg5[%c0_9, %c0_10, %c0_11], %26 {strides = array<i32>} : memref<1x328x128xbf16, #tpu.memory_space<vmem>>, vector<1x328x128xbf16>,
    %cst_12 = arith.constant dense<0.000000e+00> : vector<128xf32>
    %27 = vector.multi_reduction <add>, %22, %cst_12 [0] : vector<328x128xf32> to vector<128xf32>
    %28 = vector.shape_cast %27 : vector<128xf32> to vector<1x128xf32>
    %29 = arith.mulf %22, %22 : vector<328x128xf32>
    %cst_13 = arith.constant dense<0.000000e+00> : vector<128xf32>
    %30 = vector.multi_reduction <add>, %29, %cst_13 [0] : vector<328x128xf32> to vector<128xf32>
    %31 = vector.shape_cast %30 : vector<128xf32> to vector<1x128xf32>
    %32 = tpu.concatenate %28, %31 in 0 : vector<1x128xf32>, vector<1x128xf32> -> vector<2x128xf32>
    %c0_14 = arith.constant 0 : index
    %c0_15 = arith.constant 0 : index
    %c0_16 = arith.constant 0 : index
    %33 = vector.load %arg6[%c0_14, %c0_15, %c0_16] : memref<1x2x128xf32, #tpu.memory_space<vmem>>, vector<1x2x128xf32>
    %34 = vector.shape_cast %33 : vector<1x2x128xf32> to vector<2x128xf32>
    %35 = vector.shape_cast %32 : vector<2x128xf32> to vector<1x2x128xf32>
    tpu.vector_store %arg6[%c0_14, %c0_15, %c0_16], %35 {strides = array<i32>} : memref<1x2x128xf32, #tpu.memory_space<vmem>>, vector<1x2x128xf32>,
    return
  }
  func.func @transform_0(%arg0: i32, %arg1: i32) -> (i32, i32, i32) {
    %c3_i32 = arith.constant 3 : i32
    %0 = arith.muli %arg0, %c3_i32 : i32
    %1 = arith.addi %0, %arg1 : i32
    %c0_i32 = arith.constant 0 : i32
    %c0_i32_0 = arith.constant 0 : i32
    %c0_i32_1 = arith.constant 0 : i32
    return %1, %c0_i32, %c0_i32_0 : i32, i32, i32
  }
  func.func @transform_1(%arg0: i32, %arg1: i32) -> (i32, i32) {
    %c0_i32 = arith.constant 0 : i32
    %c0_i32_0 = arith.constant 0 : i32
    %c0_i32_1 = arith.constant 0 : i32
    return %c0_i32, %c0_i32_0 : i32, i32
  }
  func.func @transform_2(%arg0: i32, %arg1: i32) -> (i32, i32) {
    %c0_i32 = arith.constant 0 : i32
    %c0_i32_0 = arith.constant 0 : i32
    %c0_i32_1 = arith.constant 0 : i32
    return %c0_i32, %c0_i32_0 : i32, i32
  }
  func.func @transform_3(%arg0: i32, %arg1: i32) -> (i32, i32, i32) {
    %c3_i32 = arith.constant 3 : i32
    %0 = arith.muli %arg0, %c3_i32 : i32
    %1 = arith.addi %0, %arg1 : i32
    %c0_i32 = arith.constant 0 : i32
    %c0_i32_0 = arith.constant 0 : i32
    %c0_i32_1 = arith.constant 0 : i32
    return %1, %c0_i32, %c0_i32_0 : i32, i32, i32
  }
  func.func @transform_4(%arg0: i32, %arg1: i32) -> (i32, i32, i32) {
    %c3_i32 = arith.constant 3 : i32
    %0 = arith.muli %arg0, %c3_i32 : i32
    %1 = arith.addi %0, %arg1 : i32
    %c0_i32 = arith.constant 0 : i32
    %c0_i32_0 = arith.constant 0 : i32
    %c0_i32_1 = arith.constant 0 : i32
    return %1, %c0_i32, %c0_i32_0 : i32, i32, i32
  }
}

module attributes {stable_mosaic.version = 11 : i64} {
  func.func @kernel(%arg0: i32, %arg1: i32, %arg2: memref<1x328x128xbf16, #tpu.memory_space<vmem>>, %arg3: memref<1152x128xbf16, #tpu.memory_space<vmem>>, %arg4: memref<328x1xf32, #tpu.memory_space<vmem>>, %arg5: memref<1x1x128xf32, #tpu.memory_space<vmem>>, %arg6: memref<1x1x128xf32, #tpu.memory_space<vmem>>, %arg7: memref<1x328x128xbf16, #tpu.memory_space<vmem>>, %arg8: memref<1x2x128xf32, #tpu.memory_space<vmem>>) attributes {dimension_semantics = [#tpu.dimension_semantics<parallel>, #tpu.dimension_semantics<parallel>], iteration_bounds = array<i64: 2, 3>, scalar_prefetch = 0 : i64, scratch_operands = 0 : i64, tpu.core_type = #tpu.core_type<tc>, window_params = [{transform_indices = @transform_0, window_bounds = array<i64: 1, 328, 128>}, {pipeline_mode = #tpu.pipeline_mode<synchronous>, transform_indices = @transform_1, window_bounds = array<i64: 1152, 128>}, {pipeline_mode = #tpu.pipeline_mode<synchronous>, transform_indices = @transform_2, window_bounds = array<i64: 328, 1>}, {transform_indices = @transform_3, window_bounds = array<i64: 1, 1, 128>}, {transform_indices = @transform_4, window_bounds = array<i64: 1, 1, 128>}, {transform_indices = @transform_5, window_bounds = array<i64: 1, 328, 128>}, {transform_indices = @transform_6, window_bounds = array<i64: 1, 2, 128>}]} {
    %c0 = arith.constant 0 : index
    %c0_0 = arith.constant 0 : index
    %0 = vector.load %arg4[%c0, %c0_0] : memref<328x1xf32, #tpu.memory_space<vmem>>, vector<328x1xf32>
    %cst = arith.constant 0.000000e+00 : f32
    %1 = vector.broadcast %cst : f32 to vector<328x1xf32>
    %2 = arith.cmpf ogt, %0, %1 : vector<328x1xf32>
    %c0_1 = arith.constant 0 : index
    %c0_2 = arith.constant 0 : index
    %c0_3 = arith.constant 0 : index
    %3 = vector.load %arg2[%c0_1, %c0_2, %c0_3] : memref<1x328x128xbf16, #tpu.memory_space<vmem>>, vector<1x328x128xbf16>
    %4 = vector.shape_cast %3 : vector<1x328x128xbf16> to vector<328x128xbf16>
    %5 = arith.extf %4 : vector<328x128xbf16> to vector<328x128xf32>
    %c0_4 = arith.constant 0 : index
    %c0_5 = arith.constant 0 : index
    %c0_6 = arith.constant 0 : index
    %6 = vector.load %arg5[%c0_4, %c0_5, %c0_6] : memref<1x1x128xf32, #tpu.memory_space<vmem>>, vector<1x1x128xf32>
    %7 = vector.shape_cast %6 : vector<1x1x128xf32> to vector<1x128xf32>
    %8 = vector.broadcast %7 : vector<1x128xf32> to vector<328x128xf32>
    %9 = arith.mulf %5, %8 : vector<328x128xf32>
    %c0_7 = arith.constant 0 : index
    %c0_8 = arith.constant 0 : index
    %c0_9 = arith.constant 0 : index
    %10 = vector.load %arg6[%c0_7, %c0_8, %c0_9] : memref<1x1x128xf32, #tpu.memory_space<vmem>>, vector<1x1x128xf32>
    %11 = vector.shape_cast %10 : vector<1x1x128xf32> to vector<1x128xf32>
    %12 = vector.broadcast %11 : vector<1x128xf32> to vector<328x128xf32>
    %13 = arith.addf %9, %12 : vector<328x128xf32>
    %cst_10 = arith.constant 0.000000e+00 : f32
    %14 = vector.broadcast %cst_10 : f32 to vector<328x128xf32>
    %15 = arith.subf %14, %13 : vector<328x128xf32>
    %16 = math.exp %15 : vector<328x128xf32>
    %cst_11 = arith.constant 1.000000e+00 : f32
    %17 = vector.broadcast %cst_11 : f32 to vector<328x128xf32>
    %18 = arith.addf %17, %16 : vector<328x128xf32>
    %cst_12 = arith.constant 1.000000e+00 : f32
    %19 = vector.broadcast %cst_12 : f32 to vector<328x128xf32>
    %20 = arith.divf %19, %18 : vector<328x128xf32>
    %21 = arith.mulf %13, %20 : vector<328x128xf32>
    %cst_13 = arith.constant 0.000000e+00 : f32
    %22 = vector.shape_cast %2 : vector<328x1xi1> to vector<328x1xi1>
    %23 = vector.broadcast %22 : vector<328x1xi1> to vector<328x128xi1>
    %24 = vector.broadcast %cst_13 : f32 to vector<328x128xf32>
    %25 = arith.select %23, %21, %24 : vector<328x128xi1>, vector<328x128xf32>
    %26 = arith.truncf %25 : vector<328x128xf32> to vector<328x128xbf16>
    %cst_14 = arith.constant 0.000000e+00 : bf16
    %27 = vector.broadcast %cst_14 : bf16 to vector<19x128xbf16>
    %28 = tpu.concatenate %27, %26, %27 in 0 : vector<19x128xbf16>, vector<328x128xbf16>, vector<19x128xbf16> -> vector<366x128xbf16>
    %29 = vector.extract_strided_slice %28 {offsets = [0, 0], sizes = [328, 128], strides = [1, 1]} : vector<366x128xbf16> to vector<328x128xbf16>
    %30 = vector.extract_strided_slice %28 {offsets = [1, 0], sizes = [328, 128], strides = [1, 1]} : vector<366x128xbf16> to vector<328x128xbf16>
    %31 = vector.extract_strided_slice %28 {offsets = [2, 0], sizes = [328, 128], strides = [1, 1]} : vector<366x128xbf16> to vector<328x128xbf16>
    %32 = vector.extract_strided_slice %28 {offsets = [18, 0], sizes = [328, 128], strides = [1, 1]} : vector<366x128xbf16> to vector<328x128xbf16>
    %33 = vector.extract_strided_slice %28 {offsets = [19, 0], sizes = [328, 128], strides = [1, 1]} : vector<366x128xbf16> to vector<328x128xbf16>
    %34 = vector.extract_strided_slice %28 {offsets = [20, 0], sizes = [328, 128], strides = [1, 1]} : vector<366x128xbf16> to vector<328x128xbf16>
    %35 = vector.extract_strided_slice %28 {offsets = [36, 0], sizes = [328, 128], strides = [1, 1]} : vector<366x128xbf16> to vector<328x128xbf16>
    %36 = vector.extract_strided_slice %28 {offsets = [37, 0], sizes = [328, 128], strides = [1, 1]} : vector<366x128xbf16> to vector<328x128xbf16>
    %37 = vector.extract_strided_slice %28 {offsets = [38, 0], sizes = [328, 128], strides = [1, 1]} : vector<366x128xbf16> to vector<328x128xbf16>
    %38 = tpu.concatenate %29, %30, %31, %32, %33, %34, %35, %36, %37 in 1 : vector<328x128xbf16>, vector<328x128xbf16>, vector<328x128xbf16>, vector<328x128xbf16>, vector<328x128xbf16>, vector<328x128xbf16>, vector<328x128xbf16>, vector<328x128xbf16>, vector<328x128xbf16> -> vector<328x1152xbf16>
    %c0_15 = arith.constant 0 : index
    %c0_16 = arith.constant 0 : index
    %39 = vector.load %arg3[%c0_15, %c0_16] : memref<1152x128xbf16, #tpu.memory_space<vmem>>, vector<1152x128xbf16>
    %cst_17 = arith.constant dense<0.000000e+00> : vector<328x128xf32>
    %40 = tpu.matmul %38, %39, %cst_17 {dimension_numbers = #tpu.dot_dimension_numbers<[1], [0], [0], [1], [0, 0, 1, 1], [], []>} : vector<328x1152xbf16>, vector<1152x128xbf16>, vector<328x128xf32> -> vector<328x128xf32>
    %cst_18 = arith.constant 0.000000e+00 : f32
    %41 = vector.shape_cast %2 : vector<328x1xi1> to vector<328x1xi1>
    %42 = vector.broadcast %41 : vector<328x1xi1> to vector<328x128xi1>
    %43 = vector.broadcast %cst_18 : f32 to vector<328x128xf32>
    %44 = arith.select %42, %40, %43 : vector<328x128xi1>, vector<328x128xf32>
    %45 = arith.truncf %44 : vector<328x128xf32> to vector<328x128xbf16>
    %c0_19 = arith.constant 0 : index
    %c0_20 = arith.constant 0 : index
    %c0_21 = arith.constant 0 : index
    %46 = vector.load %arg7[%c0_19, %c0_20, %c0_21] : memref<1x328x128xbf16, #tpu.memory_space<vmem>>, vector<1x328x128xbf16>
    %47 = vector.shape_cast %46 : vector<1x328x128xbf16> to vector<328x128xbf16>
    %48 = vector.shape_cast %45 : vector<328x128xbf16> to vector<1x328x128xbf16>
    tpu.vector_store %arg7[%c0_19, %c0_20, %c0_21], %48 {strides = array<i32>} : memref<1x328x128xbf16, #tpu.memory_space<vmem>>, vector<1x328x128xbf16>,
    %cst_22 = arith.constant dense<0.000000e+00> : vector<128xf32>
    %49 = vector.multi_reduction <add>, %44, %cst_22 [0] : vector<328x128xf32> to vector<128xf32>
    %50 = vector.shape_cast %49 : vector<128xf32> to vector<1x128xf32>
    %51 = arith.mulf %44, %44 : vector<328x128xf32>
    %cst_23 = arith.constant dense<0.000000e+00> : vector<128xf32>
    %52 = vector.multi_reduction <add>, %51, %cst_23 [0] : vector<328x128xf32> to vector<128xf32>
    %53 = vector.shape_cast %52 : vector<128xf32> to vector<1x128xf32>
    %54 = tpu.concatenate %50, %53 in 0 : vector<1x128xf32>, vector<1x128xf32> -> vector<2x128xf32>
    %c0_24 = arith.constant 0 : index
    %c0_25 = arith.constant 0 : index
    %c0_26 = arith.constant 0 : index
    %55 = vector.load %arg8[%c0_24, %c0_25, %c0_26] : memref<1x2x128xf32, #tpu.memory_space<vmem>>, vector<1x2x128xf32>
    %56 = vector.shape_cast %55 : vector<1x2x128xf32> to vector<2x128xf32>
    %57 = vector.shape_cast %54 : vector<2x128xf32> to vector<1x2x128xf32>
    tpu.vector_store %arg8[%c0_24, %c0_25, %c0_26], %57 {strides = array<i32>} : memref<1x2x128xf32, #tpu.memory_space<vmem>>, vector<1x2x128xf32>,
    return
  }
  func.func @transform_0(%arg0: i32, %arg1: i32) -> (i32, i32, i32) {
    %c3_i32 = arith.constant 3 : i32
    %0 = arith.muli %arg0, %c3_i32 : i32
    %1 = arith.addi %0, %arg1 : i32
    %c0_i32 = arith.constant 0 : i32
    %c0_i32_0 = arith.constant 0 : i32
    %c0_i32_1 = arith.constant 0 : i32
    return %1, %c0_i32, %c0_i32_0 : i32, i32, i32
  }
  func.func @transform_1(%arg0: i32, %arg1: i32) -> (i32, i32) {
    %c0_i32 = arith.constant 0 : i32
    %c0_i32_0 = arith.constant 0 : i32
    %c0_i32_1 = arith.constant 0 : i32
    return %c0_i32, %c0_i32_0 : i32, i32
  }
  func.func @transform_2(%arg0: i32, %arg1: i32) -> (i32, i32) {
    %c0_i32 = arith.constant 0 : i32
    %c0_i32_0 = arith.constant 0 : i32
    %c0_i32_1 = arith.constant 0 : i32
    return %c0_i32, %c0_i32_0 : i32, i32
  }
  func.func @transform_3(%arg0: i32, %arg1: i32) -> (i32, i32, i32) {
    %c0_i32 = arith.constant 0 : i32
    %c0_i32_0 = arith.constant 0 : i32
    %c0_i32_1 = arith.constant 0 : i32
    return %arg0, %c0_i32, %c0_i32_0 : i32, i32, i32
  }
  func.func @transform_4(%arg0: i32, %arg1: i32) -> (i32, i32, i32) {
    %c0_i32 = arith.constant 0 : i32
    %c0_i32_0 = arith.constant 0 : i32
    %c0_i32_1 = arith.constant 0 : i32
    return %arg0, %c0_i32, %c0_i32_0 : i32, i32, i32
  }
  func.func @transform_5(%arg0: i32, %arg1: i32) -> (i32, i32, i32) {
    %c3_i32 = arith.constant 3 : i32
    %0 = arith.muli %arg0, %c3_i32 : i32
    %1 = arith.addi %0, %arg1 : i32
    %c0_i32 = arith.constant 0 : i32
    %c0_i32_0 = arith.constant 0 : i32
    %c0_i32_1 = arith.constant 0 : i32
    return %1, %c0_i32, %c0_i32_0 : i32, i32, i32
  }
  func.func @transform_6(%arg0: i32, %arg1: i32) -> (i32, i32, i32) {
    %c3_i32 = arith.constant 3 : i32
    %0 = arith.muli %arg0, %c3_i32 : i32
    %1 = arith.addi %0, %arg1 : i32
    %c0_i32 = arith.constant 0 : i32
    %c0_i32_0 = arith.constant 0 : i32
    %c0_i32_1 = arith.constant 0 : i32
    return %1, %c0_i32, %c0_i32_0 : i32, i32, i32
  }
}

module attributes {stable_mosaic.version = 11 : i64} {
  func.func @_gn_silu_res_kernel(%arg0: i32, %arg1: i32, %arg2: memref<1x328x128xbf16, #tpu.memory_space<vmem>>, %arg3: memref<1x1x128xf32, #tpu.memory_space<vmem>>, %arg4: memref<1x1x128xf32, #tpu.memory_space<vmem>>, %arg5: memref<328x1xf32, #tpu.memory_space<vmem>>, %arg6: memref<1x328x128xbf16, #tpu.memory_space<vmem>>, %arg7: memref<128x128xbf16, #tpu.memory_space<vmem>>, %arg8: memref<1x128xf32, #tpu.memory_space<vmem>>, %arg9: memref<1x328x128xf32, #tpu.memory_space<vmem>>) attributes {dimension_semantics = [#tpu.dimension_semantics<parallel>, #tpu.dimension_semantics<parallel>], iteration_bounds = array<i64: 2, 3>, scalar_prefetch = 0 : i64, scratch_operands = 0 : i64, tpu.core_type = #tpu.core_type<tc>, window_params = [{transform_indices = @transform_0, window_bounds = array<i64: 1, 328, 128>}, {transform_indices = @transform_1, window_bounds = array<i64: 1, 1, 128>}, {transform_indices = @transform_2, window_bounds = array<i64: 1, 1, 128>}, {pipeline_mode = #tpu.pipeline_mode<synchronous>, transform_indices = @transform_3, window_bounds = array<i64: 328, 1>}, {transform_indices = @transform_4, window_bounds = array<i64: 1, 328, 128>}, {pipeline_mode = #tpu.pipeline_mode<synchronous>, transform_indices = @transform_5, window_bounds = array<i64: 128, 128>}, {pipeline_mode = #tpu.pipeline_mode<synchronous>, transform_indices = @transform_6, window_bounds = array<i64: 1, 128>}, {transform_indices = @transform_7, window_bounds = array<i64: 1, 328, 128>}]} {
    %c0 = arith.constant 0 : index
    %c0_0 = arith.constant 0 : index
    %c0_1 = arith.constant 0 : index
    %0 = vector.load %arg2[%c0, %c0_0, %c0_1] : memref<1x328x128xbf16, #tpu.memory_space<vmem>>, vector<1x328x128xbf16>
    %1 = vector.shape_cast %0 : vector<1x328x128xbf16> to vector<328x128xbf16>
    %2 = arith.extf %1 : vector<328x128xbf16> to vector<328x128xf32>
    %c0_2 = arith.constant 0 : index
    %c0_3 = arith.constant 0 : index
    %c0_4 = arith.constant 0 : index
    %3 = vector.load %arg3[%c0_2, %c0_3, %c0_4] : memref<1x1x128xf32, #tpu.memory_space<vmem>>, vector<1x1x128xf32>
    %4 = vector.shape_cast %3 : vector<1x1x128xf32> to vector<1x128xf32>
    %5 = vector.broadcast %4 : vector<1x128xf32> to vector<328x128xf32>
    %6 = arith.mulf %2, %5 : vector<328x128xf32>
    %c0_5 = arith.constant 0 : index
    %c0_6 = arith.constant 0 : index
    %c0_7 = arith.constant 0 : index
    %7 = vector.load %arg4[%c0_5, %c0_6, %c0_7] : memref<1x1x128xf32, #tpu.memory_space<vmem>>, vector<1x1x128xf32>
    %8 = vector.shape_cast %7 : vector<1x1x128xf32> to vector<1x128xf32>
    %9 = vector.broadcast %8 : vector<1x128xf32> to vector<328x128xf32>
    %10 = arith.addf %6, %9 : vector<328x128xf32>
    %cst = arith.constant 0.000000e+00 : f32
    %11 = vector.broadcast %cst : f32 to vector<328x128xf32>
    %12 = arith.subf %11, %10 : vector<328x128xf32>
    %13 = math.exp %12 : vector<328x128xf32>
    %cst_8 = arith.constant 1.000000e+00 : f32
    %14 = vector.broadcast %cst_8 : f32 to vector<328x128xf32>
    %15 = arith.addf %14, %13 : vector<328x128xf32>
    %cst_9 = arith.constant 1.000000e+00 : f32
    %16 = vector.broadcast %cst_9 : f32 to vector<328x128xf32>
    %17 = arith.divf %16, %15 : vector<328x128xf32>
    %18 = arith.mulf %10, %17 : vector<328x128xf32>
    %c0_10 = arith.constant 0 : index
    %c0_11 = arith.constant 0 : index
    %19 = vector.load %arg5[%c0_10, %c0_11] : memref<328x1xf32, #tpu.memory_space<vmem>>, vector<328x1xf32>
    %cst_12 = arith.constant 0.000000e+00 : f32
    %20 = vector.broadcast %cst_12 : f32 to vector<328x1xf32>
    %21 = arith.cmpf ogt, %19, %20 : vector<328x1xf32>
    %cst_13 = arith.constant 0.000000e+00 : f32
    %22 = vector.shape_cast %21 : vector<328x1xi1> to vector<328x1xi1>
    %23 = vector.broadcast %22 : vector<328x1xi1> to vector<328x128xi1>
    %24 = vector.broadcast %cst_13 : f32 to vector<328x128xf32>
    %25 = arith.select %23, %18, %24 : vector<328x128xi1>, vector<328x128xf32>
    %c0_14 = arith.constant 0 : index
    %c0_15 = arith.constant 0 : index
    %c0_16 = arith.constant 0 : index
    %26 = vector.load %arg6[%c0_14, %c0_15, %c0_16] : memref<1x328x128xbf16, #tpu.memory_space<vmem>>, vector<1x328x128xbf16>
    %27 = vector.shape_cast %26 : vector<1x328x128xbf16> to vector<328x128xbf16>
    %c0_17 = arith.constant 0 : index
    %c0_18 = arith.constant 0 : index
    %28 = vector.load %arg7[%c0_17, %c0_18] : memref<128x128xbf16, #tpu.memory_space<vmem>>, vector<128x128xbf16>
    %cst_19 = arith.constant dense<0.000000e+00> : vector<328x128xf32>
    %29 = tpu.matmul %27, %28, %cst_19 {dimension_numbers = #tpu.dot_dimension_numbers<[1], [0], [0], [1], [0, 0, 1, 1], [], []>} : vector<328x128xbf16>, vector<128x128xbf16>, vector<328x128xf32> -> vector<328x128xf32>
    %30 = arith.addf %25, %29 : vector<328x128xf32>
    %c0_20 = arith.constant 0 : index
    %c0_21 = arith.constant 0 : index
    %31 = vector.load %arg8[%c0_20, %c0_21] : memref<1x128xf32, #tpu.memory_space<vmem>>, vector<1x128xf32>
    %32 = vector.broadcast %31 : vector<1x128xf32> to vector<328x128xf32>
    %33 = arith.addf %30, %32 : vector<328x128xf32>
    %c0_22 = arith.constant 0 : index
    %c0_23 = arith.constant 0 : index
    %c0_24 = arith.constant 0 : index
    %34 = vector.load %arg9[%c0_22, %c0_23, %c0_24] : memref<1x328x128xf32, #tpu.memory_space<vmem>>, vector<1x328x128xf32>
    %35 = vector.shape_cast %34 : vector<1x328x128xf32> to vector<328x128xf32>
    %36 = vector.shape_cast %33 : vector<328x128xf32> to vector<1x328x128xf32>
    tpu.vector_store %arg9[%c0_22, %c0_23, %c0_24], %36 {strides = array<i32>} : memref<1x328x128xf32, #tpu.memory_space<vmem>>, vector<1x328x128xf32>,
    return
  }
  func.func @transform_0(%arg0: i32, %arg1: i32) -> (i32, i32, i32) {
    %c3_i32 = arith.constant 3 : i32
    %0 = arith.muli %arg0, %c3_i32 : i32
    %1 = arith.addi %0, %arg1 : i32
    %c0_i32 = arith.constant 0 : i32
    %c0_i32_0 = arith.constant 0 : i32
    %c0_i32_1 = arith.constant 0 : i32
    return %1, %c0_i32, %c0_i32_0 : i32, i32, i32
  }
  func.func @transform_1(%arg0: i32, %arg1: i32) -> (i32, i32, i32) {
    %c0_i32 = arith.constant 0 : i32
    %c0_i32_0 = arith.constant 0 : i32
    %c0_i32_1 = arith.constant 0 : i32
    return %arg0, %c0_i32, %c0_i32_0 : i32, i32, i32
  }
  func.func @transform_2(%arg0: i32, %arg1: i32) -> (i32, i32, i32) {
    %c0_i32 = arith.constant 0 : i32
    %c0_i32_0 = arith.constant 0 : i32
    %c0_i32_1 = arith.constant 0 : i32
    return %arg0, %c0_i32, %c0_i32_0 : i32, i32, i32
  }
  func.func @transform_3(%arg0: i32, %arg1: i32) -> (i32, i32) {
    %c0_i32 = arith.constant 0 : i32
    %c0_i32_0 = arith.constant 0 : i32
    %c0_i32_1 = arith.constant 0 : i32
    return %c0_i32, %c0_i32_0 : i32, i32
  }
  func.func @transform_4(%arg0: i32, %arg1: i32) -> (i32, i32, i32) {
    %c3_i32 = arith.constant 3 : i32
    %0 = arith.muli %arg0, %c3_i32 : i32
    %1 = arith.addi %0, %arg1 : i32
    %c0_i32 = arith.constant 0 : i32
    %c0_i32_0 = arith.constant 0 : i32
    %c0_i32_1 = arith.constant 0 : i32
    return %1, %c0_i32, %c0_i32_0 : i32, i32, i32
  }
  func.func @transform_5(%arg0: i32, %arg1: i32) -> (i32, i32) {
    %c0_i32 = arith.constant 0 : i32
    %c0_i32_0 = arith.constant 0 : i32
    %c0_i32_1 = arith.constant 0 : i32
    return %c0_i32, %c0_i32_0 : i32, i32
  }
  func.func @transform_6(%arg0: i32, %arg1: i32) -> (i32, i32) {
    %c0_i32 = arith.constant 0 : i32
    %c0_i32_0 = arith.constant 0 : i32
    %c0_i32_1 = arith.constant 0 : i32
    return %c0_i32, %c0_i32_0 : i32, i32
  }
  func.func @transform_7(%arg0: i32, %arg1: i32) -> (i32, i32, i32) {
    %c3_i32 = arith.constant 3 : i32
    %0 = arith.muli %arg0, %c3_i32 : i32
    %1 = arith.addi %0, %arg1 : i32
    %c0_i32 = arith.constant 0 : i32
    %c0_i32_0 = arith.constant 0 : i32
    %c0_i32_1 = arith.constant 0 : i32
    return %1, %c0_i32, %c0_i32_0 : i32, i32, i32
  }
}

</mosaic_0001>

<bundles_post_ra>
// kernel: resnet_block_forward.5
= control target key start
LH: loop header
LB: loop body
LE: loop exit
PB: predicated region body
PF: predicated region fallthrough
CT: control target
= control target key end

     0   :  { %s2843_s24 = smov 0   ;;  %s2845_s25 = smov 0   ;;  %s4702_s0 = inlined_call_operand.vmem [shape: bf16[6,328,128], index: 0, kind: input, shape index: {}]   ;;  %s4703_s1 = inlined_call_operand.vmem [shape: f32[2,1,128], index: 1, kind: input, shape index: {}]   ;;  %s4704_s2 = inlined_call_operand.vmem [shape: f32[2,1,128], index: 2, kind: input, shape index: {}]   ;;  %s4705_s3 = inlined_call_operand.vmem [shape: f32[328,1], index: 3, kind: input, shape index: {}]   ;;  %s4706_s4 = inlined_call_operand.vmem [shape: bf16[6,328,128], index: 4, kind: input, shape index: {}]   ;;  %s4707_s5 = inlined_call_operand.vmem [shape: bf16[128,128], index: 5, kind: input, shape index: {}]   ;;  %s4708_s6 = inlined_call_operand.vmem [shape: f32[1,128], index: 6, kind: input, shape index: {}]   ;;  %s4709_s7 = inlined_call_operand.vmem [shape: f32[6,328,128], index: 7, kind: output, shape index: {}]  }
   0x1   :  { %s2847_s26 = smov 0   ;;  %s2849_s27 = smov 0  }
   0x2   :  { %s2851_s28 = smov 0  }
   0x3 LB: > { %s26_s29 = sadd.s32 1, %s2792_s26  ;;  %s29_s30 = sadd.s32 1, %s2796_s27  ;;  %s2800_s28 = sphi %s2851_s28, %s17_s28   ;;  %s2796_s27 = sphi %s2849_s27, %s4849_s27   ;;  %s2792_s26 = sphi %s2847_s26, %s4848_s26   ;;  %s2788_s25 = sphi %s2845_s25, %s4847_s25   ;;  %s2784_s24 = sphi %s2843_s24, %s4846_s24  }
   0x4   : > { %p27_p0 = scmp.ge.s32.totalorder %s26_s29, 3  ;;  %p2273_p1 = scmp.ge.s32.totalorder %s2800_s28, 1 }
   0x5   : > { %p295_p2 = scmp.lt.s32.totalorder %s2800_s28, 7 }
   0x6   : > { %s4851_s29 = smov (%p27_p0, %s26_s29), 0  ;;  %s4853_s30 = smov (!%p27_p0, %s29_s30), %s2796_s27 }
   0x7   : > { %p296_p3 = pnand %p2273_p1, %p295_p2  ;;  %p31_p4 = scmp.ge.s32.totalorder %s4853_s30, 2 }
   0x8   : > { %p353_p5 = scmp.lt.s32.totalorder (!%p296_p3), %s2788_s25, 1  ;;  %s344_s10 = smul.u32 (!%p296_p3), 3, %s2788_s25 }
   0x9   : > { %s4855_s30 = smov (%p31_p4, %s4853_s30), 0  ;;  %299 = sbr.rel (%p296_p3) target bundleno = 381 (0x17d), region = 48 }
   0xa   : > { %s345_s15 = sadd.s32 (!%p296_p3), %s2784_s24, %s344_s10 }
   0xb   : > { %p346_p6 = scmp.lt.s32.totalorder (!%p296_p3), %s345_s15, 5 }
   0xe   : > { %v2418_v0 = vld [vmem:[%s4707_s5 + $0x38] sm:$0xff]  ;;  %v1373_v1 = vld [vmem:[%s4705_s3 + $0x20] sm:$0xff]  ;;  %v1371_v2 = vld [vmem:[%s4705_s3 + $0x10] sm:$0xff]  ;;  %v2802_v3 = vmov 0   ;;  %s4857_s25 = smov (!%p353_p5, %s2788_s25), 1  ;;  %s4859_s15 = smov (!%p346_p6, %s345_s15), 5 }
   0xf   : > { %2587 = vset.pattern.permute.xlu2 %v2802_v3  ;;  %2586 = vset.pattern.permute.xlu1 %v2802_v3  ;;  %vm1414_vm0 = vcmp.gt.f32.partialorder %v1373_v1, 0.0  ;;  %vm1412_vm1 = vcmp.gt.f32.partialorder %v1371_v2, 0.0  ;;  %v1369_v4 = vld [vmem:[%s4705_s3] sm:$0xff]  ;;  %v2417_v7 = vld [vmem:[%s4707_s5 + $0x30] sm:$0xff]  ;;  %v1374_v9 = vld [vmem:[%s4705_s3 + $0x28] sm:$0xff]  ;;  %s2932_s22 = scalar_lea.vmem %s4703_s1, %s4857_s25  ;;  %s2937_s9 = scalar_lea.vmem %s4704_s2, %s4857_s25 }
  0x10   : > { %2585 = vset.pattern.permute.xlu0 %v2802_v3  ;;  %1926 = vmatpush.bf16.msra.mxu0 %v2418_v0  ;;  %v1455_v5 = vsel %vm1414_vm0, 1, %v2802_v3  ;;  %v1453_v6 = vsel %vm1412_vm1, 1, %v2802_v3  ;;  %vm1410_vm2 = vcmp.gt.f32.partialorder %v1369_v4, 0.0  ;;  %v1372_v10 = vld [vmem:[%s4705_s3 + $0x18] sm:$0xff]  ;;  %v1370_v11 = vld [vmem:[%s4705_s3 + $0x8] sm:$0xff]  ;;  %vm1415_vm3 = vcmp.gt.f32.partialorder %v1374_v9, 0.0 }
  0x11   : > { %2518 = vmatpush.bf16.msra.mxu1 %v2418_v0  ;;  %2519 = vmatpush.bf16.msra.mxu2 %v2418_v0  ;;  %v1451_v8 = vsel %vm1410_vm2, 1, %v2802_v3  ;;  %v2416_v12 = vld [vmem:[%s4707_s5 + $0x28] sm:$0xff]  ;;  %vm1413_vm4 = vcmp.gt.f32.partialorder %v1372_v10, 0.0  ;;  %vm1411_vm5 = vcmp.gt.f32.partialorder %v1370_v11, 0.0  ;;  %v1456_v13 = vsel %vm1415_vm3, 1, %v2802_v3  ;;  %v2415_v16 = vld [vmem:[%s4707_s5 + $0x20] sm:$0xff] }
  0x12   : > { %2520 = vmatpush.bf16.msra.mxu3 %v2418_v0  ;;  %1505 = vperm.xlu2 %2587, %v1455_v5   ;;  %v1454_v14 = vsel %vm1413_vm4, 1, %v2802_v3  ;;  %v1452_v15 = vsel %vm1411_vm5, 1, %v2802_v3  ;;  %v1377_v17 = vld [vmem:[%s4705_s3 + $0x40] sm:$0xff]  ;;  %v1376_v18 = vld [vmem:[%s4705_s3 + $0x38] sm:$0xff]  ;;  %v1375_v19 = vld [vmem:[%s4705_s3 + $0x30] sm:$0xff]  ;;  %s2542_s21 = smul.u32 164, %s4859_s15 }
  0x13   : > { %1499 = vperm.xlu1 %2586, %v1453_v6   ;;  %1493 = vperm.xlu0 %2585, %v1451_v8   ;;  %v2414_v20 = vld [vmem:[%s4707_s5 + $0x18] sm:$0xff]  ;;  %vm1418_vm6 = vcmp.gt.f32.partialorder %v1377_v17, 0.0  ;;  %vm1417_vm7 = vcmp.gt.f32.partialorder %v1376_v18, 0.0  ;;  %vm1416_vm8 = vcmp.gt.f32.partialorder %v1375_v19, 0.0  ;;  %v2413_v24 = vld [vmem:[%s4707_s5 + $0x10] sm:$0xff]  ;;  %v1378_v27 = vld [vmem:[%s4705_s3 + $0x48] sm:$0xff] }
  0x14   : > { %1927 = vmatpush.bf16.msra.mxu0 %v2417_v7  ;;  %v1459_v21 = vsel %vm1418_vm6, 1, %v2802_v3  ;;  %v1458_v22 = vsel %vm1417_vm7, 1, %v2802_v3  ;;  %v1457_v23 = vsel %vm1416_vm8, 1, %v2802_v3  ;;  %v1380_v25 = vld [vmem:[%s4705_s3 + $0x58] sm:$0xff]  ;;  %v1379_v26 = vld [vmem:[%s4705_s3 + $0x50] sm:$0xff]  ;;  %v2412_v28 = vld [vmem:[%s4707_s5 + $0x8] sm:$0xff]  ;;  %s2974_s25 = scalar_lea.vmem %s4706_s4, %s2542_s21  ;;  %s3074_s17 = scalar_lea.vmem %s4702_s0, %s2542_s21 }
  0x15   : > { %2521 = vmatpush.bf16.msra.mxu1 %v2417_v7  ;;  %2522 = vmatpush.bf16.msra.mxu2 %v2417_v7  ;;  %vm1421_vm9 = vcmp.gt.f32.partialorder %v1380_v25, 0.0  ;;  %vm1420_vm10 = vcmp.gt.f32.partialorder %v1379_v26, 0.0  ;;  %vm1419_vm11 = vcmp.gt.f32.partialorder %v1378_v27, 0.0  ;;  %v2411_v32 = vld [vmem:[%s4707_s5] sm:$0xff]  ;;  %v1383_v33 = vld [vmem:[%s4705_s3 + $0x70] sm:$0xff]  ;;  %v1382_v34 = vld [vmem:[%s4705_s3 + $0x68] sm:$0xff] }
  0x16   : > { %2523 = vmatpush.bf16.msra.mxu3 %v2417_v7  ;;  %v1462_v29 = vsel %vm1421_vm9, 1, %v2802_v3  ;;  %v1461_v30 = vsel %vm1420_vm10, 1, %v2802_v3  ;;  %v1460_v31 = vsel %vm1419_vm11, 1, %v2802_v3  ;;  %v1381_v35 = vld [vmem:[%s4705_s3 + $0x60] sm:$0xff]  ;;  %v2396_v37 = vld [vmem:[%s2974_s25 + $0x28] sm:$0xff]  ;;  %v2401_v38 = vld [vmem:[%s2974_s25 + $0x50] sm:$0xff] }
  0x17   : > { %v2391_v36 = vld [vmem:[%s2974_s25] sm:$0xff]  ;;  %vm1424_vm12 = vcmp.gt.f32.partialorder %v1383_v33, 0.0  ;;  %vm1423_vm13 = vcmp.gt.f32.partialorder %v1382_v34, 0.0  ;;  %vm1422_vm14 = vcmp.gt.f32.partialorder %v1381_v35, 0.0  ;;  %v1386_v43 = vld [vmem:[%s4705_s3 + $0x88] sm:$0xff]  ;;  %v1384_v45 = vld [vmem:[%s4705_s3 + $0x78] sm:$0xff] }
  0x18   : > { %1928 = vmatpush.bf16.msra.mxu0 %v2416_v12  ;;  %v2407_v39 = vld [vmem:[%s2974_s25 + $0x80] sm:$0xff]  ;;  %v1465_v40 = vsel %vm1424_vm12, 1, %v2802_v3  ;;  %v1464_v41 = vsel %vm1423_vm13, 1, %v2802_v3  ;;  %v1463_v42 = vsel %vm1422_vm14, 1, %v2802_v3  ;;  %vm1427_vm15 = vcmp.gt.f32.partialorder %v1386_v43, 0.0  ;;  %v1388_v50 = vld [vmem:[%s4705_s3 + $0x98] sm:$0xff] }
  0x19   : > { %2524 = vmatpush.bf16.msra.mxu1 %v2416_v12  ;;  %2525 = vmatpush.bf16.msra.mxu2 %v2416_v12  ;;  %v1385_v44 = vld [vmem:[%s4705_s3 + $0x80] sm:$0xff]  ;;  %vm1425_vm1 = vcmp.gt.f32.partialorder %v1384_v45, 0.0  ;;  %v1468_v46 = vsel %vm1427_vm15, 1, %v2802_v3  ;;  %v1387_v51 = vld [vmem:[%s4705_s3 + $0x90] sm:$0xff]  ;;  %v2392_v52 = vld [vmem:[%s2974_s25 + $0x8] sm:$0xff]  ;;  %vm1429_vm3 = vcmp.gt.f32.partialorder %v1388_v50, 0.0 }
  0x1a   : > { %2526 = vmatpush.bf16.msra.mxu3 %v2416_v12  ;;  %1508 = vperm.xlu2 %2587, %v1456_v13   ;;  %vm1426_vm0 = vcmp.gt.f32.partialorder %v1385_v44, 0.0  ;;  %v1466_v48 = vsel %vm1425_vm1, 1, %v2802_v3  ;;  %v1389_v49 = vld [vmem:[%s4705_s3 + $0xa0] sm:$0xff]  ;;  %v2397_v53 = vld [vmem:[%s2974_s25 + $0x30] sm:$0xff]  ;;  %v2402_v54 = vld [vmem:[%s2974_s25 + $0x58] sm:$0xff]  ;;  %vm1428_vm4 = vcmp.gt.f32.partialorder %v1387_v51, 0.0 }
  0x1b   : > { %1502 = vperm.xlu1 %2586, %v1454_v14   ;;  %1496 = vperm.xlu0 %2585, %v1452_v15   ;;  %v1467_v47 = vsel %vm1426_vm0, 1, %v2802_v3  ;;  %vm1430_vm2 = vcmp.gt.f32.partialorder %v1389_v49, 0.0  ;;  %v2408_v55 = vld [vmem:[%s2974_s25 + $0x88] sm:$0xff]  ;;  %v1470_v57 = vsel %vm1429_vm3, 1, %v2802_v3  ;;  %v1469_v58 = vsel %vm1428_vm4, 1, %v2802_v3  ;;  %v1392_v59 = vld [vmem:[%s4705_s3 + $0xb8] sm:$0xff] }
  0x1c   : > { %1929 = vmatpush.bf16.msra.mxu0 %v2415_v16  ;;  %v1471_v56 = vsel %vm1430_vm2, 1, %v2802_v3  ;;  %v1391_v60 = vld [vmem:[%s4705_s3 + $0xb0] sm:$0xff]  ;;  %v1390_v61 = vld [vmem:[%s4705_s3 + $0xa8] sm:$0xff]  ;;  %vm1433_vm5 = vcmp.gt.f32.partialorder %v1392_v59, 0.0  ;;  %v1393_v4 = vld [vmem:[%s4705_s3 + $0xc0] sm:$0xff] }
  0x1d   : > { %2527 = vmatpush.bf16.msra.mxu1 %v2415_v16  ;;  %2528 = vmatpush.bf16.msra.mxu2 %v2415_v16  ;;  %vm1432_vm6 = vcmp.gt.f32.partialorder %v1391_v60, 0.0  ;;  %vm1431_vm7 = vcmp.gt.f32.partialorder %v1390_v61, 0.0  ;;  %v1474_v62 = vsel %vm1433_vm5, 1, %v2802_v3  ;;  %v1395_v1 = vld [vmem:[%s4705_s3 + $0xd0] sm:$0xff]  ;;  %v1394_v2 = vld [vmem:[%s4705_s3 + $0xc8] sm:$0xff]  ;;  %v2398_v6 = vld [vmem:[%s2974_s25 + $0x38] sm:$0xff] }
  0x1e   : > { %2529 = vmatpush.bf16.msra.mxu3 %v2415_v16  ;;  %v1473_v63 = vsel %vm1432_vm6, 1, %v2802_v3  ;;  %v1472_v0 = vsel %vm1431_vm7, 1, %v2802_v3  ;;  %v2393_v5 = vld [vmem:[%s2974_s25 + $0x10] sm:$0xff]  ;;  %v2403_v7 = vld [vmem:[%s2974_s25 + $0x60] sm:$0xff]  ;;  %vm1436_vm8 = vcmp.gt.f32.partialorder %v1395_v1, 0.0  ;;  %vm1435_vm9 = vcmp.gt.f32.partialorder %v1394_v2, 0.0 }
  0x1f   : > { %v2409_v8 = vld [vmem:[%s2974_s25 + $0x90] sm:$0xff]  ;;  %vm1434_vm10 = vcmp.gt.f32.partialorder %v1393_v4, 0.0  ;;  %v1477_v9 = vsel %vm1436_vm8, 1, %v2802_v3  ;;  %v1476_v10 = vsel %vm1435_vm9, 1, %v2802_v3  ;;  %v1398_v12 = vld [vmem:[%s4705_s3 + $0xe8] sm:$0xff]  ;;  %v1397_v13 = vld [vmem:[%s4705_s3 + $0xe0] sm:$0xff] }
  0x20   : > { %1930 = vmatpush.bf16.msra.mxu0 %v2414_v20  ;;  %v1475_v11 = vsel %vm1434_vm10, 1, %v2802_v3  ;;  %v1396_v14 = vld [vmem:[%s4705_s3 + $0xd8] sm:$0xff]  ;;  %vm1439_vm11 = vcmp.gt.f32.partialorder %v1398_v12, 0.0  ;;  %vm1438_vm12 = vcmp.gt.f32.partialorder %v1397_v13, 0.0  ;;  %v1401_v18 = vld [vmem:[%s4705_s3 + $0x100] sm:$0xff]  ;;  %v2503_v26 = vld [vmem:[%s3074_s17 + $0x28] sm:$0xff]  }
  0x21   : > { %2530 = vmatpush.bf16.msra.mxu1 %v2414_v20  ;;  %2531 = vmatpush.bf16.msra.mxu2 %v2414_v20  ;;  %vm1437_vm13 = vcmp.gt.f32.partialorder %v1396_v14, 0.0  ;;  %v1480_v15 = vsel %vm1439_vm11, 1, %v2802_v3  ;;  %v1479_v16 = vsel %vm1438_vm12, 1, %v2802_v3  ;;  %v1400_v19 = vld [vmem:[%s4705_s3 + $0xf8] sm:$0xff]  ;;  %vm1442_vm14 = vcmp.gt.f32.partialorder %v1401_v18, 0.0  ;;  %v2420_v25 = vld [vmem:[%s3074_s17] sm:$0xff]  }
  0x22   : > { %2532 = vmatpush.bf16.msra.mxu3 %v2414_v20  ;;  %1517 = vperm.xlu2 %2587, %v1459_v21   ;;  %v1478_v17 = vsel %vm1437_vm13, 1, %v2802_v3  ;;  %v1399_v20 = vld [vmem:[%s4705_s3 + $0xf0] sm:$0xff]  ;;  %v2394_v21 = vld [vmem:[%s2974_s25 + $0x18] sm:$0xff]  ;;  %vm1441_vm15 = vcmp.gt.f32.partialorder %v1400_v19, 0.0  ;;  %v2421_v27 = vunpack.c.l.bf16 %v2420_v25  ;;  %v1402_v44 = vld [vmem:[%s4705_s3 + $0x108] sm:$0xff] }
  0x23   : > { %1514 = vperm.xlu1 %2586, %v1458_v22   ;;  %1511 = vperm.xlu0 %2585, %v1457_v23   ;;  %v2399_v22 = vld [vmem:[%s2974_s25 + $0x40] sm:$0xff]  ;;  %v2404_v23 = vld [vmem:[%s2974_s25 + $0x68] sm:$0xff]  ;;  %vm1440_vm0 = vcmp.gt.f32.partialorder %v1399_v20, 0.0  ;;  %v1482_v33 = vsel %vm1441_vm15, 1, %v2802_v3  ;;  %v1403_v43 = vld [vmem:[%s4705_s3 + $0x110] sm:$0xff]  ;;  %vm1443_vm3 = vcmp.gt.f32.partialorder %v1402_v44, 0.0 }
  0x24   : > { %1931 = vmatpush.bf16.msra.mxu0 %v2413_v24  ;;  %v1481_v35 = vsel %vm1440_vm0, 1, %v2802_v3  ;;  %vm1444_vm2 = vcmp.gt.f32.partialorder %v1403_v43, 0.0  ;;  %v1484_v2 = vsel %vm1443_vm3, 1, %v2802_v3  ;;  %v2395_v13 = vld [vmem:[%s2974_s25 + $0x20] sm:$0xff]  ;;  %v2405_v18 = vld [vmem:[%s2974_s25 + $0x70] sm:$0xff] }
  0x25   : > { %2533 = vmatpush.bf16.msra.mxu1 %v2413_v24  ;;  %2534 = vmatpush.bf16.msra.mxu2 %v2413_v24  ;;  %v1485_v1 = vsel %vm1444_vm2, 1, %v2802_v3 }
  0x26   : > { %2535 = vmatpush.bf16.msra.mxu3 %v2413_v24  ;;  %v2410_v24 = vld [vmem:[%s2974_s25 + $0x98] sm:$0xff] }
  0x28   : > { %1932 = vmatpush.bf16.msra.mxu0 %v2412_v28 }
  0x29   : > { %2536 = vmatpush.bf16.msra.mxu1 %v2412_v28  ;;  %2537 = vmatpush.bf16.msra.mxu2 %v2412_v28 }
  0x2a   : > { %2538 = vmatpush.bf16.msra.mxu3 %v2412_v28  ;;  %1526 = vperm.xlu2 %2587, %v1462_v29   ;;  %v3083_v28 = vld [vmem:[%s2932_s22] ss:$0 sm:$0xff]  ;;  %v2441_v29 = vunpack.c.l.bf16 %v2503_v26 }
  0x2b   : > { %1523 = vperm.xlu1 %2586, %v1461_v30   ;;  %1520 = vperm.xlu0 %2585, %v1460_v31   ;;  %v2422_v30 = vunpack.c.h.bf16 %v2420_v25  ;;  %v2499_v31 = vld [vmem:[%s3074_s17 + $0x8] sm:$0xff]  }
  0x2c   : > { %1933 = vmatpush.bf16.msra.mxu0 %v2411_v32  ;;  %v2425_v34 = vunpack.c.l.bf16 %v2499_v31 }
  0x2d   : > { %2539 = vmatpush.bf16.msra.mxu1 %v2411_v32  ;;  %2540 = vmatpush.bf16.msra.mxu2 %v2411_v32 }
  0x2e   : > { %2541 = vmatpush.bf16.msra.mxu3 %v2411_v32  ;;  %v1483_v32 = vsel %vm1442_vm14, 1, %v2802_v3 }
  0x2f   : > { %1934 = vmatmul.bf16.vlgmr.msra.gmra.mxu0 %v2391_v36  ;;  %v463_v36 = vmul.f32 %v3083_v28, %v2421_v27 }
  0x30   : > { %1959 = vmatmul.bf16.vlgmr.msra.gmra.mxu1 %v2396_v37  ;;  %1984 = vmatmul.bf16.vlgmr.msra.gmra.mxu2 %v2401_v38  ;;  %v3091_v37 = vld [vmem:[%s2937_s9] ss:$0 sm:$0xff]  ;;  %v473_v38 = vmul.f32 %v3083_v28, %v2441_v29 }
  0x31   : > { %2014 = vmatmul.bf16.vlgmr.msra.gmra.mxu3 %v2407_v39  ;;  %v464_v39 = vmul.f32 %v3083_v28, %v2422_v30  ;;  %v3106_v45 = vadd.f32 %v3091_v37, %v463_v36 }
  0x32   : > { %1535 = vperm.xlu2 %2587, %v1465_v40   ;;  %v1404_v40 = vld [vmem:[%s4705_s3 + $0x118] sm:$0xff] }
  0x33   : > { %1532 = vperm.xlu1 %2586, %v1464_v41   ;;  %1529 = vperm.xlu0 %2585, %v1463_v42   ;;  %v465_v41 = vmul.f32 %v3083_v28, %v2425_v34  ;;  %v2426_v42 = vunpack.c.h.bf16 %v2499_v31  ;;  %vm1445_vm1 = vcmp.gt.f32.partialorder %v1404_v40, 0.0  ;;  %v549_v51 = vsub.f32 0.0, %v3106_v45 }
  0x35   : > { %v3118_v49 = vadd.f32 %v3091_v37, %v465_v41 }
  0x3a   : > { %1544 = vperm.xlu2 %2587, %v1468_v46   ;;  %v3109_v46 = vadd.f32 %v3091_v37, %v473_v38  ;;  %v1409_v38 = vld [vmem:[%s4705_s3 + $0x140] sm:$0xff] }
  0x3b   : > { %1541 = vperm.xlu1 %2586, %v1467_v47   ;;  %1538 = vperm.xlu0 %2585, %v1466_v48   ;;  %v3112_v47 = vadd.f32 %v3091_v37, %v464_v39  ;;  %v3115_v48 = vld [vmem:[%s3074_s17 + $0x30] sm:$0xff]   ;;  %v1408_v39 = vld [vmem:[%s4705_s3 + $0x138] sm:$0xff]  ;;  %vm1450_vm7 = vcmp.gt.f32.partialorder %v1409_v38, 0.0 }
  0x3c   : > { %v2445_v50 = vunpack.c.l.bf16 %v3115_v48  ;;  %v2446_v25 = vunpack.c.h.bf16 %v3115_v48  ;;  %vm1449_vm8 = vcmp.gt.f32.partialorder %v1408_v39, 0.0 }
  0x3e   : > { %v476_v41 = vmul.f32 %v3083_v28, %v2446_v25 }
  0x3f   : > { %1939 = vmatmul.bf16.gmra.mxu0 %v2392_v52  ;;  %v559_v52 = vsub.f32 0.0, %v3109_v46 }
  0x40   : > { %1964 = vmatmul.bf16.gmra.mxu1 %v2397_v53  ;;  %1989 = vmatmul.bf16.gmra.mxu2 %v2402_v54  ;;  %v550_v53 = vsub.f32 0.0, %v3112_v47  ;;  %v1737_v54 = vld [vmem:[%s2974_s25 + $0xa0] sm:$0xf] }
  0x41   : > { %2019 = vmatmul.bf16.gmra.mxu3 %v2408_v55  ;;  %v3126_v55 = vld [vmem:[%s3074_s17 + $0x50] sm:$0xff]   ;;  %v610_v59 = vmul.f32 1.442695, %v559_v52 }
  0x42   : > { %1553 = vperm.xlu2 %2587, %v1471_v56   ;;  %v475_v56 = vmul.f32 %v3083_v28, %v2445_v50  ;;  %v2461_v60 = vunpack.c.l.bf16 %v3126_v55  ;;  %v592_v61 = vmul.f32 1.442695, %v550_v53  ;;  %v3192_v50 = vadd.f32 %v3091_v37, %v476_v41 }
  0x43   : > { %1550 = vperm.xlu1 %2586, %v1470_v57   ;;  %1547 = vperm.xlu0 %2585, %v1469_v58   ;;  %v466_v57 = vmul.f32 %v3083_v28, %v2426_v42  ;;  %v590_v58 = vmul.f32 1.442695, %v549_v51 }
  0x44   : > { %v483_v4 = vmul.f32 %v3083_v28, %v2461_v60  ;;  %v3153_v12 = vadd.f32 %v3091_v37, %v475_v56  ;;  %v1490_v56 = vsel %vm1449_vm8, 1, %v2802_v3 }
  0x45   : > { %2591 = vpow2.f32 %v590_v58 }
  0x46   : > { %2593 = vpow2.f32 %v610_v59 }
  0x47   : > { %2595 = vpow2.f32 %v592_v61 }
  0x4a   : > { %1562 = vperm.xlu2 %2587, %v1474_v62   ;;  %v1486_v62 = vsel %vm1445_vm1, 1, %v2802_v3 }
  0x4b   : > { %1559 = vperm.xlu1 %2586, %v1473_v63   ;;  %1556 = vperm.xlu0 %2585, %v1472_v0   ;;  %v2442_v63 = vunpack.c.h.bf16 %v2503_v26  ;;  %v551_v0 = vsub.f32 0.0, %v3118_v49 }
  0x4f   : > { %1944 = vmatmul.bf16.gmra.mxu0 %v2393_v5  ;;  %v1835_v5 = vunpack.c.l.b16 %v1737_v54  ;;  %v1491_v54 = vsel %vm1450_vm7, 1, %v2802_v3 }
  0x50   : > { %1969 = vmatmul.bf16.gmra.mxu1 %v2398_v6  ;;  %1994 = vmatmul.bf16.gmra.mxu2 %v2403_v7  ;;  %v1407_v6 = vld [vmem:[%s4705_s3 + $0x130] sm:$0xff]  ;;  %v474_v7 = vmul.f32 %v3083_v28, %v2442_v63  ;;  %v562_v63 = vsub.f32 0.0, %v3192_v50 }
  0x51   : > { %2024 = vmatmul.bf16.gmra.mxu3 %v2409_v8  ;;  %v3141_v8 = vadd.f32 %v3091_v37, %v466_v57  ;;  %vm1448_vm4 = vcmp.gt.f32.partialorder %v1407_v6, 0.0  ;;  %v1856_v20 = vpack.c.b16 %v1835_v5, %v1835_v5 }
  0x52   : > { %1571 = vperm.xlu2 %2587, %v1477_v9   ;;  %v1406_v9 = vld [vmem:[%s4705_s3 + $0x128] sm:$0xff]  ;;  %v3157_v14 = vadd.f32 %v3091_v37, %v474_v7  ;;  %v1489_v27 = vsel %vm1448_vm4, 1, %v2802_v3 }
  0x53   : > { %1568 = vperm.xlu1 %2586, %v1476_v10   ;;  %1565 = vperm.xlu0 %2585, %v1475_v11   ;;  %v1405_v10 = vld [vmem:[%s4705_s3 + $0x120] sm:$0xff]  ;;  %v3150_v11 = vadd.f32 %v3091_v37, %v483_v4  ;;  %vm1447_vm5 = vcmp.gt.f32.partialorder %v1406_v9, 0.0 }
  0x54   : > { %vm1446_vm6 = vcmp.gt.f32.partialorder %v1405_v10, 0.0  ;;  %v560_v30 = vsub.f32 0.0, %v3157_v14 }
  0x55   : > { %v569_v19 = vsub.f32 0.0, %v3150_v11 }
  0x56   : > { %v612_v42 = vmul.f32 1.442695, %v560_v30 }
  0x5a   : > { %1580 = vperm.xlu2 %2587, %v1480_v15   ;;  %v594_v15 = vmul.f32 1.442695, %v551_v0 }
  0x5b   : > { %1577 = vperm.xlu1 %2586, %v1479_v16   ;;  %1574 = vperm.xlu0 %2585, %v1478_v17   ;;  %v2400_v17 = vld [vmem:[%s2974_s25 + $0x48] sm:$0xff] }
  0x5c   : > { %2597 = vpow2.f32 %v594_v15 }
  0x5f   : > { %1949 = vmatmul.bf16.gmra.mxu0 %v2394_v21  ;;  %v552_v21 = vsub.f32 0.0, %v3141_v8 }
  0x60   : > { %1974 = vmatmul.bf16.gmra.mxu1 %v2399_v22  ;;  %1999 = vmatmul.bf16.gmra.mxu2 %v2404_v23  ;;  %v2592_v22 = vpop.eup %2591  ;;  %v630_v23 = vmul.f32 1.442695, %v569_v19 }
  0x61   : > { %2029 = vmatmul.bf16.gmra.mxu3 %v2410_v24  ;;  %v561_v24 = vsub.f32 0.0, %v3153_v12  ;;  %v2594_v26 = vpop.eup %2593  ;;  %v3168_v29 = vadd.f32 1.0, %v2592_v22  ;;  %v596_v36 = vmul.f32 1.442695, %v552_v21 }
  0x62   : > { %1589 = vperm.xlu2 %2587, %v1483_v32   ;;  %v2596_v31 = vpop.eup %2595  ;;  %v1488_v32 = vsel %vm1447_vm5, 1, %v2802_v3  ;;  %v3175_v34 = vadd.f32 1.0, %v2594_v26  ;;  %2599 = vpow2.f32 %v630_v23 }
  0x63   : > { %1586 = vperm.xlu1 %2586, %v1482_v33   ;;  %1583 = vperm.xlu0 %2585, %v1481_v35   ;;  %v1487_v33 = vsel %vm1446_vm6, 1, %v2802_v3  ;;  %2601 = vrcp.f32 %v3168_v29  ;;  %v3178_v35 = vadd.f32 1.0, %v2596_v31  ;;  %v614_v40 = vmul.f32 1.442695, %v561_v24  ;;  %v2598_v44 = vpop.eup %2597 }
  0x64   : > { %2603 = vrcp.f32 %v3175_v34  ;;  %v3216_v5 = vadd.f32 1.0, %v2598_v44  ;;  %vm718_vm9 = vweird.f32 %v3168_v29  ;;  %v722_v24 = vand.u32 2147483647, %v3168_v29 }
  0x65   : > { %2605 = vrcp.f32 %v3178_v35  ;;  %v874_v30 = vand.u32 2147483648, %v3175_v34  ;;  %vm868_vm12 = vweird.f32 %v3175_v34  ;;  %vm733_vm14 = vweird.f32 %v3178_v35 }
  0x66   : > { %2607 = vpow2.f32 %v596_v36  ;;  %vm723_vm0 = vcmp.eq.f32.partialorder %v722_v24, 8.507059e+37 }
  0x67   : > { %2609 = vpow2.f32 %v614_v40 }
  0x68   : > { %v2600_v48 = vpop.eup %2599  ;;  %2611 = vpow2.f32 %v612_v42  ;;  %v872_v42 = vand.u32 2147483647, %v3175_v34 }
  0x69   : > { %v3194_v51 = vpop.eup %2601  ;;  %v3196_v52 = vadd.f32 1.0, %v2600_v48 }
  0x6a   : > { %1598 = vperm.xlu2 %2587, %v1486_v62   ;;  %v3198_v53 = vpop.eup %2603  ;;  %v714_v57 = vmul.f32 %v3194_v51, %v3168_v29  ;;  %v2514_v62 = vld [vmem:[%s3074_s17 + $0x80] sm:$0xff]   ;;  %vm719_vm10 = vweird.f32 %v3194_v51  ;;  %vm3295_vm3 = vcmp.eq.f32.partialorder %v872_v42, 8.507059e+37  ;;  %v754_v42 = vand.u32 2147483648, %v3216_v5 }
  0x6b   : > { %1595 = vperm.xlu1 %2586, %v1485_v1   ;;  %1592 = vperm.xlu0 %2585, %v1484_v2   ;;  %v3204_v58 = vpop.eup %2605  ;;  %v864_v59 = vmul.f32 %v3198_v53, %v3175_v34  ;;  %2613 = vrcp.f32 %v3196_v52  ;;  %v2406_v2 = vld [vmem:[%s2974_s25 + $0x78] sm:$0xff]  ;;  %v2485_v9 = vunpack.c.l.bf16 %v2514_v62  ;;  %vm3240_vm11 = vmor %vm718_vm9, %vm719_vm10  ;;  %vm869_vm13 = vweird.f32 %v3198_v53  ;;  %s2543_s25 = smul.u32 328, %s4859_s15 }
  0x6c   : > { %v3159_v16 = vpop.permute.xlu2 %1505  ;;  %v715_v60 = vsub.f32 1.0, %v714_v57  ;;  %v729_v61 = vmul.f32 %v3204_v58, %v3178_v35  ;;  %v2608_v0 = vpop.eup %2607  ;;  %2615 = vrcp.f32 %v3216_v5  ;;  %vm734_vm15 = vweird.f32 %v3204_v58  ;;  %vm3273_vm1 = vmor %vm868_vm12, %vm869_vm13 }
  0x6d   : > { %v2610_v3 = vpop.eup %2609  ;;  %v865_v4 = vsub.f32 1.0, %v864_v59  ;;  %v3227_v19 = vadd.f32 1.0, %v2608_v0  ;;  %v495_v26 = vmul.f32 %v3083_v28, %v2485_v9  ;;  %vm3283_vm2 = vmor %vm733_vm14, %vm734_vm15  ;;  %v739_v0 = vand.u32 2147483648, %v3178_v35  ;;  %s3595_s24 = scalar_lea.vmem %s4709_s7, %s2543_s25 }
  0x6e   : > { %v2612_v6 = vpop.eup %2611  ;;  %v716_v7 = vmul.f32 %v3194_v51, %v715_v60  ;;  %v730_v10 = vsub.f32 1.0, %v729_v61  ;;  %v3233_v22 = vadd.f32 1.0, %v2610_v3  ;;  %v875_v60 = vor.u32 1.1754944e-38, %v874_v30 }
  0x6f   : > { %1954 = vmatmul.bf16.gmra.mxu0 %v2395_v13  ;;  %v616_v13 = vmul.f32 1.442695, %v562_v63  ;;  %v3230_v21 = vadd.f32 1.0, %v2612_v6  ;;  %v3267_v44 = vadd.f32 %v3091_v37, %v495_v26  ;;  %vm1018_vm4 = vweird.f32 %v3196_v52 }
  0x70   : > { %1979 = vmatmul.bf16.gmra.mxu1 %v2400_v17  ;;  %2004 = vmatmul.bf16.gmra.mxu2 %v2405_v18  ;;  %v724_v17 = vand.u32 2147483648, %v3168_v29  ;;  %v3225_v18 = vld [vmem:[%s3074_s17 + $0x58] sm:$0xff]   ;;  %v717_v23 = vadd.f32 %v3194_v51, %v716_v7  ;;  %v731_v31 = vmul.f32 %v3204_v58, %v730_v10  ;;  %v737_v7 = vand.u32 2147483647, %v3178_v35 }
  0x71   : > { %2034 = vmatmul.bf16.gmra.mxu3 %v1856_v20  ;;  %v3219_v15 = vpop.eup %2613  ;;  %v866_v20 = vmul.f32 %v3198_v53, %v865_v4  ;;  %2617 = vrcp.f32 %v3230_v21  ;;  %v581_v3 = vsub.f32 0.0, %v3267_v44  ;;  %v1024_v4 = vand.u32 2147483648, %v3196_v52 }
  0x72   : > { %1607 = vperm.xlu2 %2587, %v1489_v27   ;;  %v1014_v25 = vmul.f32 %v3219_v15, %v3196_v52  ;;  %v725_v36 = vor.u32 1.1754944e-38, %v724_v17  ;;  %v721_v41 = vsel %vm3240_vm11, %v3194_v51, %v717_v23  ;;  %v3269_v48 = vpop.eup %2615  ;;  %2619 = vrcp.f32 %v3233_v22 }
  0x73   : > { %1604 = vperm.xlu1 %2586, %v1488_v32   ;;  %1601 = vperm.xlu0 %2585, %v1487_v33   ;;  %v2462_v32 = vunpack.c.h.bf16 %v3126_v55  ;;  %v2466_v33 = vunpack.c.h.bf16 %v3225_v18  ;;  %v3253_v39 = vadd.f32 %v3198_v53, %v866_v20  ;;  %2621 = vrcp.f32 %v3227_v19 }
  0x74   : > { %v3189_v43 = vpop.permute.xlu2 %1508  ;;  %v1015_v29 = vsub.f32 1.0, %v1014_v25  ;;  %v726_v34 = vsel %vm723_vm0, %v725_v36, %v721_v41  ;;  %2623 = vpow2.f32 %v616_v13  ;;  %vm1019_vm5 = vweird.f32 %v3219_v15 }
  0x75   : > { %v484_v57 = vmul.f32 %v3083_v28, %v2462_v32  ;;  %v3289_v61 = vmul.f32 %v3083_v28, %v2466_v33  ;;  %v871_v62 = vsel %vm3273_vm1, %v3198_v53, %v3253_v39  ;;  %v654_v20 = vmul.f32 1.442695, %v581_v3  ;;  %vm3340_vm8 = vmor %vm1018_vm4, %vm1019_vm5 }
  0x76   : > { %v1016_v51 = vmul.f32 %v3219_v15, %v1015_v29  ;;  %v744_v23 = vmul.f32 %v3269_v48, %v3216_v5  ;;  %v740_v27 = vor.u32 1.1754944e-38, %v739_v0  ;;  %vm883_vm6 = vweird.f32 %v3230_v21 }
  0x77   : > { %v3309_v53 = vadd.f32 %v3091_v37, %v484_v57  ;;  %v887_v32 = vand.u32 2147483647, %v3230_v21  ;;  %v889_v33 = vand.u32 2147483648, %v3230_v21  ;;  %2625 = vpow2.f32 %v654_v20 }
  0x78   : > { %v1017_v9 = vadd.f32 %v3219_v15, %v1016_v51  ;;  %v745_v41 = vsub.f32 1.0, %v744_v23  ;;  %vm748_vm9 = vweird.f32 %v3216_v5  ;;  %vm749_vm10 = vweird.f32 %v3269_v48 }
  0x79   : > { %v570_v35 = vsub.f32 0.0, %v3309_v53  ;;  %vm738_vm11 = vcmp.eq.f32.partialorder %v737_v7, 8.507059e+37  ;;  %v752_v51 = vand.u32 2147483647, %v3216_v5  ;;  %v890_v3 = vor.u32 1.1754944e-38, %v889_v33  ;;  %vm3364_vm14 = vmor %vm748_vm9, %vm749_vm10 }
  0x7a   : > { %v746_v57 = vmul.f32 %v3269_v48, %v745_v41  ;;  %v1021_v59 = vsel %vm3340_vm8, %v3219_v15, %v1017_v9  ;;  %vm3371_vm15 = vcmp.eq.f32.partialorder %v887_v32, 8.507059e+37  ;;  %v876_v23 = vsel %vm3295_vm3, %v875_v60, %v871_v62 }
  0x7b   : > { %1613 = vperm.xlu1 %2586, %v1491_v54   ;;  %1610 = vperm.xlu0 %2585, %v1490_v56   ;;  %v732_v56 = vadd.f32 %v3204_v58, %v731_v31  ;;  %v632_v36 = vmul.f32 1.442695, %v570_v35  ;;  %v1025_v54 = vor.u32 1.1754944e-38, %v1024_v4  ;;  %v1328_v35 = vmul.f32 %v726_v34, %v3106_v45 }
  0x7c   : > { %v3213_v1 = vpop.permute.xlu2 %1517  ;;  %v747_v15 = vadd.f32 %v3269_v48, %v746_v57  ;;  %vm753_vm1 = vcmp.eq.f32.partialorder %v752_v51, 8.507059e+37  ;;  %vm898_vm3 = vweird.f32 %v3233_v22  ;;  %v904_v41 = vand.u32 2147483648, %v3233_v22 }
  0x7d   : > { %v736_v6 = vsel %vm3283_vm2, %v3204_v58, %v732_v56  ;;  %v1022_v58 = vand.u32 2147483647, %v3196_v52  ;;  %2627 = vpow2.f32 %v632_v36  ;;  %vm763_vm9 = vweird.f32 %v3227_v19 }
  0x7e   : > { %v751_v33 = vsel %vm3364_vm14, %v3269_v48, %v747_v15 }
  0x7f   : > { %vm3360_vm13 = vcmp.eq.f32.partialorder %v1022_v58, 8.507059e+37 }
  0x80   : > { %2009 = vmatmul.bf16.gmra.mxu2 %v2406_v2  ;;  %v3301_v2 = vpop.eup %2617  ;;  %v1026_v34 = vsel %vm3360_vm13, %v1025_v54, %v1021_v59 }
  0x81   : > { %v879_v10 = vmul.f32 %v3301_v2, %v3230_v21  ;;  %v3316_v13 = vpop.eup %2619  ;;  %vm884_vm7 = vweird.f32 %v3301_v2  ;;  %v1348_v51 = vmul.f32 %v1026_v34, %v3150_v11  ;;  %v905_v11 = vor.u32 1.1754944e-38, %v904_v41 }
  0x82   : > { %v3324_v24 = vpop.eup %2621  ;;  %vm3347_vm12 = vmor %vm883_vm6, %vm884_vm7  ;;  %v894_v52 = vmul.f32 %v3316_v13, %v3233_v22  ;;  %vm899_vm4 = vweird.f32 %v3316_v13 }
  0x83   : > { %v880_v30 = vsub.f32 1.0, %v879_v10  ;;  %v3332_v31 = vpop.eup %2623  ;;  %v741_v10 = vsel %vm738_vm11, %v740_v27, %v736_v6  ;;  %v2465_v6 = vunpack.c.l.bf16 %v3225_v18  ;;  %vm3422_vm7 = vmor %vm898_vm3, %vm899_vm4  ;;  %vm764_vm13 = vweird.f32 %v3324_v24 }
  0x84   : > { %v3250_v38 = vpop.permute.xlu2 %1526  ;;  %v895_v4 = vsub.f32 1.0, %v894_v52  ;;  %v2626_v9 = vpop.eup %2625  ;;  %v1329_v60 = vmul.f32 %v741_v10, %v3112_v47  ;;  %v759_v47 = vmul.f32 %v3324_v24, %v3227_v19  ;;  %v1338_v52 = vmul.f32 %v876_v23, %v3109_v46 }
  0x85   : > { %v3258_v55 = vpop.permute.xlu1 %1499  ;;  %v3260_v40 = vpop.permute.xlu0 %1493  ;;  %v881_v39 = vmul.f32 %v3301_v2, %v880_v30  ;;  %v755_v30 = vor.u32 1.1754944e-38, %v754_v42  ;;  %v3387_v32 = vadd.f32 1.0, %v2626_v9  ;;  %v485_v36 = vmul.f32 %v3083_v28, %v2465_v6  ;;  %v2517_v9 = vld [vmem:[%s3074_s17 + $0x98] sm:$0xff]  }
  0x86   : > { %vm1615_vm0 = vcmp.eq.s32.totalorder %v3260_v40, 1  ;;  %v2628_v45 = vpop.eup %2627  ;;  %v896_v62 = vmul.f32 %v3316_v13, %v895_v4  ;;  %vm1626_vm5 = vcmp.eq.s32.totalorder %v3250_v38, 1  ;;  %v3415_v42 = vadd.f32 %v3091_v37, %v3289_v61 }
  0x87   : > { %v882_v56 = vadd.f32 %v3301_v2, %v881_v39  ;;  %2629 = vrcp.f32 %v3387_v32  ;;  %v3400_v63 = vadd.f32 1.0, %v2628_v45  ;;  %v756_v48 = vsel %vm753_vm1, %v755_v30, %v751_v33 }
  0x88   : > { %v902_v39 = vand.u32 2147483647, %v3233_v22  ;;  %v897_v21 = vadd.f32 %v3316_v13, %v896_v62  ;;  %vm1617_vm6 = vcmp.eq.s32.totalorder %v3258_v55, 1  ;;  %v3431_v61 = vsel %vm1615_vm0, %v1328_v35, 0.0  ;;  %vm3496_vm0 = vmor %vm763_vm9, %vm764_vm13 }
  0x89   : > { %v886_v20 = vsel %vm3347_vm12, %v3301_v2, %v882_v56  ;;  %2631 = vrcp.f32 %v3400_v63  ;;  %v3427_v56 = vadd.f32 %v3091_v37, %v485_v36  ;;  %v1204_v4 = vand.u32 2147483648, %v3387_v32 }
  0x8a   : > { %v891_v18 = vsel %vm3371_vm15, %v890_v3, %v886_v20  ;;  %vm3446_vm8 = vcmp.eq.f32.partialorder %v902_v39, 8.507059e+37  ;;  %v901_v10 = vsel %vm3422_vm7, %v3316_v13, %v897_v21  ;;  %vm1198_vm10 = vweird.f32 %v3387_v32 }
  0x8b   : > { %v1339_v29 = vmul.f32 %v891_v18, %v3157_v14  ;;  %v1330_v14 = vmul.f32 %v756_v48, %v3118_v49  ;;  %v760_v49 = vsub.f32 1.0, %v759_v47  ;;  %v1039_v20 = vand.u32 2147483648, %v3400_v63 }
  0x8c   : > { %v3318_v17 = vpop.permute.xlu2 %1535  ;;  %v1202_v23 = vand.u32 2147483647, %v3387_v32  ;;  %v906_v6 = vsel %vm3446_vm8, %v905_v11, %v901_v10  ;;  %v3474_v33 = vadd.f32 1.0, %v3332_v31  ;;  %vm1033_vm12 = vweird.f32 %v3400_v63 }
  0x8d   : > { %v3326_v25 = vpop.permute.xlu1 %1502  ;;  %v3328_v26 = vpop.permute.xlu0 %1496  ;;  %v3444_v3 = vsel %vm1626_vm5, %v1339_v29, 0.0  ;;  %v3464_v5 = vsel %vm1617_vm6, %v1330_v14, 0.0  ;;  %v761_v30 = vmul.f32 %v3324_v24, %v760_v49  ;;  %v2497_v45 = vunpack.c.l.bf16 %v2517_v9 }
  0x8e   : > { %vm1616_vm2 = vcmp.eq.s32.totalorder %v3328_v26, 1  ;;  %v3438_v22 = vpop.eup %2629  ;;  %v571_v26 = vsub.f32 0.0, %v3427_v56  ;;  %v572_v34 = vsub.f32 0.0, %v3415_v42  ;;  %v769_v18 = vand.u32 2147483648, %v3227_v19 }
  0x8f   : > { %v3436_v46 = vsel %vm1616_vm2, %v1329_v60, 0.0  ;;  %v1194_v7 = vmul.f32 %v3438_v22, %v3387_v32  ;;  %v3458_v38 = vpop.eup %2631  ;;  %vm1199_vm14 = vweird.f32 %v3438_v22  ;;  %v767_v60 = vand.u32 2147483647, %v3227_v19 }
  0x90   : > { %v634_v15 = vmul.f32 1.442695, %v571_v26  ;;  %v1029_v13 = vmul.f32 %v3458_v38, %v3400_v63  ;;  %v762_v48 = vadd.f32 %v3324_v24, %v761_v30  ;;  %v501_v36 = vmul.f32 %v3083_v28, %v2497_v45  ;;  %vm3507_vm1 = vmor %vm1198_vm10, %vm1199_vm14 }
  0x91   : > { %v1195_v35 = vsub.f32 1.0, %v1194_v7  ;;  %v1205_v41 = vor.u32 1.1754944e-38, %v1204_v4  ;;  %v1037_v21 = vand.u32 2147483647, %v3400_v63  ;;  %v636_v54 = vmul.f32 1.442695, %v572_v34 }
  0x92   : > { %2633 = vpow2.f32 %v634_v15  ;;  %v1030_v62 = vsub.f32 1.0, %v1029_v13  ;;  %vm3511_vm2 = vcmp.eq.f32.partialorder %v1202_v23, 8.507059e+37  ;;  %v3515_v19 = vor.u32 1.1754944e-38, %v1039_v20  ;;  %v3519_v7 = vld [vmem:[%s3074_s17 + $0x88] sm:$0xff]   ;;  %v3548_v13 = vld [vmem:[%s3074_s17 + $0x10] sm:$0xff]  }
  0x93   : > { %v1196_v55 = vmul.f32 %v3438_v22, %v1195_v35  ;;  %2635 = vrcp.f32 %v3474_v33  ;;  %v1340_v26 = vmul.f32 %v906_v6, %v3153_v12  ;;  %vm3522_vm3 = vcmp.eq.f32.partialorder %v767_v60, 8.507059e+37 }
  0x94   : > { %v3376_v58 = vpop.permute.xlu2 %1544  ;;  %v770_v4 = vor.u32 1.1754944e-38, %v769_v18  ;;  %v917_v10 = vand.u32 2147483647, %v3474_v33  ;;  %v1031_v15 = vmul.f32 %v3458_v38, %v1030_v62  ;;  %v766_v12 = vsel %vm3496_vm0, %v3324_v24, %v762_v48 }
  0x95   : > { %v3383_v2 = vpop.permute.xlu1 %1514  ;;  %v3385_v27 = vpop.permute.xlu0 %1511  ;;  %v1197_v39 = vadd.f32 %v3438_v22, %v1196_v55  ;;  %v3534_v9 = vadd.f32 %v3091_v37, %v501_v36  ;;  %vm1034_vm4 = vweird.f32 %v3458_v38  ;;  %vm3542_vm5 = vcmp.eq.f32.partialorder %v1037_v21, 8.507059e+37 }
  0x96   : > { %2637 = vpow2.f32 %v636_v54  ;;  %v2490_v23 = vunpack.c.h.bf16 %v3519_v7  ;;  %vm913_vm7 = vweird.f32 %v3474_v33  ;;  %v919_v24 = vand.u32 2147483648, %v3474_v33  ;;  %vm3584_vm9 = vmor %vm1033_vm12, %vm1034_vm4 }
  0x97   : > { %v771_v30 = vsel %vm3522_vm3, %v770_v4, %v766_v12  ;;  %vm3563_vm8 = vcmp.eq.f32.partialorder %v917_v10, 8.507059e+37  ;;  %v587_v45 = vsub.f32 0.0, %v3534_v9  ;;  %v1032_v62 = vadd.f32 %v3458_v38, %v1031_v15 }
  0x98   : > { %v498_v48 = vmul.f32 %v3083_v28, %v2490_v23  ;;  %v2429_v36 = vunpack.c.l.bf16 %v3548_v13  ;;  %v3598_v11 = vmul.f32 %v771_v30, %v3141_v8  ;;  %v920_v63 = vor.u32 1.1754944e-38, %v919_v24 }
  0x99   : > { %v1036_v8 = vsel %vm3584_vm9, %v3458_v38, %v1032_v62 }
  0x9a   : > { %v3601_v32 = vadd.f32 %v3091_v37, %v498_v48  ;;  %v467_v15 = vmul.f32 %v3083_v28, %v2429_v36 }
  0x9c   : > { %v1554_v57 = vpop.permute.xlu2 %1553  ;;  %v584_v23 = vsub.f32 0.0, %v3601_v32 }
  0x9d   : > { %v1524_v59 = vpop.permute.xlu1 %1523  ;;  %v3440_v0 = vpop.permute.xlu0 %1520  ;;  %vm1635_vm11 = vcmp.eq.s32.totalorder %v1554_v57, 1 }
  0x9e   : > { %vm1625_vm15 = vcmp.eq.s32.totalorder %v1524_v59, 1  ;;  %v3501_v49 = vsel %vm1635_vm11, %v1348_v51, 0.0  ;;  %v2634_v57 = vpop.eup %2633  ;;  %v1201_v59 = vsel %vm3507_vm1, %v3438_v22, %v1197_v39  ;;  %v3557_v22 = vld [vmem:[%s4708_s6] ss:$0 sm:$0xff]  ;;  %vm1618_vm11 = vcmp.eq.s32.totalorder %v3326_v25, 1 }
  0x9f   : > { %v1666_v51 = vsel %vm1625_vm15, %v1338_v52, 0.0  ;;  %v3528_v20 = vadd.f32 1.0, %v2634_v57  ;;  %v3536_v52 = vpop.eup %2635  ;;  %v1206_v18 = vsel %vm3511_vm2, %v1205_v41, %v1201_v59  ;;  %v666_v57 = vmul.f32 1.442695, %v587_v45 }
  0xa0   : > { %v909_v6 = vmul.f32 %v3536_v52, %v3474_v33  ;;  %vm914_vm10 = vweird.f32 %v3536_v52  ;;  %v660_v36 = vmul.f32 1.442695, %v584_v23 }
  0xa1   : > { %2639 = vrcp.f32 %v3528_v20  ;;  %vm3616_vm12 = vmor %vm913_vm7, %vm914_vm10  ;;  %v1052_v33 = vand.u32 2147483647, %v3528_v20  ;;  %vm1048_vm14 = vweird.f32 %v3528_v20  ;;  %v1054_v45 = vand.u32 2147483648, %v3528_v20 }
  0xa2   : > { %v910_v40 = vsub.f32 1.0, %v909_v6  ;;  %2641 = vpow2.f32 %v666_v57  ;;  %v3631_v6 = vld [vmem:[%s3074_s17 + $0x38] sm:$0xff]   ;;  %v1360_v57 = vmul.f32 %v1206_v18, %v3267_v44 }
  0xa3   : > { %vm3659_vm0 = vcmp.eq.f32.partialorder %v1052_v33, 8.507059e+37  ;;  %v1055_v59 = vor.u32 1.1754944e-38, %v1054_v45 }
  0xa4   : > { %v3484_v31 = vpop.permute.xlu2 %1562  ;;  %v911_v10 = vmul.f32 %v3536_v52, %v910_v40 }
  0xa5   : > { %v3488_v47 = vpop.permute.xlu1 %1532  ;;  %v1530_v29 = vpop.permute.xlu0 %1529  ;;  %vm1638_vm7 = vcmp.eq.s32.totalorder %v3484_v31, 1 }
  0xa6   : > { %vm1627_vm6 = vcmp.eq.s32.totalorder %v1530_v29, 1  ;;  %v2638_v29 = vpop.eup %2637  ;;  %vm1628_vm13 = vcmp.eq.s32.totalorder %v3488_v47, 1  ;;  %v912_v30 = vadd.f32 %v3536_v52, %v911_v10 }
  0xa7   : > { %v3589_v41 = vsel %vm1627_vm6, %v1340_v26, 0.0  ;;  %v3607_v12 = vpop.eup %2639 }
  0xa8   : > { %v1044_v38 = vmul.f32 %v3607_v12, %v3528_v20  ;;  %vm1049_vm15 = vweird.f32 %v3607_v12  ;;  %v916_v48 = vsel %vm3616_vm12, %v3536_v52, %v912_v30 }
  0xa9   : > { %v921_v44 = vsel %vm3563_vm8, %v920_v63, %v916_v48  ;;  %vm3670_vm1 = vmor %vm1048_vm14, %vm1049_vm15 }
  0xaa   : > { %v1045_v62 = vsub.f32 1.0, %v1044_v38  ;;  %v1341_v20 = vmul.f32 %v921_v44, %v3192_v50  ;;  %v3698_v50 = vsel %vm1618_vm11, %v3598_v11, 0.0 }
  0xac   : > { %v3568_v34 = vpop.permute.xlu2 %1571  ;;  %v1935_v60 = vpop.f32.mrf.mxu0  ;;  %v1046_v10 = vmul.f32 %v3607_v12, %v1045_v62 }
  0xad   : > { %v3575_v39 = vpop.permute.xlu1 %1541  ;;  %v3577_v21 = vpop.permute.xlu0 %1538  ;;  %v2039_v14 = vadd.f32 %v1935_v60, %v3431_v61 }
  0xae   : > { %v1960_v61 = vpop.f32.mrf.mxu1  ;;  %v1047_v38 = vadd.f32 %v3607_v12, %v1046_v10 }
  0xaf   : > { %v2084_v26 = vadd.f32 %v3557_v22, %v2039_v14  ;;  %v2049_v4 = vadd.f32 %v1960_v61, %v1666_v51  ;;  %v3620_v51 = vadd.f32 1.0, %v2638_v29  ;;  %v3642_v14 = vadd.f32 %v3091_v37, %v467_v15 }
  0xb0   : > { %v1041_v29 = vsel %vm3542_vm5, %v3515_v19, %v1036_v8  ;;  %v1051_v48 = vsel %vm3670_vm1, %v3607_v12, %v1047_v38  ;;  %v2430_v8 = vunpack.c.h.bf16 %v3548_v13 }
  0xb1   : > { %2125 = vst [vmem:[%s3595_s24] sm:$0xff] %v2084_v26  ;;  %v2094_v24 = vadd.f32 %v3557_v22, %v2049_v4  ;;  %2643 = vrcp.f32 %v3620_v51  ;;  %v2449_v26 = vunpack.c.l.bf16 %v3631_v6  ;;  %v1067_v23 = vand.u32 2147483647, %v3620_v51 }
  0xb2   : > { %2645 = vpow2.f32 %v660_v36  ;;  %v553_v55 = vsub.f32 0.0, %v3642_v14  ;;  %v1069_v33 = vand.u32 2147483648, %v3620_v51  ;;  %vm1063_vm2 = vweird.f32 %v3620_v51 }
  0xb3   : > { %2135 = vst [vmem:[%s3595_s24 + $0x50] sm:$0xff] %v2094_v24  ;;  %v1985_v60 = vpop.f32.mrf.mxu2  ;;  %v477_v62 = vmul.f32 %v3083_v28, %v2449_v26  ;;  %v1056_v12 = vsel %vm3659_vm0, %v1055_v59, %v1051_v48  ;;  %vm3705_vm3 = vcmp.eq.f32.partialorder %v1067_v23, 8.507059e+37 }
  0xb4   : > { %v3644_v54 = vpop.permute.xlu2 %1580  ;;  %v2059_v40 = vadd.f32 %v1985_v60, %v3501_v49  ;;  %v3647_v61 = vpop.f32.mrf.mxu3  ;;  %v598_v45 = vmul.f32 1.442695, %v553_v55  ;;  %v1350_v55 = vmul.f32 %v1056_v12, %v3427_v56 }
  0xb5   : > { %v3654_v4 = vpop.permute.xlu1 %1550  ;;  %v3656_v52 = vpop.permute.xlu0 %1547 }
  0xb6   : > { %v2642_v49 = vpop.eup %2641  ;;  %v2104_v19 = vadd.f32 %v3557_v22, %v2059_v40  ;;  %v1937_v35 = vpop.f32.mrf.mxu0  ;;  %v1349_v40 = vmul.f32 %v1041_v29, %v3309_v53  ;;  %v1070_v53 = vor.u32 1.1754944e-38, %v1069_v33  ;;  %v3714_v29 = vsel %vm1628_vm13, %v1341_v20, 0.0 }
  0xb7   : > { %v1962_v18 = vpop.f32.mrf.mxu1  ;;  %v2040_v63 = vadd.f32 %v1937_v35, %v3436_v46  ;;  %v3680_v30 = vpop.eup %2643  ;;  %v3684_v60 = vadd.f32 1.0, %v2642_v49 }
  0xb8   : > { %v2050_v24 = vadd.f32 %v1962_v18, %v3444_v3  ;;  %2145 = vst [vmem:[%s3595_s24 + $0xa0] sm:$0xff] %v2104_v19  ;;  %v1059_v36 = vmul.f32 %v3680_v30, %v3620_v51  ;;  %v2646_v28 = vpop.eup %2645  ;;  %vm1064_vm4 = vweird.f32 %v3680_v30  ;;  %v3721_v18 = vadd.f32 %v3091_v37, %v477_v62 }
  0xb9   : > { %v2085_v46 = vadd.f32 %v3557_v22, %v2040_v63  ;;  %2647 = vrcp.f32 %v3684_v60  ;;  %v3717_v49 = vadd.f32 1.0, %v2646_v28  ;;  %vm3734_vm8 = vmor %vm1063_vm2, %vm1064_vm4  ;;  %vm1288_vm10 = vweird.f32 %v3684_v60 }
  0xba   : > { %v2095_v3 = vadd.f32 %v3557_v22, %v2050_v24  ;;  %v1060_v10 = vsub.f32 1.0, %v1059_v36  ;;  %2649 = vpow2.f32 %v598_v45  ;;  %v1292_v20 = vand.u32 2147483647, %v3684_v60  ;;  %v3748_v45 = vld [vmem:[%s3074_s17 + $0x60] sm:$0xff]  }
  0xbb   : > { %2126 = vst [vmem:[%s3595_s24 + $0x8] sm:$0xff] %v2085_v46  ;;  %v1987_v26 = vpop.f32.mrf.mxu2  ;;  %2651 = vrcp.f32 %v3717_v49  ;;  %v563_v36 = vsub.f32 0.0, %v3721_v18  ;;  %v1294_v12 = vand.u32 2147483648, %v3684_v60  ;;  %vm1243_vm11 = vweird.f32 %v3717_v49 }
  0xbc   : > { %2136 = vst [vmem:[%s3595_s24 + $0x58] sm:$0xff] %v2095_v3  ;;  %v1590_v25 = vpop.permute.xlu2 %1589  ;;  %v3710_v11 = vpop.f32.mrf.mxu3  ;;  %v1061_v35 = vmul.f32 %v3680_v30, %v1060_v10  ;;  %vm3791_vm15 = vcmp.eq.f32.partialorder %v1292_v20, 8.507059e+37 }
  0xbd   : > { %vm1647_vm5 = vcmp.eq.s32.totalorder %v1590_v25, 1  ;;  %v1560_v15 = vpop.permute.xlu1 %1559  ;;  %v1557_v19 = vpop.permute.xlu0 %1556 }
  0xbe   : > { %v1688_v59 = vsel %vm1647_vm5, %v1360_v57, 0.0  ;;  %vm1636_vm6 = vcmp.eq.s32.totalorder %v1557_v19, 1  ;;  %v1940_v47 = vpop.f32.mrf.mxu0  ;;  %vm1637_vm9 = vcmp.eq.s32.totalorder %v1560_v15, 1 }
  0xbf   : > { %v1965_v23 = vpop.f32.mrf.mxu1  ;;  %v2071_v63 = vadd.f32 %v3647_v61, %v1688_v59  ;;  %v1677_v24 = vsel %vm1636_vm6, %v1349_v40, 0.0  ;;  %v2041_v38 = vadd.f32 %v1940_v47, %v3464_v5  ;;  %v3738_v56 = vpop.eup %2647  ;;  %v1062_v61 = vadd.f32 %v3680_v30, %v1061_v35 }
  0xc0   : > { %v2051_v37 = vadd.f32 %v1965_v23, %v3589_v41  ;;  %v2060_v33 = vadd.f32 %v1987_v26, %v1677_v24  ;;  %v1284_v51 = vmul.f32 %v3738_v56, %v3684_v60  ;;  %v2650_v62 = vpop.eup %2649  ;;  %v1678_v40 = vsel %vm1637_vm9, %v1350_v55, 0.0 }
  0xc1   : > { %v2116_v5 = vadd.f32 %v3557_v22, %v2071_v63  ;;  %v2086_v41 = vadd.f32 %v3557_v22, %v2041_v38  ;;  %v1066_v48 = vsel %vm3734_vm8, %v3680_v30, %v1062_v61  ;;  %v2652_v25 = vpop.eup %2651  ;;  %v3762_v19 = vadd.f32 1.0, %v2650_v62  ;;  %v3845_v61 = vld [vmem:[%s3074_s17 + $0x18] sm:$0xff]  }
  0xc2   : > { %v2105_v46 = vadd.f32 %v3557_v22, %v2060_v33  ;;  %v2096_v3 = vadd.f32 %v3557_v22, %v2051_v37  ;;  %v1285_v26 = vsub.f32 1.0, %v1284_v51  ;;  %v1071_v10 = vsel %vm3705_vm3, %v1070_v53, %v1066_v48 }
  0xc3   : > { %2157 = vst [vmem:[%s3595_s24 + $0x100] sm:$0xff] %v2116_v5  ;;  %v1990_v28 = vpop.f32.mrf.mxu2  ;;  %v2469_v30 = vunpack.c.l.bf16 %v3748_v45  ;;  %vm1289_vm12 = vweird.f32 %v3738_v56  ;;  %v1239_v44 = vmul.f32 %v2652_v25, %v3717_v49  ;;  %v1249_v53 = vand.u32 2147483648, %v3717_v49 }
  0xc4   : > { %2146 = vst [vmem:[%s3595_s24 + $0xa8] sm:$0xff] %v2105_v46  ;;  %v2061_v15 = vadd.f32 %v1990_v28, %v1678_v40  ;;  %v3766_v35 = vpop.f32.mrf.mxu3  ;;  %v1286_v59 = vmul.f32 %v3738_v56, %v1285_v26  ;;  %v1351_v63 = vmul.f32 %v1071_v10, %v3415_v42  ;;  %vm1244_vm13 = vweird.f32 %v2652_v25  ;;  %vm3783_vm14 = vmor %vm1288_vm10, %vm1289_vm12  ;;  %v1599_v60 = vpop.permute.xlu2 %1598  ;;  %v3809_v40 = vld [vmem:[%s2932_s22] ss:$0 sm:$0xff] }
  0xc5   : > { %2127 = vst [vmem:[%s3595_s24 + $0x10] sm:$0xff] %v2086_v41  ;;  %v618_v24 = vmul.f32 1.442695, %v563_v36  ;;  %v1240_v33 = vsub.f32 1.0, %v1239_v44  ;;  %v1247_v42 = vand.u32 2147483647, %v3717_v49  ;;  %2653 = vrcp.f32 %v3762_v19  ;;  %vm3800_vm0 = vmor %vm1243_vm11, %vm1244_vm13 }
  0xc6   : > { %2137 = vst [vmem:[%s3595_s24 + $0x60] sm:$0xff] %v2096_v3  ;;  %v2106_v47 = vadd.f32 %v3557_v22, %v2061_v15  ;;  %v1942_v23 = vpop.f32.mrf.mxu0  ;;  %v1287_v57 = vadd.f32 %v3738_v56, %v1286_v59  ;;  %v1295_v51 = vor.u32 1.1754944e-38, %v1294_v12  ;;  %v1679_v62 = vsel %vm1638_vm7, %v1351_v63, 0.0  ;;  %v3821_v10 = vld [vmem:[%s2937_s9] ss:$0 sm:$0xff] }
  0xc7   : > { %v1967_v55 = vpop.f32.mrf.mxu1  ;;  %v2042_v38 = vadd.f32 %v1942_v23, %v3698_v50  ;;  %v1241_v41 = vmul.f32 %v2652_v25, %v1240_v33  ;;  %v1250_v3 = vor.u32 1.1754944e-38, %v1249_v53  ;;  %2655 = vpow2.f32 %v618_v24 }
  0xc8   : > { %v2052_v37 = vadd.f32 %v1967_v55, %v3714_v29  ;;  %2147 = vst [vmem:[%s3595_s24 + $0xb0] sm:$0xff] %v2106_v47  ;;  %v1291_v20 = vsel %vm3783_vm14, %v3738_v56, %v1287_v57  ;;  %v487_v31 = vmul.f32 %v3809_v40, %v2469_v30  ;;  %v468_v49 = vmul.f32 %v3809_v40, %v2430_v8 }
  0xc9   : > { %v2087_v50 = vadd.f32 %v3557_v22, %v2042_v38  ;;  %v1242_v36 = vadd.f32 %v2652_v25, %v1241_v41  ;;  %vm1248_vm1 = vcmp.eq.f32.partialorder %v1247_v42, 8.507059e+37  ;;  %v2450_v26 = vunpack.c.h.bf16 %v3631_v6 }
  0xca   : > { %v2097_v29 = vadd.f32 %v3557_v22, %v2052_v37  ;;  %v2470_v12 = vunpack.c.h.bf16 %v3748_v45  ;;  %vm1650_vm2 = vcmp.eq.s32.totalorder %v1599_v60, 1  ;;  %v3824_v15 = vadd.f32 %v3821_v10, %v487_v31  ;;  %v3869_v31 = vpop.permute.xlu1 %1568 }
  0xcb   : > { %2128 = vst [vmem:[%s3595_s24 + $0x18] sm:$0xff] %v2087_v50  ;;  %v1992_v48 = vpop.f32.mrf.mxu2  ;;  %v1246_v56 = vsel %vm3800_vm0, %v2652_v25, %v1242_v36  ;;  %v3827_v13 = vadd.f32 %v3821_v10, %v468_v49  ;;  %v2654_v8 = vpop.eup %2653  ;;  %v1296_v30 = vsel %vm3791_vm15, %v1295_v51, %v1291_v20  ;;  %vm778_vm3 = vweird.f32 %v3762_v19 }
  0xcc   : > { %2138 = vst [vmem:[%s3595_s24 + $0x68] sm:$0xff] %v2097_v29  ;;  %v2062_v28 = vadd.f32 %v1992_v48, %v1679_v62  ;;  %v782_v45 = vand.u32 2147483647, %v3762_v19  ;;  %v1251_v25 = vsel %vm1248_vm1, %v1250_v3, %v1246_v56  ;;  %v774_v59 = vmul.f32 %v2654_v8, %v3762_v19  ;;  %v2022_v55 = vpop.f32.mrf.mxu3 }
  0xcd   : > { %v784_v44 = vand.u32 2147483648, %v3762_v19  ;;  %v573_v53 = vsub.f32 0.0, %v3824_v15  ;;  %v2656_v47 = vpop.eup %2655  ;;  %v1363_v23 = vmul.f32 %v1251_v25, %v3601_v32  ;;  %v554_v63 = vsub.f32 0.0, %v3827_v13 }
  0xce   : > { %v2107_v6 = vadd.f32 %v3557_v22, %v2062_v28  ;;  %v478_v24 = vmul.f32 %v3809_v40, %v2450_v26  ;;  %v488_v38 = vmul.f32 %v3809_v40, %v2470_v12  ;;  %v775_v37 = vsub.f32 1.0, %v774_v59 }
  0xcf   : > { %vm779_vm4 = vweird.f32 %v2654_v8  ;;  %v3842_v57 = vadd.f32 1.0, %v2656_v47  ;;  %v638_v33 = vmul.f32 1.442695, %v573_v53  ;;  %v1691_v42 = vsel %vm1650_vm2, %v1363_v23, 0.0  ;;  %v3892_v23 = vpop.permute.xlu0 %1565 }
  0xd0   : > { %2148 = vst [vmem:[%s3595_s24 + $0xb8] sm:$0xff] %v2107_v6  ;;  %v600_v50 = vmul.f32 1.442695, %v554_v63  ;;  %v3849_v29 = vadd.f32 %v3821_v10, %v478_v24  ;;  %v3852_v32 = vadd.f32 %v3821_v10, %v488_v38  ;;  %v2074_v5 = vadd.f32 %v2022_v55, %v1691_v42  ;;  %vm3861_vm6 = vmor %vm778_vm3, %vm779_vm4  ;;  %v3898_v38 = vld [vmem:[%s3074_s17 + $0x40] sm:$0xff]  }
  0xd1   : > { %v776_v41 = vmul.f32 %v2654_v8, %v775_v37  ;;  %vm3854_vm5 = vcmp.eq.f32.partialorder %v782_v45, 8.507059e+37  ;;  %2657 = vrcp.f32 %v3842_v57  ;;  %v785_v62 = vor.u32 1.1754944e-38, %v784_v44  ;;  %v1945_v45 = vpop.f32.mrf.mxu0  ;;  %v3901_v37 = vld [vmem:[%s3074_s17 + $0x68] sm:$0xff]  }
  0xd2   : > { %2659 = vpow2.f32 %v638_v33  ;;  %v564_v46 = vsub.f32 0.0, %v3849_v29  ;;  %v2433_v3 = vunpack.c.l.bf16 %v3845_v61  ;;  %v2119_v20 = vadd.f32 %v3557_v22, %v2074_v5 }
  0xd3   : > { %v777_v48 = vadd.f32 %v2654_v8, %v776_v41  ;;  %2661 = vpow2.f32 %v600_v50  ;;  %v574_v36 = vsub.f32 0.0, %v3852_v32  ;;  %vm1619_vm7 = vcmp.eq.s32.totalorder %v3159_v16, 1 }
  0xd4   : > { %2160 = vst [vmem:[%s3595_s24 + $0x118] sm:$0xff] %v2119_v20  ;;  %v620_v49 = vmul.f32 1.442695, %v564_v46  ;;  %v3876_v26 = vmul.f32 %v1296_v30, %v3534_v9  ;;  %vm928_vm8 = vweird.f32 %v3842_v57  ;;  %v469_v25 = vmul.f32 %v3809_v40, %v2433_v3 }
  0xd5   : > { %v781_v19 = vsel %vm3861_vm6, %v2654_v8, %v777_v48  ;;  %v640_v28 = vmul.f32 1.442695, %v574_v36  ;;  %v932_v9 = vand.u32 2147483647, %v3842_v57  ;;  %v2489_v30 = vunpack.c.l.bf16 %v3519_v7 }
  0xd6   : > { %v786_v12 = vsel %vm3854_vm5, %v785_v62, %v781_v19  ;;  %2663 = vpow2.f32 %v620_v49  ;;  %vm1629_vm9 = vcmp.eq.s32.totalorder %v3318_v17, 1  ;;  %v934_v53 = vand.u32 2147483648, %v3842_v57  ;;  %v2757_v49 = vld [vmem:[%s3074_s17 + $0x80] sm:$0xff]  }
  0xd7   : > { %v2658_v56 = vpop.eup %2657  ;;  %v1332_v6 = vmul.f32 %v786_v12, %v3642_v14  ;;  %2665 = vpow2.f32 %v640_v28  ;;  %v497_v7 = vmul.f32 %v3809_v40, %v2489_v30  ;;  %v3906_v33 = vadd.f32 %v3821_v10, %v469_v25  ;;  %v3932_v12 = vpop.permute.xlu1 %1577 }
  0xd8   : > { %v2660_v8 = vpop.eup %2659  ;;  %v924_v59 = vmul.f32 %v2658_v56, %v3842_v57  ;;  %vm929_vm10 = vweird.f32 %v2658_v56  ;;  %v2453_v42 = vunpack.c.l.bf16 %v3898_v38  ;;  %vm3919_vm12 = vcmp.eq.f32.partialorder %v932_v9, 8.507059e+37  ;;  %v3962_v60 = vpop.permute.xlu0 %1574 }
  0xd9   : > { %v2662_v44 = vpop.eup %2661  ;;  %v1660_v14 = vsel %vm1619_vm7, %v1332_v6, 0.0  ;;  %v3890_v47 = vadd.f32 1.0, %v2660_v8  ;;  %vm3915_vm11 = vmor %vm928_vm8, %vm929_vm10  ;;  %v935_v46 = vor.u32 1.1754944e-38, %v934_v53  ;;  %v2473_v3 = vunpack.c.l.bf16 %v3901_v37 }
  0xda   : > { %v2043_v55 = vadd.f32 %v1945_v45, %v1660_v14  ;;  %v925_v63 = vsub.f32 1.0, %v924_v59  ;;  %v3894_v24 = vadd.f32 1.0, %v2662_v44  ;;  %v2434_v20 = vunpack.c.h.bf16 %v3845_v61 }
  0xdb   : > { %2667 = vrcp.f32 %v3890_v47  ;;  %v1082_v16 = vand.u32 2147483647, %v3890_v47  ;;  %v1084_v41 = vand.u32 2147483648, %v3890_v47  ;;  %v3929_v57 = vadd.f32 %v3821_v10, %v497_v7  ;;  %v1970_v7 = vpop.f32.mrf.mxu1 }
  0xdc   : > { %v2088_v50 = vadd.f32 %v3557_v22, %v2043_v55  ;;  %v926_v5 = vmul.f32 %v2658_v56, %v925_v63  ;;  %2669 = vrcp.f32 %v3894_v24  ;;  %v2664_v51 = vpop.eup %2663  ;;  %v2486_v28 = vunpack.c.h.bf16 %v2757_v49 }
  0xdd   : > { %v2666_v48 = vpop.eup %2665  ;;  %v3926_v19 = vadd.f32 1.0, %v2664_v51  ;;  %vm1078_vm13 = vweird.f32 %v3890_v47  ;;  %vm793_vm14 = vweird.f32 %v3894_v24  ;;  %v555_v6 = vsub.f32 0.0, %v3906_v33 }
  0xde   : > { %2129 = vst [vmem:[%s3595_s24 + $0x20] sm:$0xff] %v2088_v50  ;;  %v927_v36 = vadd.f32 %v2658_v56, %v926_v5  ;;  %v3938_v45 = vmul.f32 %v3809_v40, %v2453_v42  ;;  %vm3942_vm15 = vcmp.eq.f32.partialorder %v1082_v16, 8.507059e+37  ;;  %v1085_v59 = vor.u32 1.1754944e-38, %v1084_v41 }
  0xdf   : > { %2671 = vrcp.f32 %v3926_v19  ;;  %v3947_v9 = vadd.f32 1.0, %v2666_v48  ;;  %v797_v14 = vand.u32 2147483647, %v3894_v24  ;;  %v583_v53 = vsub.f32 0.0, %v3929_v57 }
  0xe0   : > { %v931_v25 = vsel %vm3915_vm11, %v2658_v56, %v927_v36  ;;  %v496_v55 = vmul.f32 %v3809_v40, %v2486_v28  ;;  %v799_v42 = vand.u32 2147483648, %v3894_v24  ;;  %v947_v50 = vand.u32 2147483647, %v3926_v19 }
  0xe1   : > { %v2668_v30 = vpop.eup %2667  ;;  %v936_v44 = vsel %vm3919_vm12, %v935_v46, %v931_v25  ;;  %vm1639_vm0 = vcmp.eq.s32.totalorder %v3892_v23, 1  ;;  %v949_v41 = vand.u32 2147483648, %v3926_v19  ;;  %v658_v51 = vmul.f32 1.442695, %v583_v53  ;;  %v4026_v25 = vpop.permute.xlu0 %1583 }
  0xe2   : > { %v2670_v56 = vpop.eup %2669  ;;  %v1342_v63 = vmul.f32 %v936_v44, %v3721_v18  ;;  %v1074_v16 = vmul.f32 %v2668_v30, %v3890_v47  ;;  %vm1079_vm1 = vweird.f32 %v2668_v30  ;;  %vm1620_vm2 = vcmp.eq.s32.totalorder %v3189_v43, 1 }
  0xe3   : > { %v789_v5 = vmul.f32 %v2670_v56, %v3894_v24  ;;  %v3967_v46 = vadd.f32 %v3821_v10, %v496_v55  ;;  %2673 = vrcp.f32 %v3947_v9  ;;  %vm794_vm3 = vweird.f32 %v2670_v56  ;;  %vm3979_vm5 = vmor %vm1078_vm13, %vm1079_vm1  ;;  %v1995_v55 = vpop.f32.mrf.mxu2 }
  0xe4   : > { %v1670_v18 = vsel %vm1629_vm9, %v1342_v63, 0.0  ;;  %v1075_v62 = vsub.f32 1.0, %v1074_v16  ;;  %2675 = vpow2.f32 %v658_v51  ;;  %vm3970_vm4 = vcmp.eq.f32.partialorder %v797_v14, 8.507059e+37  ;;  %vm3988_vm8 = vmor %vm793_vm14, %vm794_vm3  ;;  %v3997_v51 = vpop.permute.xlu1 %1586 }
  0xe5   : > { %v2053_v48 = vadd.f32 %v1970_v7, %v1670_v18  ;;  %v790_v36 = vsub.f32 1.0, %v789_v5  ;;  %v2672_v49 = vpop.eup %2671  ;;  %v800_v44 = vor.u32 1.1754944e-38, %v799_v42  ;;  %v582_v17 = vsub.f32 0.0, %v3967_v46 }
  0xe6   : > { %v1076_v28 = vmul.f32 %v2668_v30, %v1075_v62  ;;  %v939_v7 = vmul.f32 %v2672_v49, %v3926_v19  ;;  %vm943_vm6 = vweird.f32 %v3926_v19  ;;  %vm1630_vm7 = vcmp.eq.s32.totalorder %v3577_v21, 1 }
  0xe7   : > { %v2098_v53 = vadd.f32 %v3557_v22, %v2053_v48  ;;  %v791_v63 = vmul.f32 %v2670_v56, %v790_v36  ;;  %vm3992_vm9 = vcmp.eq.f32.partialorder %v947_v50, 8.507059e+37  ;;  %v950_v42 = vor.u32 1.1754944e-38, %v949_v41 }
  0xe8   : > { %v1077_v14 = vadd.f32 %v2668_v30, %v1076_v28  ;;  %v656_v5 = vmul.f32 1.442695, %v582_v17  ;;  %v940_v62 = vsub.f32 1.0, %v939_v7  ;;  %vm944_vm10 = vweird.f32 %v2672_v49 }
  0xe9   : > { %2139 = vst [vmem:[%s3595_s24 + $0x70] sm:$0xff] %v2098_v53  ;;  %v792_v18 = vadd.f32 %v2670_v56, %v791_v63  ;;  %v602_v48 = vmul.f32 1.442695, %v555_v6  ;;  %v3999_v36 = vpop.eup %2673  ;;  %vm1093_vm11 = vweird.f32 %v3947_v9  ;;  %v1097_v50 = vand.u32 2147483647, %v3947_v9  ;;  %vm4017_vm12 = vmor %vm943_vm6, %vm944_vm10 }
  0xea   : > { %v1081_v24 = vsel %vm3979_vm5, %v2668_v30, %v1077_v14  ;;  %2677 = vpow2.f32 %v656_v5  ;;  %v2676_v28 = vpop.eup %2675  ;;  %v941_v53 = vmul.f32 %v2672_v49, %v940_v62  ;;  %v1089_v6 = vmul.f32 %v3999_v36, %v3947_v9 }
  0xeb   : > { %v1086_v41 = vsel %vm3942_vm15, %v1085_v59, %v1081_v24  ;;  %v796_v17 = vsel %vm3988_vm8, %v2670_v56, %v792_v18  ;;  %v4021_v8 = vadd.f32 1.0, %v2676_v28  ;;  %v1099_v59 = vand.u32 2147483648, %v3947_v9 }
  0xec   : > { %v1352_v63 = vmul.f32 %v1086_v41, %v3824_v15  ;;  %v801_v30 = vsel %vm3970_vm4, %v800_v44, %v796_v17  ;;  %vm1640_vm13 = vcmp.eq.s32.totalorder %v3869_v31, 1  ;;  %v1947_v15 = vpop.f32.mrf.mxu0  ;;  %v942_v14 = vadd.f32 %v2672_v49, %v941_v53  ;;  %v1972_v41 = vpop.f32.mrf.mxu1 }
  0xed   : > { %v1333_v56 = vmul.f32 %v801_v30, %v3827_v13  ;;  %v1090_v16 = vsub.f32 1.0, %v1089_v6  ;;  %2679 = vpow2.f32 %v602_v48  ;;  %vm1094_vm14 = vweird.f32 %v3999_v36 }
  0xee   : > { %v1680_v19 = vsel %vm1639_vm0, %v1352_v63, 0.0  ;;  %2681 = vrcp.f32 %v4021_v8  ;;  %v4034_v44 = vadd.f32 %v3821_v10, %v3938_v45  ;;  %v946_v18 = vsel %vm4017_vm12, %v2672_v49, %v942_v14  ;;  %vm4058_vm0 = vmor %vm1093_vm11, %vm1094_vm14 }
  0xef   : > { %v2063_v5 = vadd.f32 %v1995_v55, %v1680_v19  ;;  %v1661_v13 = vsel %vm1620_vm2, %v1333_v56, 0.0  ;;  %v489_v23 = vmul.f32 %v3809_v40, %v2473_v3  ;;  %v951_v24 = vsel %vm3992_vm9, %v950_v42, %v946_v18  ;;  %v4069_v55 = vpop.permute.xlu1 %1595 }
  0xf0   : > { %v2678_v62 = vpop.eup %2677  ;;  %v2044_v48 = vadd.f32 %v1947_v15, %v1661_v13  ;;  %v1091_v45 = vmul.f32 %v3999_v36, %v1090_v16  ;;  %vm4046_vm15 = vcmp.eq.f32.partialorder %v1097_v50, 8.507059e+37  ;;  %v1343_v49 = vmul.f32 %v951_v24, %v3849_v29  ;;  %v4100_v24 = vpop.permute.xlu0 %1592 }
  0xf1   : > { %v2108_v43 = vadd.f32 %v3557_v22, %v2063_v5  ;;  %v4052_v17 = vadd.f32 1.0, %v2678_v62  ;;  %v1100_v47 = vor.u32 1.1754944e-38, %v1099_v59  ;;  %v1232_v50 = vand.u32 2147483647, %v4021_v8  ;;  %v4088_v5 = vpop.permute.xlu2 %1607 }
  0xf2   : > { %v2089_v42 = vadd.f32 %v3557_v22, %v2044_v48  ;;  %v1234_v53 = vand.u32 2147483648, %v4021_v8  ;;  %v1092_v29 = vadd.f32 %v3999_v36, %v1091_v45  ;;  %v1671_v63 = vsel %vm1630_vm7, %v1343_v49, 0.0 }
  0xf3   : > { %v2680_v6 = vpop.eup %2679  ;;  %2149 = vst [vmem:[%s3595_s24 + $0xc0] sm:$0xff] %v2108_v43  ;;  %2683 = vrcp.f32 %v4052_v17  ;;  %v565_v9 = vsub.f32 0.0, %v4034_v44  ;;  %v4074_v30 = vadd.f32 %v3821_v10, %v489_v23  ;;  %v2054_v59 = vadd.f32 %v1972_v41, %v1671_v63  ;;  %v1997_v23 = vpop.f32.mrf.mxu2 }
  0xf4   : > { %v2682_v7 = vpop.eup %2681  ;;  %2130 = vst [vmem:[%s3595_s24 + $0x28] sm:$0xff] %v2089_v42  ;;  %v1217_v56 = vand.u32 2147483647, %v4052_v17  ;;  %v1096_v15 = vsel %vm4058_vm0, %v3999_v36, %v1092_v29  ;;  %v4081_v21 = vadd.f32 1.0, %v2680_v6  ;;  %vm1228_vm1 = vweird.f32 %v4021_v8  ;;  %v4126_v6 = vld [vmem:[%s3074_s17 + $0x90] sm:$0xff]  }
  0xf5   : > { %v1224_v14 = vmul.f32 %v2682_v7, %v4021_v8  ;;  %v1219_v16 = vand.u32 2147483648, %v4052_v17  ;;  %v1101_v19 = vsel %vm4046_vm15, %v1100_v47, %v1096_v15  ;;  %v2099_v13 = vadd.f32 %v3557_v22, %v2054_v59 }
  0xf6   : > { %vm4091_vm2 = vcmp.eq.f32.partialorder %v1232_v50, 8.507059e+37  ;;  %vm1649_vm3 = vcmp.eq.s32.totalorder %v4069_v55, 1  ;;  %v1353_v36 = vmul.f32 %v1101_v19, %v3852_v32  ;;  %2685 = vrcp.f32 %v4081_v21 }
  0xf7   : > { %v1225_v62 = vsub.f32 1.0, %v1224_v14  ;;  %vm1229_vm4 = vweird.f32 %v2682_v7  ;;  %v1235_v48 = vor.u32 1.1754944e-38, %v1234_v53  ;;  %vm1213_vm5 = vweird.f32 %v4052_v17  ;;  %2140 = vst [vmem:[%s3595_s24 + $0x78] sm:$0xff] %v2099_v13 }
  0xf8   : > { %vm4102_vm6 = vcmp.eq.f32.partialorder %v1217_v56, 8.507059e+37  ;;  %v1681_v28 = vsel %vm1640_vm13, %v1353_v36, 0.0  ;;  %v622_v43 = vmul.f32 1.442695, %v565_v9  ;;  %v575_v32 = vsub.f32 0.0, %v4074_v30  ;;  %vm4117_vm9 = vmor %vm1228_vm1, %vm1229_vm4 }
  0xf9   : > { %v470_v49 = vmul.f32 %v3809_v40, %v2434_v20  ;;  %v2684_v41 = vpop.eup %2683  ;;  %vm1653_vm7 = vcmp.eq.s32.totalorder %v4088_v5, 1  ;;  %v1226_v3 = vmul.f32 %v2682_v7, %v1225_v62  ;;  %v1220_v47 = vor.u32 1.1754944e-38, %v1219_v16 }
  0xfa   : > { %v2064_v42 = vadd.f32 %v1997_v23, %v1681_v28  ;;  %vm808_vm8 = vweird.f32 %v4081_v21  ;;  %v1209_v61 = vmul.f32 %v2684_v41, %v4052_v17  ;;  %v814_v20 = vand.u32 2147483648, %v4081_v21 }
  0xfb   : > { %2687 = vpow2.f32 %v622_v43  ;;  %v642_v50 = vmul.f32 1.442695, %v575_v32  ;;  %v1227_v53 = vadd.f32 %v2682_v7, %v1226_v3  ;;  %vm1648_vm10 = vcmp.eq.s32.totalorder %v4100_v24, 1  ;;  %v4151_v32 = vld [vmem:[%s3074_s17 + $0x20] sm:$0xff]  }
  0xfc   : > { %v2109_v29 = vadd.f32 %v3557_v22, %v2064_v42  ;;  %v4129_v8 = vadd.f32 %v3821_v10, %v470_v49  ;;  %v2454_v63 = vunpack.c.h.bf16 %v3898_v38  ;;  %v2686_v9 = vpop.eup %2685  ;;  %v1210_v59 = vsub.f32 1.0, %v1209_v61 }
  0xfd   : > { %vm1214_vm11 = vweird.f32 %v2684_v41  ;;  %v2494_v56 = vunpack.c.h.bf16 %v4126_v6  ;;  %2689 = vpow2.f32 %v642_v50  ;;  %v1231_v15 = vsel %vm4117_vm9, %v2682_v7, %v1227_v53 }
  0xfe   : > { %2150 = vst [vmem:[%s3595_s24 + $0xc8] sm:$0xff] %v2109_v29  ;;  %v804_v14 = vmul.f32 %v2686_v9, %v4081_v21  ;;  %v812_v16 = vand.u32 2147483647, %v4081_v21  ;;  %v556_v19 = vsub.f32 0.0, %v4129_v8  ;;  %v1236_v38 = vsel %vm4091_vm2, %v1235_v48, %v1231_v15  ;;  %vm4146_vm12 = vmor %vm1213_vm5, %vm1214_vm11  ;;  %v4153_v48 = vpop.f32.mrf.mxu3 }
  0xff   : > { %v1211_v13 = vmul.f32 %v2684_v41, %v1210_v59  ;;  %v500_v36 = vmul.f32 %v3809_v40, %v2494_v56  ;;  %v480_v23 = vmul.f32 %v3809_v40, %v2454_v63  ;;  %v1362_v62 = vmul.f32 %v1236_v38, %v3929_v57 }
 0x100   : > { %v805_v28 = vsub.f32 1.0, %v804_v14  ;;  %vm809_vm13 = vweird.f32 %v2686_v9  ;;  %v604_v43 = vmul.f32 1.442695, %v556_v19  ;;  %v815_v3 = vor.u32 1.1754944e-38, %v814_v20 }
 0x101   : > { %v2688_v18 = vpop.eup %2687  ;;  %v1212_v49 = vadd.f32 %v2684_v41, %v1211_v13  ;;  %v4156_v42 = vadd.f32 %v3821_v10, %v500_v36  ;;  %v2437_v57 = vunpack.c.l.bf16 %v4151_v32  ;;  %v1690_v17 = vsel %vm1649_vm3, %v1362_v62, 0.0  ;;  %vm4172_vm14 = vmor %vm808_vm8, %vm809_vm13 }
 0x102   : > { %v806_v31 = vmul.f32 %v2686_v9, %v805_v28  ;;  %v4161_v61 = vadd.f32 1.0, %v2688_v18  ;;  %v4164_v50 = vadd.f32 %v3821_v10, %v480_v23  ;;  %v2073_v29 = vadd.f32 %v3766_v35, %v1690_v17 }
 0x103   : > { %v2690_v53 = vpop.eup %2689  ;;  %v1216_v20 = vsel %vm4146_vm12, %v2684_v41, %v1212_v49  ;;  %v586_v55 = vsub.f32 0.0, %v4156_v42  ;;  %2691 = vpow2.f32 %v604_v43  ;;  %vm813_vm15 = vcmp.eq.f32.partialorder %v812_v16, 8.507059e+37 }
 0x104   : > { %v1221_v59 = vsel %vm4102_vm6, %v1220_v47, %v1216_v20  ;;  %v807_v56 = vadd.f32 %v2686_v9, %v806_v31  ;;  %2693 = vrcp.f32 %v4161_v61  ;;  %vm1621_vm0 = vcmp.eq.s32.totalorder %v3385_v27, 1 }
 0x105   : > { %v4184_v35 = vsel %vm1653_vm7, %v3876_v26, 0.0  ;;  %v2118_v21 = vadd.f32 %v3557_v22, %v2073_v29  ;;  %v1361_v41 = vmul.f32 %v1221_v59, %v3967_v46  ;;  %v664_v45 = vmul.f32 1.442695, %v586_v55 }
 0x106   : > { %v811_v15 = vsel %vm4172_vm14, %v2686_v9, %v807_v56  ;;  %v4190_v47 = vadd.f32 1.0, %v2690_v53  ;;  %v566_v14 = vsub.f32 0.0, %v4164_v50  ;;  %v962_v26 = vand.u32 2147483647, %v4161_v61  ;;  %v1950_v9 = vpop.f32.mrf.mxu0  ;;  %v4212_v43 = vpop.f32.mrf.mxu3 }
 0x107   : > { %2159 = vst [vmem:[%s3595_s24 + $0x110] sm:$0xff] %v2118_v21  ;;  %v1689_v16 = vsel %vm1648_vm10, %v1361_v41, 0.0  ;;  %v816_v19 = vsel %vm813_vm15, %v815_v3, %v811_v15  ;;  %v4198_v5 = vmul.f32 %v3809_v40, %v2437_v57  ;;  %v964_v13 = vand.u32 2147483648, %v4161_v61  ;;  %v4227_v57 = vld [vmem:[%s4708_s6] ss:$0 sm:$0xff] }
 0x108   : > { %v2072_v46 = vadd.f32 %v3710_v11, %v1689_v16  ;;  %v1334_v38 = vmul.f32 %v816_v19, %v3906_v33  ;;  %2695 = vpow2.f32 %v664_v45  ;;  %vm958_vm1 = vweird.f32 %v4161_v61 }
 0x109   : > { %v2692_v36 = vpop.eup %2691  ;;  %v2493_v24 = vunpack.c.l.bf16 %v4126_v6  ;;  %2697 = vrcp.f32 %v4190_v47  ;;  %v1112_v23 = vand.u32 2147483647, %v4190_v47  ;;  %v624_v28 = vmul.f32 1.442695, %v566_v14 }
 0x10a   : > { %v2694_v62 = vpop.eup %2693  ;;  %v2117_v7 = vadd.f32 %v3557_v22, %v2072_v46  ;;  %v1662_v11 = vsel %vm1621_vm0, %v1334_v38, 0.0  ;;  %v4210_v33 = vadd.f32 1.0, %v2692_v36  ;;  %vm4215_vm2 = vcmp.eq.f32.partialorder %v962_v26, 8.507059e+37 }
 0x10b   : > { %v2045_v18 = vadd.f32 %v1950_v9, %v1662_v11  ;;  %v954_v49 = vmul.f32 %v2694_v62, %v4161_v61  ;;  %v499_v3 = vmul.f32 %v3809_v40, %v2493_v24  ;;  %vm1631_vm3 = vcmp.eq.s32.totalorder %v3575_v39, 1 }
 0x10c   : > { %2158 = vst [vmem:[%s3595_s24 + $0x108] sm:$0xff] %v2117_v7  ;;  %vm959_vm4 = vweird.f32 %v2694_v62  ;;  %v965_v27 = vor.u32 1.1754944e-38, %v964_v13  ;;  %v1114_v22 = vand.u32 2147483648, %v4190_v47  ;;  %2699 = vrcp.f32 %v4210_v33 }
 0x10d   : > { %v2090_v17 = vadd.f32 %v4227_v57, %v2045_v18  ;;  %v955_v31 = vsub.f32 1.0, %v954_v49  ;;  %v4231_v53 = vadd.f32 %v3821_v10, %v499_v3  ;;  %v827_v29 = vand.u32 2147483647, %v4210_v33  ;;  %vm4248_vm7 = vmor %vm958_vm1, %vm959_vm4 }
 0x10e   : > { %v2696_v20 = vpop.eup %2695  ;;  %vm1108_vm5 = vweird.f32 %v4190_v47  ;;  %vm4235_vm6 = vcmp.eq.f32.partialorder %v1112_v23, 8.507059e+37  ;;  %2701 = vpow2.f32 %v624_v28  ;;  %v2474_v55 = vunpack.c.h.bf16 %v3901_v37 }
 0x10f   : > { %v2698_v59 = vpop.eup %2697  ;;  %2131 = vst [vmem:[%s3595_s24 + $0x30] sm:$0xff] %v2090_v17  ;;  %v956_v56 = vmul.f32 %v2694_v62, %v955_v31  ;;  %v4241_v21 = vadd.f32 1.0, %v2696_v20  ;;  %v585_v41 = vsub.f32 0.0, %v4231_v53  ;;  %v829_v15 = vand.u32 2147483648, %v4210_v33  ;;  %v417_v17 = vld [vmem:[%s3074_s17 + $0xa0] sm:$0xf]  ;;  %v4284_v31 = vpop.permute.xlu1 %1604 }
 0x110   : > { %v1104_v14 = vmul.f32 %v2698_v59, %v4190_v47  ;;  %v1115_v16 = vor.u32 1.1754944e-38, %v1114_v22  ;;  %vm823_vm8 = vweird.f32 %v4210_v33  ;;  %v490_v37 = vmul.f32 %v3809_v40, %v2474_v55  ;;  %v2030_v22 = vpop.f32.mrf.mxu3 }
 0x111   : > { %v957_v19 = vadd.f32 %v2694_v62, %v956_v56  ;;  %2703 = vrcp.f32 %v4241_v21  ;;  %vm1109_vm9 = vweird.f32 %v2698_v59  ;;  %vm4256_vm10 = vcmp.eq.f32.partialorder %v827_v29, 8.507059e+37 }
 0x112   : > { %v2700_v61 = vpop.eup %2699  ;;  %vm1641_vm11 = vcmp.eq.s32.totalorder %v3568_v34, 1  ;;  %v1277_v46 = vand.u32 2147483647, %v4241_v21  ;;  %v1279_v38 = vand.u32 2147483648, %v4241_v21  ;;  %v662_v9 = vmul.f32 1.442695, %v585_v41  ;;  %vm4277_vm14 = vmor %vm1108_vm5, %vm1109_vm9 }
 0x113   : > { %v1105_v13 = vsub.f32 1.0, %v1104_v14  ;;  %v961_v36 = vsel %vm4248_vm7, %v2694_v62, %v957_v19  ;;  %vm1273_vm12 = vweird.f32 %v4241_v21  ;;  %v819_v24 = vmul.f32 %v2700_v61, %v4210_v33  ;;  %v1975_v62 = vpop.f32.mrf.mxu1 }
 0x114   : > { %v830_v23 = vor.u32 1.1754944e-38, %v829_v15  ;;  %v2702_v7 = vpop.eup %2701  ;;  %v966_v11 = vsel %vm4215_vm2, %v965_v27, %v961_v36  ;;  %2705 = vpow2.f32 %v662_v9  ;;  %v4270_v18 = vadd.f32 %v3821_v10, %v490_v37 }
 0x115   : > { %v1106_v28 = vmul.f32 %v2698_v59, %v1105_v13  ;;  %vm1622_vm13 = vcmp.eq.s32.totalorder %v3383_v2, 1  ;;  %v1344_v49 = vmul.f32 %v966_v11, %v4034_v44  ;;  %v820_v6 = vsub.f32 1.0, %v819_v24 }
 0x116   : > { %vm824_vm15 = vweird.f32 %v2700_v61  ;;  %v4281_v27 = vadd.f32 1.0, %v2702_v7  ;;  %vm4286_vm0 = vcmp.eq.f32.partialorder %v1277_v46, 8.507059e+37  ;;  %v1280_v44 = vor.u32 1.1754944e-38, %v1279_v38  ;;  %v2000_v7 = vpop.f32.mrf.mxu2 }
 0x117   : > { %v1107_v20 = vadd.f32 %v2698_v59, %v1106_v28  ;;  %v2077_v47 = vadd.f32 %v2030_v22, %v4184_v35  ;;  %v2704_v55 = vpop.eup %2703  ;;  %v1672_v56 = vsel %vm1631_vm3, %v1344_v49, 0.0  ;;  %v821_v41 = vmul.f32 %v2700_v61, %v820_v6  ;;  %vm4300_vm2 = vmor %vm823_vm8, %vm824_vm15 }
 0x118   : > { %2707 = vrcp.f32 %v4281_v27  ;;  %v458_v15 = vunpack.c.l.bf16 %v417_v17  ;;  %v2055_v45 = vadd.f32 %v1975_v62, %v1672_v56  ;;  %v1269_v14 = vmul.f32 %v2704_v55, %v4241_v21  ;;  %v1952_v21 = vpop.f32.mrf.mxu0 }
 0x119   : > { %vm1274_vm1 = vweird.f32 %v2704_v55  ;;  %v1111_v37 = vsel %vm4277_vm14, %v2698_v59, %v1107_v20  ;;  %vm1652_vm3 = vcmp.eq.s32.totalorder %v4284_v31, 1  ;;  %v2122_v19 = vadd.f32 %v4227_v57, %v2077_v47 }
 0x11a   : > { %v1116_v39 = vsel %vm4235_vm6, %v1115_v16, %v1111_v37  ;;  %v822_v46 = vadd.f32 %v2700_v61, %v821_v41  ;;  %v977_v38 = vand.u32 2147483647, %v4281_v27  ;;  %v2706_v9 = vpop.eup %2705  ;;  %v2100_v59 = vadd.f32 %v4227_v57, %v2055_v45  ;;  %vm4330_vm5 = vmor %vm1273_vm12, %vm1274_vm1 }
 0x11b   : > { %v1270_v13 = vsub.f32 1.0, %v1269_v14  ;;  %v1354_v33 = vmul.f32 %v1116_v39, %v4074_v30  ;;  %v979_v36 = vand.u32 2147483648, %v4281_v27  ;;  %v4312_v24 = vadd.f32 1.0, %v2706_v9  ;;  %2163 = vst [vmem:[%s3595_s24 + $0x130] sm:$0xff] %v2122_v19  ;;  %v2759_v19 = vld [vmem:[%s3074_s17 + $0x98] sm:$0xff]  }
 0x11c   : > { %v826_v63 = vsel %vm4300_vm2, %v2700_v61, %v822_v46  ;;  %v503_v16 = vmul.f32 %v3809_v40, %v458_v15  ;;  %v576_v11 = vsub.f32 0.0, %v4270_v18  ;;  %2141 = vst [vmem:[%s3595_s24 + $0x80] sm:$0xff] %v2100_v59  ;;  %vm973_vm4 = vweird.f32 %v4281_v27  ;;  %v4354_v15 = vld [vmem:[%s3074_s17 + $0x48] sm:$0xff]  }
 0x11d   : > { %v1271_v28 = vmul.f32 %v2704_v55, %v1270_v13  ;;  %v831_v49 = vsel %vm4256_vm10, %v830_v23, %v826_v63  ;;  %v4325_v30 = vadd.f32 %v3821_v10, %v4198_v5  ;;  %2709 = vrcp.f32 %v4312_v24 }
 0x11e   : > { %v2708_v62 = vpop.eup %2707  ;;  %v1682_v26 = vsel %vm1641_vm11, %v1354_v33, 0.0  ;;  %vm4337_vm6 = vcmp.eq.f32.partialorder %v977_v38, 8.507059e+37  ;;  %v980_v5 = vor.u32 1.1754944e-38, %v979_v36  ;;  %v1335_v6 = vmul.f32 %v831_v49, %v4129_v8 }
 0x11f   : > { %v1272_v3 = vadd.f32 %v2704_v55, %v1271_v28  ;;  %v2065_v22 = vadd.f32 %v2000_v7, %v1682_v26  ;;  %v969_v17 = vmul.f32 %v2708_v62, %v4281_v27  ;;  %vm1258_vm7 = vweird.f32 %v4312_v24 }
 0x120   : > { %v1262_v34 = vand.u32 2147483647, %v4312_v24  ;;  %vm974_vm8 = vweird.f32 %v2708_v62  ;;  %v4346_v20 = vadd.f32 %v3821_v10, %v503_v16  ;;  %v1663_v8 = vsel %vm1622_vm13, %v1335_v6, 0.0 }
 0x121   : > { %v1276_v47 = vsel %vm4330_vm5, %v2704_v55, %v1272_v3  ;;  %v2110_v56 = vadd.f32 %v4227_v57, %v2065_v22  ;;  %v970_v41 = vsub.f32 1.0, %v969_v17  ;;  %v1264_v14 = vand.u32 2147483648, %v4312_v24  ;;  %vm4367_vm9 = vmor %vm973_vm4, %vm974_vm8  ;;  %v1977_v3 = vpop.f32.mrf.mxu1  ;;  %v1602_v22 = vpop.permute.xlu0 %1601 }
 0x122   : > { %v1281_v45 = vsel %vm4286_vm0, %v1280_v44, %v1276_v47  ;;  %v2046_v37 = vadd.f32 %v1952_v21, %v1663_v8  ;;  %v589_v35 = vsub.f32 0.0, %v4346_v20  ;;  %v2498_v46 = vunpack.c.h.bf16 %v2759_v19 }
 0x123   : > { %v1365_v39 = vmul.f32 %v1281_v45, %v4156_v42  ;;  %2151 = vst [vmem:[%s3595_s24 + $0xd0] sm:$0xff] %v2110_v56  ;;  %v971_v55 = vmul.f32 %v2708_v62, %v970_v41  ;;  %v644_v2 = vmul.f32 1.442695, %v576_v11  ;;  %v2710_v38 = vpop.eup %2709  ;;  %v557_v59 = vsub.f32 0.0, %v4325_v30  ;;  %v4407_v56 = vld [vmem:[%s3074_s17 + $0x70] sm:$0xff]  }
 0x124   : > { %v2091_v9 = vadd.f32 %v4227_v57, %v2046_v37  ;;  %v670_v44 = vmul.f32 1.442695, %v589_v35  ;;  %v2457_v42 = vunpack.c.l.bf16 %v4354_v15  ;;  %v1254_v33 = vmul.f32 %v2710_v38, %v4312_v24 }
 0x125   : > { %v1693_v13 = vsel %vm1652_vm3, %v1365_v39, 0.0  ;;  %vm1259_vm10 = vweird.f32 %v2710_v38  ;;  %v972_v36 = vadd.f32 %v2708_v62, %v971_v55  ;;  %v502_v27 = vmul.f32 %v3809_v40, %v2498_v46 }
 0x126   : > { %v2076_v7 = vadd.f32 %v4212_v43, %v1693_v13  ;;  %2132 = vst [vmem:[%s3595_s24 + $0x38] sm:$0xff] %v2091_v9  ;;  %2711 = vpow2.f32 %v670_v44  ;;  %v606_v63 = vmul.f32 1.442695, %v557_v59  ;;  %v1255_v16 = vsub.f32 1.0, %v1254_v33  ;;  %vm4397_vm12 = vmor %vm1258_vm7, %vm1259_vm10  ;;  %v4433_v13 = vpop.f32.mrf.mxu3  ;;  %v4440_v33 = vld [vmem:[%s2932_s22] ss:$0 sm:$0xff] }
 0x127   : > { %v976_v11 = vsel %vm4367_vm9, %v2708_v62, %v972_v36  ;;  %2713 = vpow2.f32 %v644_v2  ;;  %v481_v31 = vmul.f32 %v3809_v40, %v2457_v42  ;;  %vm1632_vm11 = vcmp.eq.s32.totalorder %v3376_v58, 1 }
 0x128   : > { %v2121_v28 = vadd.f32 %v4227_v57, %v2076_v7  ;;  %v981_v43 = vsel %vm4337_vm6, %v980_v5, %v976_v11  ;;  %v4387_v49 = vadd.f32 %v3821_v10, %v502_v27  ;;  %v1256_v61 = vmul.f32 %v2710_v38, %v1255_v16  ;;  %v4444_v27 = vpop.permute.xlu1 %1613  ;;  %v4452_v16 = vld [vmem:[%s2937_s9] ss:$0 sm:$0xff] }
 0x129   : > { %v1345_v26 = vmul.f32 %v981_v43, %v4164_v50  ;;  %2715 = vpow2.f32 %v606_v63  ;;  %v4391_v62 = vadd.f32 %v3821_v10, %v481_v31  ;;  %v1265_v5 = vor.u32 1.1754944e-38, %v1264_v14 }
 0x12a   : > { %2162 = vst [vmem:[%s3595_s24 + $0x128] sm:$0xff] %v2121_v28  ;;  %v588_v6 = vsub.f32 0.0, %v4387_v49  ;;  %v2438_v21 = vunpack.c.h.bf16 %v4151_v32  ;;  %v1257_v50 = vadd.f32 %v2710_v38, %v1256_v61  ;;  %vm1263_vm13 = vcmp.eq.f32.partialorder %v1262_v34, 8.507059e+37 }
 0x12b   : > { %v1673_v17 = vsel %vm1632_vm11, %v1345_v26, 0.0  ;;  %v567_v47 = vsub.f32 0.0, %v4391_v62  ;;  %v2477_v45 = vunpack.c.l.bf16 %v4407_v56  ;;  %vm1651_vm14 = vcmp.eq.s32.totalorder %v1602_v22, 1 }
 0x12c   : > { %v2712_v8 = vpop.eup %2711  ;;  %v2056_v24 = vadd.f32 %v1977_v3, %v1673_v17  ;;  %v668_v41 = vmul.f32 1.442695, %v588_v6  ;;  %v1261_v37 = vsel %vm4397_vm12, %v2710_v38, %v1257_v50  ;;  %v472_v46 = vmul.f32 %v3809_v40, %v2438_v21 }
 0x12d   : > { %v2714_v14 = vpop.eup %2713  ;;  %v4412_v32 = vadd.f32 1.0, %v2712_v8  ;;  %v626_v34 = vmul.f32 1.442695, %v567_v47  ;;  %v1266_v58 = vsel %vm1263_vm13, %v1265_v5, %v1261_v37  ;;  %v2458_v2 = vunpack.c.h.bf16 %v4354_v15 }
 0x12e   : > { %v2101_v35 = vadd.f32 %v4227_v57, %v2056_v24  ;;  %2717 = vpow2.f32 %v668_v41  ;;  %v4415_v39 = vadd.f32 1.0, %v2714_v14  ;;  %v1364_v19 = vmul.f32 %v1266_v58, %v4231_v53 }
 0x12f   : > { %v2716_v55 = vpop.eup %2715  ;;  %2719 = vrcp.f32 %v4412_v32  ;;  %v1322_v38 = vand.u32 2147483647, %v4412_v32  ;;  %v491_v9 = vmul.f32 %v3809_v40, %v2477_v45  ;;  %v1324_v44 = vand.u32 2147483648, %v4412_v32 }
 0x130   : > { %2142 = vst [vmem:[%s3595_s24 + $0x88] sm:$0xff] %v2101_v35  ;;  %2721 = vrcp.f32 %v4415_v39  ;;  %v1692_v29 = vsel %vm1651_vm14, %v1364_v19, 0.0  ;;  %v4427_v59 = vadd.f32 1.0, %v2716_v55  ;;  %v1127_v42 = vand.u32 2147483647, %v4415_v39 }
 0x131   : > { %v2075_v53 = vadd.f32 %v4153_v48, %v1692_v29  ;;  %v1129_v15 = vand.u32 2147483648, %v4415_v39  ;;  %2723 = vpow2.f32 %v626_v34  ;;  %vm1318_vm15 = vweird.f32 %v4412_v32 }
 0x132   : > { %2725 = vrcp.f32 %v4427_v59  ;;  %v4437_v40 = vadd.f32 %v3821_v10, %v472_v46  ;;  %v482_v36 = vmul.f32 %v4440_v33, %v2458_v2  ;;  %vm4446_vm0 = vcmp.eq.f32.partialorder %v1322_v38, 8.507059e+37 }
 0x133   : > { %v2120_v7 = vadd.f32 %v4227_v57, %v2075_v53  ;;  %vm1123_vm1 = vweird.f32 %v4415_v39  ;;  %v4455_v10 = vadd.f32 %v4452_v16, %v491_v9  ;;  %v1325_v31 = vor.u32 1.1754944e-38, %v1324_v44 }
 0x134   : > { %v2718_v48 = vpop.eup %2717  ;;  %v842_v43 = vand.u32 2147483647, %v4427_v59  ;;  %v844_v61 = vand.u32 2147483648, %v4427_v59  ;;  %vm4463_vm2 = vcmp.eq.f32.partialorder %v1127_v42, 8.507059e+37  ;;  %v1130_v23 = vor.u32 1.1754944e-38, %v1129_v15  ;;  %v2035_v15 = vpop.f32.mrf.mxu3 }
 0x135   : > { %v2720_v11 = vpop.eup %2719  ;;  %v4457_v28 = vadd.f32 1.0, %v2718_v48  ;;  %2161 = vst [vmem:[%s3595_s24 + $0x120] sm:$0xff] %v2120_v7  ;;  %vm838_vm3 = vweird.f32 %v4427_v59  ;;  %v577_v5 = vsub.f32 0.0, %v4455_v10  ;;  %vm1655_vm5 = vcmp.eq.s32.totalorder %v4444_v27, 1 }
 0x136   : > { %v2722_v26 = vpop.eup %2721  ;;  %v1314_v3 = vmul.f32 %v2720_v11, %v4412_v32  ;;  %vm1319_vm4 = vweird.f32 %v2720_v11  ;;  %v558_v21 = vsub.f32 0.0, %v4437_v40  ;;  %vm1642_vm6 = vcmp.eq.s32.totalorder %v3962_v60, 1 }
 0x137   : > { %2727 = vrcp.f32 %v4457_v28  ;;  %v1309_v6 = vand.u32 2147483648, %v4457_v28  ;;  %v2724_v50 = vpop.eup %2723  ;;  %v1307_v47 = vand.u32 2147483647, %v4457_v28  ;;  %v1119_v8 = vmul.f32 %v2722_v26, %v4415_v39  ;;  %vm4493_vm9 = vmor %vm1318_vm15, %vm1319_vm4 }
 0x138   : > { %v1315_v17 = vsub.f32 1.0, %v1314_v3  ;;  %v646_v24 = vmul.f32 1.442695, %v577_v5  ;;  %v4475_v41 = vpop.eup %2725  ;;  %vm4478_vm7 = vcmp.eq.f32.partialorder %v842_v43, 8.507059e+37  ;;  %v845_v14 = vor.u32 1.1754944e-38, %v844_v61 }
 0x139   : > { %v4482_v37 = vadd.f32 1.0, %v2724_v50  ;;  %v4485_v34 = vadd.f32 %v4452_v16, %v482_v36  ;;  %v2478_v58 = vunpack.c.h.bf16 %v4407_v56  ;;  %v1120_v55 = vsub.f32 1.0, %v1119_v8  ;;  %v1611_v8 = vpop.permute.xlu0 %1610 }
 0x13a   : > { %v1316_v35 = vmul.f32 %v2720_v11, %v1315_v17  ;;  %vm1124_vm8 = vweird.f32 %v2722_v26  ;;  %v834_v19 = vmul.f32 %v4475_v41, %v4427_v59  ;;  %vm1303_vm10 = vweird.f32 %v4457_v28 }
 0x13b   : > { %v4498_v2 = vor.u32 1.1754944e-38, %v1309_v6  ;;  %2729 = vrcp.f32 %v4482_v37  ;;  %v608_v56 = vmul.f32 1.442695, %v558_v21  ;;  %vm1623_vm11 = vcmp.eq.s32.totalorder %v3213_v1, 1  ;;  %vm4508_vm13 = vmor %vm1123_vm1, %vm1124_vm8 }
 0x13c   : > { %v1317_v38 = vadd.f32 %v2720_v11, %v1316_v35  ;;  %vm4502_vm12 = vcmp.eq.f32.partialorder %v1307_v47, 8.507059e+37  ;;  %v1121_v29 = vmul.f32 %v2722_v26, %v1120_v55  ;;  %v835_v32 = vsub.f32 1.0, %v834_v19  ;;  %v2002_v35 = vpop.f32.mrf.mxu2 }
 0x13d   : > { %2731 = vpow2.f32 %v646_v24  ;;  %v2728_v44 = vpop.eup %2727  ;;  %vm839_vm14 = vweird.f32 %v4475_v41  ;;  %vm988_vm15 = vweird.f32 %v4482_v37  ;;  %v992_v42 = vand.u32 2147483647, %v4482_v37 }
 0x13e   : > { %v568_v36 = vsub.f32 0.0, %v4485_v34  ;;  %v1321_v48 = vsel %vm4493_vm9, %v2720_v11, %v1317_v38  ;;  %v1299_v7 = vmul.f32 %v2728_v44, %v4457_v28  ;;  %v1122_v43 = vadd.f32 %v2722_v26, %v1121_v29  ;;  %vm4530_vm4 = vmor %vm838_vm3, %vm839_vm14 }
 0x13f   : > { %v994_v39 = vand.u32 2147483648, %v4482_v37  ;;  %v1326_v61 = vsel %vm4446_vm0, %v1325_v31, %v1321_v48  ;;  %v836_v3 = vmul.f32 %v4475_v41, %v835_v32  ;;  %2733 = vpow2.f32 %v608_v56  ;;  %v1955_v32 = vpop.f32.mrf.mxu0 }
 0x140   : > { %v628_v5 = vmul.f32 1.442695, %v568_v36  ;;  %v1368_v6 = vmul.f32 %v1326_v61, %v4346_v20  ;;  %v1300_v21 = vsub.f32 1.0, %v1299_v7  ;;  %vm1304_vm1 = vweird.f32 %v2728_v44 }
 0x141   : > { %v1126_v50 = vsel %vm4508_vm13, %v2722_v26, %v1122_v43  ;;  %v2730_v63 = vpop.eup %2729  ;;  %v837_v17 = vadd.f32 %v4475_v41, %v836_v3  ;;  %v492_v20 = vmul.f32 %v4440_v33, %v2478_v58  ;;  %vm4545_vm0 = vmor %vm1303_vm10, %vm1304_vm1  ;;  %vm1654_vm3 = vcmp.eq.s32.totalorder %v1611_v8, 1 }
 0x142   : > { %v1131_v31 = vsel %vm4463_vm2, %v1130_v23, %v1126_v50  ;;  %2735 = vpow2.f32 %v628_v5  ;;  %v1696_v26 = vsel %vm1655_vm5, %v1368_v6, 0.0  ;;  %v1301_v24 = vmul.f32 %v2728_v44, %v1300_v21  ;;  %v1980_v50 = vpop.f32.mrf.mxu1 }
 0x143   : > { %v2732_v47 = vpop.eup %2731  ;;  %v1355_v59 = vmul.f32 %v1131_v31, %v4270_v18  ;;  %v984_v55 = vmul.f32 %v2730_v63, %v4482_v37  ;;  %v841_v23 = vsel %vm4530_vm4, %v4475_v41, %v837_v17  ;;  %vm989_vm2 = vweird.f32 %v2730_v63  ;;  %v2037_v41 = vpop.f32.mrf.mxu3 }
 0x144   : > { %v4552_v27 = vadd.f32 1.0, %v2732_v47  ;;  %v2079_v58 = vadd.f32 %v2035_v15, %v1696_v26  ;;  %v1302_v19 = vadd.f32 %v2728_v44, %v1301_v24  ;;  %v846_v46 = vsel %vm4478_vm7, %v845_v14, %v841_v23  ;;  %vm4574_vm5 = vmor %vm988_vm15, %vm989_vm2 }
 0x145   : > { %v1683_v18 = vsel %vm1642_vm6, %v1355_v59, 0.0  ;;  %v985_v28 = vsub.f32 1.0, %v984_v55  ;;  %v2734_v56 = vpop.eup %2733  ;;  %v1336_v29 = vmul.f32 %v846_v46, %v4325_v30  ;;  %v995_v60 = vor.u32 1.1754944e-38, %v994_v39 }
 0x146   : > { %v2066_v38 = vadd.f32 %v2002_v35, %v1683_v18  ;;  %2737 = vrcp.f32 %v4552_v27  ;;  %v1306_v53 = vsel %vm4545_vm0, %v2728_v44, %v1302_v19  ;;  %v4563_v36 = vadd.f32 %v4452_v16, %v492_v20 }
 0x147   : > { %v986_v15 = vmul.f32 %v2730_v63, %v985_v28  ;;  %v1311_v14 = vsel %vm4502_vm12, %v4498_v2, %v1306_v53  ;;  %v1664_v48 = vsel %vm1623_vm11, %v1336_v29, 0.0  ;;  %v2124_v7 = vadd.f32 %v4227_v57, %v2079_v58 }
 0x148   : > { %v2736_v45 = vpop.eup %2735  ;;  %v2111_v30 = vadd.f32 %v4227_v57, %v2066_v38  ;;  %v1367_v43 = vmul.f32 %v1311_v14, %v4387_v49  ;;  %v2047_v39 = vadd.f32 %v1955_v32, %v1664_v48  ;;  %vm993_vm6 = vcmp.eq.f32.partialorder %v992_v42, 8.507059e+37  ;;  %v2005_v14 = vpop.f32.mrf.mxu2 }
 0x149   : > { %v987_v2 = vadd.f32 %v2730_v63, %v986_v15  ;;  %v4581_v9 = vadd.f32 1.0, %v2734_v56  ;;  %v4583_v1 = vadd.f32 1.0, %v2736_v45  ;;  %vm1633_vm7 = vcmp.eq.s32.totalorder %v3656_v52, 1  ;;  %2165 = vst [vmem:[%s3595_s24 + $0x140] sm:$0xff] %v2124_v7 }
 0x14a   : > { %2152 = vst [vmem:[%s3595_s24 + $0xd8] sm:$0xff] %v2111_v30  ;;  %v1695_v37 = vsel %vm1654_vm3, %v1367_v43, 0.0  ;;  %v2092_v61 = vadd.f32 %v4227_v57, %v2047_v39  ;;  %v578_v6 = vsub.f32 0.0, %v4563_v36  ;;  %v1142_v31 = vand.u32 2147483647, %v4552_v27 }
 0x14b   : > { %v991_v3 = vsel %vm4574_vm5, %v2730_v63, %v987_v2  ;;  %v2078_v5 = vadd.f32 %v4433_v13, %v1695_v37  ;;  %2739 = vrcp.f32 %v4581_v9  ;;  %v1144_v17 = vand.u32 2147483648, %v4552_v27  ;;  %v2513_v13 = vld [vmem:[%s3074_s17 + $0x78] sm:$0xff]  }
 0x14c   : > { %v2738_v49 = vpop.eup %2737  ;;  %v996_v42 = vsel %vm993_vm6, %v995_v60, %v991_v3  ;;  %2133 = vst [vmem:[%s3595_s24 + $0x40] sm:$0xff] %v2092_v61  ;;  %2741 = vrcp.f32 %v4583_v1  ;;  %vm1138_vm8 = vweird.f32 %v4552_v27  ;;  %vm1643_vm10 = vcmp.eq.s32.totalorder %v3932_v12, 1 }
 0x14d   : > { %v1346_v21 = vmul.f32 %v996_v42, %v4391_v62  ;;  %v1134_v11 = vmul.f32 %v2738_v49, %v4552_v27  ;;  %v2123_v63 = vadd.f32 %v4227_v57, %v2078_v5  ;;  %vm1139_vm9 = vweird.f32 %v2738_v49 }
 0x14e   : > { %v648_v26 = vmul.f32 1.442695, %v578_v6  ;;  %vm4607_vm11 = vcmp.eq.f32.partialorder %v1142_v31, 8.507059e+37  ;;  %v2481_v59 = vunpack.c.l.bf16 %v2513_v13  ;;  %v2482_v35 = vunpack.c.h.bf16 %v2513_v13  ;;  %vm4612_vm12 = vmor %vm1138_vm8, %vm1139_vm9  ;;  %v1957_v31 = vpop.f32.mrf.mxu0 }
 0x14f   : > { %v1674_v20 = vsel %vm1633_vm7, %v1346_v21, 0.0  ;;  %v1135_v47 = vsub.f32 1.0, %v1134_v11  ;;  %2164 = vst [vmem:[%s3595_s24 + $0x138] sm:$0xff] %v2123_v63  ;;  %v1145_v23 = vor.u32 1.1754944e-38, %v1144_v17  ;;  %vm853_vm13 = vweird.f32 %v4581_v9 }
 0x150   : > { %v2057_v62 = vadd.f32 %v1980_v50, %v1674_v20  ;;  %2743 = vpow2.f32 %v648_v26  ;;  %v857_v19 = vand.u32 2147483647, %v4581_v9  ;;  %v493_v18 = vmul.f32 %v4440_v33, %v2481_v59  ;;  %v1982_v20 = vpop.f32.mrf.mxu1 }
 0x151   : > { %v1136_v8 = vmul.f32 %v2738_v49, %v1135_v47  ;;  %v2740_v55 = vpop.eup %2739  ;;  %v859_v28 = vand.u32 2147483648, %v4581_v9  ;;  %vm1003_vm14 = vweird.f32 %v4583_v1  ;;  %v1007_v56 = vand.u32 2147483647, %v4583_v1 }
 0x152   : > { %v2102_v52 = vadd.f32 %v4227_v57, %v2057_v62  ;;  %v849_v58 = vmul.f32 %v2740_v55, %v4581_v9  ;;  %v2742_v46 = vpop.eup %2741  ;;  %v494_v38 = vmul.f32 %v4440_v33, %v2482_v35  ;;  %vm854_vm15 = vweird.f32 %v2740_v55 }
 0x153   : > { %v1137_v27 = vadd.f32 %v2738_v49, %v1136_v8  ;;  %v999_v41 = vmul.f32 %v2742_v46, %v4583_v1  ;;  %v1009_v15 = vand.u32 2147483648, %v4583_v1  ;;  %v4632_v60 = vadd.f32 %v4452_v16, %v493_v18  ;;  %vm4640_vm4 = vmor %vm853_vm13, %vm854_vm15 }
 0x154   : > { %2143 = vst [vmem:[%s3595_s24 + $0x90] sm:$0xff] %v2102_v52  ;;  %v850_v32 = vsub.f32 1.0, %v849_v58  ;;  %v4635_v45 = vadd.f32 %v4452_v16, %v494_v38  ;;  %vm1004_vm1 = vweird.f32 %v2742_v46  ;;  %vm4644_vm0 = vcmp.eq.f32.partialorder %v857_v19, 8.507059e+37 }
 0x155   : > { %v1141_v29 = vsel %vm4612_vm12, %v2738_v49, %v1137_v27  ;;  %v1000_v48 = vsub.f32 1.0, %v999_v41  ;;  %v860_v39 = vor.u32 1.1754944e-38, %v859_v28  ;;  %v579_v16 = vsub.f32 0.0, %v4632_v60  ;;  %vm4654_vm2 = vmor %vm1003_vm14, %vm1004_vm1 }
 0x156   : > { %v1146_v53 = vsel %vm4607_vm11, %v1145_v23, %v1141_v29  ;;  %v851_v30 = vmul.f32 %v2740_v55, %v850_v32  ;;  %v2744_v44 = vpop.eup %2743  ;;  %v1010_v5 = vor.u32 1.1754944e-38, %v1009_v15  ;;  %vm1008_vm3 = vcmp.eq.f32.partialorder %v1007_v56, 8.507059e+37 }
 0x157   : > { %v1356_v33 = vmul.f32 %v1146_v53, %v4455_v10  ;;  %v580_v10 = vsub.f32 0.0, %v4635_v45  ;;  %v1001_v61 = vmul.f32 %v2742_v46, %v1000_v48  ;;  %v701_v3 = vadd.f32 1.0, %v2744_v44 }
 0x158   : > { %v852_v37 = vadd.f32 %v2740_v55, %v851_v30  ;;  %v650_v42 = vmul.f32 1.442695, %v579_v16  ;;  %vm1624_vm5 = vcmp.eq.s32.totalorder %v3440_v0, 1  ;;  %vm1634_vm6 = vcmp.eq.s32.totalorder %v3654_v4, 1 }
 0x159   : > { %v1684_v2 = vsel %vm1643_vm10, %v1356_v33, 0.0  ;;  %v652_v6 = vmul.f32 1.442695, %v580_v10  ;;  %v1002_v50 = vadd.f32 %v2742_v46, %v1001_v61  ;;  %2745 = vrcp.f32 %v701_v3 }
 0x15a   : > { %v2067_v9 = vadd.f32 %v2005_v14, %v1684_v2  ;;  %v856_v21 = vsel %vm4640_vm4, %v2740_v55, %v852_v37  ;;  %2747 = vpow2.f32 %v650_v42  ;;  %vm1153_vm7 = vweird.f32 %v701_v3 }
 0x15b   : > { %v861_v1 = vsel %vm4644_vm0, %v860_v39, %v856_v21  ;;  %v1006_v63 = vsel %vm4654_vm2, %v2742_v46, %v1002_v50  ;;  %2749 = vpow2.f32 %v652_v6  ;;  %v1157_v35 = vand.u32 2147483647, %v701_v3 }
 0x15c   : > { %v2112_v12 = vadd.f32 %v4227_v57, %v2067_v9  ;;  %v1337_v11 = vmul.f32 %v861_v1, %v4437_v40  ;;  %v1011_v17 = vsel %vm1008_vm3, %v1010_v5, %v1006_v63  ;;  %v1159_v4 = vand.u32 2147483648, %v701_v3 }
 0x15d   : > { %v1347_v0 = vmul.f32 %v1011_v17, %v4485_v34  ;;  %v2007_v34 = vpop.f32.mrf.mxu2  ;;  %vm1158_vm10 = vcmp.eq.f32.partialorder %v1157_v35, 8.507059e+37  ;;  %vm1644_vm11 = vcmp.eq.s32.totalorder %v3644_v54, 1  ;;  %vm1645_vm3 = vcmp.eq.s32.totalorder %v4026_v25, 1 }
 0x15e   : > { %2153 = vst [vmem:[%s3595_s24 + $0xe0] sm:$0xff] %v2112_v12  ;;  %v1665_v13 = vsel %vm1624_vm5, %v1337_v11, 0.0  ;;  %v1160_v19 = vor.u32 1.1754944e-38, %v1159_v4  ;;  %vm1646_vm5 = vcmp.eq.s32.totalorder %v3997_v51, 1 }
 0x15f   : > { %v2048_v47 = vadd.f32 %v1957_v31, %v1665_v13  ;;  %v2746_v62 = vpop.eup %2745  ;;  %v1675_v26 = vsel %vm1634_vm6, %v1347_v0, 0.0 }
 0x160   : > { %v2058_v8 = vadd.f32 %v1982_v20, %v1675_v26  ;;  %v1149_v24 = vmul.f32 %v2746_v62, %v701_v3  ;;  %v2748_v59 = vpop.eup %2747  ;;  %vm1154_vm8 = vweird.f32 %v2746_v62 }
 0x161   : > { %v2093_v40 = vadd.f32 %v4227_v57, %v2048_v47  ;;  %v2750_v55 = vpop.eup %2749  ;;  %v702_v23 = vadd.f32 1.0, %v2748_v59  ;;  %vm1155_vm9 = vmor %vm1153_vm7, %vm1154_vm8 }
 0x162   : > { %v2103_v52 = vadd.f32 %v4227_v57, %v2058_v8  ;;  %v1150_v22 = vsub.f32 1.0, %v1149_v24  ;;  %v703_v27 = vadd.f32 1.0, %v2750_v55 }
 0x163   : > { %2134 = vst [vmem:[%s3595_s24 + $0x48] sm:$0xff] %v2093_v40  ;;  %2751 = vrcp.f32 %v702_v23  ;;  %vm1168_vm12 = vweird.f32 %v702_v23  ;;  %v1172_v53 = vand.u32 2147483647, %v702_v23  ;;  %v1174_v15 = vand.u32 2147483648, %v702_v23 }
 0x164   : > { %2144 = vst [vmem:[%s3595_s24 + $0x98] sm:$0xff] %v2103_v52  ;;  %v1151_v58 = vmul.f32 %v2746_v62, %v1150_v22  ;;  %2753 = vrcp.f32 %v703_v27  ;;  %v1189_v44 = vand.u32 2147483648, %v703_v27  ;;  %vm1183_vm14 = vweird.f32 %v703_v27 }
 0x165   : > { %v2010_v33 = vpop.f32.mrf.mxu2  ;;  %v1187_v54 = vand.u32 2147483647, %v703_v27  ;;  %v1175_v39 = vor.u32 1.1754944e-38, %v1174_v15  ;;  %vm1173_vm4 = vcmp.eq.f32.partialorder %v1172_v53, 8.507059e+37 }
 0x166   : > { %v1152_v18 = vadd.f32 %v2746_v62, %v1151_v58  ;;  %v1190_v2 = vor.u32 1.1754944e-38, %v1189_v44 }
 0x167   : > { %vm1188_vm2 = vcmp.eq.f32.partialorder %v1187_v54, 8.507059e+37 }
 0x168   : > { %v1156_v46 = vsel %vm1155_vm9, %v2746_v62, %v1152_v18 }
 0x169   : > { %v1161_v28 = vsel %vm1158_vm10, %v1160_v19, %v1156_v46  ;;  %v2752_v56 = vpop.eup %2751 }
 0x16a   : > { %v1357_v38 = vmul.f32 %v1161_v28, %v4563_v36  ;;  %v2754_v29 = vpop.eup %2753  ;;  %v1164_v32 = vmul.f32 %v2752_v56, %v702_v23  ;;  %vm1169_vm13 = vweird.f32 %v2752_v56 }
 0x16b   : > { %v1179_v14 = vmul.f32 %v2754_v29, %v703_v27  ;;  %vm1184_vm15 = vweird.f32 %v2754_v29  ;;  %vm1170_vm1 = vmor %vm1168_vm12, %vm1169_vm13 }
 0x16c   : > { %v1685_v41 = vsel %vm1644_vm11, %v1357_v38, 0.0  ;;  %v1165_v48 = vsub.f32 1.0, %v1164_v32  ;;  %vm1185_vm0 = vmor %vm1183_vm14, %vm1184_vm15 }
 0x16d   : > { %v2068_v30 = vadd.f32 %v2007_v34, %v1685_v41  ;;  %v1180_v7 = vsub.f32 1.0, %v1179_v14  ;;  %v2012_v6 = vpop.f32.mrf.mxu2 }
 0x16e   : > { %v1166_v36 = vmul.f32 %v2752_v56, %v1165_v48 }
 0x16f   : > { %v2113_v43 = vadd.f32 %v4227_v57, %v2068_v30  ;;  %v1181_v16 = vmul.f32 %v2754_v29, %v1180_v7 }
 0x170   : > { %v1167_v10 = vadd.f32 %v2752_v56, %v1166_v36 }
 0x171   : > { %2154 = vst [vmem:[%s3595_s24 + $0xe8] sm:$0xff] %v2113_v43  ;;  %v1182_v37 = vadd.f32 %v2754_v29, %v1181_v16 }
 0x172   : > { %v1171_v61 = vsel %vm1170_vm1, %v2752_v56, %v1167_v10 }
 0x173   : > { %v1176_v3 = vsel %vm1173_vm4, %v1175_v39, %v1171_v61  ;;  %v1186_v9 = vsel %vm1185_vm0, %v2754_v29, %v1182_v37 }
 0x174   : > { %v1358_v49 = vmul.f32 %v1176_v3, %v4632_v60  ;;  %v1191_v5 = vsel %vm1188_vm2, %v1190_v2, %v1186_v9 }
 0x175   : > { %v1359_v42 = vmul.f32 %v1191_v5, %v4635_v45 }
 0x176   : > { %v1686_v21 = vsel %vm1645_vm3, %v1358_v49, 0.0 }
 0x177   : > { %v2069_v50 = vadd.f32 %v2010_v33, %v1686_v21  ;;  %v1687_v12 = vsel %vm1646_vm5, %v1359_v42, 0.0 }
 0x178   : > { %v2070_v1 = vadd.f32 %v2012_v6, %v1687_v12 }
 0x179   : > { %v2114_v11 = vadd.f32 %v4227_v57, %v2069_v50 }
 0x17a   : > { %v2115_v31 = vadd.f32 %v4227_v57, %v2070_v1 }
 0x17b   : > { %2155 = vst [vmem:[%s3595_s24 + $0xf0] sm:$0xff] %v2114_v11 }
 0x17c   : > { %2156 = vst [vmem:[%s3595_s24 + $0xf8] sm:$0xff] %v2115_v31 }
 0x17d PF: > { %s17_s28 = sadd.s32 1, %s2800_s28   ;;  %s4846_s24 = smov %s2792_s26 }
 0x17e   : > { %p14_p7 = scmp.ge.s32.totalorder %s17_s28, 8   ;;  %s4847_s25 = smov %s2796_s27 }
 0x17f   : > { %s4848_s26 = smov %s4851_s29  ;;  %s4849_s27 = smov %s4855_s30 }
 0x180   :  { %16 = sbr.rel (!%p14_p7) target bundleno = 3 (0x3), region = 87 }

// kernel: resnet_block_forward.3
= control target key start
LH: loop header
LB: loop body
LE: loop exit
PB: predicated region body
PF: predicated region fallthrough
CT: control target
= control target key end

     0   :  { %s4192_s15 = smov 0   ;;  %s4194_s16 = smov 0   ;;  %s5884_s0 = inlined_call_operand.vmem [shape: bf16[6,328,128], index: 0, kind: input, shape index: {}]   ;;  %s5885_s1 = inlined_call_operand.vmem [shape: bf16[1152,128], index: 1, kind: input, shape index: {}]   ;;  %s5886_s2 = inlined_call_operand.vmem [shape: f32[328,1], index: 2, kind: input, shape index: {}]   ;;  %s5887_s3 = inlined_call_operand.vmem [shape: bf16[6,328,128], index: 3, kind: output, shape index: {0}]   ;;  %s5888_s4 = inlined_call_operand.vmem [shape: f32[6,2,128], index: 4, kind: output, shape index: {1}]  }
   0x1   :  { %s4196_s17 = smov 0   ;;  %s4198_s18 = smov 0  }
   0x2   :  { %s4200_s19 = smov 0  }
   0x3 LB: > { %s24_s20 = sadd.s32 1, %s4156_s17  ;;  %s27_s21 = sadd.s32 1, %s4160_s18  ;;  %s4164_s19 = sphi %s4200_s19, %s15_s19   ;;  %s4160_s18 = sphi %s4198_s18, %s6103_s18   ;;  %s4156_s17 = sphi %s4196_s17, %s6102_s17   ;;  %s4152_s16 = sphi %s4194_s16, %s6101_s16   ;;  %s4148_s15 = sphi %s4192_s15, %s6100_s15  }
   0x4   : > { %p25_p0 = scmp.ge.s32.totalorder %s24_s20, 3  ;;  %p3472_p1 = scmp.ge.s32.totalorder %s4164_s19, 1 }
   0x5   : > { %p193_p2 = scmp.lt.s32.totalorder %s4164_s19, 7 }
   0x6   : > { %s6105_s20 = smov (%p25_p0, %s24_s20), 0  ;;  %s6107_s21 = smov (!%p25_p0, %s27_s21), %s4160_s18 }
   0x7   : > { %p194_p3 = pnand %p3472_p1, %p193_p2  ;;  %p29_p4 = scmp.ge.s32.totalorder %s6107_s21, 2 }
   0x9   : > { %s6109_s21 = smov (%p29_p4, %s6107_s21), 0  ;;  %197 = sbr.rel (%p194_p3) target bundleno = 955 (0x3bb), region = 32 }
   0xe   : > { %v3873_v0 = vld [vmem:[%s5885_s1 + $0x38] sm:$0xff]  ;;  %s229_s24 = smul.u32 3, %s4152_s16  ;;  %v3872_v1 = vld [vmem:[%s5885_s1 + $0x30] sm:$0xff]  ;;  %v5889_v2 = vmov 0   ;;  %v3871_v3 = vld [vmem:[%s5885_s1 + $0x28] sm:$0xff]  ;;  %vm692_vm1 = vcmask 1041408  }
   0xf   : > { %4057 = vmatpush.bf16.msra.mxu1 %v3873_v0  ;;  %4058 = vmatpush.bf16.msra.mxu2 %v3873_v0  ;;  %v3870_v4 = vld [vmem:[%s5885_s1 + $0x20] sm:$0xff]  ;;  %v3869_v7 = vld [vmem:[%s5885_s1 + $0x18] sm:$0xff]  ;;  %v3868_v14 = vld [vmem:[%s5885_s1 + $0x10] sm:$0xff]  ;;  %vm482_vm0 = vsmask.f32 1280  ;;  %vm890_vm3 = vcmask 1046528  }
  0x10   : > { %s230_s27 = sadd.s32 %s4148_s15, %s229_s24  ;;  %1877 = vmatpush.bf16.msra.mxu0 %v3873_v0  ;;  %4059 = vmatpush.bf16.msra.mxu3 %v3873_v0  ;;  %v3867_v23 = vld [vmem:[%s5885_s1 + $0x8] sm:$0xff]  ;;  %v3866_v29 = vld [vmem:[%s5885_s1] sm:$0xff]  ;;  %v3889_v33 = vld [vmem:[%s5885_s1 + $0xb8] sm:$0xff]  ;;  %vm699_vm4 = vsmask.f32 7424  ;;  %vm695_vm6 = vcmask 1045504  }
  0x11   : > { %p231_p5 = scmp.lt.s32.totalorder %s230_s27, 5  ;;  %4123 = vset.pattern.permute.xlu0 %v5889_v2  ;;  %4124 = vset.pattern.permute.xlu1 %v5889_v2  ;;  %v3881_v34 = vld [vmem:[%s5885_s1 + $0x78] sm:$0xff]  ;;  %v3888_v41 = vld [vmem:[%s5885_s1 + $0xb0] sm:$0xff]  ;;  %v3887_v50 = vld [vmem:[%s5885_s1 + $0xa8] sm:$0xff]  ;;  %vm958_vm5 = vsmask.f32 6400 }
  0x12   : > { %4125 = vset.pattern.permute.xlu2 %v5889_v2  ;;  %v3905_v35 = vld [vmem:[%s5885_s1 + $0x138] sm:$0xff]  ;;  %v3880_v44 = vld [vmem:[%s5885_s1 + $0x70] sm:$0xff]  ;;  %v3879_v55 = vld [vmem:[%s5885_s1 + $0x68] sm:$0xff]  ;;  %vm696_vm7 = vsmask.f32 5376  ;;  %vm1238_vm10 = vcmask 1044480  }
  0x13   : > { %s6111_s27 = smov (!%p231_p5, %s230_s27), 5  ;;  %4060 = vmatpush.bf16.msra.mxu1 %v3872_v1  ;;  %4061 = vmatpush.bf16.msra.mxu2 %v3872_v1  ;;  %v3904_v45 = vld [vmem:[%s5885_s1 + $0x130] sm:$0xff]  ;;  %v3903_v56 = vld [vmem:[%s5885_s1 + $0x128] sm:$0xff]  ;;  %vm693_vm2 = vmand %vm692_vm1, %vm482_vm0 }
  0x14   : > { %1878 = vmatpush.bf16.msra.mxu0 %v3872_v1  ;;  %s4081_s30 = smul.u32 164, %s6111_s27  ;;  %4062 = vmatpush.bf16.msra.mxu3 %v3872_v1  ;;  %v3886_v1 = vld [vmem:[%s5885_s1 + $0xa0] sm:$0xff]  ;;  %vm697_vm8 = vmand %vm695_vm6, %vm696_vm7  ;;  %s3475_s8 = sshll.u32 %s6111_s27, 1 }
  0x16   : > { %s4245_s9 = scalar_lea.vmem %s5884_s0, %s4081_s30  ;;  %s5461_s26 = scalar_lea.vmem %s5887_s3, %s4081_s30 }
  0x17   : > { %4063 = vmatpush.bf16.msra.mxu1 %v3871_v3  ;;  %4064 = vmatpush.bf16.msra.mxu2 %v3871_v3  ;;  %v3850_v5 = vld [vmem:[%s4245_s9 + $0x20] sm:$0xff]  ;;  %v3851_v6 = vld [vmem:[%s4245_s9 + $0x28] sm:$0xff]  ;;  %v3856_v8 = vld [vmem:[%s4245_s9 + $0x50] sm:$0xff] }
  0x18   : > { %1879 = vmatpush.bf16.msra.mxu0 %v3871_v3  ;;  %4065 = vmatpush.bf16.msra.mxu3 %v3871_v3  ;;  %v3857_v9 = vld [vmem:[%s4245_s9 + $0x58] sm:$0xff]  ;;  %v519_v10 = vshrl.u32 %v3850_v5, 16  ;;  %v522_v11 = vshll.u32 %v3850_v5, 16  ;;  %v528_v12 = vshrl.u32 %v3851_v6, 16  ;;  %v531_v13 = vshll.u32 %v3851_v6, 16  ;;  %v3852_v36 = vld [vmem:[%s4245_s9 + $0x30] sm:$0xff] }
  0x19   : > { %v573_v15 = vshrl.u32 %v3856_v8, 16  ;;  %v576_v16 = vshll.u32 %v3856_v8, 16  ;;  %v582_v17 = vshrl.u32 %v3857_v9, 16  ;;  %v585_v18 = vshll.u32 %v3857_v9, 16  ;;  %v3858_v39 = vld [vmem:[%s4245_s9 + $0x60] sm:$0xff]  ;;  %v3863_v52 = vld [vmem:[%s4245_s9 + $0x88] sm:$0xff] }
  0x1a   : > { %v521_v19 = vrot.slane %v519_v10, 6  ;;  %v524_v20 = vrot.slane %v522_v11, 7  ;;  %v530_v21 = vrot.slane %v528_v12, 6  ;;  %v533_v22 = vrot.slane %v531_v13, 7  ;;  %v3846_v40 = vld [vmem:[%s4245_s9] sm:$0xff] }
  0x1b   : > { %4066 = vmatpush.bf16.msra.mxu1 %v3870_v4  ;;  %4067 = vmatpush.bf16.msra.mxu2 %v3870_v4  ;;  %v575_v24 = vrot.slane %v573_v15, 6  ;;  %v578_v25 = vrot.slane %v576_v16, 7  ;;  %v584_v26 = vrot.slane %v582_v17, 6  ;;  %v587_v27 = vrot.slane %v585_v18, 7  ;;  %v3862_v51 = vld [vmem:[%s4245_s9 + $0x80] sm:$0xff]  ;;  %v3853_v17 = vld [vmem:[%s4245_s9 + $0x38] sm:$0xff] }
  0x1c   : > { %1880 = vmatpush.bf16.msra.mxu0 %v3870_v4  ;;  %4068 = vmatpush.bf16.msra.mxu3 %v3870_v4  ;;  %v4260_v28 = vor.u32 %v524_v20, %v521_v19  ;;  %v4265_v30 = vor.u32 %v533_v22, %v530_v21  ;;  %v537_v42 = vshrl.u32 %v3852_v36, 16  ;;  %v540_v43 = vshll.u32 %v3852_v36, 16  ;;  %v3902_v10 = vld [vmem:[%s5885_s1 + $0x120] sm:$0xff]  ;;  %v3859_v18 = vld [vmem:[%s4245_s9 + $0x68] sm:$0xff]  ;;  %v3885_v21 = vld [vmem:[%s5885_s1 + $0x98] sm:$0xff] }
  0x1d   : > { %v4267_v31 = vor.u32 %v578_v25, %v575_v24  ;;  %v4269_v32 = vor.u32 %v587_v27, %v584_v26  ;;  %v591_v46 = vshrl.u32 %v3858_v39, 16  ;;  %v594_v47 = vshll.u32 %v3858_v39, 16  ;;  %v3847_v20 = vld [vmem:[%s4245_s9 + $0x8] sm:$0xff]  ;;  %v3897_v26 = vld [vmem:[%s5885_s1 + $0xf8] sm:$0xff] }
  0x1e   : > { %v4284_v37 = vsel %vm482_vm0, %v4260_v28, %v4265_v30  ;;  %v484_v48 = vshrl.u32 %v3846_v40, 16  ;;  %v487_v49 = vshll.u32 %v3846_v40, 16  ;;  %v539_v53 = vrot.slane %v537_v42, 6  ;;  %v3877_v27 = vld [vmem:[%s5885_s1 + $0x58] sm:$0xff] }
  0x1f   : > { %4069 = vmatpush.bf16.msra.mxu1 %v3869_v7  ;;  %4070 = vmatpush.bf16.msra.mxu2 %v3869_v7  ;;  %5943 = vst [vmem:[#allocation2_spill] sm:$0xff] %v4284_v37  ;;  %v4289_v38 = vsel %vm482_vm0, %v4267_v31, %v4269_v32  ;;  %v542_v54 = vrot.slane %v540_v43, 7  ;;  %v627_v57 = vshrl.u32 %v3862_v51, 16  ;;  %v630_v58 = vshll.u32 %v3862_v51, 16 }
  0x20   : > { %1881 = vmatpush.bf16.msra.mxu0 %v3869_v7  ;;  %4071 = vmatpush.bf16.msra.mxu3 %v3869_v7  ;;  %v636_v59 = vshrl.u32 %v3863_v52, 16  ;;  %v639_v60 = vshll.u32 %v3863_v52, 16  ;;  %v593_v61 = vrot.slane %v591_v46, 6  ;;  %v596_v62 = vrot.slane %v594_v47, 7  ;;  %v3878_v7 = vld [vmem:[%s5885_s1 + $0x60] sm:$0xff] }
  0x21   : > { %v486_v63 = vrot.slane %v484_v48, 6  ;;  %v489_v0 = vrot.slane %v487_v49, 7  ;;  %v629_v3 = vrot.slane %v627_v57, 6  ;;  %v632_v4 = vrot.slane %v630_v58, 7  ;;  %v3895_v49 = vld [vmem:[%s5885_s1 + $0xe8] sm:$0xff]  ;;  %v3860_v57 = vld [vmem:[%s4245_s9 + $0x70] sm:$0xff] }
  0x22   : > { %v638_v5 = vrot.slane %v636_v59, 6  ;;  %v641_v6 = vrot.slane %v639_v60, 7  ;;  %v543_v11 = vor.u32 %v542_v54, %v539_v53  ;;  %v597_v12 = vor.u32 %v596_v62, %v593_v61  ;;  %v3854_v54 = vld [vmem:[%s4245_s9 + $0x40] sm:$0xff]  ;;  %v3848_v59 = vld [vmem:[%s4245_s9 + $0x10] sm:$0xff] }
  0x23   : > { %4072 = vmatpush.bf16.msra.mxu1 %v3868_v14  ;;  %4073 = vmatpush.bf16.msra.mxu2 %v3868_v14  ;;  %v4322_v8 = vor.u32 %v632_v4, %v629_v3  ;;  %v490_v13 = vor.u32 %v489_v0, %v486_v63  ;;  %v546_v22 = vshrl.u32 %v3853_v17, 16  ;;  %v600_v24 = vshrl.u32 %v3859_v18, 16  ;;  %v3876_v61 = vld [vmem:[%s5885_s1 + $0x50] sm:$0xff]  ;;  %v3883_v4 = vld [vmem:[%s5885_s1 + $0x88] sm:$0xff] }
  0x24   : > { %1882 = vmatpush.bf16.msra.mxu0 %v3868_v14  ;;  %4074 = vmatpush.bf16.msra.mxu3 %v3868_v14  ;;  %v642_v9 = vor.u32 %v641_v6, %v638_v5  ;;  %v4335_v15 = vsel %vm482_vm0, %v4265_v30, %v543_v11  ;;  %v4339_v16 = vsel %vm482_vm0, %v4269_v32, %v597_v12  ;;  %v603_v25 = vshll.u32 %v3859_v18, 16  ;;  %v3864_v32 = vld [vmem:[%s4245_s9 + $0x90] sm:$0xff] }
  0x25   : > { %5945 = vst [vmem:[#allocation4_spill] sm:$0xff] %v4335_v15  ;;  %v4343_v19 = vsel %vm693_vm2, 0, %v490_v13  ;;  %v495_v30 = vshll.u32 %v3847_v20, 16  ;;  %v645_v36 = vshrl.u32 %v3864_v32, 16  ;;  %v648_v39 = vshll.u32 %v3864_v32, 16  ;;  %v3900_v3 = vld [vmem:[%s5885_s1 + $0x110] sm:$0xff] }
  0x26   : > { %v4329_v14 = vsel %vm482_vm0, %v4322_v8, %v642_v9  ;;  %5946 = vst [vmem:[#allocation5_spill] sm:$0xff] %v4339_v16  ;;  %v548_v40 = vrot.slane %v546_v22, 6  ;;  %v602_v42 = vrot.slane %v600_v24, 6  ;;  %v605_v43 = vrot.slane %v603_v25, 7 }
  0x27   : > { %4075 = vmatpush.bf16.msra.mxu1 %v3867_v23  ;;  %4076 = vmatpush.bf16.msra.mxu2 %v3867_v23  ;;  %5944 = vst [vmem:[#allocation3_spill] sm:$0xff] %v4329_v14  ;;  %v647_v46 = vrot.slane %v645_v36, 6  ;;  %v650_v47 = vrot.slane %v648_v39, 7  ;;  %v555_v60 = vshrl.u32 %v3854_v54, 16  ;;  %v558_v62 = vshll.u32 %v3854_v54, 16  ;;  %v3861_v36 = vld [vmem:[%s4245_s9 + $0x78] sm:$0xff] }
  0x28   : > { %1883 = vmatpush.bf16.msra.mxu0 %v3867_v23  ;;  %4077 = vmatpush.bf16.msra.mxu3 %v3867_v23  ;;  %5947 = vst [vmem:[#allocation6_spill] sm:$0xff] %v4343_v19  ;;  %v549_v23 = vshll.u32 %v3853_v17, 16  ;;  %v606_v51 = vor.u32 %v605_v43, %v602_v42  ;;  %v609_v63 = vshrl.u32 %v3860_v57, 16  ;;  %v612_v0 = vshll.u32 %v3860_v57, 16 }
  0x29   : > { %v651_v48 = vor.u32 %v650_v47, %v647_v46  ;;  %v501_v5 = vshrl.u32 %v3848_v59, 16  ;;  %v504_v6 = vshll.u32 %v3848_v59, 16  ;;  %v560_v17 = vrot.slane %v558_v62, 7  ;;  %v3891_v46 = vld [vmem:[%s5885_s1 + $0xc8] sm:$0xff]  ;;  %v3882_v47 = vld [vmem:[%s5885_s1 + $0x80] sm:$0xff] }
  0x2a   : > { %v611_v18 = vrot.slane %v609_v63, 6  ;;  %v618_v43 = vshrl.u32 %v3861_v36, 16  ;;  %v892_v57 = vrot.slane %v4343_v19, 1 }
  0x2b   : > { %4078 = vmatpush.bf16.msra.mxu1 %v3866_v29  ;;  %4079 = vmatpush.bf16.msra.mxu2 %v3866_v29  ;;  %v4372_v53 = vsel %vm482_vm0, %v642_v9, %v651_v48  ;;  %v3875_v9 = vld [vmem:[%s5885_s1 + $0x48] sm:$0xff]  ;;  %v506_v22 = vrot.slane %v504_v6, 7 }
  0x2c   : > { %1884 = vmatpush.bf16.msra.mxu0 %v3866_v29  ;;  %4080 = vmatpush.bf16.msra.mxu3 %v3866_v29  ;;  %v492_v29 = vshrl.u32 %v3847_v20, 16  ;;  %v614_v20 = vrot.slane %v612_v0, 7 }
  0x2e   : > { %1915 = vmatmul.bf16.vlgmr.msra.gmra.mxu1 %v4284_v37  ;;  %1945 = vmatmul.bf16.vlgmr.msra.gmra.mxu2 %v4289_v38 }
  0x2f   : > { %2103 = vmatpush.bf16.msrb.mxu2 %v3889_v33  ;;  %1990 = vmatpush.bf16.msrb.mxu1 %v3881_v34  ;;  %v3901_v33 = vld [vmem:[%s5885_s1 + $0x118] sm:$0xff]  ;;  %v3884_v34 = vld [vmem:[%s5885_s1 + $0x90] sm:$0xff] }
  0x30   : > { %2329 = vmatpush.bf16.msrb.mxu0 %v3905_v35  ;;  %1975 = vmatmul.bf16.vlgmr.msra.gmra.mxu3 %v4329_v14  ;;  %v3896_v35 = vld [vmem:[%s5885_s1 + $0xf0] sm:$0xff] }
  0x31   : > { %1885 = vmatmul.bf16.vlgmr.msra.gmra.mxu0 %v5889_v2  ;;  %2216 = vmatpush.bf16.msrb.mxu3 %v3897_v26  ;;  %v3892_v26 = vld [vmem:[%s5885_s1 + $0xd0] sm:$0xff] }
  0x33   : > { %2104 = vmatpush.bf16.msrb.mxu2 %v3888_v41  ;;  %1991 = vmatpush.bf16.msrb.mxu1 %v3880_v44  ;;  %v551_v41 = vrot.slane %v549_v23, 7  ;;  %v494_v44 = vrot.slane %v492_v29, 6  ;;  %v615_v29 = vor.u32 %v614_v20, %v611_v18 }
  0x34   : > { %2330 = vmatpush.bf16.msrb.mxu0 %v3904_v45  ;;  %v497_v45 = vrot.slane %v495_v30, 7 }
  0x35   : > { %2217 = vmatpush.bf16.msrb.mxu3 %v3896_v35  ;;  %v4424_v35 = vsel %vm482_vm0, %v606_v51, %v615_v29 }
  0x36   : > { %v498_v52 = vor.u32 %v497_v45, %v494_v44  ;;  %5953 = vst [vmem:[#allocation12_spill] sm:$0xff] %v4424_v35  ;;  %v621_v44 = vshll.u32 %v3861_v36, 16  ;;  %v3899_v45 = vld [vmem:[%s5885_s1 + $0x108] sm:$0xff]  ;;  %v705_v36 = vrot.slane %v5889_v2, 1 }
  0x37   : > { %2105 = vmatpush.bf16.msrb.mxu2 %v3887_v50  ;;  %1992 = vmatpush.bf16.msrb.mxu1 %v3879_v55  ;;  %v552_v50 = vor.u32 %v551_v41, %v548_v40  ;;  %v3849_v40 = vld [vmem:[%s4245_s9 + $0x18] sm:$0xff] }
  0x38   : > { %2331 = vmatpush.bf16.msrb.mxu0 %v3903_v56  ;;  %v4380_v56 = vsel %vm482_vm0, %v597_v12, %v606_v51  ;;  %v4384_v58 = vsel %vm482_vm0, %v490_v13, %v498_v52  ;;  %v557_v13 = vrot.slane %v555_v60, 6  ;;  %v3890_v51 = vld [vmem:[%s5885_s1 + $0xc0] sm:$0xff]  ;;  %v623_v62 = vrot.slane %v621_v44, 7 }
  0x39   : > { %2218 = vmatpush.bf16.msrb.mxu3 %v3895_v49  ;;  %v4377_v55 = vsel %vm482_vm0, %v543_v11, %v552_v50  ;;  %5949 = vst [vmem:[#allocation8_spill] sm:$0xff] %v4380_v56  ;;  %v513_v49 = vshll.u32 %v3849_v40, 16  ;;  %v894_v59 = vrot.slane %v4384_v58, 1  ;;  %v893_v44 = vsel %vm890_vm3, %v705_v36, %v892_v57 }
  0x3a   : > { %5948 = vst [vmem:[#allocation7_spill] sm:$0xff] %v4377_v55 }
  0x3b   : > { %2106 = vmatpush.bf16.msrb.mxu2 %v3886_v1  ;;  %1993 = vmatpush.bf16.msrb.mxu1 %v3878_v7  ;;  %5950 = vst [vmem:[#allocation9_spill] sm:$0xff] %v4384_v58  ;;  %v3894_v1 = vld [vmem:[%s5885_s1 + $0xe0] sm:$0xff]  ;;  %v3865_v7 = vld [vmem:[%s4245_s9 + $0x98] sm:$0xff]  ;;  %v515_v0 = vrot.slane %v513_v49, 7 }
  0x3c   : > { %2332 = vmatpush.bf16.msrb.mxu0 %v3902_v10  ;;  %v3893_v10 = vld [vmem:[%s5885_s1 + $0xd8] sm:$0xff]  ;;  %v654_v11 = vshrl.u32 %v3865_v7, 16  ;;  %v657_v12 = vshll.u32 %v3865_v7, 16 }
  0x3d   : > { %2219 = vmatpush.bf16.msrb.mxu3 %v3894_v1  ;;  %v4455_v1 = vsel %vm890_vm3, %v892_v57, %v894_v59 }
  0x3e   : > { %1920 = vmatmul.bf16.gmra.mxu1 %v4335_v15  ;;  %1950 = vmatmul.bf16.gmra.mxu2 %v4339_v16  ;;  %v656_v23 = vrot.slane %v654_v11, 6  ;;  %v659_v24 = vrot.slane %v657_v12, 7  ;;  %v3929_v11 = vld [vmem:[%s5885_s1 + $0x1f8] sm:$0xff] }
  0x3f   : > { %2107 = vmatpush.bf16.msrb.mxu2 %v3885_v21  ;;  %1994 = vmatpush.bf16.msrb.mxu1 %v3877_v27  ;;  %v503_v21 = vrot.slane %v501_v5, 6  ;;  %v561_v27 = vor.u32 %v560_v17, %v557_v13  ;;  %v3913_v12 = vld [vmem:[%s5885_s1 + $0x178] sm:$0xff] }
  0x40   : > { %2333 = vmatpush.bf16.msrb.mxu0 %v3901_v33  ;;  %1980 = vmatmul.bf16.gmra.mxu3 %v4372_v53  ;;  %v4409_v25 = vor.u32 %v659_v24, %v656_v23  ;;  %v3855_v33 = vld [vmem:[%s4245_s9 + $0x48] sm:$0xff]  ;;  %v3937_v13 = vld [vmem:[%s5885_s1 + $0x238] sm:$0xff]  ;;  %v708_v23 = vshll.u32 %v4343_v19, 16  ;;  %v712_v24 = vshrl.u32 %v4343_v19, 16 }
  0x41   : > { %1890 = vmatmul.bf16.gmra.mxu0 %v4343_v19  ;;  %2220 = vmatpush.bf16.msrb.mxu3 %v3893_v10  ;;  %v507_v30 = vor.u32 %v506_v22, %v503_v21  ;;  %v564_v41 = vshrl.u32 %v3855_v33, 16  ;;  %v567_v42 = vshll.u32 %v3855_v33, 16  ;;  %v3921_v10 = vld [vmem:[%s5885_s1 + $0x1b8] sm:$0xff] }
  0x42   : > { %v4416_v32 = vsel %vm482_vm0, %v651_v48, %v4409_v25  ;;  %v510_v48 = vshrl.u32 %v3849_v40, 16  ;;  %v710_v40 = vrot.slane %v708_v23, 1 }
  0x43   : > { %2108 = vmatpush.bf16.msrb.mxu2 %v3884_v34  ;;  %1995 = vmatpush.bf16.msrb.mxu1 %v3876_v61  ;;  %5951 = vst [vmem:[#allocation10_spill] sm:$0xff] %v4416_v32  ;;  %v4421_v34 = vsel %vm482_vm0, %v552_v50, %v561_v27  ;;  %v4428_v39 = vsel %vm482_vm0, %v498_v52, %v507_v30  ;;  %v3874_v50 = vld [vmem:[%s5885_s1 + $0x40] sm:$0xff]  ;;  %v566_v54 = vrot.slane %v564_v41, 6  ;;  %v569_v60 = vrot.slane %v567_v42, 7 }
  0x44   : > { %2334 = vmatpush.bf16.msrb.mxu0 %v3900_v3  ;;  %5952 = vst [vmem:[#allocation11_spill] sm:$0xff] %v4421_v34  ;;  %v3898_v52 = vld [vmem:[%s5885_s1 + $0x100] sm:$0xff]  ;;  %v620_v61 = vrot.slane %v618_v43, 6  ;;  %v512_v63 = vrot.slane %v510_v48, 6  ;;  %v896_v17 = vrot.slane %v4428_v39, 1  ;;  %v711_v43 = vsel %vm699_vm4, %v705_v36, %v710_v40 }
  0x45   : > { %2221 = vmatpush.bf16.msrb.mxu3 %v3892_v26  ;;  %5954 = vst [vmem:[#allocation13_spill] sm:$0xff] %v4428_v39  ;;  %v570_v3 = vor.u32 %v569_v60, %v566_v54  ;;  %v714_v54 = vor.u32 %v712_v24, %v710_v40  ;;  %v3928_v60 = vld [vmem:[%s5885_s1 + $0x1f0] sm:$0xff] }
  0x46   : > { %v516_v5 = vor.u32 %v515_v0, %v512_v63  ;;  %v4484_v18 = vsel %vm890_vm3, %v894_v59, %v896_v17 }
  0x47   : > { %2109 = vmatpush.bf16.msrb.mxu2 %v3883_v4  ;;  %1996 = vmatpush.bf16.msrb.mxu1 %v3875_v9  ;;  %v624_v4 = vor.u32 %v623_v62, %v620_v61  ;;  %v4459_v6 = vsel %vm482_vm0, %v561_v27, %v570_v3  ;;  %v4489_v20 = vsel %vm482_vm0, %v570_v3, %v4267_v31  ;;  %v4505_v31 = vshll.u32 %v4384_v58, 16  ;;  %v3912_v62 = vld [vmem:[%s5885_s1 + $0x170] sm:$0xff] }
  0x48   : > { %2335 = vmatpush.bf16.msrb.mxu0 %v3899_v45  ;;  %5955 = vst [vmem:[#allocation14_spill] sm:$0xff] %v4459_v6  ;;  %v4465_v9 = vsel %vm482_vm0, %v507_v30, %v516_v5  ;;  %v4497_v22 = vsel %vm482_vm0, %v516_v5, %v4260_v28  ;;  %v959_v28 = vrot.slane %v712_v24, 1  ;;  %v960_v27 = vrot.slane %v708_v23, 2 }
  0x49   : > { %2222 = vmatpush.bf16.msrb.mxu3 %v3891_v46  ;;  %v4462_v7 = vsel %vm482_vm0, %v615_v29, %v624_v4  ;;  %5957 = vst [vmem:[#allocation16_spill] sm:$0xff] %v4465_v9  ;;  %v4493_v21 = vsel %vm482_vm0, %v624_v4, %v4322_v8  ;;  %v4508_v8 = vshrl.u32 %v4384_v58, 16  ;;  %v898_v26 = vrot.slane %v4465_v9, 1  ;;  %v3936_v4 = vld [vmem:[%s5885_s1 + $0x230] sm:$0xff] }
  0x4a   : > { %5956 = vst [vmem:[#allocation15_spill] sm:$0xff] %v4462_v7  ;;  %v963_v30 = vrot.slane %v4505_v31, 2  ;;  %v961_v41 = vor.u32 %v960_v27, %v959_v28  ;;  %v4522_v46 = vshll.u32 %v4428_v39, 16  ;;  %v718_v57 = vrot.slane %v4505_v31, 1 }
  0x4b   : > { %2110 = vmatpush.bf16.msrb.mxu2 %v3882_v47  ;;  %1997 = vmatpush.bf16.msrb.mxu1 %v3874_v50  ;;  %5958 = vst [vmem:[#allocation17_spill] sm:$0xff] %v4489_v20  ;;  %v962_v29 = vrot.slane %v4508_v8, 1  ;;  %v4514_v33 = vsel %vm890_vm3, %v896_v17, %v898_v26  ;;  %v4525_v47 = vshrl.u32 %v4428_v39, 16  ;;  %v900_v50 = vrot.slane %v4497_v22, 1 }
  0x4c   : > { %2336 = vmatpush.bf16.msrb.mxu0 %v3898_v52  ;;  %5959 = vst [vmem:[#allocation18_spill] sm:$0xff] %v4493_v21  ;;  %v967_v49 = vrot.slane %v4522_v46, 2  ;;  %v719_v61 = vsel %vm699_vm4, %v714_v54, %v718_v57  ;;  %v4548_v0 = vshll.u32 %v4465_v9, 16  ;;  %v4551_v3 = vshrl.u32 %v4465_v9, 16 }
  0x4d   : > { %2223 = vmatpush.bf16.msrb.mxu3 %v3890_v51  ;;  %5960 = vst [vmem:[#allocation19_spill] sm:$0xff] %v4497_v22  ;;  %v964_v42 = vor.u32 %v963_v30, %v962_v29  ;;  %v966_v48 = vrot.slane %v4525_v47, 1  ;;  %v3920_v51 = vld [vmem:[%s5885_s1 + $0x1b0] sm:$0xff]  ;;  %v4534_v52 = vsel %vm890_vm3, %v898_v26, %v900_v50  ;;  %v4573_v27 = vshll.u32 %v4497_v22, 16 }
  0x4e   : > { %1925 = vmatmul.bf16.gmra.mxu1 %v4377_v55  ;;  %1955 = vmatmul.bf16.gmra.mxu2 %v4380_v56  ;;  %5961 = vst [vmem:[#allocation20_spill] sm:$0xff] %v4505_v31  ;;  %v970_v5 = vrot.slane %v4551_v3, 1  ;;  %v4576_v29 = vshrl.u32 %v4497_v22, 16 }
  0x4f   : > { %2555 = vmatpush.bf16.msra.mxu2 %v3921_v10  ;;  %2442 = vmatpush.bf16.msra.mxu1 %v3913_v12  ;;  %5962 = vst [vmem:[#allocation21_spill] sm:$0xff] %v4508_v8  ;;  %v965_v45 = vsel %vm958_vm5, %v961_v41, %v964_v42  ;;  %v968_v59 = vor.u32 %v967_v49, %v966_v48  ;;  %v971_v10 = vrot.slane %v4548_v0, 2 }
  0x50   : > { %1985 = vmatmul.bf16.gmra.mxu3 %v4416_v32  ;;  %2781 = vmatpush.bf16.msra.mxu0 %v3937_v13  ;;  %5963 = vst [vmem:[#allocation22_spill] sm:$0xff] %v4522_v46  ;;  %v722_v12 = vor.u32 %v4508_v8, %v718_v57  ;;  %v726_v13 = vrot.slane %v4522_v46, 1  ;;  %v974_v41 = vrot.slane %v4576_v29, 1 }
  0x51   : > { %1895 = vmatmul.bf16.gmra.mxu0 %v4384_v58  ;;  %2668 = vmatpush.bf16.msra.mxu3 %v3929_v11  ;;  %5964 = vst [vmem:[#allocation23_spill] sm:$0xff] %v4525_v47  ;;  %v969_v63 = vsel %vm958_vm5, %v964_v42, %v968_v59  ;;  %v902_v11 = vrot.slane %v4284_v37, 1  ;;  %v972_v17 = vor.u32 %v971_v10, %v970_v5  ;;  %v975_v42 = vrot.slane %v4573_v27, 2 }
  0x52   : > { %5965 = vst [vmem:[#allocation24_spill] sm:$0xff] %v4548_v0  ;;  %v727_v24 = vsel %vm699_vm4, %v722_v12, %v726_v13 }
  0x53   : > { %2556 = vmatpush.bf16.msra.mxu2 %v3920_v51  ;;  %2443 = vmatpush.bf16.msra.mxu1 %v3912_v62  ;;  %5966 = vst [vmem:[#allocation25_spill] sm:$0xff] %v4551_v3  ;;  %v973_v28 = vsel %vm958_vm5, %v968_v59, %v972_v17  ;;  %v976_v48 = vor.u32 %v975_v42, %v974_v41  ;;  %v742_v41 = vrot.slane %v4573_v27, 1 }
  0x54   : > { %2782 = vmatpush.bf16.msra.mxu0 %v3936_v4  ;;  %5967 = vst [vmem:[#allocation26_spill] sm:$0xff] %v4573_v27 }
  0x55   : > { %2669 = vmatpush.bf16.msra.mxu3 %v3928_v60  ;;  %5968 = vst [vmem:[#allocation27_spill] sm:$0xff] %v4576_v29  ;;  %v977_v57 = vsel %vm958_vm5, %v972_v17, %v976_v48  ;;  %v4605_v60 = vshll.u32 %v4284_v37, 16  ;;  %v906_v17 = vrot.slane %v4377_v55, 1 }
  0x57   : > { %5972 = vst [vmem:[#allocation31_spill] sm:$0xff] %v4605_v60 }
  0x5e   : > { %1930 = vmatmul.bf16.gmra.mxu1 %v4421_v34  ;;  %1960 = vmatmul.bf16.gmra.mxu2 %v4424_v35 }
  0x60   : > { %2224 = vmatmul.bf16.vlgmr.msrb.gmra.mxu3 %v4455_v1 }
  0x61   : > { %1900 = vmatmul.bf16.gmra.mxu0 %v4428_v39 }
  0x6e   : > { %1935 = vmatmul.bf16.gmra.mxu1 %v4459_v6  ;;  %1965 = vmatmul.bf16.gmra.mxu2 %v4462_v7 }
  0x70   : > { %2229 = vmatmul.bf16.gmra.mxu3 %v4484_v18 }
  0x71   : > { %1905 = vmatmul.bf16.gmra.mxu0 %v4465_v9 }
  0x7e   : > { %1940 = vmatmul.bf16.gmra.mxu1 %v4489_v20  ;;  %1970 = vmatmul.bf16.gmra.mxu2 %v4493_v21 }
  0x80   : > { %2234 = vmatmul.bf16.gmra.mxu3 %v4514_v33 }
  0x81   : > { %1910 = vmatmul.bf16.gmra.mxu0 %v4497_v22 }
  0x8e   : > { %1998 = vmatmul.bf16.vlgmr.msrb.gmra.mxu1 %v711_v43  ;;  %2111 = vmatmul.bf16.vlgmr.msrb.gmra.mxu2 %v893_v44  ;;  %v904_v43 = vrot.slane %v4335_v15, 1  ;;  %v730_v44 = vor.u32 %v4525_v47, %v726_v13  ;;  %v3911_v13 = vld [vmem:[%s5885_s1 + $0x168] sm:$0xff] }
  0x8f   : > { %2444 = vmatpush.bf16.msra.mxu1 %v3911_v13 }
  0x90   : > { %2239 = vmatmul.bf16.gmra.mxu3 %v4534_v52 }
  0x91   : > { %2337 = vmatmul.bf16.vlgmr.msrb.gmra.mxu0 %v965_v45  ;;  %v734_v45 = vrot.slane %v4548_v0, 1 }
  0x93   : > { %v735_v51 = vsel %vm699_vm4, %v730_v44, %v734_v45 }
  0x9e   : > { %2003 = vmatmul.bf16.gmra.mxu1 %v719_v61  ;;  %2116 = vmatmul.bf16.gmra.mxu2 %v4455_v1  ;;  %v4560_v1 = vsel %vm890_vm3, %v900_v50, %v902_v11  ;;  %v4608_v61 = vshrl.u32 %v4284_v37, 16 }
  0xa0   : > { %2244 = vmatmul.bf16.gmra.mxu3 %v4560_v1  ;;  %5973 = vst [vmem:[#allocation32_spill] sm:$0xff] %v4608_v61  ;;  %v978_v10 = vrot.slane %v4608_v61, 1 }
  0xa1   : > { %2342 = vmatmul.bf16.gmra.mxu0 %v969_v63  ;;  %v3919_v63 = vld [vmem:[%s5885_s1 + $0x1a8] sm:$0xff] }
  0xa2   : > { %2557 = vmatpush.bf16.msra.mxu2 %v3919_v63  ;;  %v3935_v63 = vld [vmem:[%s5885_s1 + $0x228] sm:$0xff] }
  0xa3   : > { %2783 = vmatpush.bf16.msra.mxu0 %v3935_v63 }
  0xab   : > { %v4565_v23 = vpop.f32.mrf.mxu1 }
  0xae   : > { %v4568_v26 = vpop.f32.mrf.mxu0  ;;  %2008 = vmatmul.bf16.gmra.mxu1 %v727_v24  ;;  %2121 = vmatmul.bf16.gmra.mxu2 %v4484_v18  ;;  %v4588_v18 = vsel %vm890_vm3, %v902_v11, %v904_v43  ;;  %v979_v11 = vrot.slane %v4605_v60, 2  ;;  %v4631_v24 = vsel %vm890_vm3, %v904_v43, %v906_v17 }
  0xb0   : > { %2249 = vmatmul.bf16.gmra.mxu3 %v4588_v18  ;;  %v980_v42 = vor.u32 %v979_v11, %v978_v10  ;;  %v4651_v10 = vshll.u32 %v4335_v15, 16  ;;  %v4654_v11 = vshrl.u32 %v4335_v15, 16 }
  0xb1   : > { %2347 = vmatmul.bf16.gmra.mxu0 %v973_v28  ;;  %v4578_v30 = vpop.f32.mrf.mxu2  ;;  %v738_v28 = vor.u32 %v4551_v3, %v734_v45 }
  0xb2   : > { %5969 = vst [vmem:[#allocation28_spill] sm:$0xff] %v4578_v30  ;;  %v981_v43 = vsel %vm958_vm5, %v976_v48, %v980_v42  ;;  %v982_v48 = vrot.slane %v4654_v11, 1  ;;  %v983_v63 = vrot.slane %v4651_v10, 2 }
  0xb3   : > { %v4580_v36 = vpop.f32.mrf.mxu1  ;;  %v4601_v59 = vpop.f32.mrf.mxu3  ;;  %5978 = vst [vmem:[#allocation37_spill] sm:$0xff] %v4651_v10 }
  0xb4   : > { %5971 = vst [vmem:[#allocation30_spill] sm:$0xff] %v4601_v59  ;;  %v984_v59 = vor.u32 %v983_v63, %v982_v48 }
  0xb5   : > { %5979 = vst [vmem:[#allocation38_spill] sm:$0xff] %v4654_v11 }
  0xb6   : > { %v4582_v40 = vpop.f32.mrf.mxu0 }
  0xb9   : > { %v4592_v49 = vpop.f32.mrf.mxu2 }
  0xba   : > { %5970 = vst [vmem:[#allocation29_spill] sm:$0xff] %v4592_v49 }
  0xbb   : > { %v4595_v50 = vpop.f32.mrf.mxu1  ;;  %v4624_v12 = vpop.f32.mrf.mxu3 }
  0xbc   : > { %5975 = vst [vmem:[#allocation34_spill] sm:$0xff] %v4624_v12  ;;  %v750_v12 = vrot.slane %v4605_v60, 1 }
  0xbe   : > { %v4598_v54 = vpop.f32.mrf.mxu0  ;;  %2013 = vmatmul.bf16.gmra.mxu1 %v735_v51  ;;  %2126 = vmatmul.bf16.gmra.mxu2 %v4514_v33  ;;  %v3927_v33 = vld [vmem:[%s5885_s1 + $0x1e8] sm:$0xff] }
  0xbf   : > { %2670 = vmatpush.bf16.msra.mxu3 %v3927_v33 }
  0xc0   : > { %2254 = vmatmul.bf16.gmra.mxu3 %v4631_v24 }
  0xc1   : > { %2352 = vmatmul.bf16.gmra.mxu0 %v977_v57  ;;  %v4610_v62 = vpop.f32.mrf.mxu2  ;;  %v743_v57 = vsel %vm699_vm4, %v738_v28, %v742_v41 }
  0xc2   : > { %5974 = vst [vmem:[#allocation33_spill] sm:$0xff] %v4610_v62 }
  0xc3   : > { %v4615_v4 = vpop.f32.mrf.mxu1  ;;  %v4647_v45 = vpop.f32.mrf.mxu3 }
  0xc4   : > { %5977 = vst [vmem:[#allocation36_spill] sm:$0xff] %v4647_v45  ;;  %v746_v45 = vor.u32 %v4576_v29, %v742_v41  ;;  %v4688_v41 = vshrl.u32 %v4377_v55, 16 }
  0xc6   : > { %v4620_v5 = vpop.f32.mrf.mxu0  ;;  %v751_v22 = vsel %vm699_vm4, %v746_v45, %v750_v12  ;;  %5985 = vst [vmem:[#allocation44_spill] sm:$0xff] %v4688_v41 }
  0xc9   : > { %v4635_v44 = vpop.f32.mrf.mxu2 }
  0xca   : > { %5976 = vst [vmem:[#allocation35_spill] sm:$0xff] %v4635_v44 }
  0xcb   : > { %v4638_v51 = vpop.f32.mrf.mxu1 }
  0xce   : > { %v4644_v33 = vpop.f32.mrf.mxu0  ;;  %2018 = vmatmul.bf16.gmra.mxu1 %v743_v57  ;;  %2131 = vmatmul.bf16.gmra.mxu2 %v4534_v52  ;;  %v4664_v57 = vpop.f32.mrf.mxu3  ;;  %v908_v52 = vrot.slane %v4421_v34, 1 }
  0xcf   : > { %5981 = vst [vmem:[#allocation40_spill] sm:$0xff] %v4664_v57  ;;  %v985_v57 = vsel %vm958_vm5, %v980_v42, %v984_v59  ;;  %v986_v42 = vrot.slane %v4688_v41, 1 }
  0xd1   : > { %2357 = vmatmul.bf16.gmra.mxu0 %v981_v43  ;;  %v4656_v13 = vpop.f32.mrf.mxu2  ;;  %v4668_v43 = vsel %vm890_vm3, %v906_v17, %v908_v52  ;;  %v4685_v17 = vshll.u32 %v4377_v55, 16  ;;  %v758_v55 = vrot.slane %v4651_v10, 1  ;;  %v3934_v10 = vld [vmem:[%s5885_s1 + $0x220] sm:$0xff] }
  0xd2   : > { %5980 = vst [vmem:[#allocation39_spill] sm:$0xff] %v4656_v13  ;;  %2259 = vmatmul.bf16.gmra.mxu3 %v4668_v43  ;;  %2784 = vmatpush.bf16.msra.mxu0 %v3934_v10 }
  0xd3   : > { %v4658_v28 = vpop.f32.mrf.mxu1  ;;  %5984 = vst [vmem:[#allocation43_spill] sm:$0xff] %v4685_v17 }
  0xd6   : > { %v4660_v2 = vpop.f32.mrf.mxu0  ;;  %v4681_v44 = vpop.f32.mrf.mxu3 }
  0xd7   : > { %5983 = vst [vmem:[#allocation42_spill] sm:$0xff] %v4681_v44  ;;  %v987_v44 = vrot.slane %v4685_v17, 2 }
  0xd9   : > { %v4672_v15 = vpop.f32.mrf.mxu2  ;;  %v988_v9 = vor.u32 %v987_v44, %v986_v42  ;;  %v3926_v44 = vld [vmem:[%s5885_s1 + $0x1e0] sm:$0xff] }
  0xda   : > { %5982 = vst [vmem:[#allocation41_spill] sm:$0xff] %v4672_v15  ;;  %v754_v15 = vor.u32 %v4608_v61, %v750_v12  ;;  %v3918_v12 = vld [vmem:[%s5885_s1 + $0x1a0] sm:$0xff]  ;;  %2671 = vmatpush.bf16.msra.mxu3 %v3926_v44 }
  0xdb   : > { %v4675_v37 = vpop.f32.mrf.mxu1  ;;  %2558 = vmatpush.bf16.msra.mxu2 %v3918_v12 }
  0xdc   : > { %v759_v62 = vsel %vm699_vm4, %v754_v15, %v758_v55  ;;  %v3910_v15 = vld [vmem:[%s5885_s1 + $0x160] sm:$0xff] }
  0xdd   : > { %2445 = vmatpush.bf16.msra.mxu1 %v3910_v15  ;;  %v762_v15 = vor.u32 %v4654_v11, %v758_v55  ;;  %v4763_v55 = vshll.u32 %v4459_v6, 16 }
  0xde   : > { %v4678_v13 = vpop.f32.mrf.mxu0  ;;  %2023 = vmatmul.bf16.gmra.mxu1 %v751_v22  ;;  %2136 = vmatmul.bf16.gmra.mxu2 %v4560_v1  ;;  %v1988_v22 = vpop.f32.mrf.mxu3  ;;  %v910_v1 = vrot.slane %v4459_v6, 1 }
  0xdf   : > { %v989_v22 = vsel %vm958_vm5, %v984_v59, %v988_v9  ;;  %v4726_v59 = vshll.u32 %v4421_v34, 16 }
  0xe1   : > { %2362 = vmatmul.bf16.gmra.mxu0 %v985_v57  ;;  %v4690_v48 = vpop.f32.mrf.mxu2  ;;  %v4700_v57 = vsel %vm890_vm3, %v908_v52, %v910_v1  ;;  %5989 = vst [vmem:[#allocation48_spill] sm:$0xff] %v4726_v59  ;;  %v4729_v52 = vshrl.u32 %v4421_v34, 16  ;;  %v991_v12 = vrot.slane %v4726_v59, 2  ;;  %v912_v34 = vrot.slane %v4489_v20, 1 }
  0xe2   : > { %5986 = vst [vmem:[#allocation45_spill] sm:$0xff] %v4690_v48  ;;  %2264 = vmatmul.bf16.gmra.mxu3 %v4700_v57 }
  0xe3   : > { %v4692_v63 = vpop.f32.mrf.mxu1  ;;  %v4746_v44 = vsel %vm890_vm3, %v910_v1, %v912_v34  ;;  %v4766_v1 = vshrl.u32 %v4459_v6, 16 }
  0xe6   : > { %v4694_v45 = vpop.f32.mrf.mxu0  ;;  %v4713_v39 = vpop.f32.mrf.mxu3 }
  0xe9   : > { %v4704_v48 = vpop.f32.mrf.mxu2 }
  0xea   : > { %5987 = vst [vmem:[#allocation46_spill] sm:$0xff] %v4704_v48 }
  0xeb   : > { %v4707_v60 = vpop.f32.mrf.mxu1 }
  0xec   : > { %5988 = vst [vmem:[#allocation47_spill] sm:$0xff] %v4707_v60 }
  0xee   : > { %v4710_v49 = vpop.f32.mrf.mxu0  ;;  %2028 = vmatmul.bf16.gmra.mxu1 %v759_v62  ;;  %2141 = vmatmul.bf16.gmra.mxu2 %v4588_v18  ;;  %v4739_v48 = vpop.f32.mrf.mxu3 }
  0xf1   : > { %2367 = vmatmul.bf16.gmra.mxu0 %v989_v22  ;;  %v4731_v62 = vpop.f32.mrf.mxu2  ;;  %v990_v22 = vrot.slane %v4729_v52, 1 }
  0xf2   : > { %5990 = vst [vmem:[#allocation49_spill] sm:$0xff] %v4731_v62  ;;  %v766_v62 = vrot.slane %v4685_v17, 1  ;;  %2269 = vmatmul.bf16.gmra.mxu3 %v4746_v44  ;;  %v774_v17 = vrot.slane %v4726_v59, 1 }
  0xf3   : > { %v4733_v18 = vpop.f32.mrf.mxu1  ;;  %v992_v61 = vor.u32 %v991_v12, %v990_v22 }
  0xf4   : > { %5991 = vst [vmem:[#allocation50_spill] sm:$0xff] %v4733_v18  ;;  %v767_v27 = vsel %vm699_vm4, %v762_v15, %v766_v62  ;;  %v770_v6 = vor.u32 %v4688_v41, %v766_v62  ;;  %v4797_v62 = vshrl.u32 %v4489_v20, 16 }
  0xf5   : > { %v993_v10 = vsel %vm958_vm5, %v988_v9, %v992_v61  ;;  %v994_v9 = vrot.slane %v4766_v1, 1 }
  0xf6   : > { %v4735_v42 = vpop.f32.mrf.mxu0  ;;  %v4759_v30 = vpop.f32.mrf.mxu3  ;;  %v775_v0 = vsel %vm699_vm4, %v770_v6, %v774_v17  ;;  %v998_v41 = vrot.slane %v4797_v62, 1 }
  0xf9   : > { %v4750_v58 = vpop.f32.mrf.mxu2 }
  0xfa   : > { %5992 = vst [vmem:[#allocation51_spill] sm:$0xff] %v4750_v58  ;;  %v995_v58 = vrot.slane %v4763_v55, 2 }
  0xfb   : > { %v4753_v19 = vpop.f32.mrf.mxu1 }
  0xfc   : > { %5993 = vst [vmem:[#allocation52_spill] sm:$0xff] %v4753_v19 }
  0xfe   : > { %v4756_v29 = vpop.f32.mrf.mxu0  ;;  %2033 = vmatmul.bf16.gmra.mxu1 %v767_v27  ;;  %2146 = vmatmul.bf16.gmra.mxu2 %v4631_v24  ;;  %v4776_v27 = vpop.f32.mrf.mxu3  ;;  %v914_v24 = vrot.slane %v4289_v38, 1 }
 0x101   : > { %2372 = vmatmul.bf16.gmra.mxu0 %v993_v10  ;;  %v4768_v22 = vpop.f32.mrf.mxu2  ;;  %v4780_v10 = vsel %vm890_vm3, %v912_v34, %v914_v24 }
 0x102   : > { %5994 = vst [vmem:[#allocation53_spill] sm:$0xff] %v4768_v22  ;;  %v996_v22 = vor.u32 %v995_v58, %v994_v9  ;;  %2274 = vmatmul.bf16.gmra.mxu3 %v4780_v10  ;;  %v4794_v58 = vshll.u32 %v4489_v20, 16 }
 0x103   : > { %v4770_v12 = vpop.f32.mrf.mxu1 }
 0x104   : > { %5995 = vst [vmem:[#allocation54_spill] sm:$0xff] %v4770_v12  ;;  %v997_v19 = vsel %vm958_vm5, %v992_v61, %v996_v22 }
 0x106   : > { %v4772_v15 = vpop.f32.mrf.mxu0  ;;  %v4789_v18 = vpop.f32.mrf.mxu3 }
 0x109   : > { %v4784_v11 = vpop.f32.mrf.mxu2 }
 0x10a   : > { %5996 = vst [vmem:[#allocation55_spill] sm:$0xff] %v4784_v11 }
 0x10b   : > { %v1999_v12 = vpop.f32.mrf.mxu1 }
 0x10c   : > { %v2000_v34 = vadd.f32 %v1999_v12, %v4568_v26  ;;  %v916_v26 = vrot.slane %v4339_v16, 1  ;;  %v3925_v12 = vld [vmem:[%s5885_s1 + $0x1d8] sm:$0xff] }
 0x10d   : > { %2672 = vmatpush.bf16.msra.mxu3 %v3925_v12 }
 0x10e   : > { %v2338_v3 = vpop.f32.mrf.mxu0  ;;  %2038 = vmatmul.bf16.gmra.mxu1 %v775_v0  ;;  %2151 = vmatmul.bf16.gmra.mxu2 %v4668_v43  ;;  %v999_v0 = vrot.slane %v4794_v58, 2  ;;  %v4802_v43 = vpop.f32.mrf.mxu3 }
 0x110   : > { %v1000_v46 = vor.u32 %v999_v0, %v998_v41  ;;  %v4839_v41 = vshrl.u32 %v4289_v38, 16 }
 0x111   : > { %2377 = vmatmul.bf16.gmra.mxu0 %v997_v19  ;;  %v2112_v9 = vpop.f32.mrf.mxu2  ;;  %v3917_v19 = vld [vmem:[%s5885_s1 + $0x198] sm:$0xff] }
 0x112   : > { %v2113_v11 = vadd.f32 %v2112_v9, %v2000_v34  ;;  %2559 = vmatpush.bf16.msra.mxu2 %v3917_v19  ;;  %v778_v34 = vor.u32 %v4729_v52, %v774_v17  ;;  %v782_v9 = vrot.slane %v4763_v55, 1  ;;  %v3909_v17 = vld [vmem:[%s5885_s1 + $0x158] sm:$0xff]  ;;  %v1002_v0 = vrot.slane %v4839_v41, 1 }
 0x113   : > { %v2001_v6 = vpop.f32.mrf.mxu1  ;;  %2446 = vmatpush.bf16.msra.mxu1 %v3909_v17 }
 0x114   : > { %v2226_v59 = vadd.f32 %v4713_v39, %v2113_v11  ;;  %v4812_v39 = vsel %vm890_vm3, %v914_v24, %v916_v26  ;;  %v2002_v20 = vadd.f32 %v2001_v6, %v4582_v40  ;;  %v783_v19 = vsel %vm699_vm4, %v778_v34, %v782_v9 }
 0x115   : > { %2279 = vmatmul.bf16.gmra.mxu3 %v4812_v39 }
 0x116   : > { %v2340_v61 = vpop.f32.mrf.mxu0  ;;  %v4814_v11 = vadd.f32 %v2338_v3, %v2226_v59  ;;  %v1001_v3 = vsel %vm958_vm5, %v996_v22, %v1000_v46  ;;  %v4826_v59 = vpop.f32.mrf.mxu3 }
 0x119   : > { %v2114_v47 = vpop.f32.mrf.mxu2 }
 0x11a   : > { %v2115_v31 = vadd.f32 %v2114_v47, %v2002_v20  ;;  %v3933_v20 = vld [vmem:[%s5885_s1 + $0x218] sm:$0xff]  ;;  %v4836_v47 = vshll.u32 %v4289_v38, 16 }
 0x11b   : > { %v2004_v8 = vpop.f32.mrf.mxu1  ;;  %2785 = vmatpush.bf16.msra.mxu0 %v3933_v20 }
 0x11c   : > { %v2228_v24 = vadd.f32 %v4739_v48, %v2115_v31  ;;  %v2005_v31 = vadd.f32 %v2004_v8, %v4598_v54  ;;  %v1003_v12 = vrot.slane %v4836_v47, 2  ;;  %v918_v8 = vrot.slane %v4380_v56, 1 }
 0x11e   : > { %v2343_v60 = vpop.f32.mrf.mxu0  ;;  %2043 = vmatmul.bf16.gmra.mxu1 %v783_v19  ;;  %2156 = vmatmul.bf16.gmra.mxu2 %v4700_v57  ;;  %v4829_v40 = vadd.f32 %v2340_v61, %v2228_v24  ;;  %v4844_v34 = vpop.f32.mrf.mxu3  ;;  %v4848_v54 = vsel %vm890_vm3, %v916_v26, %v918_v8  ;;  %v786_v24 = vor.u32 %v4766_v1, %v782_v9 }
 0x11f   : > { %v1004_v17 = vor.u32 %v1003_v12, %v1002_v0  ;;  %v4869_v0 = vshrl.u32 %v4339_v16, 16 }
 0x120   : > { %5997 = vst [vmem:[#allocation56_spill] sm:$0xff] %v4829_v40 }
 0x121   : > { %2382 = vmatmul.bf16.gmra.mxu0 %v1001_v3  ;;  %v2117_v48 = vpop.f32.mrf.mxu2  ;;  %v790_v3 = vrot.slane %v4794_v58, 1 }
 0x122   : > { %v2118_v22 = vadd.f32 %v2117_v48, %v2005_v31 }
 0x123   : > { %v2006_v57 = vpop.f32.mrf.mxu1 }
 0x124   : > { %v2231_v6 = vadd.f32 %v4759_v30, %v2118_v22  ;;  %v2007_v30 = vadd.f32 %v2006_v57, %v4620_v5  ;;  %v791_v22 = vsel %vm699_vm4, %v786_v24, %v790_v3  ;;  %v4866_v57 = vshll.u32 %v4339_v16, 16 }
 0x125   : > { %2284 = vmatmul.bf16.gmra.mxu3 %v4848_v54 }
 0x126   : > { %v2345_v61 = vpop.f32.mrf.mxu0  ;;  %v4850_v19 = vadd.f32 %v2343_v60, %v2231_v6  ;;  %v1005_v60 = vsel %vm958_vm5, %v1000_v46, %v1004_v17  ;;  %v4859_v6 = vpop.f32.mrf.mxu3 }
 0x129   : > { %v2119_v20 = vpop.f32.mrf.mxu2 }
 0x12a   : > { %v2120_v31 = vadd.f32 %v2119_v20, %v2007_v30  ;;  %v1006_v20 = vrot.slane %v4869_v0, 1 }
 0x12b   : > { %v2009_v48 = vpop.f32.mrf.mxu1 }
 0x12c   : > { %v2233_v40 = vadd.f32 %v4776_v27, %v2120_v31  ;;  %v2010_v5 = vadd.f32 %v2009_v48, %v4644_v33  ;;  %v920_v33 = vrot.slane %v4424_v35, 1  ;;  %v794_v48 = vor.u32 %v4797_v62, %v790_v3 }
 0x12e   : > { %v2348_v26 = vpop.f32.mrf.mxu0  ;;  %2048 = vmatmul.bf16.gmra.mxu1 %v791_v22  ;;  %2161 = vmatmul.bf16.gmra.mxu2 %v4746_v44  ;;  %v4862_v9 = vadd.f32 %v2345_v61, %v2233_v40  ;;  %v1007_v44 = vrot.slane %v4866_v57, 2  ;;  %v4874_v40 = vpop.f32.mrf.mxu3  ;;  %v4878_v61 = vsel %vm890_vm3, %v918_v8, %v920_v33  ;;  %v798_v22 = vrot.slane %v4836_v47, 1 }
 0x130   : > { %5998 = vst [vmem:[#allocation57_spill] sm:$0xff] %v4862_v9  ;;  %v799_v9 = vsel %vm699_vm4, %v794_v48, %v798_v22 }
 0x131   : > { %2387 = vmatmul.bf16.gmra.mxu0 %v1005_v60  ;;  %v2122_v27 = vpop.f32.mrf.mxu2  ;;  %v1008_v60 = vor.u32 %v1007_v44, %v1006_v20  ;;  %v4899_v20 = vshll.u32 %v4380_v56, 16 }
 0x132   : > { %v2123_v12 = vadd.f32 %v2122_v27, %v2010_v5 }
 0x133   : > { %v2011_v24 = vpop.f32.mrf.mxu1  ;;  %v1011_v48 = vrot.slane %v4899_v20, 2 }
 0x134   : > { %v2236_v46 = vadd.f32 %v4789_v18, %v2123_v12  ;;  %v2012_v18 = vadd.f32 %v2011_v24, %v4660_v2  ;;  %v3916_v2 = vld [vmem:[%s5885_s1 + $0x190] sm:$0xff] }
 0x135   : > { %2289 = vmatmul.bf16.gmra.mxu3 %v4878_v61  ;;  %2560 = vmatpush.bf16.msra.mxu2 %v3916_v2  ;;  %v806_v2 = vrot.slane %v4866_v57, 1 }
 0x136   : > { %v2350_v30 = vpop.f32.mrf.mxu0  ;;  %v4880_v31 = vadd.f32 %v2348_v26, %v2236_v46  ;;  %v1009_v26 = vsel %vm958_vm5, %v1004_v17, %v1008_v60  ;;  %v4889_v46 = vpop.f32.mrf.mxu3 }
 0x139   : > { %v2124_v5 = vpop.f32.mrf.mxu2 }
 0x13a   : > { %v2125_v27 = vadd.f32 %v2124_v5, %v2012_v18  ;;  %v3908_v5 = vld [vmem:[%s5885_s1 + $0x150] sm:$0xff] }
 0x13b   : > { %v2014_v12 = vpop.f32.mrf.mxu1  ;;  %2447 = vmatpush.bf16.msra.mxu1 %v3908_v5 }
 0x13c   : > { %v2238_v16 = vadd.f32 %v4802_v43, %v2125_v27  ;;  %v2015_v24 = vadd.f32 %v2014_v12, %v4678_v13  ;;  %v4902_v43 = vshrl.u32 %v4380_v56, 16  ;;  %v3924_v13 = vld [vmem:[%s5885_s1 + $0x1d0] sm:$0xff]  ;;  %v922_v27 = vrot.slane %v4462_v7, 1 }
 0x13d   : > { %2673 = vmatpush.bf16.msra.mxu3 %v3924_v13 }
 0x13e   : > { %v2353_v8 = vpop.f32.mrf.mxu0  ;;  %2053 = vmatmul.bf16.gmra.mxu1 %v799_v9  ;;  %2166 = vmatmul.bf16.gmra.mxu2 %v4780_v10  ;;  %v4892_v3 = vadd.f32 %v2350_v30, %v2238_v16  ;;  %v1010_v30 = vrot.slane %v4902_v43, 1  ;;  %v4910_v18 = vpop.f32.mrf.mxu3 }
 0x140   : > { %5999 = vst [vmem:[#allocation58_spill] sm:$0xff] %v4892_v3 }
 0x141   : > { %2392 = vmatmul.bf16.gmra.mxu0 %v1009_v26  ;;  %v2127_v17 = vpop.f32.mrf.mxu2  ;;  %v802_v26 = vor.u32 %v4839_v41, %v798_v22  ;;  %v3932_v22 = vld [vmem:[%s5885_s1 + $0x210] sm:$0xff] }
 0x142   : > { %v2128_v9 = vadd.f32 %v2127_v17, %v2015_v24  ;;  %v1012_v17 = vor.u32 %v1011_v48, %v1010_v30  ;;  %v4938_v30 = vshll.u32 %v4424_v35, 16  ;;  %2786 = vmatpush.bf16.msra.mxu0 %v3932_v22 }
 0x143   : > { %v2016_v44 = vpop.f32.mrf.mxu1  ;;  %v807_v13 = vsel %vm699_vm4, %v802_v26, %v806_v2 }
 0x144   : > { %v2241_v16 = vadd.f32 %v4826_v59, %v2128_v9  ;;  %v4917_v59 = vsel %vm890_vm3, %v920_v33, %v922_v27  ;;  %v2017_v24 = vadd.f32 %v2016_v44, %v4694_v45 }
 0x145   : > { %2294 = vmatmul.bf16.gmra.mxu3 %v4917_v59 }
 0x146   : > { %v2355_v10 = vpop.f32.mrf.mxu0  ;;  %v4919_v12 = vadd.f32 %v2353_v8, %v2241_v16  ;;  %v1013_v8 = vsel %vm958_vm5, %v1008_v60, %v1012_v17  ;;  %v4931_v16 = vpop.f32.mrf.mxu3 }
 0x149   : > { %v2129_v9 = vpop.f32.mrf.mxu2 }
 0x14a   : > { %v2130_v3 = vadd.f32 %v2129_v9, %v2017_v24 }
 0x14b   : > { %v2019_v56 = vpop.f32.mrf.mxu1 }
 0x14c   : > { %v2243_v5 = vadd.f32 %v4844_v34, %v2130_v3  ;;  %v2020_v44 = vadd.f32 %v2019_v56, %v4710_v49  ;;  %v4941_v34 = vshrl.u32 %v4424_v35, 16  ;;  %v924_v56 = vrot.slane %v4493_v21, 1 }
 0x14e   : > { %v2358_v33 = vpop.f32.mrf.mxu0  ;;  %2058 = vmatmul.bf16.gmra.mxu1 %v807_v13  ;;  %2171 = vmatmul.bf16.gmra.mxu2 %v4812_v39  ;;  %v4934_v45 = vadd.f32 %v2355_v10, %v2243_v5  ;;  %v1014_v39 = vrot.slane %v4941_v34, 1  ;;  %v1015_v10 = vrot.slane %v4938_v30, 2  ;;  %v4946_v9 = vpop.f32.mrf.mxu3  ;;  %v4950_v49 = vsel %vm890_vm3, %v922_v27, %v924_v56 }
 0x14f   : > { %v810_v5 = vor.u32 %v4869_v0, %v806_v2 }
 0x150   : > { %6000 = vst [vmem:[#allocation59_spill] sm:$0xff] %v4934_v45  ;;  %v1016_v22 = vor.u32 %v1015_v10, %v1014_v39  ;;  %v4971_v39 = vshrl.u32 %v4462_v7, 16 }
 0x151   : > { %2397 = vmatmul.bf16.gmra.mxu0 %v1013_v8  ;;  %v2132_v60 = vpop.f32.mrf.mxu2  ;;  %v814_v8 = vrot.slane %v4899_v20, 1 }
 0x152   : > { %v2133_v3 = vadd.f32 %v2132_v60, %v2020_v44 }
 0x153   : > { %v2021_v48 = vpop.f32.mrf.mxu1  ;;  %v815_v45 = vsel %vm699_vm4, %v810_v5, %v814_v8 }
 0x154   : > { %v2246_v26 = vadd.f32 %v4859_v6, %v2133_v3  ;;  %v2022_v6 = vadd.f32 %v2021_v48, %v4735_v42  ;;  %v4968_v48 = vshll.u32 %v4462_v7, 16 }
 0x155   : > { %2299 = vmatmul.bf16.gmra.mxu3 %v4950_v49 }
 0x156   : > { %v2360_v24 = vpop.f32.mrf.mxu0  ;;  %v4952_v13 = vadd.f32 %v2358_v33, %v2246_v26  ;;  %v1017_v33 = vsel %vm958_vm5, %v1012_v17, %v1016_v22  ;;  %v4961_v26 = vpop.f32.mrf.mxu3 }
 0x159   : > { %v2134_v44 = vpop.f32.mrf.mxu2 }
 0x15a   : > { %v2135_v60 = vadd.f32 %v2134_v44, %v2022_v6 }
 0x15b   : > { %v2024_v3 = vpop.f32.mrf.mxu1 }
 0x15c   : > { %v2248_v35 = vadd.f32 %v4874_v40, %v2135_v60  ;;  %v2025_v42 = vadd.f32 %v2024_v3, %v4756_v29  ;;  %v926_v29 = vrot.slane %v4329_v14, 1  ;;  %v818_v60 = vor.u32 %v4902_v43, %v814_v8  ;;  %v3915_v8 = vld [vmem:[%s5885_s1 + $0x188] sm:$0xff] }
 0x15d   : > { %v822_v3 = vrot.slane %v4938_v30, 1  ;;  %2561 = vmatpush.bf16.msra.mxu2 %v3915_v8 }
 0x15e   : > { %v2363_v27 = vpop.f32.mrf.mxu0  ;;  %2063 = vmatmul.bf16.gmra.mxu1 %v815_v45  ;;  %2176 = vmatmul.bf16.gmra.mxu2 %v4848_v54  ;;  %v4964_v2 = vadd.f32 %v2360_v24, %v2248_v35  ;;  %v1018_v45 = vrot.slane %v4971_v39, 1  ;;  %v1019_v35 = vrot.slane %v4968_v48, 2  ;;  %v4976_v54 = vpop.f32.mrf.mxu3  ;;  %v4980_v24 = vsel %vm890_vm3, %v924_v56, %v926_v29 }
 0x160   : > { %6001 = vst [vmem:[#allocation60_spill] sm:$0xff] %v4964_v2  ;;  %v823_v2 = vsel %vm699_vm4, %v818_v60, %v822_v3 }
 0x161   : > { %2402 = vmatmul.bf16.gmra.mxu0 %v1017_v33  ;;  %v2137_v40 = vpop.f32.mrf.mxu2  ;;  %v1020_v33 = vor.u32 %v1019_v35, %v1018_v45  ;;  %v5007_v45 = vshll.u32 %v4493_v21, 16  ;;  %v5010_v35 = vshrl.u32 %v4493_v21, 16 }
 0x162   : > { %v2138_v10 = vadd.f32 %v2137_v40, %v2025_v42 }
 0x163   : > { %v2026_v5 = vpop.f32.mrf.mxu1 }
 0x164   : > { %v2251_v17 = vadd.f32 %v4889_v46, %v2138_v10  ;;  %v2027_v46 = vadd.f32 %v2026_v5, %v4772_v15  ;;  %v3923_v15 = vld [vmem:[%s5885_s1 + $0x1c8] sm:$0xff] }
 0x165   : > { %2304 = vmatmul.bf16.gmra.mxu3 %v4980_v24 }
 0x166   : > { %v2365_v6 = vpop.f32.mrf.mxu0  ;;  %v4982_v44 = vadd.f32 %v2363_v27, %v2251_v17  ;;  %v1021_v27 = vsel %vm958_vm5, %v1016_v22, %v1020_v33  ;;  %v4994_v17 = vpop.f32.mrf.mxu3  ;;  %2674 = vmatpush.bf16.msra.mxu3 %v3923_v15  ;;  %v830_v15 = vrot.slane %v4968_v48, 1 }
 0x169   : > { %v2139_v42 = vpop.f32.mrf.mxu2 }
 0x16a   : > { %v2140_v40 = vadd.f32 %v2139_v42, %v2027_v46 }
 0x16b   : > { %v2029_v10 = vpop.f32.mrf.mxu1 }
 0x16c   : > { %v2253_v7 = vadd.f32 %v4910_v18, %v2140_v40  ;;  %v3907_v18 = vld [vmem:[%s5885_s1 + $0x148] sm:$0xff]  ;;  %v2030_v22 = vadd.f32 %v2029_v10, %v4565_v23  ;;  %v928_v10 = vrot.slane %v4372_v53, 1 }
 0x16d   : > { %2448 = vmatpush.bf16.msra.mxu1 %v3907_v18  ;;  %v3931_v23 = vld [vmem:[%s5885_s1 + $0x208] sm:$0xff] }
 0x16e   : > { %v2368_v56 = vpop.f32.mrf.mxu0  ;;  %2068 = vmatmul.bf16.gmra.mxu1 %v823_v2  ;;  %2181 = vmatmul.bf16.gmra.mxu2 %v4878_v61  ;;  %v5003_v5 = vadd.f32 %v2365_v6, %v2253_v7  ;;  %v1022_v7 = vrot.slane %v5010_v35, 1  ;;  %v1023_v6 = vrot.slane %v5007_v45, 2  ;;  %v5015_v40 = vpop.f32.mrf.mxu3 }
 0x16f   : > { %2787 = vmatpush.bf16.msra.mxu0 %v3931_v23 }
 0x170   : > { %6002 = vst [vmem:[#allocation61_spill] sm:$0xff] %v5003_v5 }
 0x171   : > { %2407 = vmatmul.bf16.gmra.mxu0 %v1021_v27  ;;  %v2142_v2 = vpop.f32.mrf.mxu2  ;;  %v5022_v27 = vsel %vm890_vm3, %v926_v29, %v928_v10 }
 0x172   : > { %v2143_v61 = vadd.f32 %v2142_v2, %v2030_v22  ;;  %v1024_v22 = vor.u32 %v1023_v6, %v1022_v7  ;;  %v5043_v7 = vshrl.u32 %v4329_v14, 16 }
 0x173   : > { %v2031_v60 = vpop.f32.mrf.mxu1 }
 0x174   : > { %v2256_v46 = vadd.f32 %v4931_v16, %v2143_v61  ;;  %v826_v16 = vor.u32 %v4941_v34, %v822_v3  ;;  %v2032_v18 = vadd.f32 %v2031_v60, %v4580_v36  ;;  %v5040_v60 = vshll.u32 %v4329_v14, 16 }
 0x175   : > { %2309 = vmatmul.bf16.gmra.mxu3 %v5022_v27 }
 0x176   : > { %v2370_v42 = vpop.f32.mrf.mxu0  ;;  %v5024_v8 = vadd.f32 %v2368_v56, %v2256_v46  ;;  %v831_v21 = vsel %vm699_vm4, %v826_v16, %v830_v15  ;;  %v1025_v56 = vsel %vm958_vm5, %v1020_v33, %v1024_v22  ;;  %v5033_v46 = vpop.f32.mrf.mxu3 }
 0x178   : > { %6003 = vst [vmem:[#allocation62_spill] sm:$0xff] %v5024_v8 }
 0x179   : > { %v2144_v2 = vpop.f32.mrf.mxu2 }
 0x17a   : > { %v2145_v61 = vadd.f32 %v2144_v2, %v2032_v18 }
 0x17b   : > { %v2034_v5 = vpop.f32.mrf.mxu1 }
 0x17c   : > { %v2258_v23 = vadd.f32 %v4946_v9, %v2145_v61  ;;  %v2035_v36 = vadd.f32 %v2034_v5, %v4595_v50  ;;  %v5051_v50 = vrot.slane %v4416_v32, 1  ;;  %v834_v61 = vor.u32 %v4971_v39, %v830_v15 }
 0x17e   : > { %v2373_v29 = vpop.f32.mrf.mxu0  ;;  %2073 = vmatmul.bf16.gmra.mxu1 %v831_v21  ;;  %2186 = vmatmul.bf16.gmra.mxu2 %v4917_v59  ;;  %v5036_v3 = vadd.f32 %v2370_v42, %v2258_v23  ;;  %v1026_v59 = vrot.slane %v5043_v7, 1  ;;  %v1027_v42 = vrot.slane %v5040_v60, 2  ;;  %v5048_v18 = vpop.f32.mrf.mxu3  ;;  %v5055_v5 = vsel %vm890_vm3, %v928_v10, %v5051_v50 }
 0x180   : > { %6004 = vst [vmem:[#allocation63_spill] sm:$0xff] %v5036_v3 }
 0x181   : > { %2412 = vmatmul.bf16.gmra.mxu0 %v1025_v56  ;;  %v2147_v9 = vpop.f32.mrf.mxu2  ;;  %v1028_v56 = vor.u32 %v1027_v42, %v1026_v59  ;;  %v5073_v42 = vshll.u32 %v4372_v53, 16 }
 0x182   : > { %v2148_v6 = vadd.f32 %v2147_v9, %v2035_v36  ;;  %v378_v36 = vld [vmem:[%s4245_s9 + $0xa0] sm:$0xf]  ;;  %s252_s9 = scalar_lea.vmem %s5888_s4, %s3475_s8 }
 0x183   : > { %v2036_v33 = vpop.f32.mrf.mxu1 }
 0x184   : > { %v2261_v16 = vadd.f32 %v4961_v26, %v2148_v6  ;;  %v838_v26 = vrot.slane %v5007_v45, 1  ;;  %v2037_v23 = vadd.f32 %v2036_v33, %v4615_v4  ;;  %v460_v6 = vunpack.c.l.b16 %v378_v36 }
 0x185   : > { %2314 = vmatmul.bf16.gmra.mxu3 %v5055_v5 }
 0x186   : > { %v2375_v21 = vpop.f32.mrf.mxu0  ;;  %v5057_v2 = vadd.f32 %v2373_v29, %v2261_v16  ;;  %v839_v8 = vsel %vm699_vm4, %v834_v61, %v838_v26  ;;  %v1029_v16 = vsel %vm958_vm5, %v1024_v22, %v1028_v56  ;;  %v5067_v15 = vpop.f32.mrf.mxu3 }
 0x188   : > { %6005 = vst [vmem:[#allocation64_spill] sm:$0xff] %v5057_v2  ;;  %v481_v2 = vpack.c.b16 %v460_v6, %v460_v6  ;;  %v3914_v6 = vld [vmem:[%s5885_s1 + $0x180] sm:$0xff] }
 0x189   : > { %v2149_v9 = vpop.f32.mrf.mxu2  ;;  %2562 = vmatpush.bf16.msra.mxu2 %v3914_v6 }
 0x18a   : > { %v2150_v3 = vadd.f32 %v2149_v9, %v2037_v23  ;;  %v663_v4 = vshrl.u32 %v481_v2, 16  ;;  %v666_v33 = vshll.u32 %v481_v2, 16 }
 0x18b   : > { %v2039_v14 = vpop.f32.mrf.mxu1 }
 0x18c   : > { %v2263_v10 = vadd.f32 %v4976_v54, %v2150_v3  ;;  %v2040_v61 = vadd.f32 %v2039_v14, %v4638_v51  ;;  %v5077_v54 = vshrl.u32 %v4372_v53, 16  ;;  %v665_v22 = vrot.slane %v663_v4, 6 }
 0x18d   : > { %v668_v3 = vrot.slane %v666_v33, 7  ;;  %v1031_v14 = vrot.slane %v5073_v42, 2 }
 0x18e   : > { %v2378_v29 = vpop.f32.mrf.mxu0  ;;  %2078 = vmatmul.bf16.gmra.mxu1 %v839_v8  ;;  %2191 = vmatmul.bf16.gmra.mxu2 %v4950_v49  ;;  %v5070_v59 = vadd.f32 %v2375_v21, %v2263_v10  ;;  %v1030_v9 = vrot.slane %v5077_v54, 1  ;;  %v5084_v51 = vpop.f32.mrf.mxu3  ;;  %v3922_v10 = vld [vmem:[%s5885_s1 + $0x1c0] sm:$0xff] }
 0x18f   : > { %v669_v8 = vor.u32 %v668_v3, %v665_v22  ;;  %2675 = vmatpush.bf16.msra.mxu3 %v3922_v10  ;;  %v842_v22 = vor.u32 %v5010_v35, %v838_v26  ;;  %v846_v3 = vrot.slane %v5040_v60, 1 }
 0x190   : > { %6006 = vst [vmem:[#allocation65_spill] sm:$0xff] %v5070_v59 }
 0x191   : > { %2417 = vmatmul.bf16.gmra.mxu0 %v1029_v16  ;;  %v2152_v23 = vpop.f32.mrf.mxu2  ;;  %v670_v16 = vsel %vm482_vm0, %v4409_v25, %v669_v8  ;;  %v1032_v25 = vor.u32 %v1031_v14, %v1030_v9  ;;  %v847_v10 = vsel %vm699_vm4, %v842_v22, %v846_v3  ;;  %v5120_v14 = vshll.u32 %v4416_v32, 16 }
 0x192   : > { %v2153_v36 = vadd.f32 %v2152_v23, %v2040_v61  ;;  %v5097_v4 = vsel %vm697_vm8, %v670_v16, 0 }
 0x193   : > { %v2041_v49 = vpop.f32.mrf.mxu1  ;;  %v954_v33 = vrot.slane %v5097_v4, 1  ;;  %v1033_v26 = vsel %vm958_vm5, %v1028_v56, %v1032_v25 }
 0x194   : > { %v2266_v21 = vadd.f32 %v4994_v17, %v2153_v36  ;;  %v3906_v17 = vld [vmem:[%s5885_s1 + $0x140] sm:$0xff]  ;;  %v2042_v23 = vadd.f32 %v2041_v49, %v4658_v28 }
 0x195   : > { %2449 = vmatpush.bf16.msra.mxu1 %v3906_v17  ;;  %v955_v36 = vsel %vm890_vm3, %v5051_v50, %v954_v33  ;;  %v3930_v28 = vld [vmem:[%s5885_s1 + $0x200] sm:$0xff] }
 0x196   : > { %v2380_v2 = vpop.f32.mrf.mxu0  ;;  %v5100_v61 = vadd.f32 %v2378_v29, %v2266_v21  ;;  %2319 = vmatmul.bf16.gmra.mxu3 %v955_v36  ;;  %2788 = vmatpush.bf16.msra.mxu0 %v3930_v28 }
 0x198   : > { %6007 = vst [vmem:[#allocation66_spill] sm:$0xff] %v5100_v61  ;;  %v5110_v61 = vpop.f32.mrf.mxu3 }
 0x199   : > { %v2154_v8 = vpop.f32.mrf.mxu2 }
 0x19a   : > { %v2155_v16 = vadd.f32 %v2154_v8, %v2042_v23 }
 0x19b   : > { %v2044_v6 = vpop.f32.mrf.mxu1 }
 0x19c   : > { %v2268_v29 = vadd.f32 %v5015_v40, %v2155_v16  ;;  %v2045_v9 = vadd.f32 %v2044_v6, %v4675_v37  ;;  %v5123_v40 = vshrl.u32 %v4416_v32, 16  ;;  %v850_v16 = vor.u32 %v5043_v7, %v846_v3 }
 0x19d   : > { %v854_v6 = vrot.slane %v5073_v42, 1 }
 0x19e   : > { %v2383_v21 = vpop.f32.mrf.mxu0  ;;  %2083 = vmatmul.bf16.gmra.mxu1 %v847_v10  ;;  %2196 = vmatmul.bf16.gmra.mxu2 %v4980_v24  ;;  %v5116_v49 = vadd.f32 %v2380_v2, %v2268_v29  ;;  %v1034_v36 = vrot.slane %v5123_v40, 1  ;;  %v1035_v2 = vrot.slane %v5120_v14, 2 }
 0x1a0   : > { %6008 = vst [vmem:[#allocation67_spill] sm:$0xff] %v5116_v49  ;;  %v5128_v8 = vpop.f32.mrf.mxu3  ;;  %v1036_v29 = vor.u32 %v1035_v2, %v1034_v36 }
 0x1a1   : > { %2422 = vmatmul.bf16.gmra.mxu0 %v1033_v26  ;;  %v2157_v56 = vpop.f32.mrf.mxu2 }
 0x1a2   : > { %v2158_v17 = vadd.f32 %v2157_v56, %v2045_v9  ;;  %v855_v9 = vsel %vm699_vm4, %v850_v16, %v854_v6  ;;  %v1037_v49 = vsel %vm958_vm5, %v1032_v25, %v1036_v29  ;;  %v6012_v16 = vld [vmem:[#allocation21_spill] sm:$0xff]  ;;  %v6013_v25 = vld [vmem:[#allocation20_spill] sm:$0xff] }
 0x1a3   : > { %v2046_v22 = vpop.f32.mrf.mxu1 }
 0x1a4   : > { %v2271_v24 = vadd.f32 %v5033_v46, %v2158_v17  ;;  %v2047_v10 = vadd.f32 %v2046_v22, %v4692_v63  ;;  %v6011_v63 = vld [vmem:[#allocation47_spill] sm:$0xff] }
 0x1a6   : > { %v2385_v23 = vpop.f32.mrf.mxu0  ;;  %v5130_v37 = vadd.f32 %v2383_v21, %v2271_v24  ;;  %2324 = vmatmul.bf16.gmra.mxu3 %v954_v33  ;;  %v5941_v33 = vshrl.u32 %v5097_v4, 16  ;;  %v5942_v24 = vshll.u32 %v5097_v4, 16 }
 0x1a8   : > { %6009 = vst [vmem:[#allocation68_spill] sm:$0xff] %v5130_v37  ;;  %v5138_v21 = vpop.f32.mrf.mxu3  ;;  %v6015_v37 = vld [vmem:[#allocation22_spill] sm:$0xff] }
 0x1a9   : > { %v2159_v26 = vpop.f32.mrf.mxu2 }
 0x1aa   : > { %v2160_v28 = vadd.f32 %v2159_v26, %v2047_v10  ;;  %v1134_v10 = vrot.slane %v6012_v16, 2  ;;  %v1135_v26 = vrot.slane %v6013_v25, 3  ;;  %v858_v25 = vor.u32 %v5077_v54, %v854_v6 }
 0x1ab   : > { %v2049_v46 = vpop.f32.mrf.mxu1 }
 0x1ac   : > { %v2273_v56 = vadd.f32 %v5048_v18, %v2160_v28  ;;  %v2050_v22 = vadd.f32 %v2049_v46, %v6011_v63  ;;  %v6014_v28 = vld [vmem:[#allocation23_spill] sm:$0xff]  ;;  %v1041_v46 = vrot.slane %v5941_v33, 1 }
 0x1ae   : > { %v2388_v17 = vpop.f32.mrf.mxu0  ;;  %2088 = vmatmul.bf16.gmra.mxu1 %v855_v9  ;;  %2201 = vmatmul.bf16.gmra.mxu2 %v5022_v27  ;;  %v5141_v3 = vadd.f32 %v2385_v23, %v2273_v56  ;;  %v1137_v9 = vrot.slane %v6014_v28, 2  ;;  %v1138_v27 = vrot.slane %v6015_v37, 3  ;;  %v1044_v56 = vrot.slane %v5942_v24, 2 }
 0x1af   : > { %v862_v28 = vrot.slane %v5120_v14, 1 }
 0x1b0   : > { %6010 = vst [vmem:[#allocation69_spill] sm:$0xff] %v5141_v3  ;;  %v5155_v63 = vpop.f32.mrf.mxu3  ;;  %v1045_v3 = vor.u32 %v1044_v56, %v1041_v46  ;;  %v6018_v56 = vld [vmem:[#allocation25_spill] sm:$0xff] }
 0x1b1   : > { %2427 = vmatmul.bf16.gmra.mxu0 %v1037_v49  ;;  %v2162_v36 = vpop.f32.mrf.mxu2  ;;  %v863_v24 = vsel %vm699_vm4, %v858_v25, %v862_v28  ;;  %v6019_v25 = vld [vmem:[#allocation24_spill] sm:$0xff] }
 0x1b2   : > { %v2163_v2 = vadd.f32 %v2162_v36, %v2050_v22  ;;  %v1136_v22 = vor.u32 %v1135_v26, %v1134_v10  ;;  %v1139_v36 = vor.u32 %v1138_v27, %v1137_v9 }
 0x1b3   : > { %v2051_v18 = vpop.f32.mrf.mxu1 }
 0x1b4   : > { %v2276_v23 = vadd.f32 %v5067_v15, %v2163_v2  ;;  %v1140_v37 = vsel %vm696_vm7, %v1136_v22, %v1139_v36  ;;  %v6016_v15 = vld [vmem:[#allocation50_spill] sm:$0xff]  ;;  %v1141_v22 = vrot.slane %v6018_v56, 2 }
 0x1b5   : > { %v2052_v2 = vadd.f32 %v2051_v18, %v6016_v15  ;;  %v6017_v18 = vld [vmem:[#allocation52_spill] sm:$0xff]  ;;  %v256_v56 = vld [vmem:[%s5886_s2] sm:$0xff] }
 0x1b6   : > { %v2390_v49 = vpop.f32.mrf.mxu0  ;;  %v5157_v16 = vadd.f32 %v2388_v17, %v2276_v23  ;;  %2676 = vmatmul.bf16.vlgmr.msra.gmra.mxu3 %v1140_v37  ;;  %v1046_v17 = vsel %vm958_vm5, %v1036_v29, %v1045_v3  ;;  %vm297_vm9 = vcmp.gt.f32.partialorder %v256_v56, 0.0  ;;  %v6031_v56 = vld [vmem:[#allocation29_spill] sm:$0xff] }
 0x1b8   : > { %v5166_v9 = vpop.f32.mrf.mxu3 }
 0x1b9   : > { %v2164_v32 = vpop.f32.mrf.mxu2 }
 0x1ba   : > { %v2165_v33 = vadd.f32 %v2164_v32, %v2052_v2 }
 0x1bb   : > { %v2054_v59 = vpop.f32.mrf.mxu1 }
 0x1bc   : > { %v2278_v10 = vadd.f32 %v5084_v51, %v2165_v33  ;;  %v2055_v27 = vadd.f32 %v2054_v59, %v6017_v18  ;;  %v1142_v51 = vrot.slane %v6019_v25, 3 }
 0x1be   : > { %v2393_v26 = vpop.f32.mrf.mxu0  ;;  %2093 = vmatmul.bf16.gmra.mxu1 %v863_v24  ;;  %2206 = vmatmul.bf16.gmra.mxu2 %v5055_v5  ;;  %v5169_v6 = vadd.f32 %v2390_v49, %v2278_v10  ;;  %v1143_v24 = vor.u32 %v1142_v51, %v1141_v22  ;;  %v6021_v49 = vld [vmem:[#allocation54_spill] sm:$0xff]  ;;  %v6025_v51 = vld [vmem:[#allocation27_spill] sm:$0xff] }
 0x1c0   : > { %v5175_v37 = vpop.f32.mrf.mxu3  ;;  %v1144_v5 = vsel %vm696_vm7, %v1139_v36, %v1143_v24  ;;  %v6023_v36 = vld [vmem:[#allocation28_spill] sm:$0xff] }
 0x1c1   : > { %2432 = vmatmul.bf16.gmra.mxu0 %v1046_v17  ;;  %v2167_v23 = vpop.f32.mrf.mxu2  ;;  %v866_v17 = vor.u32 %v5123_v40, %v862_v28 }
 0x1c2   : > { %v2168_v32 = vadd.f32 %v2167_v23, %v2055_v27 }
 0x1c3   : > { %v2056_v46 = vpop.f32.mrf.mxu1 }
 0x1c4   : > { %v2281_v33 = vadd.f32 %v5110_v61, %v2168_v32  ;;  %v2057_v2 = vadd.f32 %v2056_v46, %v6021_v49 }
 0x1c6   : > { %v2395_v29 = vpop.f32.mrf.mxu0  ;;  %v5177_v15 = vadd.f32 %v2393_v26, %v2281_v33  ;;  %2681 = vmatmul.bf16.gmra.mxu3 %v1144_v5  ;;  %v1145_v33 = vrot.slane %v6025_v51, 2  ;;  %v6026_v5 = vld [vmem:[#allocation26_spill] sm:$0xff] }
 0x1c7   : > { %v1146_v49 = vrot.slane %v6026_v5, 3 }
 0x1c8   : > { %6020 = vst [vmem:[#allocation47_spill] sm:$0xff] %v5177_v15  ;;  %v5183_v61 = vpop.f32.mrf.mxu3 }
 0x1c9   : > { %v2169_v59 = vpop.f32.mrf.mxu2 }
 0x1ca   : > { %v2170_v10 = vadd.f32 %v2169_v59, %v2057_v2  ;;  %v1147_v2 = vor.u32 %v1146_v49, %v1145_v33 }
 0x1cb   : > { %v2059_v18 = vpop.f32.mrf.mxu1 }
 0x1cc   : > { %v2283_v27 = vadd.f32 %v5128_v8, %v2170_v10  ;;  %v2060_v32 = vadd.f32 %v2059_v18, %v6023_v36  ;;  %v6024_v8 = vmov 0   ;;  %v6028_v10 = vld [vmem:[#allocation6_spill] sm:$0xff]  ;;  %v6029_v18 = vld [vmem:[#allocation9_spill] sm:$0xff] }
 0x1cd   : > { %v2894_v25 = vsel %vm297_vm9, 1, %v6024_v8  ;;  %v6030_v36 = vld [vmem:[#allocation13_spill] sm:$0xff]  ;;  %v1239_v5 = vrot.slane %v6029_v18, 3 }
 0x1ce   : > { %v2398_v23 = vpop.f32.mrf.mxu0  ;;  %2098 = vmatmul.bf16.gmra.mxu1 %v866_v17  ;;  %2211 = vmatmul.bf16.gmra.mxu2 %v5051_v50  ;;  %v5186_v26 = vadd.f32 %v2395_v29, %v2283_v27  ;;  %v1068_v17 = vrot.slane %v6028_v10, 2  ;;  %v1069_v27 = vrot.slane %v6029_v18, 2 }
 0x1cf   : > { %2936 = vperm.xlu0 %4123, %v2894_v25  }
 0x1d0   : > { %6022 = vst [vmem:[#allocation21_spill] sm:$0xff] %v5186_v26  ;;  %v1070_v49 = vsel %vm695_vm6, %v1068_v17, %v1069_v27 }
 0x1d1   : > { %2437 = vmatmul.bf16.gmra.mxu0 %v1045_v3  ;;  %v2172_v46 = vpop.f32.mrf.mxu2  ;;  %v5196_v3 = vpop.f32.mrf.mxu3 }
 0x1d2   : > { %v2173_v28 = vadd.f32 %v2172_v46, %v2060_v32  ;;  %v1071_v32 = vrot.slane %v6030_v36, 2  ;;  %v1148_v46 = vsel %vm696_vm7, %v1143_v24, %v1147_v2 }
 0x1d3   : > { %v2061_v22 = vpop.f32.mrf.mxu1 }
 0x1d4   : > { %v2286_v50 = vadd.f32 %v5138_v21, %v2173_v28  ;;  %v2062_v51 = vadd.f32 %v2061_v22, %v6031_v56  ;;  %v1240_v21 = vrot.slane %v6030_v36, 3  ;;  %v1072_v24 = vsel %vm695_vm6, %v1069_v27, %v1071_v32  ;;  %v6033_v56 = vld [vmem:[#allocation33_spill] sm:$0xff]  ;;  %v258_v27 = vld [vmem:[%s5886_s2 + $0x10] sm:$0xff] }
 0x1d5   : > { %vm299_vm12 = vcmp.gt.f32.partialorder %v258_v27, 0.0 }
 0x1d6   : > { %v2400_v29 = vpop.f32.mrf.mxu0  ;;  %v5198_v59 = vadd.f32 %v2398_v23, %v2286_v50  ;;  %2686 = vmatmul.bf16.gmra.mxu3 %v1148_v46  ;;  %v257_v23 = vld [vmem:[%s5886_s2 + $0x8] sm:$0xff]  ;;  %v1241_v18 = vsel %vm1238_vm10, %v1239_v5, %v1240_v21  ;;  %v2896_v5 = vsel %vm299_vm12, 1, %v6024_v8 }
 0x1d7   : > { %vm298_vm11 = vcmp.gt.f32.partialorder %v257_v23, 0.0  ;;  %v6034_v23 = vld [vmem:[#allocation32_spill] sm:$0xff]  ;;  %2942 = vperm.xlu1 %4124, %v2896_v5  }
 0x1d8   : > { %6027 = vst [vmem:[#allocation20_spill] sm:$0xff] %v5198_v59  ;;  %v2895_v22 = vsel %vm298_vm11, 1, %v6024_v8 }
 0x1d9   : > { %v2174_v28 = vpop.f32.mrf.mxu2  ;;  %v5215_v36 = vpop.f32.mrf.mxu3  ;;  %2939 = vperm.xlu0 %4123, %v2895_v22   ;;  %v6035_v22 = vld [vmem:[#allocation31_spill] sm:$0xff] }
 0x1da   : > { %v2175_v25 = vadd.f32 %v2174_v28, %v2062_v51 }
 0x1db   : > { %v2064_v33 = vpop.f32.mrf.mxu1 }
 0x1dc   : > { %v2288_v50 = vadd.f32 %v5155_v63, %v2175_v25  ;;  %v2065_v51 = vadd.f32 %v2064_v33, %v6033_v56  ;;  %v1149_v25 = vrot.slane %v6034_v23, 2 }
 0x1de   : > { %v2403_v10 = vpop.f32.mrf.mxu0  ;;  %2450 = vmatmul.bf16.vlgmr.msra.gmra.mxu1 %v1070_v49  ;;  %2563 = vmatmul.bf16.vlgmr.msra.gmra.mxu2 %v1072_v24  ;;  %v5217_v46 = vadd.f32 %v2400_v29, %v2288_v50  ;;  %v1150_v49 = vrot.slane %v6035_v22, 3 }
 0x1e0   : > { %6032 = vst [vmem:[#allocation23_spill] sm:$0xff] %v5217_v46  ;;  %v1151_v33 = vor.u32 %v1150_v49, %v1149_v25  ;;  %v6037_v46 = vld [vmem:[#allocation16_spill] sm:$0xff] }
 0x1e1   : > { %2789 = vmatmul.bf16.vlgmr.msra.gmra.mxu0 %v1241_v18  ;;  %v2177_v17 = vpop.f32.mrf.mxu2  ;;  %v5227_v18 = vpop.f32.mrf.mxu3  ;;  %v1073_v59 = vrot.slane %v6037_v46, 2  ;;  %v1242_v26 = vrot.slane %v6037_v46, 3 }
 0x1e2   : > { %v2178_v28 = vadd.f32 %v2177_v17, %v2065_v51  ;;  %v1152_v51 = vsel %vm696_vm7, %v1147_v2, %v1151_v33  ;;  %v6038_v17 = vld [vmem:[#allocation35_spill] sm:$0xff] }
 0x1e3   : > { %v2066_v63 = vpop.f32.mrf.mxu1 }
 0x1e4   : > { %v2291_v29 = vadd.f32 %v5166_v9, %v2178_v28  ;;  %v2067_v27 = vadd.f32 %v2066_v63, %v6038_v17  ;;  %v259_v9 = vld [vmem:[%s5886_s2 + $0x18] sm:$0xff]  ;;  %v1243_v63 = vsel %vm1238_vm10, %v1240_v21, %v1242_v26 }
 0x1e5   : > { %vm300_vm13 = vcmp.gt.f32.partialorder %v259_v9, 0.0 }
 0x1e6   : > { %v2405_v50 = vpop.f32.mrf.mxu0  ;;  %v5229_v56 = vadd.f32 %v2403_v10, %v2291_v29  ;;  %2691 = vmatmul.bf16.gmra.mxu3 %v1152_v51  ;;  %v1074_v10 = vsel %vm695_vm6, %v1071_v32, %v1073_v59  ;;  %v2897_v25 = vsel %vm300_vm13, 1, %v6024_v8  ;;  %v6040_v29 = vld [vmem:[#allocation39_spill] sm:$0xff] }
 0x1e7   : > { %2945 = vperm.xlu1 %4124, %v2897_v25  }
 0x1e8   : > { %6036 = vst [vmem:[#allocation22_spill] sm:$0xff] %v5229_v56  ;;  %v6042_v56 = vld [vmem:[#allocation37_spill] sm:$0xff] }
 0x1e9   : > { %v2179_v23 = vpop.f32.mrf.mxu2  ;;  %v5242_v49 = vpop.f32.mrf.mxu3 }
 0x1ea   : > { %v2180_v28 = vadd.f32 %v2179_v23, %v2067_v27  ;;  %v6041_v23 = vld [vmem:[#allocation38_spill] sm:$0xff] }
 0x1eb   : > { %v2069_v5 = vpop.f32.mrf.mxu1  ;;  %v1153_v9 = vrot.slane %v6041_v23, 2 }
 0x1ec   : > { %v2293_v22 = vadd.f32 %v5175_v37, %v2180_v28  ;;  %v2070_v51 = vadd.f32 %v2069_v5, %v6040_v29  ;;  %v1154_v37 = vrot.slane %v6042_v56, 3  ;;  %v6044_v5 = vld [vmem:[#allocation41_spill] sm:$0xff] }
 0x1ee   : > { %v2408_v2 = vpop.f32.mrf.mxu0  ;;  %2455 = vmatmul.bf16.gmra.mxu1 %v1072_v24  ;;  %2568 = vmatmul.bf16.gmra.mxu2 %v1074_v10  ;;  %v5244_v46 = vadd.f32 %v2405_v50, %v2293_v22  ;;  %v1155_v25 = vor.u32 %v1154_v37, %v1153_v9  ;;  %v6043_v50 = vld [vmem:[#allocation19_spill] sm:$0xff] }
 0x1ef   : > { %v1075_v22 = vrot.slane %v6043_v50, 2 }
 0x1f0   : > { %6039 = vst [vmem:[#allocation50_spill] sm:$0xff] %v5244_v46 }
 0x1f1   : > { %2794 = vmatmul.bf16.gmra.mxu0 %v1243_v63  ;;  %v2182_v17 = vpop.f32.mrf.mxu2  ;;  %v5250_v15 = vpop.f32.mrf.mxu3  ;;  %v1156_v63 = vsel %vm696_vm7, %v1151_v33, %v1155_v25 }
 0x1f2   : > { %v2183_v27 = vadd.f32 %v2182_v17, %v2070_v51  ;;  %v1244_v51 = vrot.slane %v6043_v50, 3  ;;  %v262_v50 = vld [vmem:[%s5886_s2 + $0x30] sm:$0xff] }
 0x1f3   : > { %v2071_v32 = vpop.f32.mrf.mxu1  ;;  %vm303_vm14 = vcmp.gt.f32.partialorder %v262_v50, 0.0 }
 0x1f4   : > { %v2296_v28 = vadd.f32 %v5183_v61, %v2183_v27  ;;  %v2072_v29 = vadd.f32 %v2071_v32, %v6044_v5  ;;  %v1076_v61 = vsel %vm695_vm6, %v1073_v59, %v1075_v22  ;;  %v6046_v32 = vld [vmem:[#allocation45_spill] sm:$0xff] }
 0x1f6   : > { %v2410_v21 = vpop.f32.mrf.mxu0  ;;  %v5252_v24 = vadd.f32 %v2408_v2, %v2296_v28  ;;  %2696 = vmatmul.bf16.gmra.mxu3 %v1156_v63  ;;  %v1245_v2 = vsel %vm1238_vm10, %v1242_v26, %v1244_v51  ;;  %v2900_v63 = vsel %vm303_vm14, 1, %v6024_v8  ;;  %v6047_v26 = vld [vmem:[#allocation44_spill] sm:$0xff] }
 0x1f7   : > { %v1157_v5 = vrot.slane %v6047_v26, 2  ;;  %2954 = vperm.xlu0 %4123, %v2900_v63  }
 0x1f9   : > { %v2184_v17 = vpop.f32.mrf.mxu2  ;;  %v5261_v9 = vpop.f32.mrf.mxu3 }
 0x1fa   : > { %v2185_v23 = vadd.f32 %v2184_v17, %v2072_v29  ;;  %v6048_v29 = vld [vmem:[#allocation43_spill] sm:$0xff] }
 0x1fb   : > { %v2074_v56 = vpop.f32.mrf.mxu1 }
 0x1fc   : > { %v2298_v27 = vadd.f32 %v5196_v3, %v2185_v23  ;;  %v2075_v37 = vadd.f32 %v2074_v56, %v6046_v32 }
 0x1fe   : > { %v2413_v46 = vpop.f32.mrf.mxu0  ;;  %2460 = vmatmul.bf16.gmra.mxu1 %v1074_v10  ;;  %2573 = vmatmul.bf16.gmra.mxu2 %v1076_v61  ;;  %v5263_v33 = vadd.f32 %v2410_v21, %v2298_v27  ;;  %v1158_v10 = vrot.slane %v6048_v29, 3 }
 0x200   : > { %6045 = vst [vmem:[#allocation52_spill] sm:$0xff] %v5263_v33  ;;  %v1159_v56 = vor.u32 %v1158_v10, %v1157_v5 }
 0x201   : > { %2799 = vmatmul.bf16.gmra.mxu0 %v1245_v2  ;;  %v2187_v28 = vpop.f32.mrf.mxu2  ;;  %v5273_v23 = vpop.f32.mrf.mxu3  ;;  %v6049_v2 = vld [vmem:[#allocation2_spill] sm:$0xff] }
 0x202   : > { %v2188_v59 = vadd.f32 %v2187_v28, %v2075_v37  ;;  %v1077_v32 = vrot.slane %v6049_v2, 2  ;;  %v1160_v37 = vsel %vm696_vm7, %v1155_v25, %v1159_v56  ;;  %v6050_v28 = vld [vmem:[#allocation46_spill] sm:$0xff]  ;;  %v1246_v33 = vrot.slane %v6049_v2, 3 }
 0x203   : > { %v2076_v3 = vpop.f32.mrf.mxu1 }
 0x204   : > { %v2301_v21 = vadd.f32 %v5215_v36, %v2188_v59  ;;  %v2077_v50 = vadd.f32 %v2076_v3, %v6050_v28  ;;  %v260_v36 = vld [vmem:[%s5886_s2 + $0x20] sm:$0xff]  ;;  %v263_v59 = vld [vmem:[%s5886_s2 + $0x38] sm:$0xff]  ;;  %v1078_v25 = vsel %vm695_vm6, %v1075_v22, %v1077_v32 }
 0x205   : > { %vm301_vm15 = vcmp.gt.f32.partialorder %v260_v36, 0.0  ;;  %vm304_vm0 = vcmp.gt.f32.partialorder %v263_v59, 0.0  ;;  %v6052_v28 = vld [vmem:[#allocation49_spill] sm:$0xff]  ;;  %v1161_v59 = vrot.slane %v4729_v52, 2 }
 0x206   : > { %v2415_v17 = vpop.f32.mrf.mxu0  ;;  %v5275_v27 = vadd.f32 %v2413_v46, %v2301_v21  ;;  %2701 = vmatmul.bf16.gmra.mxu3 %v1160_v37  ;;  %v2898_v3 = vsel %vm301_vm15, 1, %v6024_v8  ;;  %v2901_v5 = vsel %vm304_vm0, 1, %v6024_v8  ;;  %v1247_v21 = vsel %vm1238_vm10, %v1244_v51, %v1246_v33 }
 0x207   : > { %2948 = vperm.xlu2 %4125, %v2898_v3   ;;  %2957 = vperm.xlu1 %4124, %v2901_v5  }
 0x209   : > { %v2189_v26 = vpop.f32.mrf.mxu2  ;;  %v5292_v2 = vpop.f32.mrf.mxu3 }
 0x20a   : > { %v2190_v46 = vadd.f32 %v2189_v26, %v2077_v50  ;;  %v261_v26 = vld [vmem:[%s5886_s2 + $0x28] sm:$0xff] }
 0x20b   : > { %v2079_v63 = vpop.f32.mrf.mxu1  ;;  %vm302_vm1 = vcmp.gt.f32.partialorder %v261_v26, 0.0 }
 0x20c   : > { %v2303_v29 = vadd.f32 %v5227_v18, %v2190_v46  ;;  %v2080_v22 = vadd.f32 %v2079_v63, %v6052_v28  ;;  %v2899_v51 = vsel %vm302_vm1, 1, %v6024_v8  ;;  %v6053_v46 = vld [vmem:[#allocation48_spill] sm:$0xff] }
 0x20e   : > { %v2418_v10 = vpop.f32.mrf.mxu0  ;;  %2465 = vmatmul.bf16.gmra.mxu1 %v1076_v61  ;;  %2578 = vmatmul.bf16.gmra.mxu2 %v1078_v25  ;;  %v5294_v37 = vadd.f32 %v2415_v17, %v2303_v29  ;;  %v1162_v61 = vrot.slane %v6053_v46, 3 }
 0x20f   : > { %2951 = vperm.xlu2 %4125, %v2899_v51  }
 0x210   : > { %6051 = vst [vmem:[#allocation25_spill] sm:$0xff] %v5294_v37  ;;  %v1163_v63 = vor.u32 %v1162_v61, %v1161_v59 }
 0x211   : > { %2804 = vmatmul.bf16.gmra.mxu0 %v1247_v21  ;;  %v2192_v50 = vpop.f32.mrf.mxu2  ;;  %v5304_v5 = vpop.f32.mrf.mxu3  ;;  %v6054_v21 = vld [vmem:[#allocation4_spill] sm:$0xff] }
 0x212   : > { %v2193_v18 = vadd.f32 %v2192_v50, %v2080_v22  ;;  %v1079_v28 = vrot.slane %v6054_v21, 2  ;;  %v1164_v22 = vsel %vm696_vm7, %v1159_v56, %v1163_v63  ;;  %v6055_v50 = vld [vmem:[#allocation51_spill] sm:$0xff]  ;;  %v1248_v37 = vrot.slane %v6054_v21, 3  ;;  %v6056_v21 = vld [vmem:[#allocation53_spill] sm:$0xff] }
 0x213   : > { %v2081_v36 = vpop.f32.mrf.mxu1 }
 0x214   : > { %v2306_v17 = vadd.f32 %v5242_v49, %v2193_v18  ;;  %v2082_v26 = vadd.f32 %v2081_v36, %v6055_v50  ;;  %v265_v49 = vld [vmem:[%s5886_s2 + $0x48] sm:$0xff]  ;;  %v1249_v36 = vsel %vm1238_vm10, %v1246_v33, %v1248_v37 }
 0x215   : > { %vm306_vm2 = vcmp.gt.f32.partialorder %v265_v49, 0.0 }
 0x216   : > { %v2420_v3 = vpop.f32.mrf.mxu0  ;;  %v5306_v29 = vadd.f32 %v2418_v10, %v2306_v17  ;;  %2706 = vmatmul.bf16.gmra.mxu3 %v1164_v22  ;;  %v1080_v10 = vsel %vm695_vm6, %v1077_v32, %v1079_v28  ;;  %v2903_v59 = vsel %vm306_vm2, 1, %v6024_v8  ;;  %v266_v32 = vld [vmem:[%s5886_s2 + $0x50] sm:$0xff] }
 0x217   : > { %2963 = vperm.xlu0 %4123, %v2903_v59   ;;  %vm307_vm3 = vcmp.gt.f32.partialorder %v266_v32, 0.0 }
 0x218   : > { %v2904_v33 = vsel %vm307_vm3, 1, %v6024_v8 }
 0x219   : > { %v2194_v52 = vpop.f32.mrf.mxu2  ;;  %v5319_v61 = vpop.f32.mrf.mxu3  ;;  %2966 = vperm.xlu1 %4124, %v2904_v33  }
 0x21a   : > { %v2195_v18 = vadd.f32 %v2194_v52, %v2082_v26  ;;  %v1165_v52 = vrot.slane %v4766_v1, 2 }
 0x21b   : > { %v2084_v51 = vpop.f32.mrf.mxu1 }
 0x21c   : > { %v2308_v46 = vadd.f32 %v5250_v15, %v2195_v18  ;;  %v2085_v22 = vadd.f32 %v2084_v51, %v6056_v21 }
 0x21e   : > { %v2423_v56 = vpop.f32.mrf.mxu0  ;;  %2470 = vmatmul.bf16.gmra.mxu1 %v1078_v25  ;;  %2583 = vmatmul.bf16.gmra.mxu2 %v1080_v10  ;;  %v5321_v17 = vadd.f32 %v2420_v3, %v2308_v46  ;;  %v1166_v25 = vrot.slane %v4763_v55, 3  ;;  %v6057_v46 = vld [vmem:[#allocation7_spill] sm:$0xff]  ;;  %v264_v55 = vld [vmem:[%s5886_s2 + $0x40] sm:$0xff] }
 0x21f   : > { %v1250_v32 = vrot.slane %v6057_v46, 3  ;;  %vm305_vm4 = vcmp.gt.f32.partialorder %v264_v55, 0.0 }
 0x220   : > { %v1167_v51 = vor.u32 %v1166_v25, %v1165_v52  ;;  %v2902_v33 = vsel %vm305_vm4, 1, %v6024_v8 }
 0x221   : > { %2809 = vmatmul.bf16.gmra.mxu0 %v1249_v36  ;;  %v2197_v50 = vpop.f32.mrf.mxu2  ;;  %v5331_v18 = vpop.f32.mrf.mxu3  ;;  %v1081_v36 = vrot.slane %v6057_v46, 2  ;;  %2960 = vperm.xlu2 %4125, %v2902_v33   ;;  %v6060_v46 = vld [vmem:[#allocation30_spill] sm:$0xff] }
 0x222   : > { %v2198_v26 = vadd.f32 %v2197_v50, %v2085_v22  ;;  %v1168_v21 = vsel %vm696_vm7, %v1163_v63, %v1167_v51  ;;  %v6058_v22 = vld [vmem:[#allocation55_spill] sm:$0xff] }
 0x223   : > { %v2086_v15 = vpop.f32.mrf.mxu1 }
 0x224   : > { %v2311_v3 = vadd.f32 %v5261_v9, %v2198_v26  ;;  %v2087_v50 = vadd.f32 %v2086_v15, %v6058_v22  ;;  %v1251_v15 = vsel %vm1238_vm10, %v1248_v37, %v1250_v32 }
 0x226   : > { %v2425_v49 = vpop.f32.mrf.mxu0  ;;  %v5333_v59 = vadd.f32 %v2423_v56, %v2311_v3  ;;  %2711 = vmatmul.bf16.gmra.mxu3 %v1168_v21  ;;  %v1082_v56 = vsel %vm695_vm6, %v1079_v28, %v1081_v36  ;;  %v268_v28 = vld [vmem:[%s5886_s2 + $0x60] sm:$0xff] }
 0x227   : > { %vm309_vm5 = vcmp.gt.f32.partialorder %v268_v28, 0.0 }
 0x228   : > { %v2906_v37 = vsel %vm309_vm5, 1, %v6024_v8 }
 0x229   : > { %v2199_v1 = vpop.f32.mrf.mxu2  ;;  %v5346_v25 = vpop.f32.mrf.mxu3  ;;  %2972 = vperm.xlu0 %4123, %v2906_v37  }
 0x22a   : > { %v2200_v9 = vadd.f32 %v2199_v1, %v2087_v50  ;;  %v1169_v1 = vrot.slane %v4797_v62, 2 }
 0x22b   : > { %v2089_v26 = vpop.f32.mrf.mxu1 }
 0x22c   : > { %v2313_v52 = vadd.f32 %v5273_v23, %v2200_v9  ;;  %v2090_v21 = vadd.f32 %v2089_v26, %v6060_v46 }
 0x22e   : > { %v2428_v63 = vpop.f32.mrf.mxu0  ;;  %2475 = vmatmul.bf16.gmra.mxu1 %v1080_v10  ;;  %2588 = vmatmul.bf16.gmra.mxu2 %v1082_v56  ;;  %v5348_v3 = vadd.f32 %v2425_v49, %v2313_v52  ;;  %v1170_v10 = vrot.slane %v4794_v58, 3  ;;  %v6061_v52 = vld [vmem:[#allocation11_spill] sm:$0xff] }
 0x22f   : > { %v1252_v28 = vrot.slane %v6061_v52, 3  ;;  %v269_v58 = vld [vmem:[%s5886_s2 + $0x68] sm:$0xff] }
 0x230   : > { %6059 = vst [vmem:[#allocation24_spill] sm:$0xff] %v5348_v3  ;;  %v1171_v26 = vor.u32 %v1170_v10, %v1169_v1  ;;  %vm310_vm8 = vcmp.gt.f32.partialorder %v269_v58, 0.0 }
 0x231   : > { %2814 = vmatmul.bf16.gmra.mxu0 %v1251_v15  ;;  %v2202_v22 = vpop.f32.mrf.mxu2  ;;  %v2327_v9 = vpop.f32.mrf.mxu3  ;;  %v1083_v15 = vrot.slane %v6061_v52, 2 }
 0x232   : > { %v2203_v50 = vadd.f32 %v2202_v22, %v2090_v21  ;;  %v1172_v46 = vsel %vm696_vm7, %v1167_v51, %v1171_v26  ;;  %v6062_v21 = vld [vmem:[#allocation34_spill] sm:$0xff] }
 0x233   : > { %v2091_v23 = vpop.f32.mrf.mxu1 }
 0x234   : > { %v2316_v49 = vadd.f32 %v5292_v2, %v2203_v50  ;;  %v2092_v22 = vadd.f32 %v2091_v23, %v6062_v21  ;;  %v2907_v50 = vsel %vm310_vm8, 1, %v6024_v8  ;;  %v1253_v23 = vsel %vm1238_vm10, %v1250_v32, %v1252_v28 }
 0x235   : > { %2975 = vperm.xlu1 %4124, %v2907_v50  }
 0x236   : > { %v2430_v55 = vpop.f32.mrf.mxu0  ;;  %v5358_v33 = vadd.f32 %v2428_v63, %v2316_v49  ;;  %2716 = vmatmul.bf16.gmra.mxu3 %v1172_v46  ;;  %v1084_v63 = vsel %vm695_vm6, %v1081_v36, %v1083_v15  ;;  %v267_v36 = vld [vmem:[%s5886_s2 + $0x58] sm:$0xff]  ;;  %v1173_v46 = vrot.slane %v4839_v41, 2 }
 0x237   : > { %vm308_vm9 = vcmp.gt.f32.partialorder %v267_v36, 0.0 }
 0x238   : > { %v2905_v32 = vsel %vm308_vm9, 1, %v6024_v8 }
 0x239   : > { %v2204_v3 = vpop.f32.mrf.mxu2  ;;  %v5371_v1 = vpop.f32.mrf.mxu3  ;;  %2969 = vperm.xlu2 %4125, %v2905_v32  }
 0x23a   : > { %v2205_v62 = vadd.f32 %v2204_v3, %v2092_v22  ;;  %v6063_v3 = vld [vmem:[#allocation36_spill] sm:$0xff] }
 0x23b   : > { %v2094_v2 = vpop.f32.mrf.mxu1 }
 0x23c   : > { %v2318_v37 = vadd.f32 %v5304_v5, %v2205_v62  ;;  %v2095_v49 = vadd.f32 %v2094_v2, %v6063_v3  ;;  %v6064_v2 = vld [vmem:[#allocation14_spill] sm:$0xff] }
 0x23d   : > { %v1085_v50 = vrot.slane %v6064_v2, 2 }
 0x23e   : > { %v2433_v51 = vpop.f32.mrf.mxu0  ;;  %2480 = vmatmul.bf16.gmra.mxu1 %v1082_v56  ;;  %2593 = vmatmul.bf16.gmra.mxu2 %v1084_v63  ;;  %v5373_v10 = vadd.f32 %v2430_v55, %v2318_v37  ;;  %v1174_v56 = vrot.slane %v4836_v47, 3  ;;  %v271_v47 = vld [vmem:[%s5886_s2 + $0x78] sm:$0xff] }
 0x23f   : > { %vm312_vm11 = vcmp.gt.f32.partialorder %v271_v47, 0.0 }
 0x240   : > { %v1175_v58 = vor.u32 %v1174_v56, %v1173_v46  ;;  %v2909_v36 = vsel %vm312_vm11, 1, %v6024_v8  ;;  %v6066_v56 = vld [vmem:[#allocation42_spill] sm:$0xff] }
 0x241   : > { %2819 = vmatmul.bf16.gmra.mxu0 %v1253_v23  ;;  %v2207_v9 = vpop.f32.mrf.mxu2  ;;  %v5383_v22 = vpop.f32.mrf.mxu3  ;;  %v6065_v23 = vld [vmem:[#allocation40_spill] sm:$0xff]  ;;  %2981 = vperm.xlu0 %4123, %v2909_v36  }
 0x242   : > { %v2208_v52 = vadd.f32 %v2207_v9, %v2095_v49  ;;  %v1176_v37 = vsel %vm696_vm7, %v1171_v26, %v1175_v58  ;;  %v1254_v49 = vrot.slane %v6064_v2, 3 }
 0x243   : > { %v2096_v5 = vpop.f32.mrf.mxu1 }
 0x244   : > { %v2321_v55 = vadd.f32 %v5319_v61, %v2208_v52  ;;  %v2097_v3 = vadd.f32 %v2096_v5, %v6065_v23  ;;  %v1255_v5 = vsel %vm1238_vm10, %v1252_v28, %v1254_v49  ;;  %v1177_v23 = vrot.slane %v4869_v0, 2 }
 0x246   : > { %v2435_v21 = vpop.f32.mrf.mxu0  ;;  %v5385_v62 = vadd.f32 %v2433_v51, %v2321_v55  ;;  %2721 = vmatmul.bf16.gmra.mxu3 %v1176_v37  ;;  %v1086_v51 = vsel %vm695_vm6, %v1083_v15, %v1085_v50  ;;  %v272_v15 = vld [vmem:[%s5886_s2 + $0x80] sm:$0xff] }
 0x247   : > { %vm313_vm12 = vcmp.gt.f32.partialorder %v272_v15, 0.0 }
 0x248   : > { %v2910_v28 = vsel %vm313_vm12, 1, %v6024_v8 }
 0x249   : > { %v2209_v41 = vpop.f32.mrf.mxu2  ;;  %v5398_v32 = vpop.f32.mrf.mxu3  ;;  %2984 = vperm.xlu1 %4124, %v2910_v28   ;;  %v274_v28 = vld [vmem:[%s5886_s2 + $0x90] sm:$0xff] }
 0x24a   : > { %v2210_v61 = vadd.f32 %v2209_v41, %v2097_v3  ;;  %vm315_vm14 = vcmp.gt.f32.partialorder %v274_v28, 0.0 }
 0x24b   : > { %v2099_v9 = vpop.f32.mrf.mxu1 }
 0x24c   : > { %v2323_v52 = vadd.f32 %v5331_v18, %v2210_v61  ;;  %v2100_v55 = vadd.f32 %v2099_v9, %v6066_v56  ;;  %v6067_v9 = vld [vmem:[#allocation17_spill] sm:$0xff] }
 0x24d   : > { %v1087_v36 = vrot.slane %v6067_v9, 2 }
 0x24e   : > { %v2438_v26 = vpop.f32.mrf.mxu0  ;;  %2485 = vmatmul.bf16.gmra.mxu1 %v1084_v63  ;;  %2598 = vmatmul.bf16.gmra.mxu2 %v1086_v51  ;;  %v5400_v46 = vadd.f32 %v2435_v21, %v2323_v52  ;;  %v1178_v63 = vrot.slane %v4866_v57, 3  ;;  %v270_v57 = vld [vmem:[%s5886_s2 + $0x70] sm:$0xff] }
 0x24f   : > { %vm311_vm13 = vcmp.gt.f32.partialorder %v270_v57, 0.0  ;;  %v6068_v57 = vld [vmem:[#allocation56_spill] sm:$0xff] }
 0x250   : > { %v1179_v47 = vor.u32 %v1178_v63, %v1177_v23  ;;  %v2912_v63 = vsel %vm315_vm14, 1, %v6024_v8 }
 0x251   : > { %2824 = vmatmul.bf16.gmra.mxu0 %v1255_v5  ;;  %v2212_v2 = vpop.f32.mrf.mxu2  ;;  %v5410_v41 = vpop.f32.mrf.mxu3  ;;  %v1256_v5 = vrot.slane %v6067_v9, 3  ;;  %2990 = vperm.xlu0 %4123, %v2912_v63  }
 0x252   : > { %v2213_v37 = vadd.f32 %v2212_v2, %v2100_v55  ;;  %v1180_v52 = vsel %vm696_vm7, %v1175_v58, %v1179_v47  ;;  %v2908_v55 = vsel %vm311_vm13, 1, %v6024_v8 }
 0x253   : > { %v2101_v18 = vpop.f32.mrf.mxu1  ;;  %v1257_v2 = vsel %vm1238_vm10, %v1254_v49, %v1256_v5  ;;  %2978 = vperm.xlu2 %4125, %v2908_v55   ;;  %v1181_v49 = vrot.slane %v4902_v43, 2  ;;  %v1258_v55 = vrot.slane %v4289_v38, 3 }
 0x254   : > { %v2326_v21 = vadd.f32 %v5346_v25, %v2213_v37  ;;  %v1088_v25 = vsel %vm695_vm6, %v1085_v50, %v1087_v36  ;;  %v2937_v37 = vpop.permute.xlu0 %2936 }
 0x255   : > { %vm3058_vm0 = vcmp.eq.s32.totalorder %v2937_v37, 1 }
 0x256   : > { %v2440_v3 = vpop.f32.mrf.mxu0  ;;  %v5412_v61 = vadd.f32 %v2438_v26, %v2326_v21  ;;  %2726 = vmatmul.bf16.gmra.mxu3 %v1180_v52  ;;  %v1182_v21 = vrot.slane %v4899_v20, 3  ;;  %v1089_v52 = vrot.slane %v4289_v38, 2  ;;  %v275_v20 = vld [vmem:[%s5886_s2 + $0x98] sm:$0xff] }
 0x257   : > { %vm316_vm15 = vcmp.gt.f32.partialorder %v275_v20, 0.0 }
 0x258   : > { %v2913_v28 = vsel %vm316_vm15, 1, %v6024_v8 }
 0x259   : > { %v2214_v56 = vpop.f32.mrf.mxu2  ;;  %v5423_v15 = vpop.f32.mrf.mxu3  ;;  %2993 = vperm.xlu1 %4124, %v2913_v28  }
 0x25b   : > { %v2451_v0 = vpop.f32.mrf.mxu1 }
 0x25c   : > { %v2452_v58 = vadd.f32 %v2451_v0, %v4814_v11  ;;  %v1183_v11 = vor.u32 %v1182_v21, %v1181_v49 }
 0x25e   : > { %v2790_v26 = vpop.f32.mrf.mxu0  ;;  %2490 = vmatmul.bf16.gmra.mxu1 %v1086_v51  ;;  %2603 = vmatmul.bf16.gmra.mxu2 %v1088_v25  ;;  %v1184_v56 = vsel %vm696_vm7, %v1179_v47, %v1183_v11  ;;  %v5445_v47 = vsel %vm695_vm6, %v1087_v36, %v1089_v52 }
 0x261   : > { %2829 = vmatmul.bf16.gmra.mxu0 %v1257_v2  ;;  %v2564_v18 = vpop.f32.mrf.mxu2  ;;  %v5432_v3 = vpop.f32.mrf.mxu3 }
 0x262   : > { %v2565_v50 = vadd.f32 %v2564_v18, %v2452_v58  ;;  %v2940_v18 = vpop.permute.xlu0 %2939 }
 0x263   : > { %v2453_v23 = vpop.f32.mrf.mxu1  ;;  %vm3059_vm1 = vcmp.eq.s32.totalorder %v2940_v18, 1 }
 0x264   : > { %v2678_v9 = vadd.f32 %v5371_v1, %v2565_v50  ;;  %v2454_v0 = vadd.f32 %v2453_v23, %v6068_v57 }
 0x266   : > { %v2792_v51 = vpop.f32.mrf.mxu0  ;;  %2731 = vmatmul.bf16.gmra.mxu3 %v1184_v56  ;;  %v2791_v43 = vadd.f32 %v2790_v26, %v2678_v9  ;;  %v1259_v26 = vsel %vm1238_vm10, %v1256_v5, %v1258_v55  ;;  %v2943_v5 = vpop.permute.xlu1 %2942 }
 0x267   : > { %vm3060_vm3 = vcmp.eq.s32.totalorder %v2943_v5, 1 }
 0x268   : > { %v3099_v37 = vsel %vm3058_vm0, %v2791_v43, 0.0  ;;  %v1185_v43 = vrot.slane %v4941_v34, 2  ;;  %v6070_v34 = vld [vmem:[#allocation57_spill] sm:$0xff] }
 0x269   : > { %v2566_v2 = vpop.f32.mrf.mxu2  ;;  %v5452_v63 = vpop.f32.mrf.mxu3  ;;  %v3268_v21 = vmul.f32 %v3099_v37, %v3099_v37 }
 0x26a   : > { %v2567_v58 = vadd.f32 %v2566_v2, %v2454_v0 }
 0x26b   : > { %v2456_v1 = vpop.f32.mrf.mxu1 }
 0x26c   : > { %v2680_v50 = vadd.f32 %v5383_v22, %v2567_v58  ;;  %v2457_v36 = vadd.f32 %v2456_v1, %v4850_v19  ;;  %v1186_v58 = vrot.slane %v4938_v30, 3 }
 0x26e   : > { %v2795_v23 = vpop.f32.mrf.mxu0  ;;  %v2793_v49 = vadd.f32 %v2792_v51, %v2680_v50  ;;  %2495 = vmatmul.bf16.gmra.mxu1 %v1088_v25  ;;  %2608 = vmatmul.bf16.gmra.mxu2 %v5445_v47  ;;  %v273_v25 = vld [vmem:[%s5886_s2 + $0x88] sm:$0xff]  ;;  %v1187_v50 = vor.u32 %v1186_v58, %v1185_v43 }
 0x26f   : > { %vm314_vm2 = vcmp.gt.f32.partialorder %v273_v25, 0.0  ;;  %v2946_v25 = vpop.permute.xlu1 %2945 }
 0x270   : > { %v3100_v22 = vsel %vm3059_vm1, %v2793_v49, 0.0  ;;  %v2911_v20 = vsel %vm314_vm2, 1, %v6024_v8  ;;  %vm3061_vm8 = vcmp.eq.s32.totalorder %v2946_v25, 1 }
 0x271   : > { %2834 = vmatmul.bf16.gmra.mxu0 %v1259_v26  ;;  %v3941_v9 = vpack.c.bf16 %v3100_v22, %v3099_v37  ;;  %v3222_v56 = vadd.f32 %v3100_v22, %v3099_v37  ;;  %v3269_v57 = vmul.f32 %v3100_v22, %v3100_v22  ;;  %v2569_v51 = vpop.f32.mrf.mxu2  ;;  %v5471_v28 = vpop.f32.mrf.mxu3  ;;  %2987 = vperm.xlu2 %4125, %v2911_v20   ;;  %v6069_v37 = vld [vmem:[#allocation5_spill] sm:$0xff]  ;;  %v277_v22 = vld [vmem:[%s5886_s2 + $0xa8] sm:$0xff] }
 0x272   : > { %v2570_v0 = vadd.f32 %v2569_v51, %v2457_v36  ;;  %v1091_v49 = vrot.slane %v6069_v37, 2  ;;  %v1188_v36 = vsel %vm696_vm7, %v1183_v11, %v1187_v50  ;;  %vm318_vm4 = vcmp.gt.f32.partialorder %v277_v22, 0.0  ;;  %v278_v11 = vld [vmem:[%s5886_s2 + $0xb0] sm:$0xff] }
 0x273   : > { %3942 = vst [vmem:[%s5461_s26] sm:$0xff] %v3941_v9   ;;  %v3309_v19 = vadd.f32 %v3269_v57, %v3268_v21  ;;  %v2458_v2 = vpop.f32.mrf.mxu1  ;;  %vm319_vm5 = vcmp.gt.f32.partialorder %v278_v11, 0.0  ;;  %v1189_v11 = vrot.slane %v4971_v39, 2  ;;  %v283_v39 = vld [vmem:[%s5886_s2 + $0xd8] sm:$0xff] }
 0x274   : > { %v2683_v18 = vadd.f32 %v5398_v32, %v2570_v0  ;;  %v2459_v21 = vadd.f32 %v2458_v2, %v6070_v34  ;;  %v1260_v32 = vrot.slane %v6069_v37, 3  ;;  %v2916_v20 = vsel %vm319_vm5, 1, %v6024_v8 }
 0x275   : > { %3002 = vperm.xlu1 %4124, %v2916_v20   ;;  %vm324_vm13 = vcmp.gt.f32.partialorder %v283_v39, 0.0 }
 0x276   : > { %v2797_v1 = vpop.f32.mrf.mxu0  ;;  %v2796_v26 = vadd.f32 %v2795_v23, %v2683_v18  ;;  %2736 = vmatmul.bf16.gmra.mxu3 %v1188_v36  ;;  %v2915_v23 = vsel %vm318_vm4, 1, %v6024_v8  ;;  %v1261_v18 = vsel %vm1238_vm10, %v1258_v55, %v1260_v32  ;;  %v2949_v36 = vpop.permute.xlu2 %2948 }
 0x277   : > { %2999 = vperm.xlu0 %4123, %v2915_v23   ;;  %vm3062_vm12 = vcmp.eq.s32.totalorder %v2949_v36, 1 }
 0x278   : > { %v3101_v30 = vsel %vm3060_vm3, %v2796_v26, 0.0 }
 0x279   : > { %v3223_v9 = vadd.f32 %v3222_v56, %v3101_v30  ;;  %v3270_v57 = vmul.f32 %v3101_v30, %v3101_v30  ;;  %v2571_v51 = vpop.f32.mrf.mxu2  ;;  %v5489_v56 = vsel %vm695_vm6, %v1089_v52, %v1091_v49 }
 0x27a   : > { %v2572_v5 = vadd.f32 %v2571_v51, %v2459_v21 }
 0x27b   : > { %v3310_v0 = vadd.f32 %v3309_v19, %v3270_v57  ;;  %v2461_v2 = vpop.f32.mrf.mxu1  ;;  %v5498_v19 = vpop.f32.mrf.mxu3 }
 0x27c   : > { %v2685_v43 = vadd.f32 %v5410_v41, %v2572_v5  ;;  %v280_v41 = vld [vmem:[%s5886_s2 + $0xc0] sm:$0xff]  ;;  %v2462_v52 = vadd.f32 %v2461_v2, %v4880_v31 }
 0x27d   : > { %vm321_vm9 = vcmp.gt.f32.partialorder %v280_v41, 0.0 }
 0x27e   : > { %v2800_v58 = vpop.f32.mrf.mxu0  ;;  %v2798_v26 = vadd.f32 %v2797_v1, %v2685_v43  ;;  %2500 = vmatmul.bf16.gmra.mxu1 %v5445_v47  ;;  %2613 = vmatmul.bf16.gmra.mxu2 %v5489_v56  ;;  %v2918_v1 = vsel %vm321_vm9, 1, %v6024_v8  ;;  %v281_v47 = vld [vmem:[%s5886_s2 + $0xc8] sm:$0xff]  ;;  %v6071_v43 = vld [vmem:[#allocation8_spill] sm:$0xff] }
 0x27f   : > { %3008 = vperm.xlu0 %4123, %v2918_v1   ;;  %vm322_vm11 = vcmp.gt.f32.partialorder %v281_v47, 0.0  ;;  %v1262_v41 = vrot.slane %v6071_v43, 3 }
 0x280   : > { %v3102_v38 = vsel %vm3061_vm8, %v2798_v26, 0.0  ;;  %v2919_v31 = vsel %vm322_vm11, 1, %v6024_v8 }
 0x281   : > { %2839 = vmatmul.bf16.gmra.mxu0 %v1261_v18  ;;  %v3946_v55 = vpack.c.bf16 %v3102_v38, %v3101_v30  ;;  %v3224_v22 = vadd.f32 %v3223_v9, %v3102_v38  ;;  %v3271_v34 = vmul.f32 %v3102_v38, %v3102_v38  ;;  %v2574_v21 = vpop.f32.mrf.mxu2  ;;  %v1190_v30 = vrot.slane %v4968_v48, 3  ;;  %3011 = vperm.xlu1 %4124, %v2919_v31   ;;  %v6072_v48 = vld [vmem:[#allocation58_spill] sm:$0xff] }
 0x282   : > { %v2575_v57 = vadd.f32 %v2574_v21, %v2462_v52  ;;  %v1093_v18 = vrot.slane %v6071_v43, 2  ;;  %v2952_v21 = vpop.permute.xlu2 %2951  ;;  %v292_v43 = vld [vmem:[%s5886_s2 + $0x120] sm:$0xff] }
 0x283   : > { %4038 = vst [vmem:[%s5461_s26 + $0x8] sm:$0xff] %v3946_v55   ;;  %v3311_v51 = vadd.f32 %v3310_v0, %v3271_v34  ;;  %v2463_v23 = vpop.f32.mrf.mxu1  ;;  %v5515_v25 = vpop.f32.mrf.mxu3  ;;  %v5517_v2 = vor.u32 %v1190_v30, %v1189_v11  ;;  %v284_v55 = vld [vmem:[%s5886_s2 + $0xe0] sm:$0xff]  ;;  %vm3063_vm0 = vcmp.eq.s32.totalorder %v2952_v21, 1  ;;  %vm333_vm11 = vcmp.gt.f32.partialorder %v292_v43, 0.0 }
 0x284   : > { %v2688_v9 = vadd.f32 %v5423_v15, %v2575_v57  ;;  %v2464_v26 = vadd.f32 %v2463_v23, %v6072_v48  ;;  %vm325_vm15 = vcmp.gt.f32.partialorder %v284_v55, 0.0  ;;  %v5539_v47 = vsel %vm695_vm6, %v1091_v49, %v1093_v18 }
 0x285   : > { %v1192_v0 = vsel %vm696_vm7, %v1187_v50, %v5517_v2  ;;  %v276_v50 = vld [vmem:[%s5886_s2 + $0xa0] sm:$0xff]  ;;  %v2922_v23 = vsel %vm325_vm15, 1, %v6024_v8 }
 0x286   : > { %v2802_v5 = vpop.f32.mrf.mxu0  ;;  %v2801_v20 = vadd.f32 %v2800_v58, %v2688_v9  ;;  %2741 = vmatmul.bf16.gmra.mxu3 %v1192_v0  ;;  %v2921_v58 = vsel %vm324_vm13, 1, %v6024_v8  ;;  %vm317_vm14 = vcmp.gt.f32.partialorder %v276_v50, 0.0 }
 0x287   : > { %3017 = vperm.xlu0 %4123, %v2921_v58   ;;  %v2914_v57 = vsel %vm317_vm14, 1, %v6024_v8 }
 0x288   : > { %v3103_v15 = vsel %vm3062_vm12, %v2801_v20, 0.0  ;;  %2996 = vperm.xlu2 %4125, %v2914_v57  }
 0x289   : > { %v3225_v52 = vadd.f32 %v3224_v22, %v3103_v15  ;;  %v3272_v38 = vmul.f32 %v3103_v15, %v3103_v15  ;;  %v2576_v36 = vpop.f32.mrf.mxu2  ;;  %3020 = vperm.xlu1 %4124, %v2922_v23  }
 0x28a   : > { %v2577_v34 = vadd.f32 %v2576_v36, %v2464_v26  ;;  %v2955_v26 = vpop.permute.xlu0 %2954 }
 0x28b   : > { %v3312_v1 = vadd.f32 %v3311_v51, %v3272_v38  ;;  %v2466_v22 = vpop.f32.mrf.mxu1  ;;  %v1263_v51 = vsel %vm1238_vm10, %v1260_v32, %v1262_v41  ;;  %v5549_v30 = vpop.f32.mrf.mxu3  ;;  %vm3064_vm3 = vcmp.eq.s32.totalorder %v2955_v26, 1 }
 0x28c   : > { %v2690_v31 = vadd.f32 %v5432_v3, %v2577_v34  ;;  %v286_v3 = vld [vmem:[%s5886_s2 + $0xf0] sm:$0xff]  ;;  %v2467_v37 = vadd.f32 %v2466_v22, %v4919_v12 }
 0x28d   : > { %vm327_vm1 = vcmp.gt.f32.partialorder %v286_v3, 0.0  ;;  %v6073_v22 = vld [vmem:[#allocation12_spill] sm:$0xff] }
 0x28e   : > { %v2805_v11 = vpop.f32.mrf.mxu0  ;;  %v2803_v49 = vadd.f32 %v2802_v5, %v2690_v31  ;;  %2505 = vmatmul.bf16.gmra.mxu1 %v5489_v56  ;;  %2618 = vmatmul.bf16.gmra.mxu2 %v5539_v47  ;;  %v2924_v5 = vsel %vm327_vm1, 1, %v6024_v8  ;;  %v287_v56 = vld [vmem:[%s5886_s2 + $0xf8] sm:$0xff]  ;;  %v1095_v57 = vrot.slane %v6073_v22, 2  ;;  %v1264_v31 = vrot.slane %v6073_v22, 3 }
 0x28f   : > { %3026 = vperm.xlu0 %4123, %v2924_v5   ;;  %vm328_vm2 = vcmp.gt.f32.partialorder %v287_v56, 0.0 }
 0x290   : > { %v3104_v9 = vsel %vm3063_vm0, %v2803_v49, 0.0  ;;  %v2925_v12 = vsel %vm328_vm2, 1, %v6024_v8 }
 0x291   : > { %2844 = vmatmul.bf16.gmra.mxu0 %v1263_v51  ;;  %v3951_v32 = vpack.c.bf16 %v3104_v9, %v3103_v15  ;;  %v3226_v20 = vadd.f32 %v3225_v52, %v3104_v9  ;;  %v3273_v0 = vmul.f32 %v3104_v9, %v3104_v9  ;;  %v2579_v39 = vpop.f32.mrf.mxu2  ;;  %v1193_v15 = vrot.slane %v5010_v35, 2  ;;  %3029 = vperm.xlu1 %4124, %v2925_v12   ;;  %v6074_v35 = vld [vmem:[#allocation59_spill] sm:$0xff]  ;;  %v2958_v9 = vpop.permute.xlu1 %2957 }
 0x292   : > { %v2580_v48 = vadd.f32 %v2579_v39, %v2467_v37  ;;  %v1194_v52 = vrot.slane %v5007_v45, 3  ;;  %v289_v45 = vld [vmem:[%s5886_s2 + $0x108] sm:$0xff]  ;;  %vm3065_vm8 = vcmp.eq.s32.totalorder %v2958_v9, 1 }
 0x293   : > { %4039 = vst [vmem:[%s5461_s26 + $0x10] sm:$0xff] %v3951_v32   ;;  %v3313_v38 = vadd.f32 %v3312_v1, %v3273_v0  ;;  %v2468_v36 = vpop.f32.mrf.mxu1  ;;  %v5566_v55 = vpop.f32.mrf.mxu3  ;;  %vm330_vm4 = vcmp.gt.f32.partialorder %v289_v45, 0.0  ;;  %v6075_v9 = vld [vmem:[#allocation15_spill] sm:$0xff] }
 0x294   : > { %v2693_v58 = vadd.f32 %v5452_v63, %v2580_v48  ;;  %v5568_v34 = vor.u32 %v1194_v52, %v1193_v15  ;;  %v2469_v63 = vadd.f32 %v2468_v36, %v6074_v35  ;;  %v1265_v48 = vsel %vm1238_vm10, %v1262_v41, %v1264_v31 }
 0x296   : > { %v2807_v50 = vpop.f32.mrf.mxu0  ;;  %v2806_v21 = vadd.f32 %v2805_v11, %v2693_v58  ;;  %v1196_v1 = vsel %vm696_vm7, %v5517_v2, %v5568_v34  ;;  %v2927_v11 = vsel %vm330_vm4, 1, %v6024_v8  ;;  %v290_v2 = vld [vmem:[%s5886_s2 + $0x110] sm:$0xff]  ;;  %v2930_v58 = vsel %vm333_vm11, 1, %v6024_v8 }
 0x297   : > { %2746 = vmatmul.bf16.gmra.mxu3 %v1196_v1  ;;  %3035 = vperm.xlu0 %4123, %v2927_v11   ;;  %vm331_vm5 = vcmp.gt.f32.partialorder %v290_v2, 0.0  ;;  %v2961_v1 = vpop.permute.xlu2 %2960  ;;  %v282_v11 = vld [vmem:[%s5886_s2 + $0xd0] sm:$0xff] }
 0x298   : > { %v3105_v23 = vsel %vm3064_vm3, %v2806_v21, 0.0  ;;  %v2928_v39 = vsel %vm331_vm5, 1, %v6024_v8  ;;  %vm3066_vm13 = vcmp.eq.s32.totalorder %v2961_v1, 1  ;;  %vm323_vm14 = vcmp.gt.f32.partialorder %v282_v11, 0.0  ;;  %v285_v1 = vld [vmem:[%s5886_s2 + $0xe8] sm:$0xff] }
 0x299   : > { %v3227_v51 = vadd.f32 %v3226_v20, %v3105_v23  ;;  %v3274_v49 = vmul.f32 %v3105_v23, %v3105_v23  ;;  %v2581_v3 = vpop.f32.mrf.mxu2  ;;  %v5588_v20 = vsel %vm695_vm6, %v1093_v18, %v1095_v57  ;;  %3038 = vperm.xlu1 %4124, %v2928_v39   ;;  %v279_v18 = vld [vmem:[%s5886_s2 + $0xb8] sm:$0xff]  ;;  %vm326_vm2 = vcmp.gt.f32.partialorder %v285_v1, 0.0 }
 0x29a   : > { %v2582_v37 = vadd.f32 %v2581_v3, %v2469_v63  ;;  %vm320_vm9 = vcmp.gt.f32.partialorder %v279_v18, 0.0  ;;  %v1197_v63 = vrot.slane %v5043_v7, 2  ;;  %v2920_v7 = vsel %vm323_vm14, 1, %v6024_v8 }
 0x29b   : > { %v3314_v32 = vadd.f32 %v3313_v38, %v3274_v49  ;;  %v2471_v0 = vpop.f32.mrf.mxu1  ;;  %v5597_v26 = vpop.f32.mrf.mxu3 }
 0x29c   : > { %v2695_v5 = vadd.f32 %v5471_v28, %v2582_v37  ;;  %v2917_v28 = vsel %vm320_vm9, 1, %v6024_v8  ;;  %v2472_v41 = vadd.f32 %v2471_v0, %v4952_v13  ;;  %v6076_v0 = vld [vmem:[#allocation60_spill] sm:$0xff] }
 0x29d   : > { %3005 = vperm.xlu2 %4125, %v2917_v28  }
 0x29e   : > { %v2810_v56 = vpop.f32.mrf.mxu0  ;;  %v2808_v38 = vadd.f32 %v2807_v50, %v2695_v5  ;;  %2510 = vmatmul.bf16.gmra.mxu1 %v5539_v47  ;;  %2623 = vmatmul.bf16.gmra.mxu2 %v5588_v20  ;;  %v293_v50 = vld [vmem:[%s5886_s2 + $0x128] sm:$0xff] }
 0x29f   : > { %3044 = vperm.xlu0 %4123, %v2930_v58   ;;  %vm334_vm12 = vcmp.gt.f32.partialorder %v293_v50, 0.0 }
 0x2a0   : > { %v3106_v36 = vsel %vm3065_vm8, %v2808_v38, 0.0  ;;  %v2931_v35 = vsel %vm334_vm12, 1, %v6024_v8 }
 0x2a1   : > { %2849 = vmatmul.bf16.gmra.mxu0 %v1265_v48  ;;  %v3956_v12 = vpack.c.bf16 %v3106_v36, %v3105_v23  ;;  %v3228_v15 = vadd.f32 %v3227_v51, %v3106_v36  ;;  %v3275_v52 = vmul.f32 %v3106_v36, %v3106_v36  ;;  %v2584_v47 = vpop.f32.mrf.mxu2  ;;  %v1198_v23 = vrot.slane %v5040_v60, 3  ;;  %3047 = vperm.xlu1 %4124, %v2931_v35  }
 0x2a2   : > { %v2585_v21 = vadd.f32 %v2584_v47, %v2472_v41  ;;  %v1266_v48 = vrot.slane %v6075_v9, 3  ;;  %v2964_v41 = vpop.permute.xlu0 %2963 }
 0x2a3   : > { %4040 = vst [vmem:[%s5461_s26 + $0x18] sm:$0xff] %v3956_v12   ;;  %v3315_v45 = vadd.f32 %v3314_v32, %v3275_v52  ;;  %v2473_v13 = vpop.f32.mrf.mxu1  ;;  %v5618_v3 = vpop.f32.mrf.mxu3  ;;  %v5623_v2 = vor.u32 %v1198_v23, %v1197_v63  ;;  %v1097_v32 = vrot.slane %v6075_v9, 2  ;;  %vm3067_vm1 = vcmp.eq.s32.totalorder %v2964_v41, 1 }
 0x2a4   : > { %v2698_v51 = vadd.f32 %v5498_v19, %v2585_v21  ;;  %v295_v19 = vld [vmem:[%s5886_s2 + $0x138] sm:$0xff]  ;;  %v2474_v39 = vadd.f32 %v2473_v13, %v6076_v0  ;;  %v1267_v50 = vsel %vm1238_vm10, %v1264_v31, %v1266_v48 }
 0x2a5   : > { %v1200_v60 = vsel %vm696_vm7, %v5568_v34, %v5623_v2  ;;  %3014 = vperm.xlu2 %4125, %v2920_v7   ;;  %vm336_vm15 = vcmp.gt.f32.partialorder %v295_v19, 0.0  ;;  %v296_v34 = vld [vmem:[%s5886_s2 + $0x140] sm:$0xff] }
 0x2a6   : > { %v2812_v49 = vpop.f32.mrf.mxu0  ;;  %v2811_v37 = vadd.f32 %v2810_v56, %v2698_v51  ;;  %v2933_v28 = vsel %vm336_vm15, 1, %v6024_v8  ;;  %vm337_vm0 = vcmp.gt.f32.partialorder %v296_v34, 0.0  ;;  %v2967_v51 = vpop.permute.xlu1 %2966 }
 0x2a7   : > { %2751 = vmatmul.bf16.gmra.mxu3 %v1200_v60  ;;  %3053 = vperm.xlu0 %4123, %v2933_v28   ;;  %v2934_v52 = vsel %vm337_vm0, 1, %v6024_v8  ;;  %vm3068_vm3 = vcmp.eq.s32.totalorder %v2967_v51, 1 }
 0x2a8   : > { %v3107_v5 = vsel %vm3066_vm13, %v2811_v37, 0.0  ;;  %v1202_v37 = vrot.slane %v5073_v42, 3 }
 0x2a9   : > { %v3229_v56 = vadd.f32 %v3228_v15, %v3107_v5  ;;  %v3276_v18 = vmul.f32 %v3107_v5, %v3107_v5  ;;  %v2586_v38 = vpop.f32.mrf.mxu2  ;;  %v1098_v15 = vsel %vm695_vm6, %v1095_v57, %v1097_v32  ;;  %3056 = vperm.xlu1 %4124, %v2934_v52  }
 0x2aa   : > { %v2587_v43 = vadd.f32 %v2586_v38, %v2474_v39 }
 0x2ab   : > { %v3316_v36 = vadd.f32 %v3315_v45, %v3276_v18  ;;  %v2476_v12 = vpop.f32.mrf.mxu1  ;;  %v5651_v21 = vpop.f32.mrf.mxu3 }
 0x2ac   : > { %v2700_v47 = vadd.f32 %v5515_v25, %v2587_v43  ;;  %v2923_v25 = vsel %vm326_vm2, 1, %v6024_v8  ;;  %v2477_v22 = vadd.f32 %v2476_v12, %v4982_v44  ;;  %v288_v44 = vld [vmem:[%s5886_s2 + $0x100] sm:$0xff]  ;;  %v2970_v12 = vpop.permute.xlu2 %2969 }
 0x2ad   : > { %3023 = vperm.xlu2 %4125, %v2923_v25   ;;  %vm329_vm4 = vcmp.gt.f32.partialorder %v288_v44, 0.0  ;;  %vm3069_vm5 = vcmp.eq.s32.totalorder %v2970_v12, 1  ;;  %v291_v25 = vld [vmem:[%s5886_s2 + $0x118] sm:$0xff] }
 0x2ae   : > { %v2815_v58 = vpop.f32.mrf.mxu0  ;;  %v2813_v57 = vadd.f32 %v2812_v49, %v2700_v47  ;;  %2515 = vmatmul.bf16.gmra.mxu1 %v5588_v20  ;;  %2628 = vmatmul.bf16.gmra.mxu2 %v1098_v15  ;;  %v1201_v20 = vrot.slane %v5077_v54, 2  ;;  %v2926_v18 = vsel %vm329_vm4, 1, %v6024_v8  ;;  %v6078_v54 = vld [vmem:[#allocation61_spill] sm:$0xff]  ;;  %vm332_vm8 = vcmp.gt.f32.partialorder %v291_v25, 0.0  ;;  %v2976_v12 = vpop.permute.xlu1 %2975 }
 0x2af   : > { %vm3071_vm12 = vcmp.eq.s32.totalorder %v2976_v12, 1 }
 0x2b0   : > { %v3108_v31 = vsel %vm3067_vm1, %v2813_v57, 0.0  ;;  %v1203_v0 = vor.u32 %v1202_v37, %v1201_v20 }
 0x2b1   : > { %2854 = vmatmul.bf16.gmra.mxu0 %v1267_v50  ;;  %v3961_v45 = vpack.c.bf16 %v3108_v31, %v3107_v5  ;;  %v3230_v13 = vadd.f32 %v3229_v56, %v3108_v31  ;;  %v3277_v35 = vmul.f32 %v3108_v31, %v3108_v31  ;;  %v2589_v63 = vpop.f32.mrf.mxu2  ;;  %v6077_v5 = vld [vmem:[#allocation18_spill] sm:$0xff] }
 0x2b2   : > { %v2590_v23 = vadd.f32 %v2589_v63, %v2477_v22  ;;  %v1099_v56 = vrot.slane %v6077_v5, 2  ;;  %v1204_v42 = vsel %vm696_vm7, %v5623_v2, %v1203_v0  ;;  %v1268_v28 = vrot.slane %v6077_v5, 3 }
 0x2b3   : > { %4041 = vst [vmem:[%s5461_s26 + $0x20] sm:$0xff] %v3961_v45   ;;  %v3317_v11 = vadd.f32 %v3316_v36, %v3277_v35  ;;  %v2478_v49 = vpop.f32.mrf.mxu1  ;;  %v5663_v19 = vpop.f32.mrf.mxu3 }
 0x2b4   : > { %v2703_v7 = vadd.f32 %v5549_v30, %v2590_v23  ;;  %v2479_v30 = vadd.f32 %v2478_v49, %v6078_v54  ;;  %v1100_v2 = vsel %vm695_vm6, %v1097_v32, %v1099_v56  ;;  %v1269_v1 = vsel %vm1238_vm10, %v1266_v48, %v1268_v28  ;;  %v6079_v32 = vld [vmem:[#allocation62_spill] sm:$0xff]  ;;  %v2973_v23 = vpop.permute.xlu0 %2972 }
 0x2b5   : > { %3032 = vperm.xlu2 %4125, %v2926_v18   ;;  %v1206_v49 = vrot.slane %v5120_v14, 3  ;;  %vm3070_vm9 = vcmp.eq.s32.totalorder %v2973_v23, 1  ;;  %v6080_v18 = vld [vmem:[#allocation3_spill] sm:$0xff]  ;;  %v6084_v23 = vshll.u32 %v5097_v4, 16 }
 0x2b6   : > { %v2817_v60 = vpop.f32.mrf.mxu0  ;;  %v2816_v39 = vadd.f32 %v2815_v58, %v2703_v7  ;;  %v6081_v14 = vld [vmem:[#allocation63_spill] sm:$0xff] }
 0x2b7   : > { %2756 = vmatmul.bf16.gmra.mxu3 %v1204_v42  ;;  %v1101_v42 = vrot.slane %v6080_v18, 2 }
 0x2b8   : > { %v3109_v38 = vsel %vm3068_vm3, %v2816_v39, 0.0 }
 0x2b9   : > { %v3231_v34 = vadd.f32 %v3230_v13, %v3109_v38  ;;  %v3278_v43 = vmul.f32 %v3109_v38, %v3109_v38  ;;  %v2591_v41 = vpop.f32.mrf.mxu2 }
 0x2ba   : > { %v2592_v36 = vadd.f32 %v2591_v41, %v2479_v30 }
 0x2bb   : > { %v3318_v52 = vadd.f32 %v3317_v11, %v3278_v43  ;;  %v2481_v47 = vpop.f32.mrf.mxu1  ;;  %v5685_v57 = vpop.f32.mrf.mxu3 }
 0x2bc   : > { %v2705_v58 = vadd.f32 %v5566_v55, %v2592_v36  ;;  %v2929_v55 = vsel %vm332_vm8, 1, %v6024_v8  ;;  %v2482_v31 = vadd.f32 %v2481_v47, %v6079_v32 }
 0x2bd   : > { %3041 = vperm.xlu2 %4125, %v2929_v55   ;;  %v6082_v55 = vld [vmem:[#allocation64_spill] sm:$0xff] }
 0x2be   : > { %v2820_v50 = vpop.f32.mrf.mxu0  ;;  %v2818_v22 = vadd.f32 %v2817_v60, %v2705_v58  ;;  %2520 = vmatmul.bf16.gmra.mxu1 %v1098_v15  ;;  %2633 = vmatmul.bf16.gmra.mxu2 %v1100_v2  ;;  %v1205_v15 = vrot.slane %v5123_v40, 2  ;;  %v294_v60 = vld [vmem:[%s5886_s2 + $0x130] sm:$0xff]  ;;  %v1102_v58 = vsel %vm695_vm6, %v1099_v56, %v1101_v42 }
 0x2bf   : > { %vm335_vm11 = vcmp.gt.f32.partialorder %v294_v60, 0.0 }
 0x2c0   : > { %v3110_v9 = vsel %vm3069_vm5, %v2818_v22, 0.0  ;;  %v1207_v44 = vor.u32 %v1206_v49, %v1205_v15  ;;  %v2932_v54 = vsel %vm335_vm11, 1, %v6024_v8 }
 0x2c1   : > { %2859 = vmatmul.bf16.gmra.mxu0 %v1269_v1  ;;  %v3966_v48 = vpack.c.bf16 %v3110_v9, %v3109_v38  ;;  %v3232_v45 = vadd.f32 %v3231_v34, %v3110_v9  ;;  %v3279_v13 = vmul.f32 %v3110_v9, %v3110_v9  ;;  %v2594_v35 = vpop.f32.mrf.mxu2  ;;  %v1270_v38 = vrot.slane %v6080_v18, 3 }
 0x2c2   : > { %v2595_v63 = vadd.f32 %v2594_v35, %v2482_v31  ;;  %v1208_v40 = vsel %vm696_vm7, %v1203_v0, %v1207_v44 }
 0x2c3   : > { %4042 = vst [vmem:[%s5461_s26 + $0x28] sm:$0xff] %v3966_v48   ;;  %v3319_v51 = vadd.f32 %v3318_v52, %v3279_v13  ;;  %v2483_v11 = vpop.f32.mrf.mxu1  ;;  %v5696_v7 = vpop.f32.mrf.mxu3  ;;  %v1271_v1 = vsel %vm1238_vm10, %v1268_v28, %v1270_v38  ;;  %v6083_v28 = vshrl.u32 %v5097_v4, 16 }
 0x2c4   : > { %v2708_v20 = vadd.f32 %v5597_v26, %v2595_v63  ;;  %v2484_v30 = vadd.f32 %v2483_v11, %v6081_v14  ;;  %v2979_v13 = vpop.permute.xlu2 %2978 }
 0x2c5   : > { %3050 = vperm.xlu2 %4125, %v2932_v54   ;;  %v1209_v63 = vrot.slane %v6083_v28, 2  ;;  %vm3072_vm13 = vcmp.eq.s32.totalorder %v2979_v13, 1 }
 0x2c6   : > { %v2822_v37 = vpop.f32.mrf.mxu0  ;;  %v2821_v39 = vadd.f32 %v2820_v50, %v2708_v20 }
 0x2c7   : > { %2761 = vmatmul.bf16.gmra.mxu3 %v1208_v40  ;;  %v1272_v40 = vrot.slane %v4372_v53, 3 }
 0x2c8   : > { %v3111_v26 = vsel %vm3070_vm9, %v2821_v39, 0.0  ;;  %v6085_v39 = vld [vmem:[#allocation65_spill] sm:$0xff] }
 0x2c9   : > { %v3233_v34 = vadd.f32 %v3232_v45, %v3111_v26  ;;  %v3280_v43 = vmul.f32 %v3111_v26, %v3111_v26  ;;  %v2596_v41 = vpop.f32.mrf.mxu2 }
 0x2ca   : > { %v2597_v36 = vadd.f32 %v2596_v41, %v2484_v30 }
 0x2cb   : > { %v3320_v52 = vadd.f32 %v3319_v51, %v3280_v43  ;;  %v2486_v47 = vpop.f32.mrf.mxu1  ;;  %v5713_v25 = vpop.f32.mrf.mxu3 }
 0x2cc   : > { %v2710_v0 = vadd.f32 %v5618_v3, %v2597_v36  ;;  %v2487_v32 = vadd.f32 %v2486_v47, %v6082_v55 }
 0x2ce   : > { %v2825_v50 = vpop.f32.mrf.mxu0  ;;  %v2823_v22 = vadd.f32 %v2822_v37, %v2710_v0  ;;  %2525 = vmatmul.bf16.gmra.mxu1 %v1100_v2  ;;  %2638 = vmatmul.bf16.gmra.mxu2 %v1102_v58  ;;  %v1210_v2 = vrot.slane %v6084_v23, 3  ;;  %v1103_v37 = vrot.slane %v4372_v53, 2  ;;  %v6086_v0 = vld [vmem:[#allocation66_spill] sm:$0xff]  ;;  %v6088_v23 = vld [vmem:[#allocation67_spill] sm:$0xff] }
 0x2d0   : > { %v3112_v31 = vsel %vm3071_vm12, %v2823_v22, 0.0  ;;  %v1211_v49 = vor.u32 %v1210_v2, %v1209_v63  ;;  %v1104_v36 = vsel %vm695_vm6, %v1101_v42, %v1103_v37 }
 0x2d1   : > { %2864 = vmatmul.bf16.gmra.mxu0 %v1271_v1  ;;  %v3971_v9 = vpack.c.bf16 %v3112_v31, %v3111_v26  ;;  %v3234_v56 = vadd.f32 %v3233_v34, %v3112_v31  ;;  %v3281_v48 = vmul.f32 %v3112_v31, %v3112_v31  ;;  %v2599_v3 = vpop.f32.mrf.mxu2  ;;  %v2982_v34 = vpop.permute.xlu0 %2981 }
 0x2d2   : > { %v2600_v45 = vadd.f32 %v2599_v3, %v2487_v32  ;;  %v1212_v60 = vsel %vm696_vm7, %v1207_v44, %v1211_v49  ;;  %v1273_v44 = vsel %vm1238_vm10, %v1270_v38, %v1272_v40  ;;  %vm3073_vm14 = vcmp.eq.s32.totalorder %v2982_v34, 1 }
 0x2d3   : > { %4043 = vst [vmem:[%s5461_s26 + $0x30] sm:$0xff] %v3971_v9   ;;  %v3321_v5 = vadd.f32 %v3320_v52, %v3281_v48  ;;  %v2488_v35 = vpop.f32.mrf.mxu1  ;;  %v5722_v15 = vpop.f32.mrf.mxu3  ;;  %v5736_v38 = vrot.slane %v6024_v8, 2  ;;  %v5739_v48 = vrot.slane %v6024_v8, 3 }
 0x2d4   : > { %v2713_v51 = vadd.f32 %v5651_v21, %v2600_v45  ;;  %v2489_v18 = vadd.f32 %v2488_v35, %v6085_v39  ;;  %v6087_v35 = vld [vmem:[#allocation10_spill] sm:$0xff]  ;;  %v2988_v39 = vpop.permute.xlu2 %2987 }
 0x2d5   : > { %v1215_v13 = vor.u32 %v5739_v48, %v5736_v38  ;;  %v1105_v28 = vrot.slane %v6087_v35, 2  ;;  %v1274_v8 = vrot.slane %v6087_v35, 3 }
 0x2d6   : > { %v2827_v11 = vpop.f32.mrf.mxu0  ;;  %v2826_v20 = vadd.f32 %v2825_v50, %v2713_v51 }
 0x2d7   : > { %2766 = vmatmul.bf16.gmra.mxu3 %v1212_v60  ;;  %v1216_v63 = vsel %vm696_vm7, %v1211_v49, %v1215_v13  ;;  %v1275_v49 = vsel %vm1238_vm10, %v1272_v40, %v1274_v8  ;;  %vm3075_vm7 = vcmp.eq.s32.totalorder %v2988_v39, 1 }
 0x2d8   : > { %v3113_v54 = vsel %vm3072_vm13, %v2826_v20, 0.0 }
 0x2d9   : > { %v3235_v14 = vadd.f32 %v3234_v56, %v3113_v54  ;;  %v3282_v30 = vmul.f32 %v3113_v54, %v3113_v54  ;;  %v2601_v26 = vpop.f32.mrf.mxu2 }
 0x2da   : > { %v2602_v21 = vadd.f32 %v2601_v26, %v2489_v18 }
 0x2db   : > { %v3322_v43 = vadd.f32 %v3321_v5, %v3282_v30  ;;  %v2491_v41 = vpop.f32.mrf.mxu1  ;;  %v5731_v47 = vpop.f32.mrf.mxu3 }
 0x2dc   : > { %v2715_v12 = vadd.f32 %v5663_v19, %v2602_v21  ;;  %v2492_v50 = vadd.f32 %v2491_v41, %v6086_v0  ;;  %v2985_v19 = vpop.permute.xlu1 %2984 }
 0x2dd   : > { %vm3074_vm15 = vcmp.eq.s32.totalorder %v2985_v19, 1 }
 0x2de   : > { %v2830_v52 = vpop.f32.mrf.mxu0  ;;  %v2828_v53 = vadd.f32 %v2827_v11, %v2715_v12  ;;  %2530 = vmatmul.bf16.gmra.mxu1 %v1102_v58  ;;  %2643 = vmatmul.bf16.gmra.mxu2 %v1104_v36 }
 0x2e0   : > { %v3114_v1 = vsel %vm3073_vm14, %v2828_v53, 0.0 }
 0x2e1   : > { %2869 = vmatmul.bf16.gmra.mxu0 %v1273_v44  ;;  %v3976_v22 = vpack.c.bf16 %v3114_v1, %v3113_v54  ;;  %v3236_v55 = vadd.f32 %v3235_v14, %v3114_v1  ;;  %v3283_v32 = vmul.f32 %v3114_v1, %v3114_v1  ;;  %v2604_v42 = vpop.f32.mrf.mxu2  ;;  %v1106_v14 = vsel %vm695_vm6, %v1103_v37, %v1105_v28 }
 0x2e2   : > { %v2605_v31 = vadd.f32 %v2604_v42, %v2492_v50  ;;  %v6090_v42 = vld [vmem:[#allocation69_spill] sm:$0xff] }
 0x2e3   : > { %4044 = vst [vmem:[%s5461_s26 + $0x38] sm:$0xff] %v3976_v22   ;;  %v3323_v9 = vadd.f32 %v3322_v43, %v3283_v32  ;;  %v2493_v56 = vpop.f32.mrf.mxu1  ;;  %v5742_v45 = vpop.f32.mrf.mxu3  ;;  %v6089_v43 = vld [vmem:[#allocation68_spill] sm:$0xff]  ;;  %v5761_v32 = vrot.slane %v5097_v4, 2 }
 0x2e4   : > { %v2718_v58 = vadd.f32 %v5685_v57, %v2605_v31  ;;  %v2494_v2 = vadd.f32 %v2493_v56, %v6088_v23  ;;  %v2994_v35 = vpop.permute.xlu1 %2993 }
 0x2e5   : > { %v1108_v23 = vsel %vm695_vm6, %v1105_v28, %v5761_v32  ;;  %vm3077_vm1 = vcmp.eq.s32.totalorder %v2994_v35, 1 }
 0x2e6   : > { %v2832_v3 = vpop.f32.mrf.mxu0  ;;  %v2831_v5 = vadd.f32 %v2830_v52, %v2718_v58 }
 0x2e7   : > { %2771 = vmatmul.bf16.gmra.mxu3 %v1216_v63 }
 0x2e8   : > { %v3115_v51 = vsel %vm3074_vm15, %v2831_v5, 0.0 }
 0x2e9   : > { %v3237_v11 = vadd.f32 %v3236_v55, %v3115_v51  ;;  %v3284_v20 = vmul.f32 %v3115_v51, %v3115_v51  ;;  %v2606_v57 = vpop.f32.mrf.mxu2 }
 0x2ea   : > { %v2607_v60 = vadd.f32 %v2606_v57, %v2494_v2 }
 0x2eb   : > { %v3324_v18 = vadd.f32 %v3323_v9, %v3284_v20  ;;  %v2496_v54 = vpop.f32.mrf.mxu1  ;;  %v5753_v21 = vpop.f32.mrf.mxu3  ;;  %v1276_v9 = vrot.slane %v5097_v4, 3 }
 0x2ec   : > { %v2720_v30 = vadd.f32 %v5696_v7, %v2607_v60  ;;  %v2497_v41 = vadd.f32 %v2496_v54, %v6089_v43  ;;  %v2991_v7 = vpop.permute.xlu0 %2990 }
 0x2ed   : > { %vm3076_vm0 = vcmp.eq.s32.totalorder %v2991_v7, 1  ;;  %v1131_v7 = vsel %vm695_vm6, %v5761_v32, %v5736_v38 }
 0x2ee   : > { %v2835_v26 = vpop.f32.mrf.mxu0  ;;  %v2833_v34 = vadd.f32 %v2832_v3, %v2720_v30  ;;  %2535 = vmatmul.bf16.gmra.mxu1 %v1104_v36  ;;  %2648 = vmatmul.bf16.gmra.mxu2 %v1106_v14 }
 0x2f0   : > { %v3116_v12 = vsel %vm3075_vm7, %v2833_v34, 0.0 }
 0x2f1   : > { %2874 = vmatmul.bf16.gmra.mxu0 %v1275_v49  ;;  %v3981_v52 = vpack.c.bf16 %v3116_v12, %v3115_v51  ;;  %v3238_v44 = vadd.f32 %v3237_v11, %v3116_v12  ;;  %v3285_v53 = vmul.f32 %v3116_v12, %v3116_v12  ;;  %v2609_v37 = vpop.f32.mrf.mxu2  ;;  %v1277_v11 = vsel %vm1238_vm10, %v1274_v8, %v1276_v9 }
 0x2f2   : > { %v2610_v0 = vadd.f32 %v2609_v37, %v2497_v41 }
 0x2f3   : > { %4045 = vst [vmem:[%s5461_s26 + $0x40] sm:$0xff] %v3981_v52   ;;  %v3325_v50 = vadd.f32 %v3324_v18, %v3285_v53  ;;  %v2498_v1 = vpop.f32.mrf.mxu1  ;;  %v5758_v55 = vpop.f32.mrf.mxu3 }
 0x2f4   : > { %v2723_v40 = vadd.f32 %v5713_v25, %v2610_v0  ;;  %v2499_v31 = vadd.f32 %v2498_v1, %v6090_v42  ;;  %v3000_v0 = vpop.permute.xlu0 %2999  ;;  %v1279_v1 = vsel %vm1238_vm10, %v1276_v9, %v5739_v48 }
 0x2f5   : > { %vm3079_vm3 = vcmp.eq.s32.totalorder %v3000_v0, 1  ;;  %v6094_v0 = vld [vmem:[#allocation23_spill] sm:$0xff] }
 0x2f6   : > { %v2837_v22 = vpop.f32.mrf.mxu0  ;;  %v2836_v36 = vadd.f32 %v2835_v26, %v2723_v40 }
 0x2f7   : > { %2776 = vmatmul.bf16.gmra.mxu3 %v1215_v13 }
 0x2f8   : > { %v3117_v19 = vsel %vm3076_vm0, %v2836_v36, 0.0 }
 0x2f9   : > { %v3239_v56 = vadd.f32 %v3238_v44, %v3117_v19  ;;  %v3286_v58 = vmul.f32 %v3117_v19, %v3117_v19  ;;  %v2611_v3 = vpop.f32.mrf.mxu2 }
 0x2fa   : > { %v2612_v5 = vadd.f32 %v2611_v3, %v2499_v31 }
 0x2fb   : > { %v3326_v25 = vadd.f32 %v3325_v50, %v3286_v58  ;;  %v2501_v63 = vpop.f32.mrf.mxu1  ;;  %v5769_v20 = vpop.f32.mrf.mxu3 }
 0x2fc   : > { %v2725_v2 = vadd.f32 %v5722_v15, %v2612_v5  ;;  %v2502_v13 = vadd.f32 %v2501_v63, %v5157_v16  ;;  %v2997_v15 = vpop.permute.xlu2 %2996  ;;  %v3003_v5 = vpop.permute.xlu1 %3002 }
 0x2fd   : > { %vm3078_vm2 = vcmp.eq.s32.totalorder %v2997_v15, 1  ;;  %vm3080_vm6 = vcmp.eq.s32.totalorder %v3003_v5, 1 }
 0x2fe   : > { %v2840_v51 = vpop.f32.mrf.mxu0  ;;  %v2838_v4 = vadd.f32 %v2837_v22, %v2725_v2  ;;  %2540 = vmatmul.bf16.gmra.mxu1 %v1106_v14  ;;  %2653 = vmatmul.bf16.gmra.mxu2 %v1108_v23  ;;  %v6091_v22 = vld [vmem:[#allocation47_spill] sm:$0xff]  ;;  %v6092_v2 = vld [vmem:[#allocation21_spill] sm:$0xff] }
 0x300   : > { %v3118_v57 = vsel %vm3077_vm1, %v2838_v4, 0.0 }
 0x301   : > { %2879 = vmatmul.bf16.gmra.mxu0 %v1277_v11  ;;  %v3986_v60 = vpack.c.bf16 %v3118_v57, %v3117_v19  ;;  %v3240_v39 = vadd.f32 %v3239_v56, %v3118_v57  ;;  %v3287_v18 = vmul.f32 %v3118_v57, %v3118_v57  ;;  %v2614_v28 = vpop.f32.mrf.mxu2 }
 0x302   : > { %v2615_v54 = vadd.f32 %v2614_v28, %v2502_v13 }
 0x303   : > { %4046 = vst [vmem:[%s5461_s26 + $0x48] sm:$0xff] %v3986_v60   ;;  %v3327_v30 = vadd.f32 %v3326_v25, %v3287_v18  ;;  %v2503_v26 = vpop.f32.mrf.mxu1  ;;  %v5774_v34 = vpop.f32.mrf.mxu3 }
 0x304   : > { %v2728_v8 = vadd.f32 %v5731_v47, %v2615_v54  ;;  %v2504_v43 = vadd.f32 %v2503_v26, %v5169_v6 }
 0x306   : > { %v2842_v49 = vpop.f32.mrf.mxu0  ;;  %v2841_v14 = vadd.f32 %v2840_v51, %v2728_v8  ;;  %v6093_v8 = vld [vmem:[#allocation20_spill] sm:$0xff] }
 0x308   : > { %v3119_v16 = vsel %vm3078_vm2, %v2841_v14, 0.0 }
 0x309   : > { %v3241_v41 = vadd.f32 %v3240_v39, %v3119_v16  ;;  %v3288_v12 = vmul.f32 %v3119_v16, %v3119_v16  ;;  %v2616_v52 = vpop.f32.mrf.mxu2  ;;  %v3006_v39 = vpop.permute.xlu2 %3005 }
 0x30a   : > { %v2617_v44 = vadd.f32 %v2616_v52, %v2504_v43  ;;  %vm3081_vm10 = vcmp.eq.s32.totalorder %v3006_v39, 1  ;;  %v6096_v39 = vld [vmem:[#allocation50_spill] sm:$0xff] }
 0x30b   : > { %v3328_v53 = vadd.f32 %v3327_v30, %v3288_v12  ;;  %v2506_v37 = vpop.f32.mrf.mxu1  ;;  %v5783_v6 = vpop.f32.mrf.mxu3 }
 0x30c   : > { %v2730_v47 = vadd.f32 %v5742_v45, %v2617_v44  ;;  %v2507_v36 = vadd.f32 %v2506_v37, %v6091_v22  ;;  %v3009_v12 = vpop.permute.xlu0 %3008  ;;  %v3012_v22 = vpop.permute.xlu1 %3011 }
 0x30d   : > { %vm3082_vm4 = vcmp.eq.s32.totalorder %v3009_v12, 1  ;;  %vm3083_vm5 = vcmp.eq.s32.totalorder %v3012_v22, 1 }
 0x30e   : > { %v2845_v50 = vpop.f32.mrf.mxu0  ;;  %v2843_v40 = vadd.f32 %v2842_v49, %v2730_v47  ;;  %2545 = vmatmul.bf16.gmra.mxu1 %v1108_v23  ;;  %2658 = vmatmul.bf16.gmra.mxu2 %v1131_v7 }
 0x310   : > { %v3120_v42 = vsel %vm3079_vm3, %v2843_v40, 0.0 }
 0x311   : > { %2884 = vmatmul.bf16.gmra.mxu0 %v1279_v1  ;;  %v3991_v31 = vpack.c.bf16 %v3120_v42, %v3119_v16  ;;  %v3242_v19 = vadd.f32 %v3241_v41, %v3120_v42  ;;  %v3289_v56 = vmul.f32 %v3120_v42, %v3120_v42  ;;  %v2619_v58 = vpop.f32.mrf.mxu2 }
 0x312   : > { %v2620_v45 = vadd.f32 %v2619_v58, %v2507_v36 }
 0x313   : > { %4047 = vst [vmem:[%s5461_s26 + $0x50] sm:$0xff] %v3991_v31   ;;  %v3329_v3 = vadd.f32 %v3328_v53, %v3289_v56  ;;  %v2508_v35 = vpop.f32.mrf.mxu1  ;;  %v5788_v63 = vpop.f32.mrf.mxu3 }
 0x314   : > { %v2733_v9 = vadd.f32 %v5753_v21, %v2620_v45  ;;  %v2509_v51 = vadd.f32 %v2508_v35, %v6092_v2  ;;  %v6095_v45 = vld [vmem:[#allocation22_spill] sm:$0xff]  ;;  %v3015_v2 = vpop.permute.xlu2 %3014 }
 0x315   : > { %vm3084_vm8 = vcmp.eq.s32.totalorder %v3015_v2, 1 }
 0x316   : > { %v2847_v25 = vpop.f32.mrf.mxu0  ;;  %v2846_v23 = vadd.f32 %v2845_v50, %v2733_v9 }
 0x318   : > { %v3121_v11 = vsel %vm3080_vm6, %v2846_v23, 0.0 }
 0x319   : > { %v2621_v4 = vpop.f32.mrf.mxu2  ;;  %v3243_v13 = vadd.f32 %v3242_v19, %v3121_v11  ;;  %v3290_v57 = vmul.f32 %v3121_v11, %v3121_v11 }
 0x31a   : > { %v2622_v60 = vadd.f32 %v2621_v4, %v2509_v51 }
 0x31b   : > { %v3330_v18 = vadd.f32 %v3329_v3, %v3290_v57  ;;  %v2511_v28 = vpop.f32.mrf.mxu1  ;;  %v5792_v21 = vpop.f32.mrf.mxu3 }
 0x31c   : > { %v2735_v54 = vadd.f32 %v5758_v55, %v2622_v60  ;;  %v2512_v49 = vadd.f32 %v2511_v28, %v6093_v8 }
 0x31e   : > { %v2850_v15 = vpop.f32.mrf.mxu0  ;;  %v2848_v30 = vadd.f32 %v2847_v25, %v2735_v54  ;;  %2550 = vmatmul.bf16.gmra.mxu1 %v5761_v32  ;;  %2663 = vmatmul.bf16.gmra.mxu2 %v5736_v38 }
 0x320   : > { %v3122_v26 = vsel %vm3081_vm10, %v2848_v30, 0.0 }
 0x321   : > { %2889 = vmatmul.bf16.gmra.mxu0 %v5739_v48  ;;  %v3996_v14 = vpack.c.bf16 %v3122_v26, %v3121_v11  ;;  %v3244_v43 = vadd.f32 %v3243_v13, %v3122_v26  ;;  %v3291_v16 = vmul.f32 %v3122_v26, %v3122_v26  ;;  %v2624_v41 = vpop.f32.mrf.mxu2 }
 0x322   : > { %v2625_v55 = vadd.f32 %v2624_v41, %v2512_v49 }
 0x323   : > { %4048 = vst [vmem:[%s5461_s26 + $0x58] sm:$0xff] %v3996_v14   ;;  %v3331_v52 = vadd.f32 %v3330_v18, %v3291_v16  ;;  %v2513_v44 = vpop.f32.mrf.mxu1  ;;  %v5800_v32 = vpop.f32.mrf.mxu3 }
 0x324   : > { %v2738_v53 = vadd.f32 %v5769_v20, %v2625_v55  ;;  %v2514_v7 = vadd.f32 %v2513_v44, %v6094_v0 }
 0x326   : > { %v2852_v37 = vpop.f32.mrf.mxu0  ;;  %v2851_v38 = vadd.f32 %v2850_v15, %v2738_v53 }
 0x328   : > { %v3123_v48 = vsel %vm3082_vm4, %v2851_v38, 0.0 }
 0x329   : > { %v3245_v47 = vadd.f32 %v3244_v43, %v3123_v48  ;;  %v3292_v50 = vmul.f32 %v3123_v48, %v3123_v48  ;;  %v2626_v1 = vpop.f32.mrf.mxu2 }
 0x32a   : > { %v2627_v40 = vadd.f32 %v2626_v1, %v2514_v7 }
 0x32b   : > { %v3332_v36 = vadd.f32 %v3331_v52, %v3292_v50  ;;  %v2516_v42 = vpop.f32.mrf.mxu1  ;;  %v5804_v20 = vpop.f32.mrf.mxu3 }
 0x32c   : > { %v2740_v31 = vadd.f32 %v5774_v34, %v2627_v40  ;;  %v2517_v3 = vadd.f32 %v2516_v42, %v6095_v45  ;;  %v6097_v40 = vld [vmem:[#allocation52_spill] sm:$0xff] }
 0x32e   : > { %v2855_v19 = vpop.f32.mrf.mxu0  ;;  %v2853_v56 = vadd.f32 %v2852_v37, %v2740_v31 }
 0x330   : > { %v3124_v58 = vsel %vm3083_vm5, %v2853_v56, 0.0  ;;  %vm3355_vm5 = vcmask 1040384  }
 0x331   : > { %v4001_v5 = vpack.c.bf16 %v3124_v58, %v3123_v48  ;;  %v3246_v35 = vadd.f32 %v3245_v47, %v3124_v58  ;;  %v3293_v9 = vmul.f32 %v3124_v58, %v3124_v58  ;;  %v2629_v25 = vpop.f32.mrf.mxu2  ;;  %v3021_v47 = vpop.permute.xlu1 %3020 }
 0x332   : > { %v2630_v23 = vadd.f32 %v2629_v25, %v2517_v3  ;;  %vm3086_vm11 = vcmp.eq.s32.totalorder %v3021_v47, 1  ;;  %v3024_v3 = vpop.permute.xlu2 %3023 }
 0x333   : > { %4049 = vst [vmem:[%s5461_s26 + $0x60] sm:$0xff] %v4001_v5   ;;  %v3333_v51 = vadd.f32 %v3332_v36, %v3293_v9  ;;  %v2518_v11 = vpop.f32.mrf.mxu1  ;;  %v5809_v13 = vpop.f32.mrf.mxu3  ;;  %vm3087_vm12 = vcmp.eq.s32.totalorder %v3024_v3, 1 }
 0x334   : > { %v2743_v4 = vadd.f32 %v5783_v6, %v2630_v23  ;;  %v2519_v18 = vadd.f32 %v2518_v11, %v6096_v39  ;;  %v3018_v6 = vpop.permute.xlu0 %3017 }
 0x335   : > { %vm3085_vm9 = vcmp.eq.s32.totalorder %v3018_v6, 1 }
 0x336   : > { %v2857_v34 = vpop.f32.mrf.mxu0  ;;  %v2856_v57 = vadd.f32 %v2855_v19, %v2743_v4 }
 0x338   : > { %v3125_v60 = vsel %vm3084_vm8, %v2856_v57, 0.0 }
 0x339   : > { %v3247_v28 = vadd.f32 %v3246_v35, %v3125_v60  ;;  %v3294_v54 = vmul.f32 %v3125_v60, %v3125_v60  ;;  %v2631_v15 = vpop.f32.mrf.mxu2 }
 0x33a   : > { %v2632_v30 = vadd.f32 %v2631_v15, %v2519_v18 }
 0x33b   : > { %v3334_v26 = vadd.f32 %v3333_v51, %v3294_v54  ;;  %v2521_v8 = vpop.f32.mrf.mxu1  ;;  %v5813_v43 = vpop.f32.mrf.mxu3  ;;  %v6098_v54 = vld [vmem:[#allocation25_spill] sm:$0xff] }
 0x33c   : > { %v2745_v49 = vadd.f32 %v5788_v63, %v2632_v30  ;;  %v2522_v55 = vadd.f32 %v2521_v8, %v5252_v24  ;;  %v3027_v39 = vpop.permute.xlu0 %3026 }
 0x33d   : > { %vm3088_vm13 = vcmp.eq.s32.totalorder %v3027_v39, 1 }
 0x33e   : > { %v2860_v14 = vpop.f32.mrf.mxu0  ;;  %v2858_v16 = vadd.f32 %v2857_v34, %v2745_v49 }
 0x340   : > { %v3126_v41 = vsel %vm3085_vm9, %v2858_v16, 0.0 }
 0x341   : > { %v4006_v12 = vpack.c.bf16 %v3126_v41, %v3125_v60  ;;  %v3248_v52 = vadd.f32 %v3247_v28, %v3126_v41  ;;  %v3295_v44 = vmul.f32 %v3126_v41, %v3126_v41  ;;  %v2634_v53 = vpop.f32.mrf.mxu2  ;;  %v3030_v41 = vpop.permute.xlu1 %3029 }
 0x342   : > { %v2635_v37 = vadd.f32 %v2634_v53, %v2522_v55  ;;  %vm3089_vm14 = vcmp.eq.s32.totalorder %v3030_v41, 1 }
 0x343   : > { %4050 = vst [vmem:[%s5461_s26 + $0x68] sm:$0xff] %v4006_v12   ;;  %v3335_v38 = vadd.f32 %v3334_v26, %v3295_v44  ;;  %v2523_v48 = vpop.f32.mrf.mxu1  ;;  %v5818_v7 = vpop.f32.mrf.mxu3 }
 0x344   : > { %v2748_v0 = vadd.f32 %v5792_v21, %v2635_v37  ;;  %v2524_v22 = vadd.f32 %v2523_v48, %v6097_v40  ;;  %v3036_v3 = vpop.permute.xlu0 %3035 }
 0x345   : > { %vm3091_vm7 = vcmp.eq.s32.totalorder %v3036_v3, 1 }
 0x346   : > { %v2862_v63 = vpop.f32.mrf.mxu0  ;;  %v2861_v50 = vadd.f32 %v2860_v14, %v2748_v0 }
 0x348   : > { %v3127_v1 = vsel %vm3086_vm11, %v2861_v50, 0.0 }
 0x349   : > { %v3249_v24 = vadd.f32 %v3248_v52, %v3127_v1  ;;  %v3296_v36 = vmul.f32 %v3127_v1, %v3127_v1  ;;  %v2636_v42 = vpop.f32.mrf.mxu2 }
 0x34a   : > { %v2637_v31 = vadd.f32 %v2636_v42, %v2524_v22 }
 0x34b   : > { %v3336_v19 = vadd.f32 %v3335_v38, %v3296_v36  ;;  %v2526_v56 = vpop.f32.mrf.mxu1  ;;  %v5822_v21 = vpop.f32.mrf.mxu3 }
 0x34c   : > { %v2750_v58 = vadd.f32 %v5800_v32, %v2637_v31  ;;  %v2527_v9 = vadd.f32 %v2526_v56, %v5275_v27 }
 0x34e   : > { %v2865_v45 = vpop.f32.mrf.mxu0  ;;  %v2863_v5 = vadd.f32 %v2862_v63, %v2750_v58 }
 0x350   : > { %v3128_v35 = vsel %vm3087_vm12, %v2863_v5, 0.0 }
 0x351   : > { %v4011_v25 = vpack.c.bf16 %v3128_v35, %v3127_v1  ;;  %v3250_v23 = vadd.f32 %v3249_v24, %v3128_v35  ;;  %v3297_v2 = vmul.f32 %v3128_v35, %v3128_v35  ;;  %v2639_v51 = vpop.f32.mrf.mxu2  ;;  %v3033_v1 = vpop.permute.xlu2 %3032 }
 0x352   : > { %v2640_v11 = vadd.f32 %v2639_v51, %v2527_v9  ;;  %vm3090_vm15 = vcmp.eq.s32.totalorder %v3033_v1, 1 }
 0x353   : > { %4051 = vst [vmem:[%s5461_s26 + $0x70] sm:$0xff] %v4011_v25   ;;  %v3337_v4 = vadd.f32 %v3336_v19, %v3297_v2  ;;  %v2528_v34 = vpop.f32.mrf.mxu1  ;;  %v5827_v60 = vpop.f32.mrf.mxu3 }
 0x354   : > { %v2753_v57 = vadd.f32 %v5804_v20, %v2640_v11  ;;  %v2529_v15 = vadd.f32 %v2528_v34, %v6098_v54 }
 0x356   : > { %v2867_v32 = vpop.f32.mrf.mxu0  ;;  %v2866_v18 = vadd.f32 %v2865_v45, %v2753_v57 }
 0x358   : > { %v3129_v28 = vsel %vm3088_vm13, %v2866_v18, 0.0 }
 0x359   : > { %v3251_v27 = vadd.f32 %v3250_v23, %v3129_v28  ;;  %v3298_v30 = vmul.f32 %v3129_v28, %v3129_v28  ;;  %v2641_v26 = vpop.f32.mrf.mxu2 }
 0x35a   : > { %v2642_v8 = vadd.f32 %v2641_v26, %v2529_v15 }
 0x35b   : > { %v3338_v49 = vadd.f32 %v3337_v4, %v3298_v30  ;;  %v2531_v14 = vpop.f32.mrf.mxu1  ;;  %v5831_v20 = vpop.f32.mrf.mxu3 }
 0x35c   : > { %v2755_v6 = vadd.f32 %v5809_v13, %v2642_v8  ;;  %v2532_v52 = vadd.f32 %v2531_v14, %v5306_v29 }
 0x35e   : > { %v2870_v16 = vpop.f32.mrf.mxu0  ;;  %v2868_v55 = vadd.f32 %v2867_v32, %v2755_v6  ;;  %v3039_v32 = vpop.permute.xlu1 %3038 }
 0x35f   : > { %vm3092_vm0 = vcmp.eq.s32.totalorder %v3039_v32, 1  ;;  %v3042_v6 = vpop.permute.xlu2 %3041 }
 0x360   : > { %v3130_v12 = vsel %vm3089_vm14, %v2868_v55, 0.0  ;;  %vm3093_vm1 = vcmp.eq.s32.totalorder %v3042_v6, 1 }
 0x361   : > { %v4016_v44 = vpack.c.bf16 %v3130_v12, %v3129_v28  ;;  %v3252_v53 = vadd.f32 %v3251_v27, %v3130_v12  ;;  %v3299_v37 = vmul.f32 %v3130_v12, %v3130_v12  ;;  %v2644_v38 = vpop.f32.mrf.mxu2  ;;  %v6099_v28 = vld [vmem:[#allocation24_spill] sm:$0xff] }
 0x362   : > { %v2645_v48 = vadd.f32 %v2644_v38, %v2532_v52 }
 0x363   : > { %4052 = vst [vmem:[%s5461_s26 + $0x78] sm:$0xff] %v4016_v44   ;;  %v3339_v0 = vadd.f32 %v3338_v49, %v3299_v37  ;;  %v2533_v63 = vpop.f32.mrf.mxu1  ;;  %v5836_v50 = vpop.f32.mrf.mxu3 }
 0x364   : > { %v2758_v47 = vadd.f32 %v5813_v43, %v2645_v48  ;;  %v2534_v24 = vadd.f32 %v2533_v63, %v5321_v17 }
 0x366   : > { %v2872_v13 = vpop.f32.mrf.mxu0  ;;  %v2871_v40 = vadd.f32 %v2870_v16, %v2758_v47  ;;  %v3045_v47 = vpop.permute.xlu0 %3044 }
 0x367   : > { %vm3094_vm2 = vcmp.eq.s32.totalorder %v3045_v47, 1 }
 0x368   : > { %v3131_v22 = vsel %vm3090_vm15, %v2871_v40, 0.0 }
 0x369   : > { %v3253_v29 = vadd.f32 %v3252_v53, %v3131_v22  ;;  %v3300_v36 = vmul.f32 %v3131_v22, %v3131_v22  ;;  %v2646_v42 = vpop.f32.mrf.mxu2 }
 0x36a   : > { %v2647_v31 = vadd.f32 %v2646_v42, %v2534_v24 }
 0x36b   : > { %v3340_v19 = vadd.f32 %v3339_v0, %v3300_v36  ;;  %v2536_v56 = vpop.f32.mrf.mxu1  ;;  %v5840_v43 = vpop.f32.mrf.mxu3 }
 0x36c   : > { %v2760_v58 = vadd.f32 %v5818_v7, %v2647_v31  ;;  %v2537_v9 = vadd.f32 %v2536_v56, %v5333_v59  ;;  %v3048_v56 = vpop.permute.xlu1 %3047 }
 0x36d   : > { %vm3095_vm3 = vcmp.eq.s32.totalorder %v3048_v56, 1 }
 0x36e   : > { %v2875_v45 = vpop.f32.mrf.mxu0  ;;  %v2873_v5 = vadd.f32 %v2872_v13, %v2760_v58 }
 0x370   : > { %v3132_v35 = vsel %vm3091_vm7, %v2873_v5, 0.0 }
 0x371   : > { %v4021_v25 = vpack.c.bf16 %v3132_v35, %v3131_v22  ;;  %v3254_v17 = vadd.f32 %v3253_v29, %v3132_v35  ;;  %v3301_v23 = vmul.f32 %v3132_v35, %v3132_v35  ;;  %v2649_v2 = vpop.f32.mrf.mxu2 }
 0x372   : > { %v2650_v51 = vadd.f32 %v2649_v2, %v2537_v9 }
 0x373   : > { %4053 = vst [vmem:[%s5461_s26 + $0x80] sm:$0xff] %v4021_v25   ;;  %v3341_v11 = vadd.f32 %v3340_v19, %v3301_v23  ;;  %v2538_v4 = vpop.f32.mrf.mxu1  ;;  %v5845_v57 = vpop.f32.mrf.mxu3 }
 0x374   : > { %v2763_v34 = vadd.f32 %v5822_v21, %v2650_v51  ;;  %v2539_v54 = vadd.f32 %v2538_v4, %v6099_v28  ;;  %v3051_v23 = vpop.permute.xlu2 %3050  ;;  %v3054_v28 = vpop.permute.xlu0 %3053 }
 0x375   : > { %vm3096_vm6 = vcmp.eq.s32.totalorder %v3051_v23, 1  ;;  %vm3097_vm10 = vcmp.eq.s32.totalorder %v3054_v28, 1 }
 0x376   : > { %v2877_v7 = vpop.f32.mrf.mxu0  ;;  %v2876_v39 = vadd.f32 %v2875_v45, %v2763_v34 }
 0x378   : > { %v3133_v18 = vsel %vm3092_vm0, %v2876_v39, 0.0 }
 0x379   : > { %v3255_v59 = vadd.f32 %v3254_v17, %v3133_v18  ;;  %v3302_v15 = vmul.f32 %v3133_v18, %v3133_v18  ;;  %v2651_v27 = vpop.f32.mrf.mxu2 }
 0x37a   : > { %v2652_v30 = vadd.f32 %v2651_v27, %v2539_v54 }
 0x37b   : > { %v3342_v26 = vadd.f32 %v3341_v11, %v3302_v15  ;;  %v2541_v8 = vpop.f32.mrf.mxu1  ;;  %v5849_v21 = vpop.f32.mrf.mxu3 }
 0x37c   : > { %v2765_v49 = vadd.f32 %v5827_v60, %v2652_v30  ;;  %v2542_v55 = vadd.f32 %v2541_v8, %v5358_v33 }
 0x37e   : > { %v2880_v14 = vpop.f32.mrf.mxu0  ;;  %v2878_v16 = vadd.f32 %v2877_v7, %v2765_v49 }
 0x380   : > { %v3134_v41 = vsel %vm3093_vm1, %v2878_v16, 0.0  ;;  %v3057_v16 = vpop.permute.xlu1 %3056 }
 0x381   : > { %v4026_v12 = vpack.c.bf16 %v3134_v41, %v3133_v18  ;;  %v3256_v52 = vadd.f32 %v3255_v59, %v3134_v41  ;;  %v3303_v44 = vmul.f32 %v3134_v41, %v3134_v41  ;;  %v2654_v53 = vpop.f32.mrf.mxu2  ;;  %vm3098_vm4 = vcmp.eq.s32.totalorder %v3057_v16, 1 }
 0x382   : > { %v2655_v37 = vadd.f32 %v2654_v53, %v2542_v55 }
 0x383   : > { %4054 = vst [vmem:[%s5461_s26 + $0x88] sm:$0xff] %v4026_v12   ;;  %v3343_v38 = vadd.f32 %v3342_v26, %v3303_v44  ;;  %v2543_v48 = vpop.f32.mrf.mxu1  ;;  %v2779_v63 = vpop.f32.mrf.mxu3 }
 0x384   : > { %v2768_v0 = vadd.f32 %v5831_v20, %v2655_v37  ;;  %v2544_v40 = vadd.f32 %v2543_v48, %v5373_v10 }
 0x386   : > { %v2882_v60 = vpop.f32.mrf.mxu0  ;;  %v2881_v13 = vadd.f32 %v2880_v14, %v2768_v0 }
 0x388   : > { %v3135_v1 = vsel %vm3094_vm2, %v2881_v13, 0.0 }
 0x389   : > { %v3257_v22 = vadd.f32 %v3256_v52, %v3135_v1  ;;  %v3304_v33 = vmul.f32 %v3135_v1, %v3135_v1  ;;  %v2656_v24 = vpop.f32.mrf.mxu2 }
 0x38a   : > { %v2657_v29 = vadd.f32 %v2656_v24, %v2544_v40 }
 0x38b   : > { %v3344_v36 = vadd.f32 %v3343_v38, %v3304_v33  ;;  %v2546_v42 = vpop.f32.mrf.mxu1 }
 0x38c   : > { %v2770_v31 = vadd.f32 %v5836_v50, %v2657_v29  ;;  %v2547_v45 = vadd.f32 %v2546_v42, %v5385_v62 }
 0x38e   : > { %v2885_v19 = vpop.f32.mrf.mxu0  ;;  %v2883_v20 = vadd.f32 %v2882_v60, %v2770_v31 }
 0x390   : > { %v3136_v58 = vsel %vm3095_vm3, %v2883_v20, 0.0 }
 0x391   : > { %v4031_v3 = vpack.c.bf16 %v3136_v58, %v3135_v1  ;;  %v3258_v5 = vadd.f32 %v3257_v22, %v3136_v58  ;;  %v3305_v35 = vmul.f32 %v3136_v58, %v3136_v58  ;;  %v2659_v10 = vpop.f32.mrf.mxu2 }
 0x392   : > { %v2660_v9 = vadd.f32 %v2659_v10, %v2547_v45 }
 0x393   : > { %4055 = vst [vmem:[%s5461_s26 + $0x90] sm:$0xff] %v4031_v3   ;;  %v3345_v25 = vadd.f32 %v3344_v36, %v3305_v35  ;;  %v2548_v17 = vpop.f32.mrf.mxu1 }
 0x394   : > { %v2773_v2 = vadd.f32 %v5840_v43, %v2660_v9  ;;  %v2549_v4 = vadd.f32 %v2548_v17, %v5400_v46 }
 0x396   : > { %v2887_v51 = vpop.f32.mrf.mxu0  ;;  %v2886_v50 = vadd.f32 %v2885_v19, %v2773_v2 }
 0x398   : > { %v3137_v11 = vsel %vm3096_vm6, %v2886_v50, 0.0 }
 0x399   : > { %v3259_v34 = vadd.f32 %v3258_v5, %v3137_v11  ;;  %v3306_v7 = vmul.f32 %v3137_v11, %v3137_v11  ;;  %v2661_v62 = vpop.f32.mrf.mxu2 }
 0x39a   : > { %v2662_v32 = vadd.f32 %v2661_v62, %v2549_v4 }
 0x39b   : > { %v3346_v39 = vadd.f32 %v3345_v25, %v3306_v7  ;;  %v2551_v18 = vpop.f32.mrf.mxu1 }
 0x39c   : > { %v2775_v54 = vadd.f32 %v5845_v57, %v2662_v32  ;;  %v2552_v27 = vadd.f32 %v2551_v18, %v5412_v61 }
 0x39e   : > { %v2890_v59 = vpop.f32.mrf.mxu0  ;;  %v2888_v15 = vadd.f32 %v2887_v51, %v2775_v54 }
 0x3a0   : > { %v3138_v43 = vsel %vm3097_vm10, %v2888_v15, 0.0 }
 0x3a1   : > { %v4036_v30 = vpack.c.bf16 %v3138_v43, %v3137_v11  ;;  %v3260_v26 = vadd.f32 %v3259_v34, %v3138_v43  ;;  %v3307_v8 = vmul.f32 %v3138_v43, %v3138_v43  ;;  %v2664_v46 = vpop.f32.mrf.mxu2 }
 0x3a2   : > { %v2665_v49 = vadd.f32 %v2664_v46, %v2552_v27 }
 0x3a3   : > { %4056 = vst [vmem:[%s5461_s26 + $0x98] sm:$0xff] %v4036_v30   ;;  %v3347_v14 = vadd.f32 %v3346_v39, %v3307_v8  ;;  %v2553_v6 = vpop.f32.mrf.mxu1 }
 0x3a4   : > { %v2778_v41 = vadd.f32 %v5849_v21, %v2665_v49 }
 0x3a6   : > { %v2892_v55 = vpop.f32.mrf.mxu0  ;;  %v2891_v57 = vadd.f32 %v2890_v59, %v2778_v41 }
 0x3a8   : > { %v3139_v12 = vsel %vm3098_vm4, %v2891_v57, 0.0 }
 0x3a9   : > { %v3180_v52 = vpack.c.bf16 %v3139_v12, %v3139_v12  ;;  %v3261_v44 = vadd.f32 %v3260_v26, %v3139_v12  ;;  %v3308_v61 = vmul.f32 %v3139_v12, %v3139_v12  ;;  %v2666_v53 = vpop.f32.mrf.mxu2 }
 0x3ab   : > { %3221 = vst [vmem:[%s5461_s26 + $0xa0] sm:$0xf] %v3180_v52  ;;  %v3262_v37 = vrot.slane %v3261_v44, 4  ;;  %v3348_v38 = vadd.f32 %v3347_v14, %v3308_v61 }
 0x3ad   : > { %v3263_v48 = vadd.f32 %v3262_v37, %v3261_v44  ;;  %v3349_v0 = vrot.slane %v3348_v38, 4 }
 0x3af   : > { %v3264_v60 = vrot.slane %v3263_v48, 2  ;;  %v3350_v63 = vadd.f32 %v3349_v0, %v3348_v38 }
 0x3b1   : > { %v3265_v47 = vadd.f32 %v3264_v60, %v3263_v48  ;;  %v3351_v13 = vrot.slane %v3350_v63, 2 }
 0x3b3   : > { %v3266_v1 = vrot.slane %v3265_v47, 1  ;;  %v3352_v21 = vadd.f32 %v3351_v13, %v3350_v63 }
 0x3b5   : > { %v3353_v40 = vrot.slane %v3352_v21, 1  ;;  %v3267_v22 = vadd.f32 %v3266_v1, %v3265_v47 }
 0x3b7   : > { %v3354_v33 = vadd.f32 %v3353_v40, %v3352_v21 }
 0x3b9   : > { %v3356_v24 = vsel %vm3355_vm5, %v3267_v22, %v3354_v33 }
 0x3ba   : > { %3357 = vst [vmem:[%s252_s9] sm:$0x3] %v3356_v24 }
 0x3bb PF: > { %s15_s19 = sadd.s32 1, %s4164_s19   ;;  %s6100_s15 = smov %s4156_s17 }
 0x3bc   : > { %p12_p6 = scmp.ge.s32.totalorder %s15_s19, 8   ;;  %s6101_s16 = smov %s4160_s18 }
 0x3bd   : > { %s6102_s17 = smov %s6105_s20  ;;  %s6103_s18 = smov %s6109_s21 }
 0x3be   :  { %14 = sbr.rel (!%p12_p6) target bundleno = 3 (0x3), region = 74 }

// kernel: resnet_block_forward.4
= control target key start
LH: loop header
LB: loop body
LE: loop exit
PB: predicated region body
PF: predicated region fallthrough
CT: control target
= control target key end

     0   :  { %s5506_s21 = smov 0   ;;  %s5508_s22 = smov 0   ;;  %s8630_s0 = inlined_call_operand.vmem [shape: bf16[6,328,128], index: 0, kind: input, shape index: {}]   ;;  %s8631_s1 = inlined_call_operand.vmem [shape: bf16[1152,128], index: 1, kind: input, shape index: {}]   ;;  %s8632_s2 = inlined_call_operand.vmem [shape: f32[328,1], index: 2, kind: input, shape index: {}]   ;;  %s8633_s3 = inlined_call_operand.vmem [shape: f32[2,1,128], index: 3, kind: input, shape index: {}]   ;;  %s8634_s4 = inlined_call_operand.vmem [shape: f32[2,1,128], index: 4, kind: input, shape index: {}]   ;;  %s8635_s5 = inlined_call_operand.vmem [shape: bf16[6,328,128], index: 5, kind: output, shape index: {0}]   ;;  %s8636_s6 = inlined_call_operand.vmem [shape: f32[6,2,128], index: 6, kind: output, shape index: {1}]  }
   0x1   :  { %s5510_s23 = smov 0   ;;  %s5512_s24 = smov 0  }
   0x2   :  { %s5514_s25 = smov 0  }
   0x3 LB: > { %s26_s26 = sadd.s32 1, %s5460_s23  ;;  %s29_s27 = sadd.s32 1, %s5464_s24  ;;  %s5468_s25 = sphi %s5514_s25, %s17_s25   ;;  %s5464_s24 = sphi %s5512_s24, %s9163_s24   ;;  %s5460_s23 = sphi %s5510_s23, %s9162_s23   ;;  %s5456_s22 = sphi %s5508_s22, %s9161_s22   ;;  %s5452_s21 = sphi %s5506_s21, %s9160_s21  }
   0x4   : > { %p27_p0 = scmp.ge.s32.totalorder %s26_s26, 3  ;;  %p4605_p1 = scmp.ge.s32.totalorder %s5468_s25, 1 }
   0x5   : > { %p259_p2 = scmp.lt.s32.totalorder %s5468_s25, 7 }
   0x6   : > { %s9165_s26 = smov (%p27_p0, %s26_s26), 0  ;;  %s9167_s27 = smov (!%p27_p0, %s29_s27), %s5464_s24 }
   0x7   : > { %p260_p3 = pnand %p4605_p1, %p259_p2  ;;  %p31_p4 = scmp.ge.s32.totalorder %s9167_s27, 2 }
   0x9   : > { %s9169_s27 = smov (%p31_p4, %s9167_s27), 0  ;;  %263 = sbr.rel (%p260_p3) target bundleno = 1209 (0x4b9), region = 40 }
   0xe   : > { %v360_v0 = vld [vmem:[%s8632_s2 + $0xb0] sm:$0xff]  ;;  %v358_v1 = vld [vmem:[%s8632_s2 + $0xa0] sm:$0xff]  ;;  %v8642_v3 = vmov 0   ;;  %v361_v7 = vld [vmem:[%s8632_s2 + $0xb8] sm:$0xff]  ;;  %p314_p5 = scmp.lt.s32.totalorder %s5456_s22, 1  ;;  %s305_s8 = smul.u32 3, %s5456_s22 }
   0xf   : > { %v346_v2 = vld [vmem:[%s8632_s2 + $0x40] sm:$0xff]  ;;  %5257 = vset.pattern.permute.xlu2 %v8642_v3  ;;  %5256 = vset.pattern.permute.xlu1 %v8642_v3  ;;  %vm401_vm0 = vcmp.gt.f32.partialorder %v360_v0, 0.0  ;;  %vm399_vm1 = vcmp.gt.f32.partialorder %v358_v1, 0.0  ;;  %v359_v8 = vld [vmem:[%s8632_s2 + $0xa8] sm:$0xff]  ;;  %vm402_vm3 = vcmp.gt.f32.partialorder %v361_v7, 0.0  ;;  %v349_v13 = vld [vmem:[%s8632_s2 + $0x58] sm:$0xff] }
  0x10   : > { %vm387_vm2 = vcmp.gt.f32.partialorder %v346_v2, 0.0  ;;  %5255 = vset.pattern.permute.xlu0 %v8642_v3  ;;  %v1434_v4 = vsel %vm401_vm0, 1, %v8642_v3  ;;  %v1432_v5 = vsel %vm399_vm1, 1, %v8642_v3  ;;  %v347_v9 = vld [vmem:[%s8632_s2 + $0x48] sm:$0xff]  ;;  %vm400_vm4 = vcmp.gt.f32.partialorder %v359_v8, 0.0  ;;  %s315_s16 = scalar_select %p314_p5, %s5456_s22, 1 }
  0x11   : > { %v1420_v6 = vsel %vm387_vm2, 1, %v8642_v3  ;;  %1520 = vperm.xlu1 %5256, %v1434_v4   ;;  %1514 = vperm.xlu0 %5255, %v1432_v5   ;;  %vm388_vm5 = vcmp.gt.f32.partialorder %v347_v9, 0.0  ;;  %v1435_v10 = vsel %vm402_vm3, 1, %v8642_v3  ;;  %v1433_v11 = vsel %vm400_vm4, 1, %v8642_v3  ;;  %v348_v14 = vld [vmem:[%s8632_s2 + $0x50] sm:$0xff]  ;;  %v362_v15 = vld [vmem:[%s8632_s2 + $0xc0] sm:$0xff]  ;;  %s306_s9 = sadd.s32 %s5452_s21, %s305_s8 }
  0x12   : > { %1478 = vperm.xlu2 %5257, %v1420_v6   ;;  %v1421_v12 = vsel %vm388_vm5, 1, %v8642_v3  ;;  %s5578_s30 = scalar_lea.vmem %s8633_s3, %s315_s16  ;;  %s5586_s11 = scalar_lea.vmem %s8634_s4, %s315_s16  ;;  %vm390_vm6 = vcmp.gt.f32.partialorder %v349_v13, 0.0  ;;  %vm389_vm7 = vcmp.gt.f32.partialorder %v348_v14, 0.0  ;;  %vm403_vm8 = vcmp.gt.f32.partialorder %v362_v15, 0.0  ;;  %v350_v19 = vld [vmem:[%s8632_s2 + $0x60] sm:$0xff]  ;;  %v363_v20 = vld [vmem:[%s8632_s2 + $0xc8] sm:$0xff] }
  0x13   : > { %v1423_v16 = vsel %vm390_vm6, 1, %v8642_v3  ;;  %v1422_v17 = vsel %vm389_vm7, 1, %v8642_v3  ;;  %v1436_v18 = vsel %vm403_vm8, 1, %v8642_v3  ;;  %v351_v21 = vld [vmem:[%s8632_s2 + $0x68] sm:$0xff]  ;;  %vm391_vm9 = vcmp.gt.f32.partialorder %v350_v19, 0.0  ;;  %v338_v26 = vld [vmem:[%s8632_s2] sm:$0xff] }
  0x14   : > { %vm404_vm10 = vcmp.gt.f32.partialorder %v363_v20, 0.0  ;;  %vm392_vm11 = vcmp.gt.f32.partialorder %v351_v21, 0.0  ;;  %v1424_v22 = vsel %vm391_vm9, 1, %v8642_v3  ;;  %v339_v25 = vld [vmem:[%s8632_s2 + $0x8] sm:$0xff]  ;;  %v364_v27 = vld [vmem:[%s8632_s2 + $0xd0] sm:$0xff]  ;;  %vm379_vm13 = vcmp.gt.f32.partialorder %v338_v26, 0.0 }
  0x15   : > { %v1437_v23 = vsel %vm404_vm10, 1, %v8642_v3  ;;  %v1425_v24 = vsel %vm392_vm11, 1, %v8642_v3  ;;  %vm380_vm12 = vcmp.gt.f32.partialorder %v339_v25, 0.0  ;;  %vm405_vm14 = vcmp.gt.f32.partialorder %v364_v27, 0.0  ;;  %v352_v31 = vld [vmem:[%s8632_s2 + $0x70] sm:$0xff]  ;;  %v365_v32 = vld [vmem:[%s8632_s2 + $0xd8] sm:$0xff] }
  0x16   : > { %v1413_v28 = vsel %vm380_vm12, 1, %v8642_v3  ;;  %v1412_v29 = vsel %vm379_vm13, 1, %v8642_v3  ;;  %v1438_v30 = vsel %vm405_vm14, 1, %v8642_v3  ;;  %p307_p6 = scmp.lt.s32.totalorder %s306_s9, 5  ;;  %v353_v33 = vld [vmem:[%s8632_s2 + $0x78] sm:$0xff]  ;;  %vm393_vm15 = vcmp.gt.f32.partialorder %v352_v31, 0.0 }
  0x17   : > { %vm406_vm0 = vcmp.gt.f32.partialorder %v365_v32, 0.0  ;;  %vm394_vm1 = vcmp.gt.f32.partialorder %v353_v33, 0.0  ;;  %v1426_v34 = vsel %vm393_vm15, 1, %v8642_v3  ;;  %v341_v37 = vld [vmem:[%s8632_s2 + $0x18] sm:$0xff]  ;;  %v340_v38 = vld [vmem:[%s8632_s2 + $0x10] sm:$0xff]  ;;  %v366_v39 = vld [vmem:[%s8632_s2 + $0xe0] sm:$0xff] }
  0x18   : > { %s9171_s9 = smov (!%p307_p6, %s306_s9), 5  ;;  %v1439_v35 = vsel %vm406_vm0, 1, %v8642_v3  ;;  %v1427_v36 = vsel %vm394_vm1, 1, %v8642_v3  ;;  %vm382_vm2 = vcmp.gt.f32.partialorder %v341_v37, 0.0  ;;  %vm381_vm3 = vcmp.gt.f32.partialorder %v340_v38, 0.0  ;;  %v370_v42 = vld [vmem:[%s8632_s2 + $0x100] sm:$0xff] }
  0x19   : > { %1523 = vperm.xlu1 %5256, %v1435_v10   ;;  %1517 = vperm.xlu0 %5255, %v1433_v11   ;;  %s5213_s19 = smul.u32 164, %s9171_s9  ;;  %vm407_vm4 = vcmp.gt.f32.partialorder %v366_v39, 0.0  ;;  %v1415_v40 = vsel %vm382_vm2, 1, %v8642_v3  ;;  %v1414_v41 = vsel %vm381_vm3, 1, %v8642_v3  ;;  %v371_v44 = vld [vmem:[%s8632_s2 + $0x108] sm:$0xff]  ;;  %vm411_vm5 = vcmp.gt.f32.partialorder %v370_v42, 0.0 }
  0x1a   : > { %1481 = vperm.xlu2 %5257, %v1421_v12   ;;  %v1440_v43 = vsel %vm407_vm4, 1, %v8642_v3  ;;  %v367_v46 = vld [vmem:[%s8632_s2 + $0xe8] sm:$0xff]  ;;  %v5664_v47 = vld [vmem:[%s5578_s30] ss:$0 sm:$0xff]  ;;  %vm412_vm6 = vcmp.gt.f32.partialorder %v371_v44, 0.0  ;;  %v1444_v0 = vsel %vm411_vm5, 1, %v8642_v3 }
  0x1b   : > { %s5646_s8 = scalar_lea.vmem %s8630_s0, %s5213_s19  ;;  %v5679_v55 = vld [vmem:[%s5586_s11] ss:$0 sm:$0xff]  ;;  %vm408_vm7 = vcmp.gt.f32.partialorder %v367_v46, 0.0  ;;  %v1445_v7 = vsel %vm412_vm6, 1, %v8642_v3  ;;  %v373_v8 = vld [vmem:[%s8632_s2 + $0x118] sm:$0xff]  ;;  %v372_v11 = vld [vmem:[%s8632_s2 + $0x110] sm:$0xff]  ;;  %s8416_s10 = scalar_lea.vmem %s8635_s5, %s5213_s19 }
  0x1c   : > { %v5658_v45 = vld [vmem:[%s5646_s8 + $0x58] sm:$0xff]   ;;  %v5668_v49 = vld [vmem:[%s5646_s8 + $0x50] sm:$0xff]   ;;  %v5154_v50 = vld [vmem:[%s5646_s8 + $0x20] sm:$0xff]   ;;  %v1441_v2 = vsel %vm408_vm7, 1, %v8642_v3  ;;  %vm414_vm8 = vcmp.gt.f32.partialorder %v373_v8, 0.0  ;;  %vm413_vm9 = vcmp.gt.f32.partialorder %v372_v11, 0.0 }
  0x1d   : > { %v5017_v48 = vunpack.c.l.bf16 %v5658_v45  ;;  %v5672_v51 = vld [vmem:[%s5646_s8 + $0x60] sm:$0xff]   ;;  %v5013_v52 = vunpack.c.l.bf16 %v5668_v49  ;;  %v5676_v53 = vld [vmem:[%s5646_s8 + $0x30] sm:$0xff]   ;;  %v4989_v54 = vunpack.c.l.bf16 %v5154_v50  ;;  %v4990_v56 = vunpack.c.h.bf16 %v5154_v50  ;;  %v343_v27 = vld [vmem:[%s8632_s2 + $0x28] sm:$0xff]  ;;  %s4608_s19 = sshll.u32 %s9171_s9, 1 }
  0x1e   : > { %v5021_v57 = vunpack.c.l.bf16 %v5672_v51  ;;  %v4998_v63 = vunpack.c.h.bf16 %v5676_v53  ;;  %v354_v15 = vld [vmem:[%s8632_s2 + $0x80] sm:$0xff]  ;;  %v5018_v25 = vunpack.c.h.bf16 %v5658_v45  ;;  %v355_v31 = vld [vmem:[%s8632_s2 + $0x88] sm:$0xff]  ;;  %vm384_vm11 = vcmp.gt.f32.partialorder %v343_v27, 0.0  ;;  %v368_v44 = vld [vmem:[%s8632_s2 + $0xf0] sm:$0xff]  ;;  %s334_s14 = scalar_lea.vmem %s8636_s6, %s4608_s19 }
  0x1f   : > { %v528_v58 = vmul.f32 %v5664_v47, %v5017_v48  ;;  %v526_v59 = vmul.f32 %v5664_v47, %v5013_v52  ;;  %v514_v60 = vmul.f32 %v5664_v47, %v4989_v54  ;;  %v515_v61 = vmul.f32 %v5664_v47, %v4990_v56  ;;  %v374_v39 = vld [vmem:[%s8632_s2 + $0x120] sm:$0xff]  ;;  %v357_v52 = vld [vmem:[%s8632_s2 + $0x98] sm:$0xff] }
  0x20   : > { %v530_v62 = vmul.f32 %v5664_v47, %v5021_v57  ;;  %v519_v14 = vmul.f32 %v5664_v47, %v4998_v63  ;;  %vm395_vm10 = vcmp.gt.f32.partialorder %v354_v15, 0.0  ;;  %v529_v37 = vmul.f32 %v5664_v47, %v5018_v25  ;;  %v376_v63 = vld [vmem:[%s8632_s2 + $0x130] sm:$0xff]  ;;  %v4906_v15 = vld [vmem:[%s8631_s1 + $0x38] sm:$0xff] }
  0x21   : > { %1487 = vperm.xlu1 %5256, %v1423_v16   ;;  %1484 = vperm.xlu0 %5255, %v1422_v17   ;;  %v5691_v1 = vadd.f32 %v5679_v55, %v528_v58  ;;  %v5695_v4 = vadd.f32 %v5679_v55, %v514_v60  ;;  %v5698_v5 = vadd.f32 %v5679_v55, %v515_v61  ;;  %v1428_v26 = vsel %vm395_vm10, 1, %v8642_v3  ;;  %v375_v60 = vld [vmem:[%s8632_s2 + $0x128] sm:$0xff] }
  0x22   : > { %1526 = vperm.xlu2 %5257, %v1436_v18   ;;  %v5701_v6 = vadd.f32 %v5679_v55, %v530_v62  ;;  %v5709_v10 = vadd.f32 %v5679_v55, %v526_v59  ;;  %vm396_vm13 = vcmp.gt.f32.partialorder %v355_v31, 0.0  ;;  %vm415_vm14 = vcmp.gt.f32.partialorder %v374_v39, 0.0  ;;  %v356_v59 = vld [vmem:[%s8632_s2 + $0x90] sm:$0xff]  ;;  %5190 = vmatpush.bf16.msra.mxu2 %v4906_v15 }
  0x23   : > { %v614_v9 = vsub.f32 0.0, %v5691_v1  ;;  %v600_v12 = vsub.f32 0.0, %v5695_v4  ;;  %v601_v13 = vsub.f32 0.0, %v5698_v5  ;;  %v1429_v54 = vsel %vm396_vm13, 1, %v8642_v3  ;;  %3197 = vmatpush.bf16.msra.mxu0 %v4906_v15  ;;  %5189 = vmatpush.bf16.msra.mxu1 %v4906_v15 }
  0x24   : > { %v616_v16 = vsub.f32 0.0, %v5701_v6  ;;  %v612_v21 = vsub.f32 0.0, %v5709_v10  ;;  %v5771_v56 = vadd.f32 %v5679_v55, %v529_v37  ;;  %vm409_vm0 = vcmp.gt.f32.partialorder %v368_v44, 0.0  ;;  %5191 = vmatpush.bf16.msra.mxu3 %v4906_v15 }
  0x25   : > { %v677_v17 = vmul.f32 1.442695, %v614_v9  ;;  %v649_v18 = vmul.f32 1.442695, %v600_v12  ;;  %v651_v19 = vmul.f32 1.442695, %v601_v13 }
  0x26   : > { %v681_v20 = vmul.f32 1.442695, %v616_v16  ;;  %vm398_vm1 = vcmp.gt.f32.partialorder %v357_v52, 0.0  ;;  %v1442_v8 = vsel %vm409_vm0, 1, %v8642_v3  ;;  %v345_v9 = vld [vmem:[%s8632_s2 + $0x38] sm:$0xff]  ;;  %v615_v11 = vsub.f32 0.0, %v5771_v56 }
  0x27   : > { %5260 = vpow2.f32 %v677_v17  ;;  %v5802_v12 = vld [vmem:[%s5646_s8 + $0x28] sm:$0xff]   ;;  %vm397_vm2 = vcmp.gt.f32.partialorder %v356_v59, 0.0  ;;  %vm416_vm3 = vcmp.gt.f32.partialorder %v375_v60, 0.0  ;;  %vm417_vm4 = vcmp.gt.f32.partialorder %v376_v63, 0.0 }
  0x28   : > { %5262 = vpow2.f32 %v649_v18  ;;  %vm386_vm5 = vcmp.gt.f32.partialorder %v345_v9, 0.0  ;;  %v5834_v27 = vsel %vm416_vm3, 1, %v8642_v3  ;;  %v5840_v31 = vsel %vm417_vm4, 1, %v8642_v3  ;;  %v4904_v52 = vld [vmem:[%s8631_s1 + $0x28] sm:$0xff] }
  0x29   : > { %1490 = vperm.xlu1 %5256, %v1424_v22   ;;  %1529 = vperm.xlu0 %5255, %v1437_v23   ;;  %v5723_v22 = vadd.f32 %v5679_v55, %v519_v14  ;;  %5264 = vpow2.f32 %v651_v19  ;;  %v1447_v23 = vsel %vm414_vm8, 1, %v8642_v3  ;;  %v5808_v14 = vsel %vm398_vm1, 1, %v8642_v3 }
  0x2a   : > { %1493 = vperm.xlu2 %5257, %v1425_v24   ;;  %v1446_v24 = vsel %vm413_vm9, 1, %v8642_v3  ;;  %5266 = vpow2.f32 %v681_v20  ;;  %v5852_v37 = vsel %vm386_vm5, 1, %v8642_v3 }
  0x2b   : > { %v605_v32 = vsub.f32 0.0, %v5723_v22 }
  0x2d   : > { %v5261_v33 = vpop.eup %5260  ;;  %v659_v46 = vmul.f32 1.442695, %v605_v32  ;;  %v5845_v32 = vld [vmem:[%s8632_s2 + $0x30] sm:$0xff] }
  0x2e   : > { %vm385_vm7 = vcmp.gt.f32.partialorder %v5845_v32, 0.0 }
  0x31   : > { %1457 = vperm.xlu1 %5256, %v1413_v28   ;;  %1454 = vperm.xlu0 %5255, %v1412_v29   ;;  %v342_v28 = vld [vmem:[%s8632_s2 + $0x20] sm:$0xff]  ;;  %v673_v29 = vmul.f32 1.442695, %v612_v21 }
  0x32   : > { %1532 = vperm.xlu2 %5257, %v1438_v30   ;;  %v5014_v30 = vunpack.c.h.bf16 %v5668_v49  ;;  %vm383_vm12 = vcmp.gt.f32.partialorder %v342_v28, 0.0  ;;  %v1417_v49 = vsel %vm384_vm11, 1, %v8642_v3 }
  0x33   : > { %5268 = vpow2.f32 %v673_v29  ;;  %v1416_v50 = vsel %vm383_vm12, 1, %v8642_v3  ;;  %v679_v29 = vmul.f32 1.442695, %v615_v11 }
  0x39   : > { %1496 = vperm.xlu1 %5256, %v1426_v34   ;;  %1535 = vperm.xlu0 %5255, %v1439_v35   ;;  %v5163_v34 = vld [vmem:[%s5646_s8 + $0x68] sm:$0xff]   ;;  %v5263_v35 = vpop.eup %5262 }
  0x3a   : > { %1499 = vperm.xlu2 %5257, %v1427_v36   ;;  %v5741_v36 = vadd.f32 1.0, %v5261_v33  ;;  %v5265_v38 = vpop.eup %5264  ;;  %v5025_v48 = vunpack.c.l.bf16 %v5163_v34  ;;  %v4905_v34 = vld [vmem:[%s8631_s1 + $0x30] sm:$0xff] }
  0x3b   : > { %v5267_v42 = vpop.eup %5266  ;;  %v5756_v45 = vadd.f32 1.0, %v5265_v38  ;;  %5193 = vmatpush.bf16.msra.mxu2 %v4905_v34  ;;  %3198 = vmatpush.bf16.msra.mxu0 %v4905_v34 }
  0x3c   : > { %5270 = vrcp.f32 %v5741_v36  ;;  %v5773_v57 = vadd.f32 1.0, %v5267_v42  ;;  %v532_v61 = vmul.f32 %v5664_v47, %v5025_v48  ;;  %v5269_v62 = vpop.eup %5268  ;;  %5192 = vmatpush.bf16.msra.mxu1 %v4905_v34  ;;  %5194 = vmatpush.bf16.msra.mxu3 %v4905_v34  ;;  %vm1091_vm11 = vweird.f32 %v5741_v36 }
  0x3d   : > { %vm896_vm8 = vweird.f32 %v5756_v45  ;;  %v902_v59 = vand.u32 2147483648, %v5756_v45 }
  0x3e   : > { %v5821_v20 = vadd.f32 %v5679_v55, %v532_v61  ;;  %vm1121_vm4 = vweird.f32 %v5773_v57 }
  0x3f   : > { %5196 = vmatpush.bf16.msra.mxu2 %v4904_v52  ;;  %3199 = vmatpush.bf16.msra.mxu0 %v4904_v52 }
  0x40   : > { %v618_v39 = vsub.f32 0.0, %v5821_v20  ;;  %5195 = vmatpush.bf16.msra.mxu1 %v4904_v52  ;;  %5197 = vmatpush.bf16.msra.mxu3 %v4904_v52  ;;  %v5976_v52 = vld [vmem:[%s5646_s8 + $0x38] sm:$0xff]  }
  0x41   : > { %1463 = vperm.xlu1 %5256, %v1415_v40   ;;  %1460 = vperm.xlu0 %5255, %v1414_v41   ;;  %v5747_v40 = vadd.f32 1.0, %v5263_v35  ;;  %v527_v41 = vmul.f32 %v5664_v47, %v5014_v30 }
  0x42   : > { %1538 = vperm.xlu2 %5257, %v1440_v43   ;;  %v369_v43 = vld [vmem:[%s8632_s2 + $0xf8] sm:$0xff]  ;;  %v685_v61 = vmul.f32 1.442695, %v618_v39 }
  0x43   : > { %5272 = vrcp.f32 %v5747_v40  ;;  %vm410_vm15 = vcmp.gt.f32.partialorder %v369_v43, 0.0  ;;  %v5776_v58 = vadd.f32 %v5679_v55, %v527_v41  ;;  %v4993_v41 = vunpack.c.l.bf16 %v5802_v12 }
  0x44   : > { %5274 = vrcp.f32 %v5756_v45  ;;  %vm881_vm6 = vweird.f32 %v5747_v40 }
  0x45   : > { %5276 = vpow2.f32 %v659_v46  ;;  %v613_v16 = vsub.f32 0.0, %v5776_v58  ;;  %v885_v46 = vand.u32 2147483647, %v5747_v40  ;;  %v516_v34 = vmul.f32 %v5664_v47, %v4993_v41 }
  0x46   : > { %5278 = vrcp.f32 %v5773_v57 }
  0x47   : > { %v675_v35 = vmul.f32 1.442695, %v613_v16 }
  0x49   : > { %1550 = vperm.xlu1 %5256, %v1444_v0   ;;  %1541 = vperm.xlu0 %5255, %v1441_v2   ;;  %v5789_v0 = vpop.eup %5270  ;;  %v1448_v2 = vsel %vm415_vm14, 1, %v8642_v3  ;;  %vm5900_vm14 = vcmp.eq.f32.partialorder %v885_v46, 8.507059e+37 }
  0x4a   : > { %1553 = vperm.xlu2 %5257, %v1445_v7   ;;  %v1443_v7 = vsel %vm410_vm15, 1, %v8642_v3  ;;  %v5804_v13 = vpop.eup %5272  ;;  %v1087_v19 = vmul.f32 %v5789_v0, %v5741_v36  ;;  %vm1092_vm12 = vweird.f32 %v5789_v0 }
  0x4b   : > { %v5814_v17 = vpop.eup %5274  ;;  %v877_v18 = vmul.f32 %v5804_v13, %v5747_v40  ;;  %vm882_vm9 = vweird.f32 %v5804_v13  ;;  %vm5929_vm3 = vmor %vm1091_vm11, %vm1092_vm12 }
  0x4c   : > { %v892_v21 = vmul.f32 %v5814_v17, %v5756_v45  ;;  %v5277_v25 = vpop.eup %5276  ;;  %v1088_v38 = vsub.f32 1.0, %v1087_v19  ;;  %vm897_vm10 = vweird.f32 %v5814_v17  ;;  %vm5896_vm13 = vmor %vm881_vm6, %vm882_vm9  ;;  %v4903_v19 = vld [vmem:[%s8631_s1 + $0x20] sm:$0xff] }
  0x4d   : > { %v878_v28 = vsub.f32 1.0, %v877_v18  ;;  %v5836_v30 = vpop.eup %5278  ;;  %v5858_v42 = vadd.f32 1.0, %v5277_v25  ;;  %v1097_v18 = vand.u32 2147483648, %v5741_v36  ;;  %vm5913_vm15 = vmor %vm896_vm8, %vm897_vm10  ;;  %v903_v25 = vor.u32 1.1754944e-38, %v902_v59  ;;  %5199 = vmatpush.bf16.msra.mxu2 %v4903_v19  ;;  %3200 = vmatpush.bf16.msra.mxu0 %v4903_v19 }
  0x4e   : > { %v893_v33 = vsub.f32 1.0, %v892_v21  ;;  %v1117_v48 = vmul.f32 %v5836_v30, %v5773_v57  ;;  %v1089_v60 = vmul.f32 %v5789_v0, %v1088_v38  ;;  %5198 = vmatpush.bf16.msra.mxu1 %v4903_v19  ;;  %vm1122_vm5 = vweird.f32 %v5836_v30  ;;  %5200 = vmatpush.bf16.msra.mxu3 %v4903_v19 }
  0x4f   : > { %v879_v44 = vmul.f32 %v5804_v13, %v878_v28  ;;  %vm956_vm11 = vweird.f32 %v5858_v42 }
  0x50   : > { %v1090_v28 = vadd.f32 %v5789_v0, %v1089_v60 }
  0x51   : > { %1559 = vperm.xlu1 %5256, %v1447_v23   ;;  %1556 = vperm.xlu0 %5255, %v1446_v24   ;;  %v5825_v23 = vadd.f32 1.0, %v5269_v62  ;;  %v4994_v24 = vunpack.c.h.bf16 %v5802_v12  ;;  %v880_v63 = vadd.f32 %v5804_v13, %v879_v44 }
  0x52   : > { %1502 = vperm.xlu2 %5257, %v1428_v26   ;;  %v5830_v26 = vsel %vm397_vm2, 1, %v8642_v3 }
  0x53   : > { %5280 = vrcp.f32 %v5825_v23  ;;  %v517_v43 = vmul.f32 %v5664_v47, %v4994_v24  ;;  %vm1061_vm8 = vweird.f32 %v5825_v23 }
  0x54   : > { %5282 = vpow2.f32 %v679_v29  ;;  %v1095_v29 = vand.u32 2147483647, %v5741_v36 }
  0x55   : > { %5284 = vpow2.f32 %v675_v35  ;;  %v5879_v62 = vadd.f32 %v5679_v55, %v517_v43 }
  0x56   : > { %5286 = vrcp.f32 %v5858_v42  ;;  %vm5959_vm6 = vcmp.eq.f32.partialorder %v1095_v29, 8.507059e+37 }
  0x57   : > { %5288 = vpow2.f32 %v685_v61  ;;  %v603_v36 = vsub.f32 0.0, %v5879_v62 }
  0x59   : > { %1466 = vperm.xlu1 %5256, %v1416_v50   ;;  %1505 = vperm.xlu0 %5255, %v1429_v54   ;;  %v894_v50 = vmul.f32 %v5814_v17, %v893_v33  ;;  %v900_v54 = vand.u32 2147483647, %v5756_v45  ;;  %v5890_v9 = vpop.eup %5280  ;;  %v655_v12 = vmul.f32 1.442695, %v603_v36  ;;  %v960_v45 = vand.u32 2147483647, %v5858_v42 }
  0x5a   : > { %1469 = vperm.xlu2 %5257, %v1417_v49   ;;  %v887_v49 = vand.u32 2147483648, %v5747_v40  ;;  %v5283_v40 = vpop.eup %5282  ;;  %v1057_v35 = vmul.f32 %v5890_v9, %v5825_v23  ;;  %vm1062_vm9 = vweird.f32 %v5890_v9 }
  0x5b   : > { %v895_v16 = vadd.f32 %v5814_v17, %v894_v50  ;;  %vm5917_vm0 = vcmp.eq.f32.partialorder %v900_v54, 8.507059e+37  ;;  %v5285_v33 = vpop.eup %5284  ;;  %v5948_v41 = vadd.f32 1.0, %v5283_v40  ;;  %v1125_v40 = vand.u32 2147483647, %v5773_v57 }
  0x5c   : > { %v888_v15 = vor.u32 1.1754944e-38, %v887_v49  ;;  %v5942_v38 = vpop.eup %5286  ;;  %v5963_v46 = vadd.f32 1.0, %v5285_v33  ;;  %v1418_v49 = vsel %vm385_vm7, 1, %v8642_v3  ;;  %v1058_v60 = vsub.f32 1.0, %v1057_v35  ;;  %vm5990_vm7 = vmor %vm1121_vm4, %vm1122_vm5 }
  0x5d   : > { %v899_v39 = vsel %vm5913_vm15, %v5814_v17, %v895_v16  ;;  %v1094_v17 = vsel %vm5929_vm3, %v5789_v0, %v1090_v28  ;;  %v1127_v0 = vand.u32 2147483648, %v5773_v57  ;;  %5290 = vrcp.f32 %v5948_v41  ;;  %v5289_v32 = vpop.eup %5288 }
  0x5e   : > { %v904_v54 = vsel %vm5917_vm0, %v903_v25, %v899_v39  ;;  %v952_v11 = vmul.f32 %v5942_v38, %v5858_v42  ;;  %5292 = vrcp.f32 %v5963_v46  ;;  %v5002_v16 = vunpack.c.h.bf16 %v5976_v52 }
  0x5f   : > { %v1380_v19 = vmul.f32 %v904_v54, %v5698_v5  ;;  %v6011_v21 = vor.u32 1.1754944e-38, %v1127_v0  ;;  %v1065_v5 = vand.u32 2147483647, %v5825_v23  ;;  %v6027_v28 = vadd.f32 1.0, %v5289_v32  ;;  %v4900_v32 = vld [vmem:[%s8631_s1 + $0x8] sm:$0xff] }
  0x60   : > { %5294 = vpow2.f32 %v655_v12  ;;  %v521_v29 = vmul.f32 %v5664_v47, %v5002_v16  ;;  %vm957_vm0 = vweird.f32 %v5942_v38  ;;  %vm1076_vm5 = vweird.f32 %v5963_v46 }
  0x61   : > { %1547 = vperm.xlu1 %5256, %v1443_v7   ;;  %1544 = vperm.xlu0 %5255, %v1442_v8   ;;  %v377_v7 = vld [vmem:[%s8632_s2 + $0x138] sm:$0xff]  ;;  %v1118_v8 = vsub.f32 1.0, %v1117_v48  ;;  %vm6057_vm15 = vcmp.eq.f32.partialorder %v1065_v5, 8.507059e+37  ;;  %5296 = vrcp.f32 %v6027_v28  ;;  %vm6094_vm4 = vmor %vm956_vm11, %vm957_vm0  ;;  %v4899_v5 = vld [vmem:[%s8631_s1] sm:$0xff] }
  0x62   : > { %1562 = vperm.xlu2 %5257, %v1448_v2   ;;  %v378_v2 = vld [vmem:[%s8632_s2 + $0x140] sm:$0xff]  ;;  %vm418_vm2 = vcmp.gt.f32.partialorder %v377_v7, 0.0  ;;  %v4901_v7 = vld [vmem:[%s8631_s1 + $0x10] sm:$0xff]  ;;  %v6047_v39 = vadd.f32 %v5679_v55, %v521_v29  ;;  %v1110_v29 = vand.u32 2147483647, %v5948_v41 }
  0x63   : > { %vm419_vm1 = vcmp.gt.f32.partialorder %v378_v2, 0.0  ;;  %v1451_v61 = vsel %vm418_vm2, 1, %v8642_v3  ;;  %vm1106_vm2 = vweird.f32 %v5948_v41 }
  0x64   : > { %v5972_v50 = vsel %vm419_vm1, 1, %v8642_v3  ;;  %vm6079_vm1 = vcmp.eq.f32.partialorder %v960_v45, 8.507059e+37  ;;  %v1082_v45 = vand.u32 2147483648, %v5963_v46  ;;  %vm1111_vm11 = vcmp.eq.f32.partialorder %v1110_v29, 8.507059e+37 }
  0x69   : > { %1508 = vperm.xlu1 %5256, %v5830_v26   ;;  %1565 = vperm.xlu0 %5255, %v5834_v27   ;;  %v884_v26 = vsel %vm5896_vm13, %v5804_v13, %v880_v63  ;;  %v1119_v27 = vmul.f32 %v5836_v30, %v1118_v8  ;;  %v4902_v13 = vld [vmem:[%s8631_s1 + $0x18] sm:$0xff]  ;;  %v1067_v8 = vand.u32 2147483648, %v5825_v23  ;;  %vm6041_vm13 = vcmp.eq.f32.partialorder %v1125_v40, 8.507059e+37 }
  0x6a   : > { %1511 = vperm.xlu2 %5257, %v5808_v14   ;;  %v1098_v14 = vor.u32 1.1754944e-38, %v1097_v18  ;;  %v889_v48 = vsel %vm5900_vm14, %v888_v15, %v884_v26  ;;  %5202 = vmatpush.bf16.msra.mxu2 %v4902_v13  ;;  %v6004_v15 = vadd.f32 %v5679_v55, %v516_v34  ;;  %vm6053_vm14 = vmor %vm1061_vm8, %vm1062_vm9  ;;  %v607_v23 = vsub.f32 0.0, %v6047_v39 }
  0x6b   : > { %v5981_v59 = vadd.f32 %v5836_v30, %v1119_v27  ;;  %3201 = vmatpush.bf16.msra.mxu0 %v4902_v13  ;;  %5201 = vmatpush.bf16.msra.mxu1 %v4902_v13  ;;  %v1379_v18 = vmul.f32 %v889_v48, %v5695_v4  ;;  %v1059_v4 = vmul.f32 %v5890_v9, %v1058_v60  ;;  %v1068_v57 = vor.u32 1.1754944e-38, %v1067_v8 }
  0x6c   : > { %v5953_v43 = vpop.permute.xlu2 %1478  ;;  %v1099_v2 = vsel %vm5959_vm6, %v1098_v14, %v1094_v17  ;;  %5203 = vmatpush.bf16.msra.mxu3 %v4902_v13  ;;  %v962_v17 = vand.u32 2147483648, %v5858_v42  ;;  %v4997_v13 = vunpack.c.l.bf16 %v5676_v53  ;;  %v1083_v63 = vor.u32 1.1754944e-38, %v1082_v45 }
  0x6d   : > { %8760 = vst [vmem:[#allocation2_spill] sm:$0xff] %v5953_v43  ;;  %v1124_v24 = vsel %vm5990_vm7, %v5836_v30, %v5981_v59  ;;  %v6019_v25 = vmul.f32 %v1099_v2, %v5691_v1  ;;  %v602_v1 = vsub.f32 0.0, %v6004_v15  ;;  %vm8689_vm10 = vcmp.eq.s32.totalorder %v5953_v43, 1 }
  0x6e   : > { %5205 = vmatpush.bf16.msra.mxu2 %v4901_v7  ;;  %v1060_v35 = vadd.f32 %v5890_v9, %v1059_v4  ;;  %v963_v12 = vor.u32 1.1754944e-38, %v962_v17  ;;  %v1112_v4 = vand.u32 2147483648, %v5948_v41  ;;  %v6143_v53 = vsel %vm6041_vm13, %v6011_v21, %v1124_v24 }
  0x6f   : > { %3202 = vmatpush.bf16.msra.mxu0 %v4901_v7  ;;  %5204 = vmatpush.bf16.msra.mxu1 %v4901_v7  ;;  %v653_v36 = vmul.f32 1.442695, %v602_v1 }
  0x70   : > { %5206 = vmatpush.bf16.msra.mxu3 %v4901_v7  ;;  %v1064_v8 = vsel %vm6053_vm14, %v5890_v9, %v1060_v35 }
  0x71   : > { %1475 = vperm.xlu1 %5256, %v5852_v37   ;;  %1472 = vperm.xlu0 %5255, %v1418_v49   ;;  %v953_v37 = vsub.f32 1.0, %v952_v11  ;;  %v1625_v49 = vsel %vm8689_vm10, %v1379_v18, 0.0  ;;  %5298 = vpow2.f32 %v653_v36  ;;  %v1069_v42 = vsel %vm6057_vm15, %v1068_v57, %v1064_v8 }
  0x72   : > { %1568 = vperm.xlu2 %5257, %v5840_v31   ;;  %v6025_v31 = vpop.eup %5290  ;;  %v1666_v7 = vpack.c.bf16 %v1625_v49, %v1625_v49  ;;  %5208 = vmatpush.bf16.msra.mxu2 %v4900_v32  ;;  %v1080_v57 = vand.u32 2147483647, %v5963_v46 }
  0x73   : > { %v1102_v34 = vmul.f32 %v6025_v31, %v5948_v41  ;;  %v6038_v26 = vpop.eup %5292  ;;  %v954_v0 = vmul.f32 %v5942_v38, %v953_v37  ;;  %3203 = vmatpush.bf16.msra.mxu0 %v4900_v32  ;;  %vm1107_vm3 = vweird.f32 %v6025_v31  ;;  %5207 = vmatpush.bf16.msra.mxu1 %v4900_v32 }
  0x74   : > { %v6032_v33 = vpop.permute.xlu2 %1481  ;;  %v1072_v48 = vmul.f32 %v6038_v26, %v5963_v46  ;;  %v5295_v2 = vpop.eup %5294  ;;  %5209 = vmatpush.bf16.msra.mxu3 %v4900_v32  ;;  %vm1077_vm6 = vweird.f32 %v6038_v26  ;;  %v1748_v35 = vunpack.c.l.b16 %v1666_v7  ;;  %vm6115_vm8 = vmor %vm1106_vm2, %vm1107_vm3  ;;  %v1113_v46 = vor.u32 1.1754944e-38, %v1112_v4 }
  0x75   : > { %8765 = vst [vmem:[#allocation3_spill] sm:$0xff] %v6032_v33  ;;  %vm8680_vm12 = vcmp.eq.s32.totalorder %v6032_v33, 1  ;;  %v1103_v44 = vsub.f32 1.0, %v1102_v34  ;;  %v6088_v9 = vadd.f32 1.0, %v5295_v2  ;;  %v6104_v37 = vpop.eup %5296  ;;  %vm6129_vm9 = vmor %vm1076_vm5, %vm1077_vm6  ;;  %vm1081_vm7 = vcmp.eq.f32.partialorder %v1080_v57, 8.507059e+37 }
  0x76   : > { %v1626_v54 = vsel %vm8680_vm12, %v1380_v19, 0.0  ;;  %v1073_v60 = vsub.f32 1.0, %v1072_v48  ;;  %v955_v19 = vadd.f32 %v5942_v38, %v954_v0  ;;  %5211 = vmatpush.bf16.msra.mxu2 %v4899_v5  ;;  %v5022_v48 = vunpack.c.h.bf16 %v5672_v51 }
  0x77   : > { %v1667_v18 = vpack.c.bf16 %v1626_v54, %v1626_v54  ;;  %v5299_v34 = vpop.eup %5298  ;;  %3204 = vmatpush.bf16.msra.mxu0 %v4899_v5  ;;  %5210 = vmatpush.bf16.msra.mxu1 %v4899_v5  ;;  %v6148_v49 = vmul.f32 %v6104_v37, %v6027_v28  ;;  %v1157_v32 = vand.u32 2147483648, %v6027_v28  ;;  %v930_v11 = vand.u32 2147483647, %v6088_v9 }
  0x78   : > { %v1074_v16 = vmul.f32 %v6038_v26, %v1073_v60  ;;  %5212 = vmatpush.bf16.msra.mxu3 %v4899_v5  ;;  %v6153_v0 = vadd.f32 1.0, %v5299_v34  ;;  %vm926_vm15 = vweird.f32 %v6088_v9 }
  0x79   : > { %1574 = vperm.xlu1 %5256, %v5972_v50   ;;  %1571 = vperm.xlu0 %5255, %v1451_v61   ;;  %v1104_v50 = vmul.f32 %v6025_v31, %v1103_v44  ;;  %v663_v61 = vmul.f32 1.442695, %v607_v23  ;;  %v1749_v17 = vunpack.c.l.b16 %v1667_v18  ;;  %v959_v44 = vsel %vm6094_vm4, %v5942_v38, %v955_v19 }
  0x7a   : > { %v1075_v14 = vadd.f32 %v6038_v26, %v1074_v16  ;;  %v1391_v38 = vmul.f32 %v1069_v42, %v5709_v10  ;;  %3205 = vmatmul.bf16.vlgmr.msra.gmra.mxu0 %v8642_v3  ;;  %v6162_v10 = vsel %vm6079_vm1, %v963_v12, %v959_v44  ;;  %v531_v23 = vmul.f32 %v5664_v47, %v5022_v48 }
  0x7b   : > { %5300 = vpow2.f32 %v663_v61  ;;  %v1105_v1 = vadd.f32 %v6025_v31, %v1104_v50  ;;  %v6168_v27 = vpack.c.b16 %v1749_v17, %v1748_v35  ;;  %v1148_v60 = vsub.f32 1.0, %v6148_v49 }
  0x7c   : > { %5302 = vrcp.f32 %v6088_v9  ;;  %v1079_v24 = vsel %vm6129_vm9, %v6038_v26, %v1075_v14  ;;  %v932_v12 = vand.u32 2147483648, %v6088_v9  ;;  %vm6197_vm1 = vcmp.eq.f32.partialorder %v930_v11, 8.507059e+37 }
  0x7d   : > { %v1109_v51 = vsel %vm6115_vm8, %v6025_v31, %v1105_v1  ;;  %v518_v31 = vmul.f32 %v5664_v47, %v4997_v13  ;;  %5304 = vrcp.f32 %v6153_v0  ;;  %v1084_v8 = vsel %vm1081_vm7, %v1083_v63, %v1079_v24 }
  0x7e   : > { %v1114_v54 = vsel %vm1111_vm11, %v1113_v46, %v1109_v51  ;;  %v1839_v18 = vshrl.u32 %v6168_v27, 16  ;;  %v1392_v4 = vmul.f32 %v1084_v8, %v5776_v58  ;;  %v1842_v42 = vshll.u32 %v6168_v27, 16  ;;  %v6226_v51 = vld [vmem:[%s5646_s8 + $0x70] sm:$0xff]  }
  0x7f   : > { %v6187_v16 = vadd.f32 %v5679_v55, %v518_v31  ;;  %v1394_v19 = vmul.f32 %v1114_v54, %v5771_v56  ;;  %v933_v36 = vor.u32 1.1754944e-38, %v932_v12  ;;  %vm911_vm2 = vweird.f32 %v6153_v0 }
  0x80   : > { %v915_v13 = vand.u32 2147483647, %v6153_v0  ;;  %vm1151_vm8 = vweird.f32 %v6027_v28  ;;  %vm1152_vm9 = vweird.f32 %v6104_v37  ;;  %v1841_v11 = vrot.slane %v1839_v18, 6 }
  0x81   : > { %v5301_v30 = vpop.eup %5300  ;;  %v604_v58 = vsub.f32 0.0, %v6187_v16 }
  0x82   : > { %v5303_v2 = vpop.eup %5302  ;;  %v6180_v50 = vadd.f32 1.0, %v5301_v30  ;;  %v917_v30 = vand.u32 2147483648, %v6153_v0  ;;  %vm6251_vm7 = vcmp.eq.f32.partialorder %v915_v13, 8.507059e+37  ;;  %v6265_v13 = vld [vmem:[%s5646_s8 + $0x80] sm:$0xff]  }
  0x83   : > { %v6156_v59 = vpop.permute.xlu1 %1520  ;;  %v6158_v21 = vpop.permute.xlu0 %1514  ;;  %v922_v7 = vmul.f32 %v5303_v2, %v6088_v9  ;;  %vm927_vm0 = vweird.f32 %v5303_v2  ;;  %v657_v24 = vmul.f32 1.442695, %v604_v58 }
  0x84   : > { %8780 = vst [vmem:[#allocation4_spill] sm:$0xff] %v6156_v59  ;;  %vm8638_vm13 = vcmp.eq.s32.totalorder %v6156_v59, 1  ;;  %vm8640_vm14 = vcmp.eq.s32.totalorder %v6158_v21, 1  ;;  %5306 = vrcp.f32 %v6180_v50  ;;  %v6202_v56 = vpop.eup %5304  ;;  %vm6214_vm5 = vmor %vm926_vm15, %vm927_vm0  ;;  %v918_v29 = vor.u32 1.1754944e-38, %v917_v30 }
  0x85   : > { %8781 = vst [vmem:[#allocation5_spill] sm:$0xff] %v6158_v21  ;;  %v1639_v26 = vsel %vm8638_vm13, %v6019_v25, 0.0  ;;  %v1637_v61 = vsel %vm8640_vm14, %v1391_v38, 0.0  ;;  %v6193_v25 = vadd.f32 %v5679_v55, %v531_v23  ;;  %v923_v5 = vsub.f32 1.0, %v922_v7 }
  0x86   : > { %v1680_v40 = vpack.c.bf16 %v1639_v26, %v1639_v26  ;;  %v1678_v1 = vpack.c.bf16 %v1637_v61, %v1637_v61  ;;  %v907_v57 = vmul.f32 %v6202_v56, %v6153_v0  ;;  %vm912_vm6 = vweird.f32 %v6202_v56 }
  0x87   : > { %v924_v35 = vmul.f32 %v5303_v2, %v923_v5  ;;  %v617_v61 = vsub.f32 0.0, %v6193_v25  ;;  %v5029_v7 = vunpack.c.l.bf16 %v6226_v51  ;;  %vm6247_vm11 = vmor %vm911_vm2, %vm912_vm6  ;;  %5308 = vpow2.f32 %v657_v24 }
  0x88   : > { %v1762_v17 = vunpack.c.l.b16 %v1680_v40  ;;  %v1760_v38 = vunpack.c.l.b16 %v1678_v1  ;;  %v908_v49 = vsub.f32 1.0, %v907_v57  ;;  %vm6299_vm2 = vmor %vm1151_vm8, %vm1152_vm9 }
  0x89   : > { %v925_v48 = vadd.f32 %v5303_v2, %v924_v35 }
  0x8a   : > { %v6232_v31 = vpop.eup %5306  ;;  %v909_v8 = vmul.f32 %v6202_v56, %v908_v49 }
  0x8b   : > { %v6204_v45 = vpop.permute.xlu1 %1523  ;;  %v6206_v34 = vpop.permute.xlu0 %1517  ;;  %v929_v63 = vsel %vm6214_vm5, %v5303_v2, %v925_v48  ;;  %v1149_v2 = vmul.f32 %v6104_v37, %v1148_v60  ;;  %v982_v35 = vmul.f32 %v6232_v31, %v6180_v50  ;;  %vm986_vm5 = vweird.f32 %v6180_v50 }
  0x8c   : > { %8784 = vst [vmem:[#allocation6_spill] sm:$0xff] %v6204_v45  ;;  %vm8637_vm3 = vcmp.eq.s32.totalorder %v6204_v45, 1  ;;  %vm8639_vm4 = vcmp.eq.s32.totalorder %v6206_v34, 1  ;;  %v934_v26 = vsel %vm6197_vm1, %v933_v36, %v929_v63  ;;  %v910_v40 = vadd.f32 %v6202_v56, %v909_v8  ;;  %v6255_v60 = vpop.permute.xlu2 %1526 }
  0x8d   : > { %8785 = vst [vmem:[#allocation7_spill] sm:$0xff] %v6206_v34  ;;  %v1640_v44 = vsel %vm8637_vm3, %v1394_v19, 0.0  ;;  %v1638_v41 = vsel %vm8639_vm4, %v1392_v4, 0.0  ;;  %v1382_v1 = vmul.f32 %v934_v26, %v5879_v62  ;;  %v683_v62 = vmul.f32 1.442695, %v617_v61 }
  0x8e   : > { %v1681_v46 = vpack.c.bf16 %v1640_v44, %v1640_v44  ;;  %v1679_v9 = vpack.c.bf16 %v1638_v41, %v1638_v41  ;;  %8792 = vst [vmem:[#allocation8_spill] sm:$0xff] %v6255_v60  ;;  %v534_v44 = vmul.f32 %v5664_v47, %v5029_v7  ;;  %v5038_v63 = vunpack.c.h.bf16 %v6265_v13 }
  0x8f   : > { %v1844_v26 = vrot.slane %v1842_v42, 7  ;;  %5310 = vpow2.f32 %v683_v62  ;;  %vm1802_vm1 = vsmask.f32 1280  ;;  %v6289_v61 = vadd.f32 %v6104_v37, %v1149_v2 }
  0x90   : > { %v1763_v23 = vunpack.c.l.b16 %v1681_v46  ;;  %v1761_v54 = vunpack.c.l.b16 %v1679_v9  ;;  %v6286_v8 = vadd.f32 %v5679_v55, %v534_v44  ;;  %v6313_v4 = vmul.f32 %v6143_v53, %v5701_v6 }
  0x91   : > { %v1154_v6 = vsel %vm6299_vm2, %v6104_v37, %v6289_v61  ;;  %v6332_v53 = vor.u32 1.1754944e-38, %v1157_v32  ;;  %vm987_vm6 = vweird.f32 %v6232_v31  ;;  %vm8645_vm13 = vcmp.eq.s32.totalorder %v6255_v60, 1  ;;  %v5151_v60 = vld [vmem:[%s5646_s8 + $0x8] sm:$0xff]  }
  0x92   : > { %v1792_v12 = vpack.c.b16 %v1763_v23, %v1762_v17  ;;  %v1791_v19 = vpack.c.b16 %v1761_v54, %v1760_v38  ;;  %v914_v17 = vsel %vm6247_vm11, %v6202_v56, %v910_v40  ;;  %v5309_v54 = vpop.eup %5308  ;;  %v539_v40 = vmul.f32 %v5664_v47, %v5038_v63 }
  0x93   : > { %v6257_v5 = vpop.permute.xlu1 %1487  ;;  %v6262_v57 = vpop.permute.xlu0 %1484  ;;  %v919_v49 = vsel %vm6251_vm7, %v918_v29, %v914_v17  ;;  %v6324_v47 = vmul.f32 %v6162_v10, %v5723_v22  ;;  %vm6362_vm7 = vmor %vm986_vm5, %vm987_vm6 }
  0x94   : > { %8793 = vst [vmem:[#allocation9_spill] sm:$0xff] %v6257_v5  ;;  %v1902_v0 = vshrl.u32 %v1792_v12, 16  ;;  %v1905_v36 = vshll.u32 %v1792_v12, 16  ;;  %v1893_v58 = vshrl.u32 %v1791_v19, 16  ;;  %v1896_v14 = vshll.u32 %v1791_v19, 16  ;;  %v6315_v18 = vpop.permute.xlu2 %1493 }
  0x95   : > { %8794 = vst [vmem:[#allocation10_spill] sm:$0xff] %v6262_v57  ;;  %vm8664_vm15 = vcmp.eq.s32.totalorder %v6257_v5, 1  ;;  %vm8669_vm0 = vcmp.eq.s32.totalorder %v6262_v57, 1  ;;  %v1381_v23 = vmul.f32 %v919_v49, %v6004_v15  ;;  %v983_v12 = vsub.f32 1.0, %v982_v35 }
  0x96   : > { %v1904_v41 = vrot.slane %v1902_v0, 6  ;;  %v1907_v48 = vrot.slane %v1905_v36, 7  ;;  %v1895_v38 = vrot.slane %v1893_v58, 6  ;;  %v1898_v46 = vrot.slane %v1896_v14, 7  ;;  %8797 = vst [vmem:[#allocation11_spill] sm:$0xff] %v6315_v18  ;;  %v4972_v0 = vld [vmem:[%s5646_s8] sm:$0xff]   ;;  %v5311_v58 = vpop.eup %5310 }
  0x97   : > { %v1628_v9 = vsel %vm8664_vm15, %v1382_v1, 0.0  ;;  %v1627_v7 = vsel %vm8669_vm0, %v1381_v23, 0.0  ;;  %v6293_v19 = vadd.f32 1.0, %v5309_v54  ;;  %v1155_v1 = vand.u32 2147483647, %v6027_v28  ;;  %v5158_v54 = vld [vmem:[%s5646_s8 + $0x40] sm:$0xff]  }
  0x98   : > { %v6278_v30 = vor.u32 %v1907_v48, %v1904_v41  ;;  %v6280_v56 = vor.u32 %v1898_v46, %v1895_v38  ;;  %v1669_v24 = vpack.c.bf16 %v1628_v9, %v1628_v9  ;;  %v1668_v42 = vpack.c.bf16 %v1627_v7, %v1627_v7 }
  0x99   : > { %5312 = vrcp.f32 %v6293_v19  ;;  %v620_v35 = vsub.f32 0.0, %v6286_v8  ;;  %v6320_v36 = vor.u32 %v1844_v26, %v1841_v11  ;;  %v984_v17 = vmul.f32 %v6232_v31, %v983_v12 }
  0x9a   : > { %v1751_v27 = vunpack.c.l.b16 %v1669_v24  ;;  %v6306_v2 = vsel %vm1802_vm1, %v6280_v56, %v6278_v30  ;;  %v1750_v29 = vunpack.c.l.b16 %v1668_v42  ;;  %v990_v11 = vand.u32 2147483647, %v6180_v50 }
  0x9b   : > { %3265 = vmatmul.bf16.vlgmr.msra.gmra.mxu2 %v6306_v2  ;;  %v6337_v62 = vadd.f32 %v5679_v55, %v539_v40  ;;  %v6341_v22 = vadd.f32 1.0, %v5311_v58  ;;  %v4974_v10 = vunpack.c.h.bf16 %v4972_v0  ;;  %vm6343_vm8 = vcmp.eq.f32.partialorder %v1155_v1, 8.507059e+37 }
  0x9c   : > { %v1786_v14 = vpack.c.b16 %v1751_v27, %v1750_v29  ;;  %v689_v41 = vmul.f32 1.442695, %v620_v35  ;;  %v4973_v48 = vunpack.c.l.bf16 %v4972_v0  ;;  %vm8653_vm9 = vcmp.eq.s32.totalorder %v6315_v18, 1  ;;  %v6370_v27 = vld [vmem:[%s5578_s30] ss:$0 sm:$0xff] }
  0x9d   : > { %v992_v55 = vand.u32 2147483648, %v6180_v50  ;;  %5314 = vrcp.f32 %v6341_v22  ;;  %v625_v46 = vsub.f32 0.0, %v6337_v62  ;;  %v985_v63 = vadd.f32 %v6232_v31, %v984_v17  ;;  %v6376_v35 = vld [vmem:[%s5586_s11] ss:$0 sm:$0xff] }
  0x9e   : > { %v1848_v32 = vshrl.u32 %v1786_v14, 16  ;;  %v1851_v44 = vshll.u32 %v1786_v14, 16  ;;  %vm6352_vm11 = vcmp.eq.f32.partialorder %v990_v11, 8.507059e+37  ;;  %vm941_vm3 = vweird.f32 %v6293_v19  ;;  %v6381_v14 = vpop.permute.xlu2 %1532 }
  0x9f   : > { %v5313_v38 = vpop.eup %5312  ;;  %v945_v7 = vand.u32 2147483647, %v6293_v19  ;;  %v947_v12 = vand.u32 2147483648, %v6293_v19  ;;  %v507_v42 = vmul.f32 %v6370_v27, %v4974_v10  ;;  %5316 = vpow2.f32 %v689_v41  ;;  %8804 = vst [vmem:[#allocation12_spill] sm:$0xff] %v6381_v14 }
  0xa0   : > { %v1850_v9 = vrot.slane %v1848_v32, 6  ;;  %v1853_v49 = vrot.slane %v1851_v44, 7  ;;  %v937_v23 = vmul.f32 %v5313_v38, %v6293_v19  ;;  %vm942_vm4 = vweird.f32 %v5313_v38 }
  0xa1   : > { %v506_v50 = vmul.f32 %v6370_v27, %v4973_v48  ;;  %v993_v1 = vor.u32 1.1754944e-38, %v992_v55  ;;  %v699_v29 = vmul.f32 1.442695, %v625_v46  ;;  %v6379_v0 = vadd.f32 %v6376_v35, %v507_v42  ;;  %vm6393_vm5 = vmor %vm941_vm3, %vm942_vm4  ;;  %v6403_v46 = vpop.permute.xlu1 %1490 }
  0xa2   : > { %v938_v40 = vsub.f32 1.0, %v937_v23  ;;  %v5005_v58 = vunpack.c.l.bf16 %v5158_v54  ;;  %v6383_v17 = vor.u32 %v1853_v49, %v1850_v9  ;;  %v989_v11 = vsel %vm6362_vm7, %v6232_v31, %v985_v63  ;;  %8809 = vst [vmem:[#allocation13_spill] sm:$0xff] %v6403_v46 }
  0xa3   : > { %v6389_v32 = vadd.f32 %v6376_v35, %v506_v50  ;;  %v5315_v44 = vpop.eup %5314  ;;  %vm6397_vm6 = vcmp.eq.f32.partialorder %v945_v7, 8.507059e+37  ;;  %v948_v55 = vor.u32 1.1754944e-38, %v947_v12  ;;  %vm1136_vm14 = vweird.f32 %v6341_v22 }
  0xa4   : > { %v939_v10 = vmul.f32 %v5313_v38, %v938_v40  ;;  %v593_v31 = vsub.f32 0.0, %v6379_v0  ;;  %v1132_v49 = vmul.f32 %v5315_v44, %v6341_v22  ;;  %v1140_v19 = vand.u32 2147483647, %v6341_v22 }
  0xa5   : > { %v1142_v63 = vand.u32 2147483648, %v6341_v22  ;;  %vm1137_vm3 = vweird.f32 %v5315_v44  ;;  %5318 = vpow2.f32 %v699_v29  ;;  %v522_v54 = vmul.f32 %v6370_v27, %v5005_v58  ;;  %v5317_v26 = vpop.eup %5316 }
  0xa6   : > { %v940_v9 = vadd.f32 %v5313_v38, %v939_v10  ;;  %v635_v23 = vmul.f32 1.442695, %v593_v31  ;;  %v1133_v12 = vsub.f32 1.0, %v1132_v49  ;;  %v592_v42 = vsub.f32 0.0, %v6389_v32  ;;  %vm6438_vm2 = vmor %vm1136_vm14, %vm1137_vm3  ;;  %v6456_v48 = vpop.permute.xlu2 %1499 }
  0xa7   : > { %v6415_v40 = vsel %vm1802_vm1, %v6320_v36, %v6383_v17  ;;  %v1159_v50 = vsel %vm6343_vm8, %v6332_v53, %v1154_v6  ;;  %vm8656_vm4 = vcmp.eq.s32.totalorder %v6403_v46, 1  ;;  %v1630_v29 = vsel %vm8653_vm9, %v6324_v47, 0.0  ;;  %v6449_v47 = vpop.permute.xlu0 %1529  ;;  %8814 = vst [vmem:[#allocation16_spill] sm:$0xff] %v6456_v48 }
  0xa8   : > { %v944_v7 = vsel %vm6393_vm5, %v5313_v38, %v940_v9  ;;  %8810 = vst [vmem:[#allocation14_spill] sm:$0xff] %v6415_v40  ;;  %5320 = vpow2.f32 %v635_v23  ;;  %3235 = vmatmul.bf16.vlgmr.msra.gmra.mxu1 %v6415_v40  ;;  %v1134_v58 = vmul.f32 %v5315_v44, %v1133_v12  ;;  %v633_v37 = vmul.f32 1.442695, %v592_v42 }
  0xa9   : > { %v949_v38 = vsel %vm6397_vm6, %v948_v55, %v944_v7  ;;  %v994_v61 = vsel %vm6352_vm11, %v993_v1, %v989_v11  ;;  %v1143_v53 = vor.u32 1.1754944e-38, %v1142_v63  ;;  %v6442_v28 = vadd.f32 1.0, %v5317_v26  ;;  %8813 = vst [vmem:[#allocation15_spill] sm:$0xff] %v6449_v47 }
  0xaa   : > { %v1383_v15 = vmul.f32 %v949_v38, %v6187_v16  ;;  %v6445_v10 = vadd.f32 %v6376_v35, %v522_v54  ;;  %v1135_v24 = vadd.f32 %v5315_v44, %v1134_v58  ;;  %vm1141_vm8 = vcmp.eq.f32.partialorder %v1140_v19, 8.507059e+37  ;;  %v4922_v38 = vld [vmem:[%s8631_s1 + $0xb8] sm:$0xff] }
  0xab   : > { %v5319_v1 = vpop.eup %5318  ;;  %v1641_v22 = vsel %vm8645_vm13, %v6313_v4, 0.0  ;;  %v1671_v11 = vpack.c.bf16 %v1630_v29, %v1630_v29  ;;  %v1397_v41 = vmul.f32 %v1159_v50, %v5821_v20  ;;  %vm8641_vm14 = vcmp.eq.s32.totalorder %v6381_v14, 1  ;;  %3423 = vmatpush.bf16.msrb.mxu2 %v4922_v38 }
  0xac   : > { %v1629_v16 = vsel %vm8656_vm4, %v1383_v15, 0.0  ;;  %v1386_v55 = vmul.f32 %v994_v61, %v6047_v39  ;;  %v1139_v9 = vsel %vm6438_vm2, %v5315_v44, %v1135_v24  ;;  %5322 = vpow2.f32 %v633_v37  ;;  %v5426_v15 = vld [vmem:[%s5646_s8 + $0x68] sm:$0xff]   ;;  %v6489_v37 = vld [vmem:[%s5646_s8 + $0x10] sm:$0xff]  }
  0xad   : > { %v1670_v31 = vpack.c.bf16 %v1629_v16, %v1629_v16  ;;  %v1144_v19 = vsel %vm1141_vm8, %v1143_v53, %v1139_v9  ;;  %vm8644_vm11 = vcmp.eq.s32.totalorder %v6449_v47, 1  ;;  %5324 = vrcp.f32 %v6442_v28 }
  0xae   : > { %v5321_v49 = vpop.eup %5320  ;;  %v608_v4 = vsub.f32 0.0, %v6445_v10  ;;  %v1396_v20 = vmul.f32 %v1144_v19, %v6193_v25  ;;  %v6465_v63 = vadd.f32 1.0, %v5319_v1  ;;  %v5001_v39 = vunpack.c.l.bf16 %v5976_v52 }
  0xaf   : > { %v6467_v23 = vadd.f32 1.0, %v5321_v49  ;;  %v1682_v54 = vpack.c.bf16 %v1641_v22, %v1641_v22  ;;  %vm8650_vm7 = vcmp.eq.s32.totalorder %v6456_v48, 1  ;;  %v1752_v44 = vunpack.c.l.b16 %v1670_v31 }
  0xb0   : > { %v1642_v26 = vsel %vm8644_vm11, %v1396_v20, 0.0  ;;  %v1753_v7 = vunpack.c.l.b16 %v1671_v11  ;;  %v6476_v25 = vsel %vm8641_vm14, %v1397_v41, 0.0  ;;  %v665_v42 = vmul.f32 1.442695, %v608_v4  ;;  %v6499_v41 = vpop.permute.xlu1 %1457 }
  0xb1   : > { %5326 = vrcp.f32 %v6467_v23  ;;  %v1683_v12 = vpack.c.bf16 %v1642_v26, %v1642_v26  ;;  %v6480_v52 = vsel %vm8650_vm7, %v1386_v55, 0.0  ;;  %v520_v29 = vmul.f32 %v6370_v27, %v5001_v39  ;;  %8815 = vst [vmem:[#allocation17_spill] sm:$0xff] %v6499_v41 }
  0xb2   : > { %v5323_v50 = vpop.eup %5322  ;;  %5328 = vrcp.f32 %v6465_v63  ;;  %v5026_v58 = vunpack.c.h.bf16 %v5426_v15  ;;  %v1764_v6 = vunpack.c.l.b16 %v1682_v54  ;;  %v1787_v24 = vpack.c.b16 %v1753_v7, %v1752_v44 }
  0xb3   : > { %v6491_v61 = vpop.eup %5324  ;;  %v1765_v53 = vunpack.c.l.b16 %v1683_v12  ;;  %v6495_v1 = vadd.f32 1.0, %v5323_v50  ;;  %5330 = vpow2.f32 %v665_v42  ;;  %v6506_v49 = vadd.f32 %v6376_v35, %v520_v29 }
  0xb4   : > { %v1177_v9 = vmul.f32 %v6491_v61, %v6442_v28  ;;  %v533_v19 = vmul.f32 %v6370_v27, %v5026_v58  ;;  %vm776_vm5 = vweird.f32 %v6467_v23  ;;  %v1857_v44 = vshrl.u32 %v1787_v24, 16 }
  0xb5   : > { %v1793_v11 = vpack.c.b16 %v1765_v53, %v1764_v6  ;;  %5332 = vrcp.f32 %v6495_v1  ;;  %v1860_v26 = vshll.u32 %v1787_v24, 16  ;;  %v780_v7 = vand.u32 2147483647, %v6467_v23 }
  0xb6   : > { %v782_v12 = vand.u32 2147483648, %v6467_v23  ;;  %vm1577_vm6 = vcmp.eq.s32.totalorder %v6499_v41, 1  ;;  %v1178_v29 = vsub.f32 1.0, %v1177_v9  ;;  %vm1181_vm2 = vweird.f32 %v6442_v28 }
  0xb7   : > { %v5327_v31 = vpop.eup %5326  ;;  %v1911_v4 = vshrl.u32 %v1793_v11, 16  ;;  %v1914_v20 = vshll.u32 %v1793_v11, 16  ;;  %v1185_v15 = vand.u32 2147483647, %v6442_v28  ;;  %v1187_v58 = vand.u32 2147483648, %v6442_v28  ;;  %v6522_v11 = vpop.permute.xlu0 %1454 }
  0xb8   : > { %v772_v39 = vmul.f32 %v5327_v31, %v6467_v23  ;;  %v6511_v54 = vpop.eup %5328  ;;  %vm777_vm3 = vweird.f32 %v5327_v31  ;;  %vm1182_vm8 = vweird.f32 %v6491_v61  ;;  %8816 = vst [vmem:[#allocation18_spill] sm:$0xff] %v6522_v11  ;;  %v1859_v9 = vrot.slane %v1857_v44, 6 }
  0xb9   : > { %v1913_v42 = vrot.slane %v1911_v4, 6  ;;  %v1916_v50 = vrot.slane %v1914_v20, 7  ;;  %v5331_v6 = vpop.eup %5330  ;;  %v1252_v53 = vmul.f32 %v6511_v54, %v6465_v63  ;;  %v6525_v4 = vadd.f32 %v6376_v35, %v533_v19  ;;  %vm6531_vm14 = vmor %vm776_vm5, %vm777_vm3 }
  0xba   : > { %v773_v38 = vsub.f32 1.0, %v772_v39  ;;  %vm6535_vm11 = vcmp.eq.f32.partialorder %v780_v7, 8.507059e+37  ;;  %v1862_v16 = vrot.slane %v1860_v26, 7  ;;  %v606_v44 = vsub.f32 0.0, %v6506_v49 }
  0xbb   : > { %v5333_v20 = vpop.eup %5332  ;;  %v6527_v39 = vor.u32 %v1916_v50, %v1913_v42  ;;  %v1179_v42 = vmul.f32 %v6491_v61, %v1178_v29  ;;  %vm761_vm13 = vweird.f32 %v6495_v1  ;;  %v765_v23 = vand.u32 2147483647, %v6495_v1 }
  0xbc   : > { %v774_v24 = vmul.f32 %v5327_v31, %v773_v38  ;;  %v783_v38 = vor.u32 1.1754944e-38, %v782_v12  ;;  %v757_v19 = vmul.f32 %v5333_v20, %v6495_v1  ;;  %v767_v50 = vand.u32 2147483648, %v6495_v1 }
  0xbd   : > { %vm1576_vm5 = vcmp.eq.s32.totalorder %v6522_v11, 1  ;;  %vm762_vm3 = vweird.f32 %v5333_v20  ;;  %v661_v12 = vmul.f32 1.442695, %v606_v44  ;;  %v619_v29 = vsub.f32 0.0, %v6525_v4 }
  0xbe   : > { %v775_v55 = vadd.f32 %v5327_v31, %v774_v24  ;;  %v758_v26 = vsub.f32 1.0, %v757_v19  ;;  %v1253_v24 = vsub.f32 1.0, %v1252_v53  ;;  %v6554_v47 = vsel %vm1802_vm1, %v6278_v30, %v6527_v39 }
  0xbf   : > { %v6557_v45 = vor.u32 %v1862_v16, %v1859_v9  ;;  %vm6559_vm7 = vcmp.eq.f32.partialorder %v1185_v15, 8.507059e+37  ;;  %v6564_v53 = vadd.f32 1.0, %v5331_v6  ;;  %3270 = vmatmul.bf16.gmra.mxu2 %v6554_v47  ;;  %v768_v30 = vor.u32 1.1754944e-38, %v767_v50 }
  0xc0   : > { %v779_v7 = vsel %vm6531_vm14, %v5327_v31, %v775_v55  ;;  %v759_v31 = vmul.f32 %v5333_v20, %v758_v26  ;;  %vm6569_vm14 = vmor %vm761_vm13, %vm762_vm3  ;;  %5334 = vpow2.f32 %v661_v12  ;;  %v687_v16 = vmul.f32 1.442695, %v619_v29 }
  0xc1   : > { %v784_v14 = vsel %vm6535_vm11, %v783_v38, %v779_v7  ;;  %v8825_v15 = vunpack.c.h.bf16 %v6489_v37  ;;  %vm766_vm11 = vcmp.eq.f32.partialorder %v765_v23, 8.507059e+37  ;;  %v4978_v6 = vunpack.c.h.bf16 %v5151_v60  ;;  %vm6586_vm13 = vmor %vm1181_vm2, %vm1182_vm8 }
  0xc2   : > { %v1372_v55 = vmul.f32 %v784_v14, %v6379_v0  ;;  %v760_v14 = vadd.f32 %v5333_v20, %v759_v31  ;;  %v1180_v38 = vadd.f32 %v6491_v61, %v1179_v42  ;;  %5336 = vpow2.f32 %v687_v16 }
  0xc3   : > { %v511_v9 = vmul.f32 %v6370_v27, %v8825_v15  ;;  %v4977_v19 = vunpack.c.l.bf16 %v5151_v60  ;;  %v1254_v50 = vmul.f32 %v6511_v54, %v1253_v24  ;;  %v509_v42 = vmul.f32 %v6370_v27, %v4978_v6 }
  0xc4   : > { %v1618_v0 = vsel %vm1577_vm6, %v1372_v55, 0.0  ;;  %v764_v23 = vsel %vm6569_vm14, %v5333_v20, %v760_v14  ;;  %v6597_v7 = vsel %vm1802_vm1, %v6383_v17, %v6557_v45  ;;  %5338 = vrcp.f32 %v6564_v53 }
  0xc5   : > { %v6580_v1 = vadd.f32 %v6376_v35, %v511_v9  ;;  %8828 = vst [vmem:[#allocation19_spill] sm:$0xff] %v6597_v7  ;;  %v1659_v60 = vpack.c.bf16 %v1618_v0, %v1618_v0  ;;  %v769_v26 = vsel %vm766_vm11, %v768_v30, %v764_v23  ;;  %v508_v28 = vmul.f32 %v6370_v27, %v4977_v19 }
  0xc6   : > { %3240 = vmatmul.bf16.gmra.mxu1 %v6597_v7  ;;  %v1188_v12 = vor.u32 1.1754944e-38, %v1187_v58  ;;  %vm1256_vm2 = vweird.f32 %v6465_v63  ;;  %v1371_v20 = vmul.f32 %v769_v26, %v6389_v32  ;;  %v6605_v24 = vadd.f32 %v6376_v35, %v509_v42  ;;  %v5335_v29 = vpop.eup %5334 }
  0xc7   : > { %v1184_v17 = vsel %vm6586_vm13, %v6491_v61, %v1180_v38  ;;  %vm1257_vm8 = vweird.f32 %v6511_v54  ;;  %v1262_v55 = vand.u32 2147483648, %v6465_v63  ;;  %v597_v31 = vsub.f32 0.0, %v6580_v1 }
  0xc8   : > { %v1617_v58 = vsel %vm1576_vm5, %v1371_v20, 0.0  ;;  %v6615_v22 = vadd.f32 1.0, %v5335_v29  ;;  %v595_v32 = vsub.f32 0.0, %v6605_v24  ;;  %v6619_v30 = vadd.f32 %v6376_v35, %v508_v28  ;;  %v5337_v16 = vpop.eup %5336  ;;  %vm6630_vm3 = vmor %vm1256_vm2, %vm1257_vm8 }
  0xc9   : > { %v1255_v61 = vadd.f32 %v6511_v54, %v1254_v50  ;;  %v1260_v15 = vand.u32 2147483647, %v6465_v63  ;;  %v1741_v9 = vunpack.c.l.b16 %v1659_v60  ;;  %v1658_v0 = vpack.c.bf16 %v1617_v58, %v1617_v58  ;;  %v4938_v63 = vld [vmem:[%s8631_s1 + $0x138] sm:$0xff]  ;;  %v6648_v60 = vld [vmem:[%s5646_s8 + $0x90] sm:$0xff]  }
  0xca   : > { %v8829_v14 = vpack.c.bf16 %v6476_v25, %v6476_v25  ;;  %5340 = vrcp.f32 %v6615_v22  ;;  %v6635_v19 = vpop.eup %5338  ;;  %v1189_v44 = vsel %vm6559_vm7, %v1188_v12, %v1184_v17  ;;  %v6639_v23 = vadd.f32 1.0, %v5337_v16  ;;  %v4914_v25 = vld [vmem:[%s8631_s1 + $0x78] sm:$0xff]  ;;  %3649 = vmatpush.bf16.msrb.mxu0 %v4938_v63 }
  0xcb   : > { %v1740_v50 = vunpack.c.l.b16 %v1658_v0  ;;  %v639_v42 = vmul.f32 1.442695, %v595_v32  ;;  %v8832_v26 = vpack.c.bf16 %v6480_v52, %v6480_v52  ;;  %v1263_v3 = vor.u32 1.1754944e-38, %v1262_v55  ;;  %3310 = vmatpush.bf16.msrb.mxu1 %v4914_v25 }
  0xcc   : > { %v6626_v6 = vunpack.c.l.b16 %v8829_v14  ;;  %v643_v12 = vmul.f32 1.442695, %v597_v31  ;;  %v594_v20 = vsub.f32 0.0, %v6619_v30  ;;  %v1259_v29 = vsel %vm6630_vm3, %v6511_v54, %v1255_v61 }
  0xcd   : > { %v6653_v28 = vunpack.c.l.b16 %v8832_v26  ;;  %vm1261_vm7 = vcmp.eq.f32.partialorder %v1260_v15, 8.507059e+37  ;;  %v1781_v17 = vpack.c.b16 %v1741_v9, %v1740_v50  ;;  %5342 = vrcp.f32 %v6639_v23 }
  0xce   : > { %v6661_v58 = vmul.f32 %v1189_v44, %v6286_v8  ;;  %v997_v52 = vmul.f32 %v6635_v19, %v6564_v53  ;;  %5344 = vpow2.f32 %v639_v42  ;;  %v5045_v55 = vunpack.c.l.bf16 %v6648_v60 }
  0xcf   : > { %v1804_v31 = vshrl.u32 %v1781_v17, 16  ;;  %v1807_v32 = vshll.u32 %v1781_v17, 16  ;;  %v637_v16 = vmul.f32 1.442695, %v594_v20  ;;  %vm2012_vm14 = vcmask 1041408  }
  0xd0   : > { %v5341_v54 = vpop.eup %5340  ;;  %v6666_v61 = vsel %vm1261_vm7, %v1263_v3, %v1259_v29  ;;  %v977_v9 = vand.u32 2147483648, %v6615_v22  ;;  %5346 = vpow2.f32 %v643_v12  ;;  %v1007_v14 = vand.u32 2147483648, %v6564_v53  ;;  %vm2013_vm2 = vmand %vm2012_vm14, %vm1802_vm1  ;;  %v6679_v12 = vpop.permute.xlu1 %1496 }
  0xd1   : > { %v1806_v8 = vrot.slane %v1804_v31, 6  ;;  %v1809_v0 = vrot.slane %v1807_v32, 7  ;;  %v967_v38 = vmul.f32 %v5341_v54, %v6615_v22  ;;  %v998_v44 = vsub.f32 1.0, %v997_v52  ;;  %8833 = vst [vmem:[#allocation20_spill] sm:$0xff] %v6679_v12 }
  0xd2   : > { %vm971_vm11 = vweird.f32 %v6615_v22  ;;  %vm972_vm13 = vweird.f32 %v5341_v54  ;;  %v975_v50 = vand.u32 2147483647, %v6615_v22  ;;  %vm1001_vm8 = vweird.f32 %v6564_v53 }
  0xd3   : > { %v5343_v25 = vpop.eup %5342  ;;  %v968_v63 = vsub.f32 1.0, %v967_v38  ;;  %5348 = vpow2.f32 %v637_v16  ;;  %v6676_v42 = vor.u32 %v1809_v0, %v1806_v8  ;;  %v542_v26 = vmul.f32 %v6370_v27, %v5045_v55  ;;  %vm6695_vm3 = vmor %vm971_vm11, %vm972_vm13 }
  0xd4   : > { %v5345_v3 = vpop.eup %5344  ;;  %v978_v20 = vor.u32 1.1754944e-38, %v977_v9  ;;  %v1162_v29 = vmul.f32 %v5343_v25, %v6639_v23  ;;  %v1172_v17 = vand.u32 2147483648, %v6639_v23  ;;  %v5037_v52 = vunpack.c.l.bf16 %v6265_v13 }
  0xd5   : > { %v969_v31 = vmul.f32 %v5341_v54, %v968_v63  ;;  %v6684_v32 = vadd.f32 1.0, %v5345_v3  ;;  %v6687_v38 = vsel %vm2013_vm2, 0, %v6676_v42  ;;  %v6690_v16 = vadd.f32 %v6376_v35, %v542_v26  ;;  %v6706_v26 = vpop.permute.xlu0 %1535 }
  0xd6   : > { %8834 = vst [vmem:[#allocation21_spill] sm:$0xff] %v6687_v38  ;;  %v5347_v55 = vpop.eup %5346  ;;  %v1163_v8 = vsub.f32 1.0, %v1162_v29  ;;  %vm1166_vm7 = vweird.f32 %v6639_v23  ;;  %vm1167_vm14 = vweird.f32 %v5343_v25  ;;  %v1170_v13 = vand.u32 2147483647, %v6639_v23  ;;  %3210 = vmatmul.bf16.gmra.mxu0 %v6687_v38  ;;  %v4913_v23 = vld [vmem:[%s8631_s1 + $0x70] sm:$0xff] }
  0xd7   : > { %v6702_v0 = vor.u32 1.1754944e-38, %v1007_v14  ;;  %v970_v63 = vadd.f32 %v5341_v54, %v969_v31  ;;  %vm976_vm2 = vcmp.eq.f32.partialorder %v975_v50, 8.507059e+37  ;;  %5350 = vrcp.f32 %v6684_v32  ;;  %8837 = vst [vmem:[#allocation22_spill] sm:$0xff] %v6706_v26  ;;  %vm6716_vm13 = vmor %vm1166_vm7, %vm1167_vm14  ;;  %3311 = vmatpush.bf16.msrb.mxu1 %v4913_v23 }
  0xd8   : > { %v999_v22 = vmul.f32 %v6635_v19, %v998_v44  ;;  %v1164_v3 = vmul.f32 %v5343_v25, %v1163_v8  ;;  %v628_v29 = vsub.f32 0.0, %v6690_v16  ;;  %v538_v15 = vmul.f32 %v6370_v27, %v5037_v52  ;;  %v6763_v14 = vpop.permute.xlu1 %1463 }
  0xd9   : > { %v5349_v59 = vpop.eup %5348  ;;  %v974_v34 = vsel %vm6695_vm3, %v5341_v54, %v970_v63  ;;  %vm8655_vm11 = vcmp.eq.s32.totalorder %v6679_v12, 1  ;;  %v1173_v44 = vor.u32 1.1754944e-38, %v1172_v17  ;;  %v6720_v50 = vadd.f32 1.0, %v5347_v55  ;;  %v4921_v54 = vld [vmem:[%s8631_s1 + $0xb0] sm:$0xff]  ;;  %v6734_v63 = vpop.permute.xlu2 %1538  ;;  %8845 = vst [vmem:[#allocation24_spill] sm:$0xff] %v6763_v14 }
  0xda   : > { %v979_v31 = vsel %vm976_vm2, %v978_v20, %v974_v34  ;;  %v1165_v8 = vadd.f32 %v5343_v25, %v1164_v3  ;;  %vm6722_vm9 = vcmp.eq.f32.partialorder %v1170_v13, 8.507059e+37  ;;  %v6726_v9 = vadd.f32 1.0, %v5349_v59  ;;  %8842 = vst [vmem:[#allocation23_spill] sm:$0xff] %v6734_v63  ;;  %3424 = vmatpush.bf16.msrb.mxu2 %v4921_v54 }
  0xdb   : > { %vm1002_vm3 = vweird.f32 %v6635_v19  ;;  %v1385_v34 = vmul.f32 %v979_v31, %v6506_v49  ;;  %vm8654_vm7 = vcmp.eq.s32.totalorder %v6706_v26, 1  ;;  %v705_v20 = vmul.f32 1.442695, %v628_v29 }
  0xdc   : > { %v6740_v59 = vadd.f32 %v6635_v19, %v999_v22  ;;  %v1169_v17 = vsel %vm6716_vm13, %v5343_v25, %v1165_v8  ;;  %5352 = vrcp.f32 %v6726_v9  ;;  %v6746_v55 = vadd.f32 %v6376_v35, %v538_v15  ;;  %vm6758_vm14 = vmor %vm1001_vm8, %vm1002_vm3 }
  0xdd   : > { %v5351_v13 = vpop.eup %5350  ;;  %v1631_v49 = vsel %vm8655_vm11, %v1385_v34, 0.0  ;;  %v1174_v3 = vsel %vm6722_vm9, %v1173_v44, %v1169_v17  ;;  %5354 = vrcp.f32 %v6720_v50  ;;  %v5030_v22 = vunpack.c.h.bf16 %v6226_v51  ;;  %v6815_v5 = vpop.permute.xlu0 %1460 }
  0xde   : > { %v1672_v15 = vpack.c.bf16 %v1631_v49, %v1631_v49  ;;  %v1398_v29 = vmul.f32 %v1174_v3, %v6525_v4  ;;  %v802_v31 = vmul.f32 %v5351_v13, %v6684_v32  ;;  %v810_v44 = vand.u32 2147483647, %v6684_v32  ;;  %8854 = vst [vmem:[#allocation26_spill] sm:$0xff] %v6815_v5 }
  0xdf   : > { %vm806_vm9 = vweird.f32 %v6684_v32  ;;  %vm807_vm2 = vweird.f32 %v5351_v13  ;;  %v812_v51 = vand.u32 2147483648, %v6684_v32  ;;  %5356 = vpow2.f32 %v705_v20 }
  0xe0   : > { %v1754_v8 = vunpack.c.l.b16 %v1672_v15  ;;  %v1644_v52 = vsel %vm8654_vm7, %v1398_v29, 0.0  ;;  %v803_v54 = vsub.f32 1.0, %v802_v31  ;;  %v624_v23 = vsub.f32 0.0, %v6746_v55  ;;  %vm6795_vm11 = vmor %vm806_vm9, %vm807_vm2 }
  0xe1   : > { %v1685_v34 = vpack.c.bf16 %v1644_v52, %v1644_v52  ;;  %vm1579_vm8 = vcmp.eq.s32.totalorder %v6763_v14, 1  ;;  %v535_v17 = vmul.f32 %v6370_v27, %v5030_v22  ;;  %vm8667_vm13 = vcmp.eq.s32.totalorder %v6734_v63, 1 }
  0xe2   : > { %v5353_v49 = vpop.eup %5352  ;;  %v1788_v20 = vpack.c.b16 %v6653_v28, %v1754_v8  ;;  %v804_v3 = vmul.f32 %v5351_v13, %v803_v54  ;;  %vm6780_vm3 = vcmp.eq.f32.partialorder %v810_v44, 8.507059e+37  ;;  %v697_v29 = vmul.f32 1.442695, %v624_v23 }
  0xe3   : > { %v6784_v31 = vpop.eup %5354  ;;  %v8848_v4 = vand.u32 2147483647, %v6564_v53  ;;  %v1767_v22 = vunpack.c.l.b16 %v1685_v34  ;;  %v813_v44 = vor.u32 1.1754944e-38, %v812_v51  ;;  %v787_v8 = vmul.f32 %v5353_v49, %v6726_v9  ;;  %v6803_v34 = vpop.permute.xlu2 %1553 }
  0xe4   : > { %vm791_vm4 = vweird.f32 %v6726_v9  ;;  %v805_v54 = vadd.f32 %v5351_v13, %v804_v3  ;;  %v795_v53 = vand.u32 2147483647, %v6726_v9  ;;  %v797_v23 = vand.u32 2147483648, %v6726_v9  ;;  %8853 = vst [vmem:[#allocation25_spill] sm:$0xff] %v6803_v34 }
  0xe5   : > { %vm6788_vm7 = vcmp.eq.f32.partialorder %v8848_v4, 8.507059e+37  ;;  %5358 = vpow2.f32 %v697_v29  ;;  %v5357_v4 = vpop.eup %5356  ;;  %v1794_v32 = vpack.c.b16 %v1767_v22, %v6626_v6  ;;  %v788_v26 = vsub.f32 1.0, %v787_v8  ;;  %v6818_v22 = vld [vmem:[%s5646_s8 + $0x48] sm:$0xff]  }
  0xe6   : > { %vm792_vm9 = vweird.f32 %v5353_v49  ;;  %v6807_v51 = vadd.f32 %v6376_v35, %v535_v17  ;;  %v1866_v21 = vshrl.u32 %v1788_v20, 16  ;;  %v1869_v48 = vshll.u32 %v1788_v20, 16 }
  0xe7   : > { %v832_v3 = vmul.f32 %v6784_v31, %v6720_v50  ;;  %v809_v12 = vsel %vm6795_vm11, %v5351_v13, %v805_v54  ;;  %v1920_v29 = vshrl.u32 %v1794_v32, 16  ;;  %v1923_v18 = vshll.u32 %v1794_v32, 16  ;;  %vm6823_vm2 = vmor %vm791_vm4, %vm792_vm9 }
  0xe8   : > { %v814_v46 = vsel %vm6780_vm3, %v813_v44, %v809_v12  ;;  %v789_v6 = vmul.f32 %v5353_v49, %v788_v26  ;;  %vm6827_vm15 = vcmp.eq.f32.partialorder %v795_v53, 8.507059e+37  ;;  %v798_v28 = vor.u32 1.1754944e-38, %v797_v23 }
  0xe9   : > { %v1374_v17 = vmul.f32 %v814_v46, %v6605_v24  ;;  %v6831_v15 = vadd.f32 1.0, %v5357_v4  ;;  %v1922_v12 = vrot.slane %v1920_v29, 6  ;;  %v1925_v44 = vrot.slane %v1923_v18, 7 }
  0xea   : > { %v790_v26 = vadd.f32 %v5353_v49, %v789_v6  ;;  %v621_v8 = vsub.f32 0.0, %v6807_v51  ;;  %v833_v46 = vsub.f32 1.0, %v832_v3  ;;  %vm1578_vm4 = vcmp.eq.s32.totalorder %v6815_v5, 1 }
  0xeb   : > { %v5359_v54 = vpop.eup %5358  ;;  %v1620_v24 = vsel %vm1579_vm8, %v1374_v17, 0.0  ;;  %v5010_v9 = vunpack.c.h.bf16 %v6818_v22  ;;  %v1868_v53 = vrot.slane %v1866_v21, 6  ;;  %v1871_v32 = vrot.slane %v1869_v48, 7  ;;  %v5167_v48 = vld [vmem:[%s5646_s8 + $0x88] sm:$0xff]  }
  0xec   : > { %v6838_v23 = vor.u32 %v1925_v44, %v1922_v12  ;;  %v794_v18 = vsel %vm6823_vm2, %v5353_v49, %v790_v26  ;;  %v1661_v4 = vpack.c.bf16 %v1620_v24, %v1620_v24  ;;  %v6844_v6 = vadd.f32 1.0, %v5359_v54 }
  0xed   : > { %v799_v29 = vsel %vm6827_vm15, %v798_v28, %v794_v18  ;;  %v691_v3 = vmul.f32 1.442695, %v621_v8  ;;  %v6849_v17 = vsel %vm8667_vm13, %v6661_v58, 0.0  ;;  %5360 = vrcp.f32 %v6831_v15 }
  0xee   : > { %v1373_v21 = vmul.f32 %v799_v29, %v6619_v30  ;;  %v6856_v49 = vmul.f32 %v6666_v61, %v6337_v62  ;;  %v8859_v20 = vsel %vm6758_vm14, %v6635_v19, %v6740_v59  ;;  %v834_v58 = vmul.f32 %v6784_v31, %v833_v46  ;;  %v6868_v30 = vpop.permute.xlu2 %1502 }
  0xef   : > { %v1009_v13 = vsel %vm6788_vm7, %v6702_v0, %v8859_v20  ;;  %5362 = vrcp.f32 %v6844_v6  ;;  %8860 = vst [vmem:[#allocation27_spill] sm:$0xff] %v6868_v30  ;;  %v6875_v62 = vsel %vm1802_vm1, %v6527_v39, %v6838_v23  ;;  %v525_v19 = vmul.f32 %v6370_v27, %v5010_v9 }
  0xf0   : > { %v1619_v28 = vsel %vm1578_vm4, %v1373_v21, 0.0  ;;  %5364 = vpow2.f32 %v691_v3  ;;  %vm8666_vm15 = vcmp.eq.s32.totalorder %v6803_v34, 1  ;;  %v6879_v61 = vor.u32 %v1871_v32, %v1868_v53  ;;  %3275 = vmatmul.bf16.gmra.mxu2 %v6875_v62  ;;  %v7075_v34 = vld [vmem:[%s5578_s30] ss:$0 sm:$0xff] }
  0xf1   : > { %v1743_v0 = vunpack.c.l.b16 %v1661_v4  ;;  %v1660_v59 = vpack.c.bf16 %v1619_v28, %v1619_v28  ;;  %v5042_v25 = vunpack.c.h.bf16 %v5167_v48  ;;  %v6883_v52 = vmul.f32 %v1009_v13, %v6445_v10 }
  0xf2   : > { %vm836_vm11 = vweird.f32 %v6720_v50  ;;  %v6887_v12 = vadd.f32 %v6376_v35, %v525_v19  ;;  %v5041_v39 = vunpack.c.l.bf16 %v5167_v48  ;;  %vm8668_vm7 = vcmp.eq.s32.totalorder %v6868_v30, 1  ;;  %v4937_v19 = vld [vmem:[%s8631_s1 + $0x130] sm:$0xff] }
  0xf3   : > { %v840_v44 = vand.u32 2147483647, %v6720_v50  ;;  %v842_v26 = vand.u32 2147483648, %v6720_v50  ;;  %v1742_v8 = vunpack.c.l.b16 %v1660_v59  ;;  %v541_v54 = vmul.f32 %v6370_v27, %v5042_v25  ;;  %v6893_v46 = vpop.eup %5360  ;;  %3650 = vmatpush.bf16.msrb.mxu0 %v4937_v19 }
  0xf4   : > { %v835_v10 = vadd.f32 %v6784_v31, %v834_v58  ;;  %vm837_vm14 = vweird.f32 %v6784_v31  ;;  %vm1241_vm3 = vweird.f32 %v6844_v6  ;;  %v611_v24 = vsub.f32 0.0, %v6887_v12 }
  0xf5   : > { %v5363_v9 = vpop.eup %5362  ;;  %v1782_v53 = vpack.c.b16 %v1743_v0, %v1742_v8  ;;  %v1245_v32 = vand.u32 2147483647, %v6844_v6  ;;  %v6901_v18 = vadd.f32 %v6376_v35, %v541_v54  ;;  %v6906_v4 = vsel %vm1802_vm1, %v6557_v45, %v6879_v61  ;;  %vm6914_vm9 = vmor %vm836_vm11, %vm837_vm14  ;;  %v4920_v0 = vld [vmem:[%s8631_s1 + $0xa8] sm:$0xff] }
  0xf6   : > { %8861 = vst [vmem:[#allocation28_spill] sm:$0xff] %v6906_v4  ;;  %v5365_v29 = vpop.eup %5364  ;;  %v1237_v3 = vmul.f32 %v5363_v9, %v6844_v6  ;;  %v1247_v21 = vand.u32 2147483648, %v6844_v6  ;;  %v671_v48 = vmul.f32 1.442695, %v611_v24  ;;  %v540_v20 = vmul.f32 %v6370_v27, %v5041_v39  ;;  %3245 = vmatmul.bf16.gmra.mxu1 %v6906_v4  ;;  %3425 = vmatpush.bf16.msrb.mxu2 %v4920_v0  ;;  %v6933_v63 = vpop.permute.xlu2 %1469 }
  0xf7   : > { %v1812_v58 = vshrl.u32 %v1782_v53, 16  ;;  %v1815_v28 = vshll.u32 %v1782_v53, 16  ;;  %v6918_v45 = vadd.f32 1.0, %v5365_v29  ;;  %v627_v59 = vsub.f32 0.0, %v6901_v18  ;;  %8864 = vst [vmem:[#allocation29_spill] sm:$0xff] %v6933_v63 }
  0xf8   : > { %v1297_v50 = vmul.f32 %v6893_v46, %v6831_v15  ;;  %v1238_v25 = vsub.f32 1.0, %v1237_v3  ;;  %vm1242_vm2 = vweird.f32 %v5363_v9  ;;  %5366 = vpow2.f32 %v671_v48  ;;  %v6937_v48 = vpop.permute.xlu1 %1550 }
  0xf9   : > { %v843_v39 = vor.u32 1.1754944e-38, %v842_v26  ;;  %v1814_v8 = vrot.slane %v1812_v58, 6  ;;  %v1817_v54 = vrot.slane %v1815_v28, 7  ;;  %5368 = vrcp.f32 %v6918_v45  ;;  %8865 = vst [vmem:[#allocation30_spill] sm:$0xff] %v6937_v48  ;;  %vm6942_vm14 = vmor %vm1241_vm3, %vm1242_vm2 }
  0xfa   : > { %v839_v24 = vsel %vm6914_vm9, %v6784_v31, %v835_v10  ;;  %vm841_vm11 = vcmp.eq.f32.partialorder %v840_v44, 8.507059e+37  ;;  %v1239_v53 = vmul.f32 %v5363_v9, %v1238_v25  ;;  %v1248_v29 = vor.u32 1.1754944e-38, %v1247_v21 }
  0xfb   : > { %v6935_v3 = vor.u32 %v1817_v54, %v1814_v8  ;;  %v703_v58 = vmul.f32 1.442695, %v627_v59  ;;  %v6947_v31 = vadd.f32 %v6376_v35, %v540_v20  ;;  %v4981_v44 = vunpack.c.l.bf16 %v6489_v37  ;;  %v6962_v20 = vld [vmem:[%s5646_s8 + $0x98] sm:$0xff]  }
  0xfc   : > { %v6953_v10 = vsel %vm8666_vm15, %v6856_v49, 0.0  ;;  %v1298_v21 = vsub.f32 1.0, %v1297_v50  ;;  %v1240_v13 = vadd.f32 %v5363_v9, %v1239_v53  ;;  %vm1246_vm9 = vcmp.eq.f32.partialorder %v1245_v32, 8.507059e+37 }
  0xfd   : > { %v844_v28 = vsel %vm841_vm11, %v843_v39, %v839_v24  ;;  %5370 = vpow2.f32 %v703_v58  ;;  %v626_v6 = vsub.f32 0.0, %v6947_v31  ;;  %v6959_v19 = vsel %vm1802_vm1, %v6676_v42, %v6935_v3 }
  0xfe   : > { %8868 = vst [vmem:[#allocation31_spill] sm:$0xff] %v6959_v19  ;;  %v5367_v37 = vpop.eup %5366  ;;  %v1633_v49 = vsel %vm8668_vm7, %v6883_v52, 0.0  ;;  %vm8690_vm3 = vcmp.eq.s32.totalorder %v6933_v63, 1  ;;  %v1244_v32 = vsel %vm6942_vm14, %v5363_v9, %v1240_v13  ;;  %vm8677_vm2 = vcmp.eq.s32.totalorder %v6937_v48, 1  ;;  %3215 = vmatmul.bf16.gmra.mxu0 %v6959_v19 }
  0xff   : > { %v5369_v0 = vpop.eup %5368  ;;  %v1249_v59 = vsel %vm1246_vm9, %v1248_v29, %v1244_v32  ;;  %v6972_v42 = vadd.f32 1.0, %v5367_v37  ;;  %v701_v50 = vmul.f32 1.442695, %v626_v6  ;;  %v510_v25 = vmul.f32 %v6370_v27, %v4981_v44 }
 0x100   : > { %v1376_v39 = vmul.f32 %v844_v28, %v6580_v1  ;;  %v1299_v52 = vmul.f32 %v6893_v46, %v1298_v21  ;;  %v1192_v8 = vmul.f32 %v5369_v0, %v6918_v45  ;;  %v5049_v54 = vunpack.c.l.bf16 %v6962_v20 }
 0x101   : > { %vm1196_vm11 = vweird.f32 %v6918_v45  ;;  %v1200_v9 = vand.u32 2147483647, %v6918_v45  ;;  %v1202_v24 = vand.u32 2147483648, %v6918_v45  ;;  %5372 = vrcp.f32 %v6972_v42 }
 0x102   : > { %v1403_v53 = vmul.f32 %v1249_v59, %v6746_v55  ;;  %v1193_v29 = vsub.f32 1.0, %v1192_v8  ;;  %vm1197_vm14 = vweird.f32 %v5369_v0  ;;  %5374 = vpow2.f32 %v701_v50  ;;  %v7010_v50 = vpop.permute.xlu0 %1541 }
 0x103   : > { %v5371_v1 = vpop.eup %5370  ;;  %vm1301_vm9 = vweird.f32 %v6831_v15  ;;  %vm1302_vm15 = vweird.f32 %v6893_v46  ;;  %v1305_v26 = vand.u32 2147483647, %v6831_v15  ;;  %v6988_v58 = vadd.f32 %v6376_v35, %v510_v25  ;;  %vm6999_vm13 = vmor %vm1196_vm11, %vm1197_vm14  ;;  %8873 = vst [vmem:[#allocation32_spill] sm:$0xff] %v7010_v50 }
 0x104   : > { %v1307_v44 = vand.u32 2147483648, %v6831_v15  ;;  %v1194_v21 = vmul.f32 %v5369_v0, %v1193_v29  ;;  %v6991_v13 = vadd.f32 1.0, %v5371_v1  ;;  %v544_v55 = vmul.f32 %v6370_v27, %v5049_v54  ;;  %vm7004_vm7 = vmor %vm1301_vm9, %vm1302_vm15 }
 0x105   : > { %v1686_v28 = vpack.c.bf16 %v6849_v17, %v6849_v17  ;;  %v1300_v6 = vadd.f32 %v6893_v46, %v1299_v52  ;;  %v1203_v32 = vor.u32 1.1754944e-38, %v1202_v24  ;;  %v596_v59 = vsub.f32 0.0, %v6988_v58 }
 0x106   : > { %v1649_v27 = vsel %vm8677_vm2, %v1403_v53, 0.0  ;;  %v1195_v17 = vadd.f32 %v5369_v0, %v1194_v21  ;;  %vm1201_vm0 = vcmp.eq.f32.partialorder %v1200_v9, 8.507059e+37  ;;  %5376 = vrcp.f32 %v6991_v13 }
 0x107   : > { %v7013_v45 = vpop.eup %5372  ;;  %v1691_v25 = vpack.c.bf16 %v6953_v10, %v6953_v10  ;;  %v1674_v52 = vpack.c.bf16 %v1633_v49, %v1633_v49  ;;  %v7019_v8 = vsel %vm8690_vm3, %v1376_v39, 0.0  ;;  %v641_v54 = vmul.f32 1.442695, %v596_v59  ;;  %v7055_v59 = vpop.permute.xlu1 %1559 }
 0x108   : > { %v5375_v24 = vpop.eup %5374  ;;  %vm7021_vm15 = vcmp.eq.f32.partialorder %v1305_v26, 8.507059e+37  ;;  %v1308_v29 = vor.u32 1.1754944e-38, %v1307_v44  ;;  %v1199_v9 = vsel %vm6999_vm13, %v5369_v0, %v1195_v17  ;;  %v7028_v1 = vadd.f32 %v6376_v35, %v544_v55  ;;  %v4912_v55 = vld [vmem:[%s8631_s1 + $0x68] sm:$0xff]  ;;  %8876 = vst [vmem:[#allocation33_spill] sm:$0xff] %v7055_v59 }
 0x109   : > { %v1304_v10 = vsel %vm7004_vm7, %v6893_v46, %v1300_v6  ;;  %v1690_v49 = vpack.c.bf16 %v1649_v27, %v1649_v27  ;;  %v1204_v39 = vsel %vm1201_vm0, %v1203_v32, %v1199_v9  ;;  %vm8679_vm11 = vcmp.eq.s32.totalorder %v7010_v50, 1  ;;  %3312 = vmatpush.bf16.msrb.mxu1 %v4912_v55 }
 0x10a   : > { %v1400_v26 = vmul.f32 %v1204_v39, %v6807_v51  ;;  %v1042_v21 = vmul.f32 %v7013_v45, %v6972_v42  ;;  %v7037_v44 = vadd.f32 1.0, %v5375_v24  ;;  %5378 = vpow2.f32 %v641_v54  ;;  %v4936_v51 = vld [vmem:[%s8631_s1 + $0x128] sm:$0xff]  ;;  %v7062_v24 = vld [vmem:[%s5646_s8 + $0x78] sm:$0xff]  }
 0x10b   : > { %v1768_v0 = vunpack.c.l.b16 %v1686_v28  ;;  %v1773_v37 = vunpack.c.l.b16 %v1691_v25  ;;  %v7039_v35 = vunpack.c.l.b16 %v1674_v52  ;;  %v7051_v28 = vsel %vm7021_vm15, %v1308_v29, %v1304_v10  ;;  %3651 = vmatpush.bf16.msrb.mxu0 %v4936_v51  ;;  %v5427_v52 = vld [vmem:[%s5646_s8 + $0x40] sm:$0xff]  }
 0x10c   : > { %v5377_v6 = vpop.eup %5376  ;;  %v1646_v32 = vsel %vm8679_vm11, %v1400_v26, 0.0  ;;  %5380 = vrcp.f32 %v7037_v44  ;;  %v630_v15 = vsub.f32 0.0, %v7028_v1  ;;  %v1772_v27 = vunpack.c.l.b16 %v1690_v49 }
 0x10d   : > { %v1687_v17 = vpack.c.bf16 %v1646_v32, %v1646_v32  ;;  %v1282_v25 = vmul.f32 %v5377_v6, %v6991_v13  ;;  %v5006_v54 = vunpack.c.h.bf16 %v5427_v52  ;;  %v1043_v53 = vsub.f32 1.0, %v1042_v21 }
 0x10e   : > { %vm1046_vm0 = vweird.f32 %v6972_v42  ;;  %v1290_v29 = vand.u32 2147483647, %v6991_v13  ;;  %v1292_v9 = vand.u32 2147483648, %v6991_v13  ;;  %vm1286_vm13 = vweird.f32 %v6991_v13 }
 0x10f   : > { %v1769_v10 = vunpack.c.l.b16 %v1687_v17  ;;  %v1283_v39 = vsub.f32 1.0, %v1282_v25  ;;  %vm1287_vm7 = vweird.f32 %v5377_v6  ;;  %vm8686_vm14 = vcmp.eq.s32.totalorder %v7055_v59, 1 }
 0x110   : > { %v5379_v49 = vpop.eup %5378  ;;  %v1050_v26 = vand.u32 2147483647, %v6972_v42  ;;  %v1052_v55 = vand.u32 2147483648, %v6972_v42  ;;  %v709_v21 = vmul.f32 1.442695, %v630_v15  ;;  %v5034_v51 = vunpack.c.h.bf16 %v7062_v24  ;;  %vm7081_vm9 = vmor %vm1286_vm13, %vm1287_vm7  ;;  %v4919_v15 = vld [vmem:[%s8631_s1 + $0xa0] sm:$0xff] }
 0x111   : > { %v7072_v32 = vpack.c.b16 %v1773_v37, %v1772_v27  ;;  %v1795_v52 = vpack.c.b16 %v1769_v10, %v1768_v0  ;;  %v1284_v46 = vmul.f32 %v5377_v6, %v1283_v39  ;;  %v523_v17 = vmul.f32 %v7075_v34, %v5006_v54  ;;  %3426 = vmatpush.bf16.msrb.mxu2 %v4919_v15 }
 0x112   : > { %v5381_v25 = vpop.eup %5380  ;;  %v1044_v48 = vmul.f32 %v7013_v45, %v1043_v53  ;;  %vm7085_vm15 = vcmp.eq.f32.partialorder %v1290_v29, 8.507059e+37  ;;  %v1293_v0 = vor.u32 1.1754944e-38, %v1292_v9  ;;  %v7089_v37 = vadd.f32 1.0, %v5379_v49  ;;  %v7092_v53 = vpop.permute.xlu2 %1562 }
 0x113   : > { %v1929_v27 = vshrl.u32 %v1795_v52, 16  ;;  %v1932_v10 = vshll.u32 %v1795_v52, 16  ;;  %v1285_v54 = vadd.f32 %v5377_v6, %v1284_v46  ;;  %v1267_v39 = vmul.f32 %v5381_v25, %v7037_v44  ;;  %8881 = vst [vmem:[#allocation34_spill] sm:$0xff] %v7092_v53  ;;  %v7100_v49 = vpop.permute.xlu0 %1556  ;;  %v7103_v46 = vld [vmem:[%s5586_s11] ss:$0 sm:$0xff] }
 0x114   : > { %vm1047_vm13 = vweird.f32 %v7013_v45  ;;  %vm1271_vm7 = vweird.f32 %v7037_v44  ;;  %v1275_v13 = vand.u32 2147483647, %v7037_v44  ;;  %v1277_v29 = vand.u32 2147483648, %v7037_v44  ;;  %8882 = vst [vmem:[#allocation35_spill] sm:$0xff] %v7100_v49 }
 0x115   : > { %v1931_v30 = vrot.slane %v1929_v27, 6  ;;  %v1934_v57 = vrot.slane %v1932_v10, 7  ;;  %v1289_v9 = vsel %vm7081_vm9, %v5377_v6, %v1285_v54  ;;  %v7106_v52 = vadd.f32 %v7103_v46, %v523_v17  ;;  %vm7120_vm9 = vmor %vm1046_vm0, %vm1047_vm13 }
 0x116   : > { %v1294_v33 = vsel %vm7085_vm15, %v1293_v0, %v1289_v9  ;;  %v1268_v43 = vsub.f32 1.0, %v1267_v39  ;;  %vm1272_vm2 = vweird.f32 %v5381_v25  ;;  %5382 = vrcp.f32 %v7089_v37 }
 0x117   : > { %v7111_v63 = vor.u32 %v1934_v57, %v1931_v30  ;;  %v1045_v27 = vadd.f32 %v7013_v45, %v1044_v48  ;;  %v1406_v50 = vmul.f32 %v1294_v33, %v6901_v18  ;;  %v537_v6 = vmul.f32 %v7075_v34, %v5034_v51  ;;  %vm7132_vm12 = vmor %vm1271_vm7, %vm1272_vm2 }
 0x118   : > { %vm7124_vm15 = vcmp.eq.f32.partialorder %v1050_v26, 8.507059e+37  ;;  %v1053_v57 = vor.u32 1.1754944e-38, %v1052_v55  ;;  %v1269_v30 = vmul.f32 %v5381_v25, %v1268_v43  ;;  %vm8687_vm11 = vcmp.eq.s32.totalorder %v7100_v49, 1 }
 0x119   : > { %v1947_v33 = vshrl.u32 %v7072_v32, 16  ;;  %v1278_v48 = vor.u32 1.1754944e-38, %v1277_v29  ;;  %5384 = vpow2.f32 %v709_v21  ;;  %v609_v42 = vsub.f32 0.0, %v7106_v52 }
 0x11a   : > { %v1950_v26 = vshll.u32 %v7072_v32, 16  ;;  %v1652_v55 = vsel %vm8686_vm14, %v1406_v50, 0.0  ;;  %v1270_v43 = vadd.f32 %v5381_v25, %v1269_v30  ;;  %vm1276_vm0 = vcmp.eq.f32.partialorder %v1275_v13, 8.507059e+37  ;;  %v7159_v9 = vpop.permute.xlu2 %1511 }
 0x11b   : > { %v1049_v51 = vsel %vm7120_vm9, %v7013_v45, %v1045_v27  ;;  %v667_v44 = vmul.f32 1.442695, %v609_v42  ;;  %v7146_v0 = vsel %vm1802_vm1, %v6838_v23, %v7111_v63  ;;  %v7149_v21 = vadd.f32 %v7103_v46, %v537_v6  ;;  %8889 = vst [vmem:[#allocation36_spill] sm:$0xff] %v7159_v9 }
 0x11c   : > { %v5383_v10 = vpop.eup %5382  ;;  %v1274_v32 = vsel %vm7132_vm12, %v5381_v25, %v1270_v43  ;;  %vm821_vm2 = vweird.f32 %v7089_v37  ;;  %3280 = vmatmul.bf16.gmra.mxu2 %v7146_v0  ;;  %v5033_v54 = vunpack.c.l.bf16 %v7062_v24  ;;  %v5009_v45 = vunpack.c.l.bf16 %v6818_v22 }
 0x11d   : > { %v1693_v39 = vpack.c.bf16 %v1652_v55, %v1652_v55  ;;  %v1279_v13 = vsel %vm1276_vm0, %v1278_v48, %v1274_v32  ;;  %v817_v23 = vmul.f32 %v5383_v10, %v7089_v37  ;;  %v827_v29 = vand.u32 2147483648, %v7089_v37  ;;  %v7173_v32 = vpop.permute.xlu1 %1466 }
 0x11e   : > { %v1405_v27 = vmul.f32 %v1279_v13, %v6947_v31  ;;  %5386 = vpow2.f32 %v667_v44  ;;  %v623_v25 = vsub.f32 0.0, %v7149_v21  ;;  %v536_v50 = vmul.f32 %v7075_v34, %v5033_v54  ;;  %8890 = vst [vmem:[#allocation37_spill] sm:$0xff] %v7173_v32 }
 0x11f   : > { %v5385_v6 = vpop.eup %5384  ;;  %v818_v17 = vsub.f32 1.0, %v817_v23  ;;  %vm822_vm12 = vweird.f32 %v5383_v10  ;;  %v825_v22 = vand.u32 2147483647, %v7089_v37  ;;  %v524_v24 = vmul.f32 %v7075_v34, %v5009_v45 }
 0x120   : > { %v1651_v30 = vsel %vm8687_vm11, %v1405_v27, 0.0  ;;  %v695_v18 = vmul.f32 1.442695, %v623_v25  ;;  %v7169_v48 = vadd.f32 %v7103_v46, %v536_v50  ;;  %v5046_v31 = vunpack.c.h.bf16 %v6648_v60  ;;  %vm7177_vm7 = vmor %vm821_vm2, %vm822_vm12 }
 0x121   : > { %v1949_v42 = vrot.slane %v1947_v33, 6  ;;  %vm8688_vm13 = vcmp.eq.s32.totalorder %v7159_v9, 1  ;;  %v1775_v55 = vunpack.c.l.b16 %v1693_v39  ;;  %v1692_v43 = vpack.c.bf16 %v1651_v30, %v1651_v30 }
 0x122   : > { %v819_v44 = vmul.f32 %v5383_v10, %v818_v17  ;;  %v828_v45 = vor.u32 1.1754944e-38, %v827_v29  ;;  %5388 = vpow2.f32 %v695_v18  ;;  %v622_v13 = vsub.f32 0.0, %v7169_v48 }
 0x123   : > { %v7183_v60 = vadd.f32 %v7103_v46, %v524_v24  ;;  %v1054_v33 = vsel %vm7124_vm15, %v1053_v57, %v1049_v51  ;;  %v1774_v39 = vunpack.c.l.b16 %v1692_v43  ;;  %vm826_vm9 = vcmp.eq.f32.partialorder %v825_v22, 8.507059e+37  ;;  %v4911_v57 = vld [vmem:[%s8631_s1 + $0x60] sm:$0xff] }
 0x124   : > { %v820_v23 = vadd.f32 %v5383_v10, %v819_v44  ;;  %v5387_v27 = vpop.eup %5386  ;;  %v1952_v25 = vrot.slane %v1950_v26, 7  ;;  %v693_v37 = vmul.f32 1.442695, %v622_v13  ;;  %v543_v17 = vmul.f32 %v7075_v34, %v5046_v31  ;;  %3313 = vmatpush.bf16.msrb.mxu1 %v4911_v57 }
 0x125   : > { %v610_v50 = vsub.f32 0.0, %v7183_v60  ;;  %v1798_v29 = vpack.c.b16 %v1775_v55, %v1774_v39  ;;  %vm8691_vm0 = vcmp.eq.s32.totalorder %v7173_v32, 1  ;;  %v7192_v24 = vadd.f32 1.0, %v5387_v27 }
 0x126   : > { %v824_v30 = vsel %vm7177_vm7, %v5383_v10, %v820_v23  ;;  %v1390_v26 = vmul.f32 %v1054_v33, %v6887_v12  ;;  %5390 = vpow2.f32 %v693_v37  ;;  %v7206_v54 = vadd.f32 %v7103_v46, %v543_v17  ;;  %v7209_v12 = vld [vmem:[%s5646_s8 + $0x18] sm:$0xff]  }
 0x127   : > { %v829_v51 = vsel %vm826_vm9, %v828_v45, %v824_v30  ;;  %v669_v22 = vmul.f32 1.442695, %v610_v50  ;;  %v1956_v18 = vshrl.u32 %v1798_v29, 16  ;;  %v1959_v10 = vshll.u32 %v1798_v29, 16 }
 0x128   : > { %v1375_v31 = vmul.f32 %v829_v51, %v6988_v58  ;;  %5392 = vrcp.f32 %v7192_v24  ;;  %v5389_v55 = vpop.eup %5388  ;;  %v1020_v43 = vand.u32 2147483647, %v7192_v24  ;;  %v1022_v44 = vand.u32 2147483648, %v7192_v24  ;;  %v7234_v51 = vpop.permute.xlu0 %1505 }
 0x129   : > { %5394 = vpow2.f32 %v669_v22  ;;  %v1958_v45 = vrot.slane %v1956_v18, 6  ;;  %v1961_v13 = vrot.slane %v1959_v10, 7  ;;  %v7213_v33 = vadd.f32 1.0, %v5389_v55  ;;  %8894 = vst [vmem:[#allocation38_spill] sm:$0xff] %v7234_v51  ;;  %v4918_v22 = vld [vmem:[%s8631_s1 + $0x98] sm:$0xff] }
 0x12a   : > { %v1621_v58 = vsel %vm8691_vm0, %v1375_v31, 0.0  ;;  %v8893_v39 = vpack.c.bf16 %v7019_v8, %v7019_v8  ;;  %v7220_v27 = vmul.f32 %v7051_v28, %v6690_v16  ;;  %v7222_v37 = vor.u32 %v1952_v25, %v1949_v42  ;;  %v4930_v18 = vld [vmem:[%s8631_s1 + $0xf8] sm:$0xff]  ;;  %3427 = vmatpush.bf16.msrb.mxu2 %v4918_v22 }
 0x12b   : > { %v1662_v50 = vpack.c.bf16 %v1621_v58, %v1621_v58  ;;  %v7224_v17 = vor.u32 %v1961_v13, %v1958_v45  ;;  %v7226_v29 = vadd.f32 1.0, %v5385_v6  ;;  %5396 = vrcp.f32 %v7213_v33  ;;  %3536 = vmatpush.bf16.msrb.mxu3 %v4930_v18 }
 0x12c   : > { %v1745_v23 = vunpack.c.l.b16 %v8893_v39  ;;  %v4986_v30 = vunpack.c.h.bf16 %v7209_v12  ;;  %v5391_v15 = vpop.eup %5390  ;;  %v7232_v8 = vsel %vm8688_vm13, %v1390_v26, 0.0  ;;  %vm1016_vm15 = vweird.f32 %v7192_v24  ;;  %v4935_v26 = vld [vmem:[%s8631_s1 + $0x120] sm:$0xff] }
 0x12d   : > { %v1744_v57 = vunpack.c.l.b16 %v1662_v50  ;;  %vm7237_vm2 = vcmp.eq.f32.partialorder %v1020_v43, 8.507059e+37  ;;  %v1023_v6 = vor.u32 1.1754944e-38, %v1022_v44  ;;  %v7241_v42 = vadd.f32 1.0, %v5391_v15  ;;  %3652 = vmatpush.bf16.msrb.mxu0 %v4935_v26  ;;  %v7266_v50 = vpop.permute.xlu1 %1547 }
 0x12e   : > { %v5393_v28 = vpop.eup %5392  ;;  %v7246_v25 = vsel %vm1802_vm1, %v7222_v37, %v7224_v17  ;;  %v629_v10 = vsub.f32 0.0, %v7206_v54  ;;  %vm1226_vm12 = vweird.f32 %v7213_v33  ;;  %v1230_v44 = vand.u32 2147483647, %v7213_v33  ;;  %8898 = vst [vmem:[#allocation40_spill] sm:$0xff] %v7266_v50 }
 0x12f   : > { %8897 = vst [vmem:[#allocation39_spill] sm:$0xff] %v7246_v25  ;;  %v5395_v31 = vpop.eup %5394  ;;  %v1783_v55 = vpack.c.b16 %v1745_v23, %v1744_v57  ;;  %v1012_v43 = vmul.f32 %v5393_v28, %v7192_v24  ;;  %3295 = vmatmul.bf16.vlgmr.msra.gmra.mxu3 %v7246_v25  ;;  %vm1017_vm7 = vweird.f32 %v5393_v28  ;;  %vm1593_vm9 = vcmp.eq.s32.totalorder %v7234_v51, 1 }
 0x130   : > { %v1232_v45 = vand.u32 2147483648, %v7213_v33  ;;  %5398 = vrcp.f32 %v7241_v42  ;;  %v513_v13 = vmul.f32 %v7075_v34, %v4986_v30  ;;  %v7268_v15 = vadd.f32 1.0, %v5395_v31  ;;  %vm7277_vm14 = vmor %vm1016_vm15, %vm1017_vm7  ;;  %v4910_v31 = vld [vmem:[%s8631_s1 + $0x58] sm:$0xff] }
 0x131   : > { %v1821_v58 = vshrl.u32 %v1783_v55, 16  ;;  %v1824_v39 = vshll.u32 %v1783_v55, 16  ;;  %v1013_v23 = vsub.f32 1.0, %v1012_v43  ;;  %v5397_v57 = vpop.eup %5396  ;;  %v1215_v59 = vand.u32 2147483647, %v7241_v42  ;;  %3314 = vmatpush.bf16.msrb.mxu1 %v4910_v31 }
 0x132   : > { %v1217_v49 = vand.u32 2147483648, %v7241_v42  ;;  %v707_v9 = vmul.f32 1.442695, %v629_v10  ;;  %v4985_v32 = vunpack.c.l.bf16 %v7209_v12  ;;  %v1222_v30 = vmul.f32 %v5397_v57, %v7213_v33 }
 0x133   : > { %v1823_v26 = vrot.slane %v1821_v58, 6  ;;  %v1826_v22 = vrot.slane %v1824_v39, 7  ;;  %v1014_v14 = vmul.f32 %v5393_v28, %v1013_v23  ;;  %vm7281_vm11 = vcmp.eq.f32.partialorder %v1230_v44, 8.507059e+37 }
 0x134   : > { %v1233_v55 = vor.u32 1.1754944e-38, %v1232_v45  ;;  %vm8694_vm13 = vcmp.eq.s32.totalorder %v7266_v50, 1  ;;  %vm1211_vm10 = vweird.f32 %v7241_v42  ;;  %5400 = vrcp.f32 %v7268_v15 }
 0x135   : > { %v7288_v12 = vor.u32 %v1826_v22, %v1823_v26  ;;  %v1015_v10 = vadd.f32 %v5393_v28, %v1014_v14  ;;  %v1223_v43 = vsub.f32 1.0, %v1222_v30  ;;  %vm1227_vm3 = vweird.f32 %v5397_v57 }
 0x136   : > { %v5399_v24 = vpop.eup %5398  ;;  %vm7290_vm15 = vcmp.eq.f32.partialorder %v1215_v59, 8.507059e+37  ;;  %5402 = vpow2.f32 %v707_v9  ;;  %v7295_v44 = vadd.f32 %v7103_v46, %v513_v13  ;;  %v512_v45 = vmul.f32 %v7075_v34, %v4985_v32  ;;  %vm7305_vm7 = vmor %vm1226_vm12, %vm1227_vm3 }
 0x137   : > { %v1019_v39 = vsel %vm7277_vm14, %v5393_v28, %v1015_v10  ;;  %v1224_v23 = vmul.f32 %v5397_v57, %v1223_v43  ;;  %v1207_v26 = vmul.f32 %v5399_v24, %v7241_v42  ;;  %v1218_v14 = vor.u32 1.1754944e-38, %v1217_v49  ;;  %v7327_v10 = vpop.permute.xlu0 %1544  ;;  %v4929_v42 = vld [vmem:[%s8631_s1 + $0xf0] sm:$0xff] }
 0x138   : > { %v1024_v22 = vsel %vm7237_vm2, %v1023_v6, %v1019_v39  ;;  %vm1031_vm0 = vweird.f32 %v7268_v15  ;;  %v7313_v9 = vsel %vm1802_vm1, %v6935_v3, %v7288_v12  ;;  %v599_v32 = vsub.f32 0.0, %v7295_v44  ;;  %8908 = vst [vmem:[#allocation42_spill] sm:$0xff] %v7327_v10  ;;  %3537 = vmatpush.bf16.msrb.mxu3 %v4929_v42 }
 0x139   : > { %8907 = vst [vmem:[#allocation41_spill] sm:$0xff] %v7313_v9  ;;  %v1388_v49 = vmul.f32 %v1024_v22, %v7106_v52  ;;  %v1225_v28 = vadd.f32 %v5397_v57, %v1224_v23  ;;  %v1208_v16 = vsub.f32 1.0, %v1207_v26  ;;  %vm1212_vm14 = vweird.f32 %v5399_v24  ;;  %3220 = vmatmul.bf16.gmra.mxu0 %v7313_v9 }
 0x13a   : > { %v5401_v33 = vpop.eup %5400  ;;  %v1035_v6 = vand.u32 2147483647, %v7268_v15  ;;  %v1037_v13 = vand.u32 2147483648, %v7268_v15  ;;  %v647_v30 = vmul.f32 1.442695, %v599_v32  ;;  %v7321_v18 = vadd.f32 %v7103_v46, %v512_v45  ;;  %vm7335_vm3 = vmor %vm1211_vm10, %vm1212_vm14 }
 0x13b   : > { %v1634_v3 = vsel %vm1593_vm9, %v1388_v49, 0.0  ;;  %v1229_v52 = vsel %vm7305_vm7, %v5397_v57, %v1225_v28  ;;  %v1209_v43 = vmul.f32 %v5399_v24, %v1208_v16  ;;  %v1027_v39 = vmul.f32 %v5401_v33, %v7268_v15 }
 0x13c   : > { %v5403_v23 = vpop.eup %5402  ;;  %v1675_v26 = vpack.c.bf16 %v1634_v3, %v1634_v3  ;;  %v1234_v22 = vsel %vm7281_vm11, %v1233_v55, %v1229_v52  ;;  %vm1032_vm2 = vweird.f32 %v5401_v33  ;;  %5404 = vpow2.f32 %v647_v30  ;;  %v7359_v52 = vpop.permute.xlu1 %1508 }
 0x13d   : > { %v1402_v57 = vmul.f32 %v1234_v22, %v7149_v21  ;;  %v1210_v59 = vadd.f32 %v5399_v24, %v1209_v43  ;;  %v1028_v32 = vsub.f32 1.0, %v1027_v39  ;;  %v7340_v49 = vadd.f32 1.0, %v5403_v23  ;;  %v4934_v21 = vld [vmem:[%s8631_s1 + $0x118] sm:$0xff]  ;;  %8911 = vst [vmem:[#allocation43_spill] sm:$0xff] %v7359_v52  ;;  %vm7368_vm12 = vmor %vm1031_vm0, %vm1032_vm2 }
 0x13e   : > { %vm8693_vm10 = vcmp.eq.s32.totalorder %v7092_v53, 1  ;;  %v1757_v55 = vunpack.c.l.b16 %v1675_v26  ;;  %vm8717_vm11 = vcmp.eq.s32.totalorder %v7327_v10, 1  ;;  %v598_v28 = vsub.f32 0.0, %v7321_v18  ;;  %3653 = vmatpush.bf16.msrb.mxu0 %v4934_v21 }
 0x13f   : > { %v5050_v16 = vunpack.c.h.bf16 %v6962_v20  ;;  %v1648_v30 = vsel %vm8694_vm13, %v1402_v57, 0.0  ;;  %v1214_v3 = vsel %vm7335_vm3, %v5399_v24, %v1210_v59  ;;  %v1029_v43 = vmul.f32 %v5401_v33, %v1028_v32 }
 0x140   : > { %5406 = vrcp.f32 %v7340_v49  ;;  %v1789_v39 = vpack.c.b16 %v1757_v55, %v7039_v35  ;;  %v1689_v23 = vpack.c.bf16 %v1648_v30, %v1648_v30  ;;  %v1219_v26 = vsel %vm7290_vm15, %v1218_v14, %v1214_v3 }
 0x141   : > { %v1038_v24 = vor.u32 1.1754944e-38, %v1037_v13  ;;  %v1677_v22 = vpack.c.bf16 %v7232_v8, %v7232_v8  ;;  %v1401_v45 = vmul.f32 %v1219_v26, %v7169_v48  ;;  %v1030_v57 = vadd.f32 %v5401_v33, %v1029_v43 }
 0x142   : > { %vm1036_vm7 = vcmp.eq.f32.partialorder %v1035_v6, 8.507059e+37  ;;  %v5405_v35 = vpop.eup %5404  ;;  %v1875_v59 = vshrl.u32 %v1789_v39, 16  ;;  %v1878_v58 = vshll.u32 %v1789_v39, 16  ;;  %vm1594_vm15 = vcmp.eq.s32.totalorder %v7359_v52, 1 }
 0x143   : > { %v645_v14 = vmul.f32 1.442695, %v598_v28  ;;  %v1771_v15 = vunpack.c.l.b16 %v1689_v23  ;;  %v1647_v32 = vsel %vm8717_vm11, %v1401_v45, 0.0  ;;  %v1034_v13 = vsel %vm7368_vm12, %v5401_v33, %v1030_v57 }
 0x144   : > { %v545_v31 = vmul.f32 %v7075_v34, %v5050_v16  ;;  %v1877_v8 = vrot.slane %v1875_v59, 6  ;;  %v1880_v42 = vrot.slane %v1878_v58, 7  ;;  %v1688_v48 = vpack.c.bf16 %v1647_v32, %v1647_v32  ;;  %v7403_v58 = vpop.permute.xlu0 %1565 }
 0x145   : > { %v1039_v55 = vsel %vm1036_vm7, %v1038_v24, %v1034_v13  ;;  %vm1316_vm0 = vweird.f32 %v7340_v49  ;;  %v7383_v30 = vadd.f32 1.0, %v5405_v35  ;;  %5408 = vpow2.f32 %v645_v14  ;;  %8915 = vst [vmem:[#allocation45_spill] sm:$0xff] %v7403_v58 }
 0x146   : > { %v5407_v6 = vpop.eup %5406  ;;  %v1389_v21 = vmul.f32 %v1039_v55, %v7183_v60  ;;  %v7385_v28 = vor.u32 %v1880_v42, %v1877_v8  ;;  %v1770_v3 = vunpack.c.l.b16 %v1688_v48  ;;  %v1320_v33 = vand.u32 2147483647, %v7340_v49 }
 0x147   : > { %v1312_v43 = vmul.f32 %v5407_v6, %v7340_v49  ;;  %vm1317_vm14 = vweird.f32 %v5407_v6  ;;  %v1322_v39 = vand.u32 2147483648, %v7340_v49  ;;  %5410 = vrcp.f32 %v7383_v30 }
 0x148   : > { %v1635_v16 = vsel %vm1594_vm15, %v1389_v21, 0.0  ;;  %v1796_v60 = vpack.c.b16 %v1771_v15, %v1770_v3  ;;  %v7396_v20 = vsel %vm1802_vm1, %v6879_v61, %v7385_v28  ;;  %v1653_v24 = vsel %vm8693_vm10, %v7220_v27, 0.0  ;;  %vm7408_vm3 = vmor %vm1316_vm0, %vm1317_vm14  ;;  %v4917_v3 = vld [vmem:[%s8631_s1 + $0x90] sm:$0xff] }
 0x149   : > { %v1676_v23 = vpack.c.bf16 %v1635_v16, %v1635_v16  ;;  %v1313_v26 = vsub.f32 1.0, %v1312_v43  ;;  %8914 = vst [vmem:[#allocation44_spill] sm:$0xff] %v7396_v20  ;;  %v1759_v45 = vunpack.c.l.b16 %v1677_v22  ;;  %5412 = vrcp.f32 %v7226_v29  ;;  %3250 = vmatmul.bf16.gmra.mxu1 %v7396_v20  ;;  %v4909_v43 = vld [vmem:[%s8631_s1 + $0x50] sm:$0xff]  ;;  %3428 = vmatpush.bf16.msrb.mxu2 %v4917_v3 }
 0x14a   : > { %v1938_v57 = vshrl.u32 %v1796_v60, 16  ;;  %v1941_v35 = vshll.u32 %v1796_v60, 16  ;;  %vm7412_vm2 = vcmp.eq.f32.partialorder %v1320_v33, 8.507059e+37  ;;  %v1323_v22 = vor.u32 1.1754944e-38, %v1322_v39  ;;  %3315 = vmatpush.bf16.msrb.mxu1 %v4909_v43 }
 0x14b   : > { %v1758_v59 = vunpack.c.l.b16 %v1676_v23  ;;  %v1314_v14 = vmul.f32 %v5407_v6, %v1313_v26  ;;  %v5409_v15 = vpop.eup %5408  ;;  %v7417_v32 = vadd.f32 %v7103_v46, %v545_v31  ;;  %v1694_v21 = vpack.c.bf16 %v1653_v24, %v1653_v24  ;;  %v4928_v31 = vld [vmem:[%s8631_s1 + $0xe8] sm:$0xff] }
 0x14c   : > { %v1940_v13 = vrot.slane %v1938_v57, 6  ;;  %v1943_v8 = vrot.slane %v1941_v35, 7  ;;  %vm8692_vm12 = vcmp.eq.s32.totalorder %v7403_v58, 1  ;;  %vm866_vm7 = vweird.f32 %v7383_v30  ;;  %3538 = vmatpush.bf16.msrb.mxu3 %v4928_v31 }
 0x14d   : > { %v1790_v42 = vpack.c.b16 %v1759_v45, %v1758_v59  ;;  %v1315_v48 = vadd.f32 %v5407_v6, %v1314_v14  ;;  %v5411_v55 = vpop.eup %5410  ;;  %v7421_v49 = vadd.f32 1.0, %v5409_v15  ;;  %v872_v45 = vand.u32 2147483648, %v7383_v30 }
 0x14e   : > { %v7432_v33 = vor.u32 %v1943_v8, %v1940_v13  ;;  %v862_v24 = vmul.f32 %v5411_v55, %v7383_v30  ;;  %vm867_vm0 = vweird.f32 %v5411_v55  ;;  %v870_v15 = vand.u32 2147483647, %v7383_v30 }
 0x14f   : > { %v1884_v16 = vshrl.u32 %v1790_v42, 16  ;;  %v1887_v39 = vshll.u32 %v1790_v42, 16  ;;  %v1319_v60 = vsel %vm7408_vm3, %v5407_v6, %v1315_v48  ;;  %v7436_v23 = vpop.eup %5412  ;;  %5414 = vrcp.f32 %v7421_v49  ;;  %vm7460_vm14 = vmor %vm866_vm7, %vm867_vm0 }
 0x150   : > { %v1324_v26 = vsel %vm7412_vm2, %v1323_v22, %v1319_v60  ;;  %v631_v6 = vsub.f32 0.0, %v7417_v32  ;;  %v863_v14 = vsub.f32 1.0, %v862_v24  ;;  %v7449_v61 = vsel %vm1802_vm1, %v7111_v63, %v7432_v33  ;;  %v7464_v60 = vpop.permute.xlu1 %1475 }
 0x151   : > { %v1886_v57 = vrot.slane %v1884_v16, 6  ;;  %v1889_v35 = vrot.slane %v1887_v39, 7  ;;  %v1408_v59 = vmul.f32 %v1324_v26, %v7206_v54  ;;  %v1327_v27 = vmul.f32 %v7436_v23, %v7226_v29  ;;  %3285 = vmatmul.bf16.gmra.mxu2 %v7449_v61  ;;  %8922 = vst [vmem:[#allocation46_spill] sm:$0xff] %v7464_v60 }
 0x152   : > { %v864_v8 = vmul.f32 %v5411_v55, %v863_v14  ;;  %v873_v63 = vor.u32 1.1754944e-38, %v872_v45  ;;  %v711_v48 = vmul.f32 1.442695, %v631_v6  ;;  %v1776_v31 = vunpack.c.l.b16 %v1694_v21 }
 0x153   : > { %v7453_v22 = vor.u32 %v1889_v35, %v1886_v57  ;;  %v1654_v54 = vsel %vm8692_vm12, %v1408_v59, 0.0  ;;  %vm871_vm3 = vcmp.eq.f32.partialorder %v870_v15, 8.507059e+37  ;;  %v1328_v39 = vsub.f32 1.0, %v1327_v27 }
 0x154   : > { %v1695_v13 = vpack.c.bf16 %v1654_v54, %v1654_v54  ;;  %v865_v16 = vadd.f32 %v5411_v55, %v864_v8  ;;  %5416 = vpow2.f32 %v711_v48  ;;  %vm851_vm2 = vweird.f32 %v7421_v49 }
 0x155   : > { %v5415_v3 = vpop.eup %5414  ;;  %v7470_v30 = vsel %vm1802_vm1, %v7385_v28, %v7453_v22  ;;  %v857_v21 = vand.u32 2147483648, %v7421_v49  ;;  %v855_v59 = vand.u32 2147483647, %v7421_v49  ;;  %vm1583_vm0 = vcmp.eq.s32.totalorder %v7464_v60, 1 }
 0x156   : > { %v1777_v43 = vunpack.c.l.b16 %v1695_v13  ;;  %v847_v26 = vmul.f32 %v5415_v3, %v7421_v49  ;;  %8923 = vst [vmem:[#allocation47_spill] sm:$0xff] %v7470_v30  ;;  %v869_v45 = vsel %vm7460_vm14, %v5411_v55, %v865_v16  ;;  %vm852_vm7 = vweird.f32 %v5415_v3  ;;  %v4927_v49 = vld [vmem:[%s8631_s1 + $0xe0] sm:$0xff] }
 0x157   : > { %v874_v57 = vsel %vm871_vm3, %v873_v63, %v869_v45  ;;  %vm7480_vm14 = vmor %vm851_vm2, %vm852_vm7  ;;  %v858_v13 = vor.u32 1.1754944e-38, %v857_v21  ;;  %v1329_v42 = vmul.f32 %v7436_v23, %v1328_v39  ;;  %v7490_v63 = vpop.permute.xlu0 %1472  ;;  %vm856_vm3 = vcmp.eq.f32.partialorder %v855_v59, 8.507059e+37  ;;  %3539 = vmatpush.bf16.msrb.mxu3 %v4927_v49  ;;  %v4933_v45 = vld [vmem:[%s8631_s1 + $0x110] sm:$0xff]  ;;  %v4916_v21 = vld [vmem:[%s8631_s1 + $0x88] sm:$0xff] }
 0x158   : > { %v1799_v24 = vpack.c.b16 %v1777_v43, %v1776_v31  ;;  %v848_v35 = vsub.f32 1.0, %v847_v26  ;;  %v1378_v15 = vmul.f32 %v874_v57, %v7295_v44  ;;  %8926 = vst [vmem:[#allocation48_spill] sm:$0xff] %v7490_v63  ;;  %vm1331_vm2 = vweird.f32 %v7226_v29  ;;  %v4926_v57 = vld [vmem:[%s8631_s1 + $0xd8] sm:$0xff]  ;;  %3654 = vmatpush.bf16.msrb.mxu0 %v4933_v45  ;;  %3429 = vmatpush.bf16.msrb.mxu2 %v4916_v21  ;;  %v7571_v45 = vpop.permute.xlu2 %1568 }
 0x159   : > { %3255 = vmatmul.bf16.gmra.mxu1 %v7470_v30  ;;  %vm1332_vm7 = vweird.f32 %v7436_v23  ;;  %v1337_v16 = vand.u32 2147483648, %v7226_v29  ;;  %vm1582_vm12 = vcmp.eq.s32.totalorder %v7490_v63, 1  ;;  %8930 = vst [vmem:[#allocation50_spill] sm:$0xff] %v7571_v45  ;;  %v7707_v58 = vshll.u32 %v6554_v47, 16 }
 0x15a   : > { %v1965_v6 = vshrl.u32 %v1799_v24, 16  ;;  %v1968_v14 = vshll.u32 %v1799_v24, 16  ;;  %v849_v28 = vmul.f32 %v5415_v3, %v848_v35  ;;  %v5417_v8 = vpop.eup %5416  ;;  %v1624_v44 = vsel %vm1583_vm0, %v1378_v15, 0.0 }
 0x15b   : > { %v7494_v43 = vadd.f32 1.0, %v5417_v8  ;;  %v1665_v26 = vpack.c.bf16 %v1624_v44, %v1624_v44  ;;  %v1335_v35 = vand.u32 2147483647, %v7226_v29  ;;  %3540 = vmatpush.bf16.msrb.mxu3 %v4926_v57  ;;  %v4925_v29 = vld [vmem:[%s8631_s1 + $0xd0] sm:$0xff]  ;;  %v4931_v44 = vld [vmem:[%s8631_s1 + $0x100] sm:$0xff]  ;;  %v7711_v10 = vshrl.u32 %v6554_v47, 16 }
 0x15c   : > { %v1967_v27 = vrot.slane %v1965_v6, 6  ;;  %v1970_v55 = vrot.slane %v1968_v14, 7  ;;  %v850_v48 = vadd.f32 %v5415_v3, %v849_v28  ;;  %v4908_v14 = vld [vmem:[%s8631_s1 + $0x48] sm:$0xff]  ;;  %v7540_v28 = vsel %vm1802_vm1, %v7432_v33, %v7222_v37  ;;  %v4907_v37 = vld [vmem:[%s8631_s1 + $0x40] sm:$0xff]  ;;  %v4954_v33 = vld [vmem:[%s8631_s1 + $0x1b8] sm:$0xff] }
 0x15d   : > { %5418 = vrcp.f32 %v7494_v43  ;;  %8929 = vst [vmem:[#allocation49_spill] sm:$0xff] %v7540_v28  ;;  %v1747_v54 = vunpack.c.l.b16 %v1665_v26  ;;  %3316 = vmatpush.bf16.msrb.mxu1 %v4908_v14  ;;  %v1350_v57 = vand.u32 2147483647, %v7494_v43  ;;  %v2497_v60 = vrot.slane %v7711_v10, 2 }
 0x15e   : > { %v7492_v31 = vor.u32 %v1970_v55, %v1967_v27  ;;  %v854_v39 = vsel %vm7480_vm14, %v5415_v3, %v850_v48  ;;  %v1330_v3 = vadd.f32 %v7436_v23, %v1329_v42  ;;  %vm7527_vm14 = vmor %vm1331_vm2, %vm1332_vm7  ;;  %v4915_v27 = vld [vmem:[%s8631_s1 + $0x80] sm:$0xff]  ;;  %v1338_v55 = vor.u32 1.1754944e-38, %v1337_v16  ;;  %v4924_v16 = vld [vmem:[%s8631_s1 + $0xc8] sm:$0xff] }
 0x15f   : > { %v859_v24 = vsel %vm856_vm3, %v858_v13, %v854_v39  ;;  %vm1336_vm3 = vcmp.eq.f32.partialorder %v1335_v35, 8.507059e+37  ;;  %3541 = vmatpush.bf16.msrb.mxu3 %v4925_v29  ;;  %3430 = vmatpush.bf16.msrb.mxu2 %v4915_v27  ;;  %vm1346_vm2 = vweird.f32 %v7494_v43  ;;  %vm1351_vm10 = vcmp.eq.f32.partialorder %v1350_v57, 8.507059e+37  ;;  %v460_v57 = vld [vmem:[%s5646_s8 + $0xa0] sm:$0xf] }
 0x160   : > { %v1377_v59 = vmul.f32 %v859_v24, %v7321_v18  ;;  %v7518_v6 = vsel %vm1802_vm1, %v7224_v17, %v7492_v31  ;;  %v4932_v17 = vld [vmem:[%s8631_s1 + $0x108] sm:$0xff]  ;;  %v1334_v49 = vsel %vm7527_vm14, %v7436_v23, %v1330_v3  ;;  %v1352_v23 = vand.u32 2147483648, %v7494_v43 }
 0x161   : > { %3300 = vmatmul.bf16.gmra.mxu3 %v7518_v6  ;;  %3290 = vmatmul.bf16.gmra.mxu2 %v7540_v28  ;;  %v1339_v39 = vsel %vm1336_vm3, %v1338_v55, %v1334_v49  ;;  %v7569_v24 = vsel %vm1802_vm1, %v7453_v22, %v6280_v56  ;;  %v4923_v56 = vld [vmem:[%s8631_s1 + $0xc0] sm:$0xff]  ;;  %vm8714_vm14 = vcmp.eq.s32.totalorder %v7571_v45, 1  ;;  %v8932_v55 = vmov 0  }
 0x162   : > { %v1623_v18 = vsel %vm1582_vm12, %v1377_v59, 0.0  ;;  %3655 = vmatpush.bf16.msrb.mxu0 %v4932_v17  ;;  %3317 = vmatpush.bf16.msrb.mxu1 %v4907_v37  ;;  %v1409_v59 = vmul.f32 %v1339_v39, %v7028_v1  ;;  %v1353_v17 = vor.u32 1.1754944e-38, %v1352_v23  ;;  %v2498_v63 = vrot.slane %v7707_v58, 3 }
 0x163   : > { %v1664_v13 = vpack.c.bf16 %v1623_v18, %v1623_v18  ;;  %v5419_v8 = vpop.eup %5418  ;;  %3875 = vmatpush.bf16.msra.mxu2 %v4954_v33  ;;  %3542 = vmatpush.bf16.msrb.mxu3 %v4924_v16 }
 0x164   : > { %v1342_v48 = vmul.f32 %v5419_v8, %v7494_v43  ;;  %vm1347_vm7 = vweird.f32 %v5419_v8  ;;  %v7581_v43 = vpop.permute.xlu0 %1571  ;;  %v1655_v1 = vsel %vm8714_vm14, %v1409_v59, 0.0  ;;  %v501_v59 = vunpack.c.l.bf16 %v460_v57 }
 0x165   : > { %v1746_v42 = vunpack.c.l.b16 %v1664_v13  ;;  %vm1348_vm3 = vmor %vm1346_vm2, %vm1347_vm7  ;;  %8931 = vst [vmem:[#allocation51_spill] sm:$0xff] %v7581_v43  ;;  %v2212_v13 = vrot.slane %v6687_v38, 1  ;;  %vm8713_vm13 = vcmp.eq.s32.totalorder %v7581_v43, 1  ;;  %vm2019_vm2 = vsmask.f32 7424 }
 0x166   : > { %v1343_v21 = vsub.f32 1.0, %v1342_v48  ;;  %3656 = vmatpush.bf16.msrb.mxu0 %v4931_v44  ;;  %v4946_v44 = vld [vmem:[%s8631_s1 + $0x178] sm:$0xff]  ;;  %v1696_v48 = vpack.c.bf16 %v1655_v1, %v1655_v1  ;;  %v2214_v1 = vrot.slane %v6959_v19, 1  ;;  %v7639_v57 = vshrl.u32 %v6415_v40, 16 }
 0x167   : > { %v1784_v26 = vpack.c.b16 %v1747_v54, %v1746_v42  ;;  %v2025_v54 = vrot.slane %v8932_v55, 1  ;;  %3543 = vmatpush.bf16.msrb.mxu3 %v4923_v56  ;;  %v2028_v42 = vshll.u32 %v6687_v38, 16  ;;  %3762 = vmatpush.bf16.msra.mxu1 %v4946_v44  ;;  %vm2278_vm7 = vsmask.f32 6400 }
 0x168   : > { %v1344_v14 = vmul.f32 %v5419_v8, %v1343_v21  ;;  %v1778_v23 = vunpack.c.l.b16 %v1696_v48 }
 0x169   : > { %v1830_v3 = vshrl.u32 %v1784_v26, 16  ;;  %v1833_v35 = vshll.u32 %v1784_v26, 16  ;;  %3260 = vmatmul.bf16.gmra.mxu1 %v7569_v24  ;;  %v2030_v26 = vrot.slane %v2028_v42, 1 }
 0x16a   : > { %v1345_v18 = vadd.f32 %v5419_v8, %v1344_v14 }
 0x16b   : > { %v1832_v22 = vrot.slane %v1830_v3, 6  ;;  %v1835_v15 = vrot.slane %v1833_v35, 7  ;;  %v2031_v35 = vsel %vm2019_vm2, %v2025_v54, %v2030_v26 }
 0x16c   : > { %v1349_v27 = vsel %vm1348_vm3, %v5419_v8, %v1345_v18  ;;  %v4962_v8 = vld [vmem:[%s8631_s1 + $0x1f8] sm:$0xff]  ;;  %vm2016_vm3 = vsmask.f32 5376 }
 0x16d   : > { %v1836_v29 = vor.u32 %v1835_v15, %v1832_v22  ;;  %v1354_v37 = vsel %vm1351_vm10, %v1353_v17, %v1349_v27  ;;  %vm2210_vm10 = vcmask 1046528   ;;  %3988 = vmatpush.bf16.msra.mxu3 %v4962_v8  ;;  %v546_v17 = vmul.f32 %v7075_v34, %v501_v59 }
 0x16e   : > { %v1410_v49 = vmul.f32 %v1354_v37, %v7417_v32  ;;  %v2213_v16 = vsel %vm2210_vm10, %v2025_v54, %v2212_v13  ;;  %v2036_v37 = vshll.u32 %v6959_v19, 16  ;;  %v2040_v8 = vshrl.u32 %v6959_v19, 16 }
 0x16f   : > { %v7590_v33 = vsel %vm1802_vm1, %v7288_v12, %v1836_v29  ;;  %v4970_v12 = vld [vmem:[%s8631_s1 + $0x238] sm:$0xff]  ;;  %v7620_v54 = vsel %vm1802_vm1, %v1836_v29, %v6320_v36  ;;  %v7626_v34 = vadd.f32 %v7103_v46, %v546_v17  ;;  %v2469_v17 = vrot.slane %v7639_v57, 2 }
 0x170   : > { %8933 = vst [vmem:[#allocation52_spill] sm:$0xff] %v7590_v33  ;;  %3225 = vmatmul.bf16.gmra.mxu0 %v7590_v33  ;;  %v1656_v32 = vsel %vm8713_vm13, %v1410_v49, 0.0  ;;  %v2215_v49 = vsel %vm2210_vm10, %v2212_v13, %v2214_v1  ;;  %v2038_v44 = vrot.slane %v2036_v37, 1  ;;  %v2283_v48 = vrot.slane %v2036_v37, 2 }
 0x171   : > { %v1697_v39 = vpack.c.bf16 %v1656_v32, %v1656_v32  ;;  %3431 = vmatmul.bf16.vlgmr.msrb.gmra.mxu2 %v2213_v16  ;;  %4101 = vmatpush.bf16.msra.mxu0 %v4970_v12  ;;  %8934 = vst [vmem:[#allocation53_spill] sm:$0xff] %v7620_v54  ;;  %v632_v36 = vsub.f32 0.0, %v7626_v34  ;;  %v2282_v12 = vrot.slane %v2040_v8, 1  ;;  %v7632_v32 = vpop.f32.mrf.mxu2  ;;  %v8709_v50 = vrot.slane %v7590_v33, 1 }
 0x172   : > { %8935 = vst [vmem:[#allocation54_spill] sm:$0xff] %v7632_v32 }
 0x173   : > { %v1779_v21 = vunpack.c.l.b16 %v1697_v39  ;;  %v713_v39 = vmul.f32 1.442695, %v632_v36  ;;  %v2284_v13 = vor.u32 %v2283_v48, %v2282_v12  ;;  %v7654_v36 = vshll.u32 %v7313_v9, 16  ;;  %v4945_v12 = vld [vmem:[%s8631_s1 + $0x170] sm:$0xff] }
 0x174   : > { %3763 = vmatpush.bf16.msra.mxu1 %v4945_v12 }
 0x175   : > { %v1800_v3 = vpack.c.b16 %v1779_v21, %v1778_v23  ;;  %v2280_v23 = vrot.slane %v2028_v42, 2  ;;  %v7636_v21 = vshll.u32 %v6415_v40, 16  ;;  %5420 = vpow2.f32 %v713_v39 }
 0x176   : > { %v8695_v42 = vrot.slane %v7313_v9, 1  ;;  %v2458_v45 = vrot.slane %v7654_v36, 3 }
 0x177   : > { %v1974_v14 = vshrl.u32 %v1800_v3, 16  ;;  %v1977_v56 = vshll.u32 %v1800_v3, 16  ;;  %v2454_v3 = vrot.slane %v2040_v8, 2 }
 0x178   : > { %v2217_v39 = vsel %vm2210_vm10, %v2214_v1, %v8695_v42  ;;  %v2287_v42 = vrot.slane %v7654_v36, 2 }
 0x179   : > { %3318 = vmatmul.bf16.vlgmr.msrb.gmra.mxu1 %v2031_v35  ;;  %v1976_v22 = vrot.slane %v1974_v14, 6  ;;  %v1979_v15 = vrot.slane %v1977_v56, 7  ;;  %v7641_v35 = vpop.f32.mrf.mxu1  ;;  %v2455_v14 = vrot.slane %v2036_v37, 3  ;;  %v7648_v56 = vshll.u32 %v6597_v7, 16  ;;  %v4953_v37 = vld [vmem:[%s8631_s1 + $0x1b0] sm:$0xff] }
 0x17a   : > { %8936 = vst [vmem:[#allocation55_spill] sm:$0xff] %v7641_v35  ;;  %3876 = vmatpush.bf16.msra.mxu2 %v4953_v37  ;;  %v2042_v37 = vor.u32 %v2040_v8, %v2038_v44 }
 0x17b   : > { %v7610_v18 = vor.u32 %v1979_v15, %v1976_v22  ;;  %v2456_v15 = vor.u32 %v2455_v14, %v2454_v3  ;;  %v2048_v3 = vshrl.u32 %v7313_v9, 16 }
 0x17d   : > { %v7616_v27 = vsel %vm1802_vm1, %v7492_v31, %v7610_v18  ;;  %v2032_v31 = vshrl.u32 %v6687_v38, 16 }
 0x17e   : > { %3305 = vmatmul.bf16.gmra.mxu3 %v7616_v27 }
 0x17f   : > { %v2034_v29 = vor.u32 %v2032_v31, %v2030_v26  ;;  %v2279_v46 = vrot.slane %v2032_v31, 1  ;;  %v7644_v26 = vshrl.u32 %v6597_v7, 16  ;;  %v2470_v31 = vrot.slane %v7636_v21, 3 }
 0x180   : > { %3230 = vmatmul.bf16.gmra.mxu0 %v7620_v54 }
 0x181   : > { %3436 = vmatmul.bf16.gmra.mxu2 %v2215_v49  ;;  %v2039_v16 = vsel %vm2019_vm2, %v2034_v29, %v2038_v44  ;;  %v2281_v59 = vor.u32 %v2280_v23, %v2279_v46  ;;  %v4961_v29 = vld [vmem:[%s8631_s1 + $0x1f0] sm:$0xff]  ;;  %v2473_v48 = vrot.slane %v7644_v26, 2  ;;  %v2474_v46 = vrot.slane %v7648_v56, 3  ;;  %v5421_v23 = vpop.eup %5420  ;;  %v7684_v1 = vpop.f32.mrf.mxu1 }
 0x182   : > { %3989 = vmatpush.bf16.msra.mxu3 %v4961_v29  ;;  %8938 = vst [vmem:[#allocation57_spill] sm:$0xff] %v7684_v1  ;;  %v2286_v29 = vrot.slane %v2048_v3, 1 }
 0x183   : > { %v2285_v22 = vsel %vm2278_vm7, %v2281_v59, %v2284_v13  ;;  %v2046_v59 = vrot.slane %v7654_v36, 1  ;;  %v2475_v14 = vor.u32 %v2474_v46, %v2473_v48 }
 0x184   : > { %v7698_v8 = vor.u32 %v2287_v42, %v2286_v29 }
 0x185   : > { %v2047_v12 = vsel %vm2019_vm2, %v2042_v37, %v2046_v59  ;;  %v7703_v37 = vshll.u32 %v6306_v2, 16 }
 0x186   : > { %v2289_v29 = vsel %vm2278_vm7, %v2284_v13, %v7698_v8 }
 0x187   : > { %v2494_v36 = vrot.slane %v7703_v37, 3 }
 0x189   : > { %3323 = vmatmul.bf16.gmra.mxu1 %v2039_v16  ;;  %v7666_v16 = vpop.f32.mrf.mxu2 }
 0x18a   : > { %8937 = vst [vmem:[#allocation56_spill] sm:$0xff] %v7666_v16 }
 0x18e   : > { %3544 = vmatmul.bf16.vlgmr.msrb.gmra.mxu3 %v2215_v49  ;;  %v7668_v49 = vor.u32 %v2470_v31, %v2469_v17  ;;  %v7680_v17 = vshrl.u32 %v6906_v4, 16  ;;  %v7682_v31 = vadd.f32 1.0, %v5421_v23  ;;  %v7696_v23 = vshrl.u32 %v6306_v2, 16 }
 0x190   : > { %3657 = vmatmul.bf16.vlgmr.msrb.gmra.mxu0 %v2285_v22  ;;  %v7677_v22 = vshll.u32 %v6906_v4, 16  ;;  %v7690_v48 = vsel %vm2016_vm3, %v7668_v49, %v2475_v14  ;;  %v2477_v46 = vrot.slane %v7680_v17, 2  ;;  %5422 = vrcp.f32 %v7682_v31 }
 0x191   : > { %3441 = vmatmul.bf16.gmra.mxu2 %v2217_v39  ;;  %8939 = vst [vmem:[#allocation58_spill] sm:$0xff] %v7690_v48  ;;  %v7700_v44 = vpop.f32.mrf.mxu2  ;;  %v2493_v42 = vrot.slane %v7696_v23, 2  ;;  %vm1361_vm13 = vweird.f32 %v7682_v31  ;;  %v1367_v16 = vand.u32 2147483648, %v7682_v31 }
 0x192   : > { %v2478_v43 = vrot.slane %v7677_v22, 3  ;;  %8940 = vst [vmem:[#allocation59_spill] sm:$0xff] %v7700_v44  ;;  %v7765_v44 = vshrl.u32 %v6875_v62, 16 }
 0x194   : > { %v2479_v53 = vor.u32 %v2478_v43, %v2477_v46  ;;  %v7724_v43 = vpop.f32.mrf.mxu1  ;;  %v7727_v46 = vshll.u32 %v7590_v33, 16  ;;  %v2501_v19 = vrot.slane %v7765_v44, 2 }
 0x195   : > { %8942 = vst [vmem:[#allocation61_spill] sm:$0xff] %v7724_v43  ;;  %v7813_v43 = vshll.u32 %v7620_v54, 16 }
 0x196   : > { %v7719_v51 = vsel %vm2016_vm3, %v2475_v14, %v2479_v53  ;;  %v7722_v55 = vpop.eup %5422  ;;  %v7736_v14 = vpop.f32.mrf.mxu0  ;;  %v2054_v41 = vrot.slane %v7727_v46, 1  ;;  %v2291_v48 = vrot.slane %v7727_v46, 2 }
 0x197   : > { %8941 = vst [vmem:[#allocation60_spill] sm:$0xff] %v7719_v51  ;;  %v1357_v5 = vmul.f32 %v7722_v55, %v7682_v31  ;;  %v2050_v51 = vor.u32 %v2048_v3, %v2046_v59  ;;  %vm1362_vm14 = vweird.f32 %v7722_v55 }
 0x198   : > { %vm7808_vm11 = vmor %vm1361_vm13, %vm1362_vm14  ;;  %vm2015_vm14 = vcmask 1045504  }
 0x199   : > { %3328 = vmatmul.bf16.gmra.mxu1 %v2047_v12  ;;  %v2457_v12 = vrot.slane %v2048_v3, 2  ;;  %v7753_v11 = vpop.f32.mrf.mxu2  ;;  %v7770_v3 = vshll.u32 %v6875_v62, 16 }
 0x19a   : > { %8945 = vst [vmem:[#allocation63_spill] sm:$0xff] %v7753_v11 }
 0x19b   : > { %v7713_v52 = vor.u32 %v2458_v45, %v2457_v12  ;;  %v4969_v45 = vld [vmem:[%s8631_s1 + $0x230] sm:$0xff] }
 0x19c   : > { %4102 = vmatpush.bf16.msra.mxu0 %v4969_v45  ;;  %v7756_v45 = vshll.u32 %v7396_v20, 16  ;;  %v7767_v11 = vpop.f32.mrf.mxu1 }
 0x19d   : > { %v7734_v13 = vsel %vm2016_vm3, %v2456_v15, %v7713_v52  ;;  %v7750_v15 = vshrl.u32 %v7590_v33, 16  ;;  %8946 = vst [vmem:[#allocation64_spill] sm:$0xff] %v7767_v11  ;;  %v2462_v11 = vrot.slane %v7727_v46, 3  ;;  %v7853_v46 = vshll.u32 %v7470_v30, 16 }
 0x19e   : > { %3549 = vmatmul.bf16.gmra.mxu3 %v2217_v39  ;;  %8943 = vst [vmem:[#allocation62_spill] sm:$0xff] %v7734_v13  ;;  %v8944_v39 = vrot.slane %v7313_v9, 1  ;;  %v2055_v13 = vsel %vm2019_vm2, %v2050_v51, %v2054_v41  ;;  %v7791_v9 = vshll.u32 %v7146_v0, 16 }
 0x1a0   : > { %3662 = vmatmul.bf16.gmra.mxu0 %v2289_v29  ;;  %v2219_v12 = vsel %vm2210_vm10, %v8944_v39, %v8709_v50  ;;  %v7743_v29 = vor.u32 %v2494_v36, %v2493_v42  ;;  %v7759_v42 = vshrl.u32 %v7396_v20, 16  ;;  %v2499_v36 = vor.u32 %v2498_v63, %v2497_v60  ;;  %v7775_v63 = vpop.f32.mrf.mxu0  ;;  %8948 = vst [vmem:[#allocation66_spill] sm:$0xff] %v7791_v9 }
 0x1a1   : > { %3446 = vmatmul.bf16.gmra.mxu2 %v2219_v12  ;;  %v1358_v39 = vsub.f32 1.0, %v1357_v5  ;;  %v2290_v50 = vrot.slane %v7750_v15, 1  ;;  %v2482_v60 = vrot.slane %v7756_v45, 3  ;;  %v7806_v32 = vpop.f32.mrf.mxu2  ;;  %v2506_v35 = vrot.slane %v7791_v9, 3 }
 0x1a2   : > { %v2481_v59 = vrot.slane %v7759_v42, 2  ;;  %8951 = vst [vmem:[#allocation69_spill] sm:$0xff] %v7806_v32 }
 0x1a3   : > { %v1359_v5 = vmul.f32 %v7722_v55, %v1358_v39  ;;  %v7777_v38 = vor.u32 %v2291_v48, %v2290_v50  ;;  %v7794_v50 = vshrl.u32 %v7146_v0, 16 }
 0x1a4   : > { %v7779_v51 = vor.u32 %v2482_v60, %v2481_v59  ;;  %v2502_v59 = vrot.slane %v7770_v3, 3 }
 0x1a5   : > { %8949 = vst [vmem:[#allocation67_spill] sm:$0xff] %v7794_v50  ;;  %v1360_v60 = vadd.f32 %v7722_v55, %v1359_v5  ;;  %v2293_v39 = vsel %vm2278_vm7, %v7698_v8, %v7777_v38  ;;  %v8954_v5 = vrot.slane %v7620_v54, 1  ;;  %v2505_v32 = vrot.slane %v7794_v50, 2 }
 0x1a6   : > { %v7798_v48 = vsel %vm2016_vm3, %v2479_v53, %v7779_v51  ;;  %v2503_v53 = vor.u32 %v2502_v59, %v2501_v19 }
 0x1a7   : > { %8950 = vst [vmem:[#allocation68_spill] sm:$0xff] %v7798_v48  ;;  %v1368_v48 = vor.u32 1.1754944e-38, %v1367_v16  ;;  %v1364_v19 = vsel %vm7808_vm11, %v7722_v55, %v1360_v60  ;;  %v2064_v16 = vshrl.u32 %v7620_v54, 16  ;;  %v7832_v59 = vor.u32 %v2506_v35, %v2505_v32  ;;  %v7839_v55 = vpop.permute.xlu1 %1574 }
 0x1a8   : > { %v7821_v8 = vsel %vm2016_vm3, %v2499_v36, %v2503_v53  ;;  %8958 = vst [vmem:[#allocation72_spill] sm:$0xff] %v7839_v55  ;;  %v2295_v60 = vrot.slane %v7813_v43, 2  ;;  %vm1616_vm11 = vcmp.eq.s32.totalorder %v7839_v55, 1  ;;  %v4944_v55 = vld [vmem:[%s8631_s1 + $0x168] sm:$0xff] }
 0x1a9   : > { %3333 = vmatmul.bf16.gmra.mxu1 %v2055_v13  ;;  %v7783_v13 = vsel %vm2016_vm3, %v7743_v29, %v2499_v36  ;;  %8956 = vst [vmem:[#allocation70_spill] sm:$0xff] %v7821_v8  ;;  %v7834_v36 = vpop.f32.mrf.mxu0  ;;  %v2461_v8 = vrot.slane %v7750_v15, 2  ;;  %v2465_v35 = vrot.slane %v2064_v16, 2 }
 0x1aa   : > { %8947 = vst [vmem:[#allocation65_spill] sm:$0xff] %v7783_v13  ;;  %v1365_v13 = vand.u32 2147483647, %v7682_v31  ;;  %v8955_v31 = vrot.slane %v7590_v33, 1  ;;  %v7844_v33 = vsel %vm2016_vm3, %v2503_v53, %v7832_v59  ;;  %3764 = vmatpush.bf16.msra.mxu1 %v4944_v55  ;;  %v7930_v55 = vshrl.u32 %v7449_v61, 16 }
 0x1ab   : > { %8959 = vst [vmem:[#allocation73_spill] sm:$0xff] %v7844_v33  ;;  %v2463_v32 = vor.u32 %v2462_v11, %v2461_v8  ;;  %v7873_v11 = vshrl.u32 %v7246_v25, 16  ;;  %v2486_v33 = vrot.slane %v7853_v46, 3 }
 0x1ac   : > { %v2221_v1 = vsel %vm2210_vm10, %v8955_v31, %v8954_v5  ;;  %vm1366_vm13 = vcmp.eq.f32.partialorder %v1365_v13, 8.507059e+37  ;;  %v2062_v31 = vrot.slane %v7813_v43, 1  ;;  %v2294_v13 = vrot.slane %v2064_v16, 1 }
 0x1ad   : > { %v1369_v5 = vsel %vm1366_vm13, %v1368_v48, %v1364_v19  ;;  %v2466_v48 = vrot.slane %v7813_v43, 3  ;;  %v7860_v53 = vsel %vm2016_vm3, %v7713_v52, %v2463_v32  ;;  %v7865_v43 = vshll.u32 %v7569_v24, 16  ;;  %8962 = vst [vmem:[#allocation76_spill] sm:$0xff] %v7873_v11  ;;  %vm2017_vm13 = vmand %vm2015_vm14, %vm2016_vm3 }
 0x1ae   : > { %3554 = vmatmul.bf16.gmra.mxu3 %v2219_v12  ;;  %v7829_v12 = vpop.f32.mrf.mxu1  ;;  %v1411_v19 = vmul.f32 %v1369_v5, %v7626_v34  ;;  %8961 = vst [vmem:[#allocation75_spill] sm:$0xff] %v7860_v53  ;;  %v7862_v8 = vor.u32 %v2295_v60, %v2294_v13  ;;  %v7868_v34 = vshrl.u32 %v7569_v24, 16  ;;  %v7878_v52 = vshll.u32 %v7246_v25, 16 }
 0x1af   : > { %8957 = vst [vmem:[#allocation71_spill] sm:$0xff] %v7829_v12  ;;  %v7856_v12 = vshrl.u32 %v7470_v30, 16  ;;  %v8966_v25 = vrot.slane %v7620_v54, 1  ;;  %v2066_v9 = vor.u32 %v2064_v16, %v2062_v31  ;;  %v7933_v16 = vshll.u32 %v7540_v28, 16 }
 0x1b0   : > { %3667 = vmatmul.bf16.gmra.mxu0 %v2293_v39  ;;  %v2058_v39 = vor.u32 %v7750_v15, %v2054_v41  ;;  %v7849_v15 = vpop.f32.mrf.mxu2  ;;  %v1657_v5 = vsel %vm1616_vm11, %v1411_v19, 0.0  ;;  %8964 = vst [vmem:[#allocation78_spill] sm:$0xff] %v7878_v52  ;;  %v4952_v19 = vld [vmem:[%s8631_s1 + $0x1a8] sm:$0xff]  ;;  %v2518_v50 = vrot.slane %v7878_v52, 3  ;;  %v2224_v52 = vrot.slane %v6597_v7, 1 }
 0x1b1   : > { %3451 = vmatmul.bf16.gmra.mxu2 %v2221_v1  ;;  %8960 = vst [vmem:[#allocation74_spill] sm:$0xff] %v7849_v15  ;;  %v2485_v60 = vrot.slane %v7856_v12, 2  ;;  %v7885_v53 = vpop.f32.mrf.mxu0  ;;  %v2489_v15 = vrot.slane %v7868_v34, 2 }
 0x1b2   : > { %v2063_v41 = vsel %vm2019_vm2, %v2058_v39, %v2062_v31  ;;  %v2467_v39 = vor.u32 %v2466_v48, %v2465_v35  ;;  %v2297_v35 = vsel %vm2278_vm7, %v7777_v38, %v7862_v8  ;;  %v2222_v48 = vrot.slane %v6415_v40, 1  ;;  %3877 = vmatpush.bf16.msra.mxu2 %v4952_v19 }
 0x1b3   : > { %v2490_v38 = vrot.slane %v7865_v43, 3  ;;  %v2517_v40 = vrot.slane %v7873_v11, 2 }
 0x1b4   : > { %v7881_v13 = vsel %vm2016_vm3, %v2463_v32, %v2467_v39  ;;  %v4960_v32 = vld [vmem:[%s8631_s1 + $0x1e8] sm:$0xff]  ;;  %v7921_v19 = vsel %vm2016_vm3, %v2467_v39, %v7668_v49  ;;  %v2298_v39 = vrot.slane %v7639_v57, 1 }
 0x1b5   : > { %8965 = vst [vmem:[#allocation79_spill] sm:$0xff] %v7881_v13  ;;  %v2487_v13 = vor.u32 %v2486_v33, %v2485_v60  ;;  %3990 = vmatpush.bf16.msra.mxu3 %v4960_v32  ;;  %v2491_v60 = vor.u32 %v2490_v38, %v2489_v15  ;;  %v2519_v54 = vor.u32 %v2518_v50, %v2517_v40  ;;  %v2070_v15 = vrot.slane %v7636_v21, 1 }
 0x1b6   : > { %8970 = vst [vmem:[#allocation83_spill] sm:$0xff] %v7921_v19  ;;  %v7927_v32 = vshll.u32 %v7449_v61, 16  ;;  %v7936_v40 = vshrl.u32 %v7540_v28, 16  ;;  %v2509_v38 = vrot.slane %v7930_v55, 2 }
 0x1b7   : > { %v7911_v33 = vsel %vm2016_vm3, %v7779_v51, %v2487_v13  ;;  %v7917_v11 = vsel %vm2016_vm3, %v2487_v13, %v2491_v60  ;;  %v2071_v50 = vsel %vm2019_vm2, %v2066_v9, %v2070_v15  ;;  %v2299_v13 = vrot.slane %v7636_v21, 2 }
 0x1b8   : > { %8967 = vst [vmem:[#allocation80_spill] sm:$0xff] %v7911_v33  ;;  %v7953_v21 = vshll.u32 %v7518_v6, 16 }
 0x1b9   : > { %3338 = vmatmul.bf16.gmra.mxu1 %v2063_v41  ;;  %v7875_v41 = vpop.f32.mrf.mxu1  ;;  %8969 = vst [vmem:[#allocation82_spill] sm:$0xff] %v7917_v11  ;;  %v7939_v31 = vpop.f32.mrf.mxu0  ;;  %v2514_v11 = vrot.slane %v7933_v16, 3  ;;  %v2300_v9 = vor.u32 %v2299_v13, %v2298_v39 }
 0x1ba   : > { %8963 = vst [vmem:[#allocation77_spill] sm:$0xff] %v7875_v41  ;;  %v2223_v41 = vsel %vm2210_vm10, %v8966_v25, %v2222_v48 }
 0x1bb   : > { %8972 = vst [vmem:[#allocation85_spill] sm:$0xff] %v7936_v40 }
 0x1be   : > { %3559 = vmatmul.bf16.gmra.mxu3 %v2221_v1  ;;  %v1698_v1 = vpack.c.bf16 %v1657_v5, %v1657_v5  ;;  %v7914_v5 = vpop.f32.mrf.mxu2 }
 0x1bf   : > { %8968 = vst [vmem:[#allocation81_spill] sm:$0xff] %v7914_v5 }
 0x1c0   : > { %3672 = vmatmul.bf16.gmra.mxu0 %v2297_v35  ;;  %v4968_v35 = vld [vmem:[%s8631_s1 + $0x228] sm:$0xff]  ;;  %v1780_v25 = vunpack.c.l.b16 %v1698_v1  ;;  %v2510_v1 = vrot.slane %v7927_v32, 3 }
 0x1c1   : > { %3456 = vmatmul.bf16.gmra.mxu2 %v2223_v41  ;;  %4103 = vmatpush.bf16.msra.mxu0 %v4968_v35  ;;  %v2513_v35 = vrot.slane %v7936_v40, 2 }
 0x1c2   : > { %v1801_v49 = vpack.c.b16 %v1780_v25, %v1780_v25  ;;  %v2511_v33 = vor.u32 %v2510_v1, %v2509_v38  ;;  %v2225_v1 = vsel %vm2210_vm10, %v2222_v48, %v2224_v52  ;;  %v2074_v48 = vor.u32 %v7639_v57, %v2070_v15 }
 0x1c4   : > { %v1983_v19 = vshrl.u32 %v1801_v49, 16  ;;  %v1986_v5 = vshll.u32 %v1801_v49, 16  ;;  %v7960_v40 = vsel %vm2016_vm3, %v7832_v59, %v2511_v33  ;;  %v2301_v49 = vsel %vm2278_vm7, %v7862_v8, %v2300_v9 }
 0x1c5   : > { %8974 = vst [vmem:[#allocation87_spill] sm:$0xff] %v7960_v40  ;;  %v2522_v59 = vrot.slane %v7953_v21, 3  ;;  %v7973_v40 = vpop.f32.mrf.mxu0  ;;  %v2078_v8 = vrot.slane %v7648_v56, 1 }
 0x1c6   : > { %v7923_v51 = vpop.f32.mrf.mxu1  ;;  %v7947_v25 = vpop.f32.mrf.mxu2  ;;  %v1985_v13 = vrot.slane %v1983_v19, 6  ;;  %v1988_v38 = vrot.slane %v1986_v5, 7 }
 0x1c7   : > { %8971 = vst [vmem:[#allocation84_spill] sm:$0xff] %v7923_v51  ;;  %v2515_v51 = vor.u32 %v2514_v11, %v2513_v35  ;;  %v2079_v7 = vsel %vm2019_vm2, %v2074_v48, %v2078_v8 }
 0x1c8   : > { %8973 = vst [vmem:[#allocation86_spill] sm:$0xff] %v7947_v25 }
 0x1c9   : > { %3343 = vmatmul.bf16.gmra.mxu1 %v2071_v50  ;;  %v7956_v50 = vshrl.u32 %v7518_v6, 16  ;;  %v7965_v39 = vsel %vm2016_vm3, %v2511_v33, %v2515_v51  ;;  %v7968_v11 = vsel %vm2016_vm3, %v2515_v51, %v2519_v54  ;;  %v7978_v33 = vsel %vm2016_vm3, %v2491_v60, %v7743_v29 }
 0x1ca   : > { %8975 = vst [vmem:[#allocation88_spill] sm:$0xff] %v7965_v39  ;;  %v2303_v39 = vrot.slane %v7648_v56, 2  ;;  %v2226_v56 = vrot.slane %v6906_v4, 1  ;;  %v2082_v4 = vor.u32 %v7644_v26, %v2078_v8  ;;  %v4959_v8 = vld [vmem:[%s8631_s1 + $0x1e0] sm:$0xff] }
 0x1cb   : > { %8976 = vst [vmem:[#allocation89_spill] sm:$0xff] %v7968_v11  ;;  %v2521_v35 = vrot.slane %v7956_v50, 2  ;;  %v2302_v11 = vrot.slane %v7644_v26, 1  ;;  %v4951_v26 = vld [vmem:[%s8631_s1 + $0x1a0] sm:$0xff]  ;;  %3991 = vmatpush.bf16.msra.mxu3 %v4959_v8 }
 0x1cc   : > { %8977 = vst [vmem:[#allocation90_spill] sm:$0xff] %v7978_v33  ;;  %3878 = vmatpush.bf16.msra.mxu2 %v4951_v26  ;;  %v2094_v26 = vrot.slane %v7756_v45, 1 }
 0x1cd   : > { %v2523_v51 = vor.u32 %v2522_v59, %v2521_v35  ;;  %v7995_v60 = vpop.f32.mrf.mxu0  ;;  %v2304_v57 = vor.u32 %v2303_v39, %v2302_v11  ;;  %v8007_v35 = vshll.u32 %v7616_v27, 16  ;;  %v2227_v59 = vsel %vm2210_vm10, %v2224_v52, %v2226_v56 }
 0x1ce   : > { %v7950_v28 = vpop.f32.mrf.mxu1  ;;  %3564 = vmatmul.bf16.gmra.mxu3 %v2223_v41  ;;  %v1989_v41 = vor.u32 %v1988_v38, %v1985_v13 }
 0x1cf   : > { %v7986_v19 = vsel %vm2016_vm3, %v2519_v54, %v2523_v51  ;;  %v7999_v54 = vpop.f32.mrf.mxu3  ;;  %v2526_v48 = vrot.slane %v8007_v35, 3 }
 0x1d0   : > { %3677 = vmatmul.bf16.gmra.mxu0 %v2301_v49  ;;  %8979 = vst [vmem:[#allocation92_spill] sm:$0xff] %v7986_v19  ;;  %v1990_v29 = vsel %vm1802_vm1, %v7610_v18, %v1989_v41  ;;  %v2305_v18 = vsel %vm2278_vm7, %v2300_v9, %v2304_v57  ;;  %v2086_v9 = vrot.slane %v7677_v22, 1  ;;  %vm2558_vm1 = vcmask 1044480  }
 0x1d1   : > { %3461 = vmatmul.bf16.gmra.mxu2 %v2225_v1  ;;  %v7997_v15 = vsel %vm2017_vm13, %v1990_v29, 0  ;;  %8980 = vst [vmem:[#allocation93_spill] sm:$0xff] %v7999_v54 }
 0x1d2   : > { %v8743_v39 = vshrl.u32 %v7997_v15, 16  ;;  %v8744_v11 = vshll.u32 %v7997_v15, 16 }
 0x1d4   : > { %v7980_v49 = vpop.f32.mrf.mxu2  ;;  %v2529_v29 = vrot.slane %v8743_v39, 2  ;;  %v2530_v19 = vrot.slane %v8744_v11, 3  ;;  %v2306_v11 = vrot.slane %v7680_v17, 1 }
 0x1d5   : > { %8978 = vst [vmem:[#allocation91_spill] sm:$0xff] %v7980_v49  ;;  %v8023_v54 = vpop.f32.mrf.mxu0  ;;  %v2307_v49 = vrot.slane %v7677_v22, 2  ;;  %v2228_v22 = vrot.slane %v7396_v20, 1 }
 0x1d6   : > { %v7982_v5 = vpop.f32.mrf.mxu1 }
 0x1d7   : > { %v8035_v39 = vpop.f32.mrf.mxu3 }
 0x1d8   : > { %8985 = vst [vmem:[#allocation98_spill] sm:$0xff] %v8035_v39 }
 0x1d9   : > { %3348 = vmatmul.bf16.gmra.mxu1 %v2079_v7  ;;  %v8010_v7 = vshrl.u32 %v7616_v27, 16 }
 0x1db   : > { %v2525_v41 = vrot.slane %v8010_v7, 2 }
 0x1dc   : > { %v8001_v13 = vpop.f32.mrf.mxu2 }
 0x1dd   : > { %8981 = vst [vmem:[#allocation94_spill] sm:$0xff] %v8001_v13  ;;  %v2527_v33 = vor.u32 %v2526_v48, %v2525_v41  ;;  %v2308_v48 = vor.u32 %v2307_v49, %v2306_v11  ;;  %v4943_v11 = vld [vmem:[%s8631_s1 + $0x160] sm:$0xff] }
 0x1de   : > { %v8004_v38 = vpop.f32.mrf.mxu1  ;;  %3569 = vmatmul.bf16.gmra.mxu3 %v2225_v1  ;;  %v8025_v1 = vor.u32 %v2530_v19, %v2529_v29  ;;  %v2087_v19 = vsel %vm2019_vm2, %v2082_v4, %v2086_v9  ;;  %3765 = vmatpush.bf16.msra.mxu1 %v4943_v11 }
 0x1df   : > { %v8033_v13 = vsel %vm2016_vm3, %v2523_v51, %v2527_v33  ;;  %v2309_v49 = vsel %vm2278_vm7, %v2304_v57, %v2308_v48  ;;  %v4967_v57 = vld [vmem:[%s8631_s1 + $0x220] sm:$0xff] }
 0x1e0   : > { %3682 = vmatmul.bf16.gmra.mxu0 %v2305_v18  ;;  %8982 = vst [vmem:[#allocation95_spill] sm:$0xff] %v8025_v1  ;;  %v8041_v41 = vsel %vm2016_vm3, %v2527_v33, %v8025_v1 }
 0x1e1   : > { %3466 = vmatmul.bf16.gmra.mxu2 %v2227_v59  ;;  %8984 = vst [vmem:[#allocation97_spill] sm:$0xff] %v8033_v13  ;;  %v2090_v13 = vor.u32 %v7680_v17, %v2086_v9  ;;  %4104 = vmatpush.bf16.msra.mxu0 %v4967_v57  ;;  %v2230_v17 = vrot.slane %v7470_v30, 1 }
 0x1e2   : > { %8986 = vst [vmem:[#allocation99_spill] sm:$0xff] %v8041_v41 }
 0x1e3   : > { %v2095_v11 = vsel %vm2019_vm2, %v2090_v13, %v2094_v26  ;;  %v2231_v13 = vsel %vm2210_vm10, %v2228_v22, %v2230_v17 }
 0x1e4   : > { %v8027_v18 = vpop.f32.mrf.mxu2  ;;  %v8057_v4 = vpop.f32.mrf.mxu3 }
 0x1e5   : > { %8983 = vst [vmem:[#allocation96_spill] sm:$0xff] %v8027_v18 }
 0x1e6   : > { %v8029_v52 = vpop.f32.mrf.mxu1  ;;  %8988 = vst [vmem:[#allocation101_spill] sm:$0xff] %v8057_v4 }
 0x1e9   : > { %3353 = vmatmul.bf16.gmra.mxu1 %v2087_v19  ;;  %v2229_v19 = vsel %vm2210_vm10, %v2226_v56, %v2228_v22 }
 0x1ec   : > { %v8053_v33 = vpop.f32.mrf.mxu2  ;;  %v8075_v4 = vpop.f32.mrf.mxu3 }
 0x1ed   : > { %v8050_v51 = vpop.f32.mrf.mxu0  ;;  %8987 = vst [vmem:[#allocation100_spill] sm:$0xff] %v8053_v33 }
 0x1ee   : > { %v8055_v29 = vpop.f32.mrf.mxu1  ;;  %3574 = vmatmul.bf16.gmra.mxu3 %v2227_v59  ;;  %v2310_v59 = vrot.slane %v7759_v42, 1  ;;  %8989 = vst [vmem:[#allocation102_spill] sm:$0xff] %v8075_v4 }
 0x1f0   : > { %3687 = vmatmul.bf16.gmra.mxu0 %v2309_v49  ;;  %v2311_v49 = vrot.slane %v7756_v45, 2 }
 0x1f1   : > { %3471 = vmatmul.bf16.gmra.mxu2 %v2229_v19 }
 0x1f2   : > { %v2312_v20 = vor.u32 %v2311_v49, %v2310_v59 }
 0x1f4   : > { %v3432_v1 = vpop.f32.mrf.mxu2  ;;  %v2313_v25 = vsel %vm2278_vm7, %v2308_v48, %v2312_v20  ;;  %v2314_v48 = vrot.slane %v7856_v12, 1 }
 0x1f5   : > { %v8065_v8 = vpop.f32.mrf.mxu0 }
 0x1f6   : > { %v3319_v41 = vpop.f32.mrf.mxu1 }
 0x1f7   : > { %v3320_v56 = vadd.f32 %v3319_v41, %v7736_v14 }
 0x1f9   : > { %3358 = vmatmul.bf16.gmra.mxu1 %v2095_v11  ;;  %v3433_v39 = vadd.f32 %v3432_v1, %v3320_v56  ;;  %v2102_v1 = vrot.slane %v7853_v46, 1  ;;  %v2098_v56 = vor.u32 %v7759_v42, %v2094_v26 }
 0x1fc   : > { %v3434_v9 = vpop.f32.mrf.mxu2 }
 0x1fd   : > { %v8077_v33 = vpop.f32.mrf.mxu0 }
 0x1fe   : > { %v3321_v18 = vpop.f32.mrf.mxu1  ;;  %3579 = vmatmul.bf16.gmra.mxu3 %v2229_v19 }
 0x1ff   : > { %v3322_v45 = vadd.f32 %v3321_v18, %v7775_v63  ;;  %v2315_v63 = vrot.slane %v7853_v46, 2  ;;  %v2103_v18 = vsel %vm2019_vm2, %v2098_v56, %v2102_v1 }
 0x200   : > { %3692 = vmatmul.bf16.gmra.mxu0 %v2313_v25 }
 0x201   : > { %v3435_v14 = vadd.f32 %v3434_v9, %v3322_v45  ;;  %v8083_v41 = vpop.f32.mrf.mxu3  ;;  %3476 = vmatmul.bf16.gmra.mxu2 %v2231_v13  ;;  %v2316_v11 = vor.u32 %v2315_v63, %v2314_v48  ;;  %v2232_v45 = vrot.slane %v7569_v24, 1 }
 0x202   : > { %8990 = vst [vmem:[#allocation103_spill] sm:$0xff] %v8083_v41 }
 0x203   : > { %v2317_v30 = vsel %vm2278_vm7, %v2312_v20, %v2316_v11  ;;  %v4950_v20 = vld [vmem:[%s8631_s1 + $0x198] sm:$0xff] }
 0x204   : > { %v3437_v59 = vpop.f32.mrf.mxu2  ;;  %3879 = vmatpush.bf16.msra.mxu2 %v4950_v20 }
 0x205   : > { %v8086_v57 = vpop.f32.mrf.mxu0 }
 0x206   : > { %v3324_v49 = vpop.f32.mrf.mxu1 }
 0x207   : > { %v3325_v25 = vadd.f32 %v3324_v49, %v7834_v36  ;;  %v2233_v36 = vsel %vm2210_vm10, %v2230_v17, %v2232_v45 }
 0x209   : > { %3363 = vmatmul.bf16.gmra.mxu1 %v2103_v18  ;;  %v3438_v22 = vadd.f32 %v3437_v59, %v3325_v25  ;;  %v3308_v19 = vpop.f32.mrf.mxu3  ;;  %v2106_v59 = vor.u32 %v7856_v12, %v2102_v1  ;;  %v2110_v18 = vrot.slane %v7865_v43, 1  ;;  %v2318_v12 = vrot.slane %v7868_v34, 1 }
 0x20b   : > { %v2111_v17 = vsel %vm2019_vm2, %v2106_v59, %v2110_v18  ;;  %v4966_v59 = vld [vmem:[%s8631_s1 + $0x218] sm:$0xff]  ;;  %v2114_v20 = vor.u32 %v7868_v34, %v2110_v18 }
 0x20c   : > { %v3439_v41 = vpop.f32.mrf.mxu2  ;;  %4105 = vmatpush.bf16.msra.mxu0 %v4966_v59 }
 0x20d   : > { %v3658_v9 = vpop.f32.mrf.mxu0 }
 0x20e   : > { %v3326_v4 = vpop.f32.mrf.mxu1  ;;  %3584 = vmatmul.bf16.gmra.mxu3 %v2231_v13 }
 0x20f   : > { %v3327_v42 = vadd.f32 %v3326_v4, %v7885_v53  ;;  %v4942_v53 = vld [vmem:[%s8631_s1 + $0x158] sm:$0xff] }
 0x210   : > { %3697 = vmatmul.bf16.gmra.mxu0 %v2317_v30  ;;  %v4958_v30 = vld [vmem:[%s8631_s1 + $0x1d8] sm:$0xff]  ;;  %3766 = vmatpush.bf16.msra.mxu1 %v4942_v53 }
 0x211   : > { %v3440_v46 = vadd.f32 %v3439_v41, %v3327_v42  ;;  %v3545_v26 = vpop.f32.mrf.mxu3  ;;  %3481 = vmatmul.bf16.gmra.mxu2 %v2233_v36  ;;  %3992 = vmatpush.bf16.msra.mxu3 %v4958_v30 }
 0x212   : > { %v3546_v49 = vadd.f32 %v3545_v26, %v3433_v39  ;;  %v2319_v39 = vrot.slane %v7865_v43, 2 }
 0x214   : > { %v8098_v48 = vadd.f32 %v3658_v9, %v3546_v49  ;;  %v3442_v63 = vpop.f32.mrf.mxu2  ;;  %v2320_v1 = vor.u32 %v2319_v39, %v2318_v12  ;;  %v2322_v39 = vrot.slane %v7696_v23, 1 }
 0x215   : > { %v3660_v56 = vpop.f32.mrf.mxu0 }
 0x216   : > { %8991 = vst [vmem:[#allocation104_spill] sm:$0xff] %v8098_v48  ;;  %v3329_v25 = vpop.f32.mrf.mxu1  ;;  %v2321_v48 = vsel %vm2278_vm7, %v2316_v11, %v2320_v1 }
 0x217   : > { %v3330_v4 = vadd.f32 %v3329_v25, %v7939_v31  ;;  %v2234_v31 = vrot.slane %v6306_v2, 1 }
 0x219   : > { %3368 = vmatmul.bf16.gmra.mxu1 %v2111_v17  ;;  %v3443_v13 = vadd.f32 %v3442_v63, %v3330_v4  ;;  %v3547_v41 = vpop.f32.mrf.mxu3 }
 0x21a   : > { %v3548_v19 = vadd.f32 %v3547_v41, %v3435_v14  ;;  %v2235_v14 = vsel %vm2210_vm10, %v2232_v45, %v2234_v31  ;;  %v2323_v45 = vrot.slane %v7703_v37, 2 }
 0x21c   : > { %v8114_v42 = vadd.f32 %v3660_v56, %v3548_v19  ;;  %v3444_v26 = vpop.f32.mrf.mxu2  ;;  %v2324_v18 = vor.u32 %v2323_v45, %v2322_v39  ;;  %v2236_v19 = vrot.slane %v6554_v47, 1 }
 0x21d   : > { %v3663_v9 = vpop.f32.mrf.mxu0 }
 0x21e   : > { %v3331_v49 = vpop.f32.mrf.mxu1  ;;  %3589 = vmatmul.bf16.gmra.mxu3 %v2233_v36 }
 0x21f   : > { %v3332_v43 = vadd.f32 %v3331_v49, %v7973_v40 }
 0x220   : > { %3702 = vmatmul.bf16.gmra.mxu0 %v2321_v48  ;;  %v2118_v48 = vrot.slane %v7703_v37, 1  ;;  %v2237_v37 = vsel %vm2210_vm10, %v2234_v31, %v2236_v19 }
 0x221   : > { %v3445_v63 = vadd.f32 %v3444_v26, %v3332_v43  ;;  %v3550_v56 = vpop.f32.mrf.mxu3  ;;  %3486 = vmatmul.bf16.gmra.mxu2 %v2235_v14 }
 0x222   : > { %v3551_v25 = vadd.f32 %v3550_v56, %v3438_v22  ;;  %v2119_v12 = vsel %vm2019_vm2, %v2114_v20, %v2118_v48  ;;  %v2126_v56 = vrot.slane %v7707_v58, 1 }
 0x224   : > { %v8124_v30 = vadd.f32 %v3663_v9, %v3551_v25  ;;  %v3447_v40 = vpop.f32.mrf.mxu2 }
 0x225   : > { %v3665_v11 = vpop.f32.mrf.mxu0 }
 0x226   : > { %v3334_v36 = vpop.f32.mrf.mxu1 }
 0x227   : > { %v3335_v53 = vadd.f32 %v3334_v36, %v7995_v60  ;;  %v2325_v60 = vsel %vm2278_vm7, %v2320_v1, %v2324_v18  ;;  %v2122_v36 = vor.u32 %v7696_v23, %v2118_v48  ;;  %v2326_v1 = vrot.slane %v7711_v10, 1 }
 0x229   : > { %3373 = vmatmul.bf16.gmra.mxu1 %v2119_v12  ;;  %v3448_v4 = vadd.f32 %v3447_v40, %v3335_v53  ;;  %v3552_v22 = vpop.f32.mrf.mxu3  ;;  %v2127_v31 = vsel %vm2019_vm2, %v2122_v36, %v2126_v56 }
 0x22a   : > { %v3553_v17 = vadd.f32 %v3552_v22, %v3440_v46 }
 0x22c   : > { %v8131_v41 = vadd.f32 %v3665_v11, %v3553_v17  ;;  %v3449_v9 = vpop.f32.mrf.mxu2  ;;  %v2238_v17 = vrot.slane %v6875_v62, 1 }
 0x22d   : > { %v3668_v34 = vpop.f32.mrf.mxu0 }
 0x22e   : > { %v3336_v26 = vpop.f32.mrf.mxu1  ;;  %3594 = vmatmul.bf16.gmra.mxu3 %v2235_v14 }
 0x22f   : > { %v3337_v49 = vadd.f32 %v3336_v26, %v8023_v54  ;;  %v2327_v54 = vrot.slane %v7707_v58, 2  ;;  %v2239_v26 = vsel %vm2210_vm10, %v2236_v19, %v2238_v17  ;;  %v4965_v19 = vld [vmem:[%s8631_s1 + $0x210] sm:$0xff] }
 0x230   : > { %3707 = vmatmul.bf16.gmra.mxu0 %v2325_v60 }
 0x231   : > { %v3450_v43 = vadd.f32 %v3449_v9, %v3337_v49  ;;  %v3555_v59 = vpop.f32.mrf.mxu3  ;;  %3491 = vmatmul.bf16.gmra.mxu2 %v2237_v37  ;;  %v2328_v12 = vor.u32 %v2327_v54, %v2326_v1  ;;  %v4941_v49 = vld [vmem:[%s8631_s1 + $0x150] sm:$0xff]  ;;  %4106 = vmatpush.bf16.msra.mxu0 %v4965_v19 }
 0x232   : > { %v3556_v46 = vadd.f32 %v3555_v59, %v3443_v13  ;;  %3767 = vmatpush.bf16.msra.mxu1 %v4941_v49 }
 0x233   : > { %v2329_v48 = vsel %vm2278_vm7, %v2324_v18, %v2328_v12 }
 0x234   : > { %v8138_v20 = vadd.f32 %v3668_v34, %v3556_v46  ;;  %v3452_v11 = vpop.f32.mrf.mxu2 }
 0x235   : > { %v3670_v25 = vpop.f32.mrf.mxu0 }
 0x236   : > { %v3339_v40 = vpop.f32.mrf.mxu1 }
 0x237   : > { %v3340_v14 = vadd.f32 %v3339_v40, %v8050_v51  ;;  %v4949_v51 = vld [vmem:[%s8631_s1 + $0x190] sm:$0xff]  ;;  %v2331_v40 = vrot.slane %v7770_v3, 2 }
 0x238   : > { %3880 = vmatpush.bf16.msra.mxu2 %v4949_v51 }
 0x239   : > { %3378 = vmatmul.bf16.gmra.mxu1 %v2127_v31  ;;  %v3453_v53 = vadd.f32 %v3452_v11, %v3340_v14  ;;  %v3557_v13 = vpop.f32.mrf.mxu3  ;;  %v2130_v11 = vor.u32 %v7711_v10, %v2126_v56 }
 0x23a   : > { %v3558_v39 = vadd.f32 %v3557_v13, %v3445_v63  ;;  %v4957_v63 = vld [vmem:[%s8631_s1 + $0x1d0] sm:$0xff] }
 0x23b   : > { %3993 = vmatpush.bf16.msra.mxu3 %v4957_v63 }
 0x23c   : > { %v8145_v22 = vadd.f32 %v3670_v25, %v3558_v39  ;;  %v3454_v34 = vpop.f32.mrf.mxu2  ;;  %v2240_v39 = vrot.slane %v7146_v0, 1 }
 0x23d   : > { %v3673_v45 = vpop.f32.mrf.mxu0 }
 0x23e   : > { %v3341_v23 = vpop.f32.mrf.mxu1  ;;  %3599 = vmatmul.bf16.gmra.mxu3 %v2237_v37 }
 0x23f   : > { %v3342_v58 = vadd.f32 %v3341_v23, %v8065_v8  ;;  %v2134_v8 = vrot.slane %v7770_v3, 1 }
 0x240   : > { %3712 = vmatmul.bf16.gmra.mxu0 %v2329_v48  ;;  %v2241_v48 = vsel %vm2210_vm10, %v2238_v17, %v2240_v39 }
 0x241   : > { %v3455_v9 = vadd.f32 %v3454_v34, %v3342_v58  ;;  %v3560_v60 = vpop.f32.mrf.mxu3  ;;  %3496 = vmatmul.bf16.gmra.mxu2 %v2239_v26  ;;  %v2135_v1 = vsel %vm2019_vm2, %v2130_v11, %v2134_v8 }
 0x242   : > { %v3561_v18 = vadd.f32 %v3560_v60, %v3448_v4  ;;  %v2330_v4 = vrot.slane %v7765_v44, 1 }
 0x244   : > { %v8161_v59 = vadd.f32 %v3673_v45, %v3561_v18  ;;  %v3457_v46 = vpop.f32.mrf.mxu2  ;;  %v2332_v31 = vor.u32 %v2331_v40, %v2330_v4 }
 0x245   : > { %v3675_v37 = vpop.f32.mrf.mxu0 }
 0x246   : > { %v3344_v25 = vpop.f32.mrf.mxu1  ;;  %v2333_v23 = vsel %vm2278_vm7, %v2328_v12, %v2332_v31  ;;  %v8993_v12 = vld [vmem:[#allocation67_spill] sm:$0xff] }
 0x247   : > { %v3345_v36 = vadd.f32 %v3344_v25, %v8077_v33  ;;  %v2334_v25 = vrot.slane %v8993_v12, 1 }
 0x249   : > { %3383 = vmatmul.bf16.gmra.mxu1 %v2135_v1  ;;  %v3458_v54 = vadd.f32 %v3457_v46, %v3345_v36  ;;  %v3562_v14 = vpop.f32.mrf.mxu3  ;;  %v2138_v46 = vor.u32 %v7765_v44, %v2134_v8 }
 0x24a   : > { %v3563_v13 = vadd.f32 %v3562_v14, %v3450_v43  ;;  %v8992_v43 = vld [vmem:[#allocation66_spill] sm:$0xff]  ;;  %v2242_v14 = vrot.slane %v7449_v61, 1 }
 0x24b   : > { %v2142_v63 = vrot.slane %v8992_v43, 1 }
 0x24c   : > { %v8171_v56 = vadd.f32 %v3675_v37, %v3563_v13  ;;  %v3459_v45 = vpop.f32.mrf.mxu2 }
 0x24d   : > { %v3678_v10 = vpop.f32.mrf.mxu0  ;;  %v2143_v17 = vsel %vm2019_vm2, %v2138_v46, %v2142_v63  ;;  %v8996_v46 = vld [vmem:[#allocation61_spill] sm:$0xff] }
 0x24e   : > { %v3346_v34 = vpop.f32.mrf.mxu1  ;;  %3604 = vmatmul.bf16.gmra.mxu3 %v2239_v26  ;;  %v8994_v26 = vld [vmem:[#allocation55_spill] sm:$0xff] }
 0x24f   : > { %v3347_v3 = vadd.f32 %v3346_v34, %v8086_v57  ;;  %v2335_v57 = vrot.slane %v8992_v43, 2 }
 0x250   : > { %3717 = vmatmul.bf16.gmra.mxu0 %v2333_v23  ;;  %v2243_v23 = vsel %vm2210_vm10, %v2240_v39, %v2242_v14  ;;  %v2339_v39 = vrot.slane %v7927_v32, 2 }
 0x251   : > { %v3460_v33 = vadd.f32 %v3459_v45, %v3347_v3  ;;  %v3565_v58 = vpop.f32.mrf.mxu3  ;;  %3501 = vmatmul.bf16.gmra.mxu2 %v2241_v48  ;;  %v2336_v4 = vor.u32 %v2335_v57, %v2334_v25 }
 0x252   : > { %v3566_v51 = vadd.f32 %v3565_v58, %v3453_v53 }
 0x253   : > { %v2337_v8 = vsel %vm2278_vm7, %v2332_v31, %v2336_v4  ;;  %v4948_v31 = vld [vmem:[%s8631_s1 + $0x188] sm:$0xff] }
 0x254   : > { %v8178_v18 = vadd.f32 %v3678_v10, %v3566_v51  ;;  %v3462_v49 = vpop.f32.mrf.mxu2  ;;  %v8995_v10 = vld [vmem:[#allocation57_spill] sm:$0xff]  ;;  %3881 = vmatpush.bf16.msra.mxu2 %v4948_v31 }
 0x255   : > { %v3680_v60 = vpop.f32.mrf.mxu0 }
 0x256   : > { %v3349_v37 = vpop.f32.mrf.mxu1 }
 0x257   : > { %v3350_v11 = vadd.f32 %v3349_v37, %v8994_v26  ;;  %v2146_v37 = vor.u32 %v8993_v12, %v2142_v63  ;;  %v4956_v63 = vld [vmem:[%s8631_s1 + $0x1c8] sm:$0xff] }
 0x258   : > { %3994 = vmatpush.bf16.msra.mxu3 %v4956_v63 }
 0x259   : > { %3388 = vmatmul.bf16.gmra.mxu1 %v2143_v17  ;;  %v3463_v19 = vadd.f32 %v3462_v49, %v3350_v11  ;;  %v3567_v53 = vpop.f32.mrf.mxu3 }
 0x25a   : > { %v3568_v40 = vadd.f32 %v3567_v53, %v3455_v9  ;;  %v2150_v9 = vrot.slane %v7927_v32, 1 }
 0x25c   : > { %v8185_v1 = vadd.f32 %v3680_v60, %v3568_v40  ;;  %v3464_v13 = vpop.f32.mrf.mxu2  ;;  %v8997_v40 = vld [vmem:[#allocation49_spill] sm:$0xff] }
 0x25d   : > { %v3683_v36 = vpop.f32.mrf.mxu0 }
 0x25e   : > { %v3351_v44 = vpop.f32.mrf.mxu1  ;;  %3609 = vmatmul.bf16.gmra.mxu3 %v2241_v48  ;;  %v2338_v48 = vrot.slane %v7930_v55, 1 }
 0x25f   : > { %v3352_v45 = vadd.f32 %v3351_v44, %v8995_v10  ;;  %v4940_v44 = vld [vmem:[%s8631_s1 + $0x148] sm:$0xff]  ;;  %v8998_v10 = vld [vmem:[#allocation64_spill] sm:$0xff] }
 0x260   : > { %3722 = vmatmul.bf16.gmra.mxu0 %v2337_v8  ;;  %v2340_v11 = vor.u32 %v2339_v39, %v2338_v48  ;;  %3768 = vmatpush.bf16.msra.mxu1 %v4940_v44  ;;  %v8999_v39 = vld [vmem:[#allocation85_spill] sm:$0xff] }
 0x261   : > { %v3465_v34 = vadd.f32 %v3464_v13, %v3352_v45  ;;  %v3570_v3 = vpop.f32.mrf.mxu3  ;;  %3506 = vmatmul.bf16.gmra.mxu2 %v2243_v23 }
 0x262   : > { %v3571_v58 = vadd.f32 %v3570_v3, %v3458_v54  ;;  %v2151_v54 = vsel %vm2019_vm2, %v2146_v37, %v2150_v9  ;;  %v2341_v8 = vsel %vm2278_vm7, %v2336_v4, %v2340_v11 }
 0x264   : > { %v8192_v43 = vadd.f32 %v3683_v36, %v3571_v58  ;;  %v3467_v60 = vpop.f32.mrf.mxu2  ;;  %v2244_v36 = vrot.slane %v8997_v40, 1 }
 0x265   : > { %v3685_v51 = vpop.f32.mrf.mxu0 }
 0x266   : > { %v3354_v49 = vpop.f32.mrf.mxu1  ;;  %v2245_v3 = vsel %vm2210_vm10, %v2242_v14, %v2244_v36  ;;  %v2343_v14 = vrot.slane %v7933_v16, 2 }
 0x267   : > { %v3355_v25 = vadd.f32 %v3354_v49, %v8996_v46  ;;  %v4964_v49 = vld [vmem:[%s8631_s1 + $0x208] sm:$0xff]  ;;  %v2342_v46 = vrot.slane %v8999_v39, 1 }
 0x268   : > { %4107 = vmatpush.bf16.msra.mxu0 %v4964_v49 }
 0x269   : > { %3393 = vmatmul.bf16.gmra.mxu1 %v2151_v54  ;;  %v3468_v57 = vadd.f32 %v3467_v60, %v3355_v25  ;;  %v3572_v26 = vpop.f32.mrf.mxu3  ;;  %v2154_v60 = vor.u32 %v7930_v55, %v2150_v9  ;;  %v9000_v25 = vld [vmem:[#allocation71_spill] sm:$0xff] }
 0x26a   : > { %v3573_v17 = vadd.f32 %v3572_v26, %v3460_v33  ;;  %v2344_v26 = vor.u32 %v2343_v14, %v2342_v46 }
 0x26c   : > { %v8205_v53 = vadd.f32 %v3685_v51, %v3573_v17  ;;  %v3469_v32 = vpop.f32.mrf.mxu2  ;;  %v2345_v44 = vsel %vm2278_vm7, %v2340_v11, %v2344_v26  ;;  %v9003_v11 = vld [vmem:[#allocation78_spill] sm:$0xff] }
 0x26d   : > { %v3688_v12 = vpop.f32.mrf.mxu0  ;;  %v2166_v14 = vrot.slane %v9003_v11, 1 }
 0x26e   : > { %v3356_v13 = vpop.f32.mrf.mxu1  ;;  %3614 = vmatmul.bf16.gmra.mxu3 %v2243_v23  ;;  %v2158_v23 = vrot.slane %v7933_v16, 1  ;;  %v9002_v16 = vld [vmem:[#allocation39_spill] sm:$0xff] }
 0x26f   : > { %v3357_v33 = vadd.f32 %v3356_v13, %v8998_v10 }
 0x270   : > { %3727 = vmatmul.bf16.gmra.mxu0 %v2341_v8  ;;  %v2159_v55 = vsel %vm2019_vm2, %v2154_v60, %v2158_v23  ;;  %v9001_v8 = vld [vmem:[#allocation77_spill] sm:$0xff] }
 0x271   : > { %v3470_v45 = vadd.f32 %v3469_v32, %v3357_v33  ;;  %v3575_v58 = vpop.f32.mrf.mxu3  ;;  %3511 = vmatmul.bf16.gmra.mxu2 %v2245_v3  ;;  %v2246_v33 = vrot.slane %v9002_v16, 1 }
 0x272   : > { %v3576_v51 = vadd.f32 %v3575_v58, %v3463_v19 }
 0x274   : > { %v8218_v31 = vadd.f32 %v3688_v12, %v3576_v51  ;;  %v3472_v4 = vpop.f32.mrf.mxu2  ;;  %v2247_v51 = vsel %vm2210_vm10, %v2244_v36, %v2246_v33  ;;  %v2347_v36 = vrot.slane %v9003_v11, 2 }
 0x275   : > { %v3690_v37 = vpop.f32.mrf.mxu0 }
 0x276   : > { %v3359_v48 = vpop.f32.mrf.mxu1 }
 0x277   : > { %v3360_v19 = vadd.f32 %v3359_v48, %v9000_v25  ;;  %v9004_v25 = vld [vmem:[#allocation84_spill] sm:$0xff] }
 0x279   : > { %3398 = vmatmul.bf16.gmra.mxu1 %v2159_v55  ;;  %v3473_v9 = vadd.f32 %v3472_v4, %v3360_v19  ;;  %v3577_v54 = vpop.f32.mrf.mxu3  ;;  %v9005_v55 = vld [vmem:[#allocation76_spill] sm:$0xff] }
 0x27a   : > { %v3578_v17 = vadd.f32 %v3577_v54, %v3465_v34  ;;  %v2162_v34 = vor.u32 %v8999_v39, %v2158_v23  ;;  %v2346_v54 = vrot.slane %v9005_v55, 1 }
 0x27c   : > { %v8225_v12 = vadd.f32 %v3690_v37, %v3578_v17  ;;  %v3474_v32 = vpop.f32.mrf.mxu2  ;;  %v2167_v19 = vsel %vm2019_vm2, %v2162_v34, %v2166_v14  ;;  %v2348_v39 = vor.u32 %v2347_v36, %v2346_v54 }
 0x27d   : > { %v3693_v63 = vpop.f32.mrf.mxu0 }
 0x27e   : > { %v3361_v13 = vpop.f32.mrf.mxu1  ;;  %3619 = vmatmul.bf16.gmra.mxu3 %v2245_v3 }
 0x27f   : > { %v3362_v10 = vadd.f32 %v3361_v13, %v9001_v8  ;;  %v2248_v13 = vrot.slane %v7518_v6, 1 }
 0x280   : > { %3732 = vmatmul.bf16.gmra.mxu0 %v2345_v44 }
 0x281   : > { %v3475_v58 = vadd.f32 %v3474_v32, %v3362_v10  ;;  %v3580_v60 = vpop.f32.mrf.mxu3  ;;  %3516 = vmatmul.bf16.gmra.mxu2 %v2247_v51  ;;  %v2349_v10 = vsel %vm2278_vm7, %v2344_v26, %v2348_v39  ;;  %v2249_v34 = vsel %vm2210_vm10, %v2246_v33, %v2248_v13  ;;  %v4955_v33 = vld [vmem:[%s8631_s1 + $0x1c0] sm:$0xff] }
 0x282   : > { %v3581_v49 = vadd.f32 %v3580_v60, %v3468_v57  ;;  %3995 = vmatpush.bf16.msra.mxu3 %v4955_v33 }
 0x284   : > { %v8232_v4 = vadd.f32 %v3693_v63, %v3581_v49  ;;  %v3477_v48 = vpop.f32.mrf.mxu2 }
 0x285   : > { %v3695_v37 = vpop.f32.mrf.mxu0 }
 0x286   : > { %v3364_v46 = vpop.f32.mrf.mxu1 }
 0x287   : > { %v3365_v3 = vadd.f32 %v3364_v46, %v9004_v25  ;;  %v2174_v46 = vrot.slane %v7953_v21, 1 }
 0x289   : > { %3403 = vmatmul.bf16.gmra.mxu1 %v2167_v19  ;;  %v3478_v17 = vadd.f32 %v3477_v48, %v3365_v3  ;;  %v3582_v57 = vpop.f32.mrf.mxu3  ;;  %v2351_v19 = vrot.slane %v7953_v21, 2  ;;  %v4963_v21 = vld [vmem:[%s8631_s1 + $0x200] sm:$0xff] }
 0x28a   : > { %v3583_v32 = vadd.f32 %v3582_v57, %v3470_v45  ;;  %4108 = vmatpush.bf16.msra.mxu0 %v4963_v21 }
 0x28c   : > { %v8239_v63 = vadd.f32 %v3695_v37, %v3583_v32  ;;  %v3479_v44 = vpop.f32.mrf.mxu2  ;;  %v4947_v37 = vld [vmem:[%s8631_s1 + $0x180] sm:$0xff] }
 0x28d   : > { %v3698_v23 = vpop.f32.mrf.mxu0  ;;  %3882 = vmatpush.bf16.msra.mxu2 %v4947_v37 }
 0x28e   : > { %v3366_v8 = vpop.f32.mrf.mxu1  ;;  %3624 = vmatmul.bf16.gmra.mxu3 %v2247_v51  ;;  %v2350_v51 = vrot.slane %v7956_v50, 1 }
 0x28f   : > { %v3367_v60 = vadd.f32 %v3366_v8, %v7950_v28  ;;  %v2170_v28 = vor.u32 %v9005_v55, %v2166_v14  ;;  %v2250_v8 = vrot.slane %v7616_v27, 1 }
 0x290   : > { %3737 = vmatmul.bf16.gmra.mxu0 %v2349_v10  ;;  %v2352_v57 = vor.u32 %v2351_v19, %v2350_v51 }
 0x291   : > { %v3480_v49 = vadd.f32 %v3479_v44, %v3367_v60  ;;  %v3585_v48 = vpop.f32.mrf.mxu3  ;;  %3521 = vmatmul.bf16.gmra.mxu2 %v2249_v34  ;;  %v2175_v36 = vsel %vm2019_vm2, %v2170_v28, %v2174_v46 }
 0x292   : > { %v3586_v45 = vadd.f32 %v3585_v48, %v3473_v9  ;;  %v4939_v9 = vld [vmem:[%s8631_s1 + $0x140] sm:$0xff] }
 0x293   : > { %3769 = vmatpush.bf16.msra.mxu1 %v4939_v9 }
 0x294   : > { %v8249_v25 = vadd.f32 %v3698_v23, %v3586_v45  ;;  %v3482_v26 = vpop.f32.mrf.mxu2 }
 0x295   : > { %v3700_v11 = vpop.f32.mrf.mxu0 }
 0x296   : > { %v3369_v3 = vpop.f32.mrf.mxu1 }
 0x297   : > { %v3370_v54 = vadd.f32 %v3369_v3, %v7982_v5  ;;  %v2353_v5 = vsel %vm2278_vm7, %v2348_v39, %v2352_v57  ;;  %v2178_v39 = vor.u32 %v7956_v50, %v2174_v46 }
 0x299   : > { %3408 = vmatmul.bf16.gmra.mxu1 %v2175_v36  ;;  %v3483_v14 = vadd.f32 %v3482_v26, %v3370_v54  ;;  %v3587_v55 = vpop.f32.mrf.mxu3  ;;  %v2182_v26 = vrot.slane %v8007_v35, 1 }
 0x29a   : > { %v3588_v32 = vadd.f32 %v3587_v55, %v3475_v58  ;;  %v2251_v58 = vsel %vm2210_vm10, %v2248_v13, %v2250_v8 }
 0x29b   : > { %v2183_v13 = vsel %vm2019_vm2, %v2178_v39, %v2182_v26 }
 0x29c   : > { %v8262_v44 = vadd.f32 %v3700_v11, %v3588_v32  ;;  %v3484_v10 = vpop.f32.mrf.mxu2 }
 0x29d   : > { %v3703_v23 = vpop.f32.mrf.mxu0 }
 0x29e   : > { %v3371_v60 = vpop.f32.mrf.mxu1  ;;  %3629 = vmatmul.bf16.gmra.mxu3 %v2249_v34  ;;  %v2355_v34 = vrot.slane %v8007_v35, 2 }
 0x29f   : > { %v3372_v48 = vadd.f32 %v3371_v60, %v8004_v38  ;;  %v2354_v38 = vrot.slane %v8010_v7, 1 }
 0x2a0   : > { %3742 = vmatmul.bf16.gmra.mxu0 %v2353_v5 }
 0x2a1   : > { %v3485_v45 = vadd.f32 %v3484_v10, %v3372_v48  ;;  %v3590_v37 = vpop.f32.mrf.mxu3  ;;  %3526 = vmatmul.bf16.gmra.mxu2 %v2251_v58  ;;  %v2356_v54 = vor.u32 %v2355_v34, %v2354_v38 }
 0x2a2   : > { %v3591_v11 = vadd.f32 %v3590_v37, %v3478_v17  ;;  %v9006_v37 = vshrl.u32 %v7997_v15, 16 }
 0x2a3   : > { %v2357_v50 = vsel %vm2278_vm7, %v2352_v57, %v2356_v54  ;;  %v9008_v57 = vld [vmem:[#allocation54_spill] sm:$0xff] }
 0x2a4   : > { %v8272_v28 = vadd.f32 %v3703_v23, %v3591_v11  ;;  %v3487_v33 = vpop.f32.mrf.mxu2  ;;  %v2361_v11 = vrot.slane %v9006_v37, 1 }
 0x2a5   : > { %v3705_v3 = vpop.f32.mrf.mxu0 }
 0x2a6   : > { %v3374_v9 = vpop.f32.mrf.mxu1 }
 0x2a7   : > { %v3375_v51 = vadd.f32 %v3374_v9, %v8029_v52 }
 0x2a9   : > { %3413 = vmatmul.bf16.gmra.mxu1 %v2183_v13  ;;  %v3488_v19 = vadd.f32 %v3487_v33, %v3375_v51  ;;  %v3592_v17 = vpop.f32.mrf.mxu3 }
 0x2aa   : > { %v3593_v36 = vadd.f32 %v3592_v17, %v3480_v49 }
 0x2ac   : > { %v8279_v32 = vadd.f32 %v3705_v3, %v3593_v36  ;;  %v3489_v23 = vpop.f32.mrf.mxu2  ;;  %v9007_v3 = vshll.u32 %v7997_v15, 16 }
 0x2ad   : > { %v3708_v55 = vpop.f32.mrf.mxu0 }
 0x2ae   : > { %v3376_v10 = vpop.f32.mrf.mxu1  ;;  %3634 = vmatmul.bf16.gmra.mxu3 %v2251_v58  ;;  %v2364_v33 = vrot.slane %v9007_v3, 2 }
 0x2af   : > { %v3377_v46 = vadd.f32 %v3376_v10, %v8055_v29  ;;  %v2186_v29 = vor.u32 %v8010_v7, %v2182_v26  ;;  %v9011_v26 = vld [vmem:[#allocation31_spill] sm:$0xff] }
 0x2b0   : > { %3747 = vmatmul.bf16.gmra.mxu0 %v2357_v50  ;;  %v2365_v38 = vor.u32 %v2364_v33, %v2361_v11 }
 0x2b1   : > { %v3490_v35 = vadd.f32 %v3489_v23, %v3377_v46  ;;  %v3595_v52 = vpop.f32.mrf.mxu3  ;;  %3531 = vmatmul.bf16.gmra.mxu2 %v2250_v8  ;;  %v9010_v46 = vld [vmem:[#allocation56_spill] sm:$0xff] }
 0x2b2   : > { %v3596_v60 = vadd.f32 %v3595_v52, %v3483_v14  ;;  %v2274_v14 = vrot.slane %v7997_v15, 1  ;;  %v2366_v50 = vsel %vm2278_vm7, %v2356_v54, %v2365_v38  ;;  %v2389_v52 = vrot.slane %v9011_v26, 2  ;;  %v9013_v54 = vld [vmem:[#allocation59_spill] sm:$0xff] }
 0x2b4   : > { %v8283_v5 = vadd.f32 %v3708_v55, %v3596_v60  ;;  %v3492_v48 = vpop.f32.mrf.mxu2  ;;  %v9009_v55 = vld [vmem:[#allocation41_spill] sm:$0xff]  ;;  %v2275_v10 = vsel %vm2210_vm10, %v2250_v8, %v2274_v14 }
 0x2b5   : > { %v3710_v21 = vpop.f32.mrf.mxu0  ;;  %v2391_v23 = vrot.slane %v9009_v55, 2  ;;  %v9012_v8 = vld [vmem:[#allocation21_spill] sm:$0xff] }
 0x2b6   : > { %v3379_v49 = vpop.f32.mrf.mxu1  ;;  %v2388_v33 = vrot.slane %v9012_v8, 2 }
 0x2b7   : > { %v3380_v9 = vadd.f32 %v3379_v49, %v9008_v57 }
 0x2b9   : > { %3418 = vmatmul.bf16.gmra.mxu1 %v2186_v29  ;;  %v3493_v58 = vadd.f32 %v3492_v48, %v3380_v9  ;;  %v3597_v39 = vpop.f32.mrf.mxu3  ;;  %v2390_v9 = vsel %vm2015_vm14, %v2388_v33, %v2389_v52  ;;  %v9016_v33 = vld [vmem:[#allocation69_spill] sm:$0xff] }
 0x2ba   : > { %v3598_v34 = vadd.f32 %v3597_v39, %v3485_v45  ;;  %v2392_v45 = vsel %vm2015_vm14, %v2389_v52, %v2391_v23 }
 0x2bc   : > { %v8292_v13 = vadd.f32 %v3710_v21, %v3598_v34  ;;  %v3494_v17 = vpop.f32.mrf.mxu2 }
 0x2bd   : > { %v3713_v51 = vpop.f32.mrf.mxu0 }
 0x2be   : > { %v3381_v36 = vpop.f32.mrf.mxu1  ;;  %3639 = vmatmul.bf16.gmra.mxu3 %v2275_v10 }
 0x2bf   : > { %v3382_v7 = vadd.f32 %v3381_v36, %v9010_v46  ;;  %v9015_v46 = vld [vmem:[#allocation63_spill] sm:$0xff] }
 0x2c0   : > { %3752 = vmatmul.bf16.gmra.mxu0 %v2366_v50  ;;  %v9014_v50 = vld [vmem:[#allocation52_spill] sm:$0xff] }
 0x2c1   : > { %v3495_v60 = vadd.f32 %v3494_v17, %v3382_v7  ;;  %v3600_v48 = vpop.f32.mrf.mxu3  ;;  %3883 = vmatmul.bf16.vlgmr.msra.gmra.mxu2 %v2392_v45 }
 0x2c2   : > { %v3601_v21 = vadd.f32 %v3600_v48, %v3488_v19 }
 0x2c4   : > { %v8300_v37 = vadd.f32 %v3713_v51, %v3601_v21  ;;  %v3497_v11 = vpop.f32.mrf.mxu2  ;;  %v2393_v51 = vrot.slane %v9014_v50, 2 }
 0x2c5   : > { %v3715_v49 = vpop.f32.mrf.mxu0 }
 0x2c6   : > { %v3384_v3 = vpop.f32.mrf.mxu1  ;;  %v2394_v21 = vsel %vm2015_vm14, %v2391_v23, %v2393_v51 }
 0x2c7   : > { %v3385_v57 = vadd.f32 %v3384_v3, %v9013_v54 }
 0x2c9   : > { %3770 = vmatmul.bf16.vlgmr.msra.gmra.mxu1 %v2390_v9  ;;  %v3498_v29 = vadd.f32 %v3497_v11, %v3385_v57  ;;  %v3602_v39 = vpop.f32.mrf.mxu3 }
 0x2ca   : > { %v3603_v34 = vadd.f32 %v3602_v39, %v3490_v35  ;;  %v2560_v39 = vrot.slane %v9009_v55, 3 }
 0x2cc   : > { %v8305_v36 = vadd.f32 %v3715_v49, %v3603_v34  ;;  %v3499_v10 = vpop.f32.mrf.mxu2  ;;  %v2559_v34 = vrot.slane %v9011_v26, 3 }
 0x2cd   : > { %v3718_v17 = vpop.f32.mrf.mxu0 }
 0x2ce   : > { %v3386_v19 = vpop.f32.mrf.mxu1  ;;  %3644 = vmatmul.bf16.gmra.mxu3 %v2274_v14 }
 0x2cf   : > { %v3387_v7 = vadd.f32 %v3386_v19, %v9015_v46  ;;  %v2561_v46 = vsel %vm2558_vm1, %v2559_v34, %v2560_v39 }
 0x2d0   : > { %3757 = vmatmul.bf16.gmra.mxu0 %v2365_v38 }
 0x2d1   : > { %v3500_v48 = vadd.f32 %v3499_v10, %v3387_v7  ;;  %v3605_v3 = vpop.f32.mrf.mxu3  ;;  %3888 = vmatmul.bf16.gmra.mxu2 %v2394_v21  ;;  %v9018_v7 = vld [vmem:[#allocation74_spill] sm:$0xff] }
 0x2d2   : > { %v3606_v52 = vadd.f32 %v3605_v3, %v3493_v58 }
 0x2d4   : > { %v8310_v8 = vadd.f32 %v3718_v17, %v3606_v52  ;;  %v3502_v35 = vpop.f32.mrf.mxu2  ;;  %v9017_v17 = vld [vmem:[#allocation53_spill] sm:$0xff] }
 0x2d5   : > { %v3720_v11 = vpop.f32.mrf.mxu0  ;;  %v2395_v19 = vrot.slane %v9017_v17, 2 }
 0x2d6   : > { %v3389_v49 = vpop.f32.mrf.mxu1 }
 0x2d7   : > { %v3390_v54 = vadd.f32 %v3389_v49, %v9016_v33  ;;  %v2396_v55 = vsel %vm2015_vm14, %v2393_v51, %v2395_v19 }
 0x2d9   : > { %3775 = vmatmul.bf16.gmra.mxu1 %v2392_v45  ;;  %v3503_v57 = vadd.f32 %v3502_v35, %v3390_v54  ;;  %v3607_v9 = vpop.f32.mrf.mxu3  ;;  %v9019_v45 = vld [vmem:[#allocation62_spill] sm:$0xff]  ;;  %v9021_v54 = vld [vmem:[#allocation81_spill] sm:$0xff] }
 0x2da   : > { %v3608_v14 = vadd.f32 %v3607_v9, %v3495_v60 }
 0x2dc   : > { %v8315_v23 = vadd.f32 %v3720_v11, %v3608_v14  ;;  %v3504_v58 = vpop.f32.mrf.mxu2 }
 0x2dd   : > { %v3723_v38 = vpop.f32.mrf.mxu0 }
 0x2de   : > { %v3391_v10 = vpop.f32.mrf.mxu1  ;;  %3996 = vmatmul.bf16.vlgmr.msra.gmra.mxu3 %v9019_v45  ;;  %v9023_v45 = vld [vmem:[#allocation86_spill] sm:$0xff] }
 0x2df   : > { %v3392_v3 = vadd.f32 %v3391_v10, %v9018_v7  ;;  %v2562_v10 = vrot.slane %v9014_v50, 3 }
 0x2e0   : > { %4109 = vmatmul.bf16.vlgmr.msra.gmra.mxu0 %v2561_v46 }
 0x2e1   : > { %v3505_v52 = vadd.f32 %v3504_v58, %v3392_v3  ;;  %v3610_v60 = vpop.f32.mrf.mxu3  ;;  %3893 = vmatmul.bf16.gmra.mxu2 %v2396_v55 }
 0x2e2   : > { %v3611_v26 = vadd.f32 %v3610_v60, %v3498_v29  ;;  %v2563_v29 = vsel %vm2558_vm1, %v2560_v39, %v2562_v10  ;;  %v9024_v60 = vld [vmem:[#allocation75_spill] sm:$0xff] }
 0x2e4   : > { %v8322_v35 = vadd.f32 %v3723_v38, %v3611_v26  ;;  %v3507_v49 = vpop.f32.mrf.mxu2  ;;  %v9025_v26 = vld [vmem:[#allocation14_spill] sm:$0xff] }
 0x2e5   : > { %v3725_v11 = vpop.f32.mrf.mxu0 }
 0x2e6   : > { %9020 = vst [vmem:[#allocation66_spill] sm:$0xff] %v8322_v35  ;;  %v3394_v33 = vpop.f32.mrf.mxu1  ;;  %v9029_v35 = vld [vmem:[#allocation19_spill] sm:$0xff] }
 0x2e7   : > { %v3395_v9 = vadd.f32 %v3394_v33, %v9021_v54  ;;  %v2397_v33 = vrot.slane %v9025_v26, 2 }
 0x2e9   : > { %3780 = vmatmul.bf16.gmra.mxu1 %v2394_v21  ;;  %v3508_v14 = vadd.f32 %v3507_v49, %v3395_v9  ;;  %v3612_v34 = vpop.f32.mrf.mxu3  ;;  %v2398_v49 = vsel %vm2015_vm14, %v2395_v19, %v2397_v33 }
 0x2ea   : > { %v3613_v7 = vadd.f32 %v3612_v34, %v3500_v48 }
 0x2ec   : > { %v8326_v58 = vadd.f32 %v3725_v11, %v3613_v7  ;;  %v3509_v51 = vpop.f32.mrf.mxu2  ;;  %v9027_v7 = vld [vmem:[#allocation91_spill] sm:$0xff] }
 0x2ed   : > { %v3728_v46 = vpop.f32.mrf.mxu0 }
 0x2ee   : > { %9022 = vst [vmem:[#allocation67_spill] sm:$0xff] %v8326_v58  ;;  %v3396_v3 = vpop.f32.mrf.mxu1  ;;  %4001 = vmatmul.bf16.gmra.mxu3 %v9024_v60 }
 0x2ef   : > { %v3397_v38 = vadd.f32 %v3396_v3, %v9023_v45 }
 0x2f0   : > { %4114 = vmatmul.bf16.gmra.mxu0 %v2563_v29  ;;  %v2564_v29 = vrot.slane %v9017_v17, 3 }
 0x2f1   : > { %v3510_v21 = vadd.f32 %v3509_v51, %v3397_v38  ;;  %v3615_v54 = vpop.f32.mrf.mxu3  ;;  %3898 = vmatmul.bf16.gmra.mxu2 %v2398_v49 }
 0x2f2   : > { %v3616_v50 = vadd.f32 %v3615_v54, %v3503_v57  ;;  %v2399_v57 = vrot.slane %v9029_v35, 2  ;;  %v9030_v54 = vld [vmem:[#allocation94_spill] sm:$0xff] }
 0x2f4   : > { %v8333_v11 = vadd.f32 %v3728_v46, %v3616_v50  ;;  %v3512_v9 = vpop.f32.mrf.mxu2  ;;  %v2565_v46 = vsel %vm2558_vm1, %v2562_v10, %v2564_v29 }
 0x2f5   : > { %v3730_v48 = vpop.f32.mrf.mxu0 }
 0x2f6   : > { %9026 = vst [vmem:[#allocation55_spill] sm:$0xff] %v8333_v11  ;;  %v3399_v34 = vpop.f32.mrf.mxu1  ;;  %v9031_v11 = vld [vmem:[#allocation79_spill] sm:$0xff] }
 0x2f7   : > { %v3400_v39 = vadd.f32 %v3399_v34, %v9027_v7 }
 0x2f9   : > { %3785 = vmatmul.bf16.gmra.mxu1 %v2396_v55  ;;  %v3513_v3 = vadd.f32 %v3512_v9, %v3400_v39  ;;  %v3617_v45 = vpop.f32.mrf.mxu3  ;;  %v2400_v9 = vsel %vm2015_vm14, %v2397_v33, %v2399_v57 }
 0x2fa   : > { %v3618_v60 = vadd.f32 %v3617_v45, %v3505_v52  ;;  %v9033_v45 = vld [vmem:[#allocation96_spill] sm:$0xff] }
 0x2fc   : > { %v8337_v51 = vadd.f32 %v3730_v48, %v3618_v60  ;;  %v3514_v19 = vpop.f32.mrf.mxu2 }
 0x2fd   : > { %v3733_v58 = vpop.f32.mrf.mxu0 }
 0x2fe   : > { %9028 = vst [vmem:[#allocation57_spill] sm:$0xff] %v8337_v51  ;;  %v3401_v38 = vpop.f32.mrf.mxu1  ;;  %4006 = vmatmul.bf16.gmra.mxu3 %v9031_v11  ;;  %v2566_v11 = vrot.slane %v9025_v26, 3 }
 0x2ff   : > { %v3402_v50 = vadd.f32 %v3401_v38, %v9030_v54 }
 0x300   : > { %4119 = vmatmul.bf16.gmra.mxu0 %v2565_v46 }
 0x301   : > { %v3515_v55 = vadd.f32 %v3514_v19, %v3402_v50  ;;  %v3620_v34 = vpop.f32.mrf.mxu3  ;;  %3903 = vmatmul.bf16.gmra.mxu2 %v2400_v9  ;;  %v9035_v50 = vld [vmem:[#allocation28_spill] sm:$0xff] }
 0x302   : > { %v3621_v17 = vadd.f32 %v3620_v34, %v3508_v14  ;;  %v2401_v14 = vrot.slane %v9035_v50, 2  ;;  %v9036_v34 = vld [vmem:[#allocation100_spill] sm:$0xff] }
 0x304   : > { %v8344_v48 = vadd.f32 %v3733_v58, %v3621_v17  ;;  %v3517_v7 = vpop.f32.mrf.mxu2  ;;  %v2567_v58 = vsel %vm2558_vm1, %v2564_v29, %v2566_v11 }
 0x305   : > { %v3735_v52 = vpop.f32.mrf.mxu0 }
 0x306   : > { %9032 = vst [vmem:[#allocation61_spill] sm:$0xff] %v8344_v48  ;;  %v3404_v39 = vpop.f32.mrf.mxu1  ;;  %v9037_v48 = vld [vmem:[#allocation83_spill] sm:$0xff] }
 0x307   : > { %v3405_v60 = vadd.f32 %v3404_v39, %v9033_v45 }
 0x309   : > { %3790 = vmatmul.bf16.gmra.mxu1 %v2398_v49  ;;  %v3518_v10 = vadd.f32 %v3517_v7, %v3405_v60  ;;  %v3622_v51 = vpop.f32.mrf.mxu3  ;;  %v2402_v7 = vsel %vm2015_vm14, %v2399_v57, %v2401_v14  ;;  %v9039_v60 = vld [vmem:[#allocation93_spill] sm:$0xff] }
 0x30a   : > { %v3623_v38 = vadd.f32 %v3622_v51, %v3510_v21 }
 0x30c   : > { %v8348_v19 = vadd.f32 %v3735_v52, %v3623_v38  ;;  %v3519_v33 = vpop.f32.mrf.mxu2 }
 0x30d   : > { %v3738_v54 = vpop.f32.mrf.mxu0 }
 0x30e   : > { %9034 = vst [vmem:[#allocation49_spill] sm:$0xff] %v8348_v19  ;;  %v3406_v46 = vpop.f32.mrf.mxu1  ;;  %4011 = vmatmul.bf16.gmra.mxu3 %v9037_v48 }
 0x30f   : > { %v3407_v17 = vadd.f32 %v3406_v46, %v9036_v34  ;;  %v2568_v46 = vrot.slane %v9029_v35, 3 }
 0x310   : > { %4124 = vmatmul.bf16.gmra.mxu0 %v2567_v58 }
 0x311   : > { %v3520_v49 = vadd.f32 %v3519_v33, %v3407_v17  ;;  %v3625_v21 = vpop.f32.mrf.mxu3  ;;  %3908 = vmatmul.bf16.gmra.mxu2 %v2402_v7  ;;  %v9041_v17 = vld [vmem:[#allocation44_spill] sm:$0xff] }
 0x312   : > { %v3626_v51 = vadd.f32 %v3625_v21, %v3513_v3  ;;  %v2403_v3 = vrot.slane %v9041_v17, 2  ;;  %v9042_v21 = vld [vmem:[#allocation98_spill] sm:$0xff] }
 0x314   : > { %v8355_v52 = vadd.f32 %v3738_v54, %v3626_v51  ;;  %v3522_v39 = vpop.f32.mrf.mxu2  ;;  %v2569_v54 = vsel %vm2558_vm1, %v2566_v11, %v2568_v46 }
 0x315   : > { %v3740_v26 = vpop.f32.mrf.mxu0 }
 0x316   : > { %9038 = vst [vmem:[#allocation64_spill] sm:$0xff] %v8355_v52  ;;  %v3409_v45 = vpop.f32.mrf.mxu1  ;;  %v9043_v52 = vld [vmem:[#allocation58_spill] sm:$0xff] }
 0x317   : > { %v3410_v38 = vadd.f32 %v3409_v45, %v9039_v60 }
 0x319   : > { %3795 = vmatmul.bf16.gmra.mxu1 %v2400_v9  ;;  %v3523_v29 = vadd.f32 %v3522_v39, %v3410_v38  ;;  %v3627_v19 = vpop.f32.mrf.mxu3  ;;  %v2404_v39 = vsel %vm2015_vm14, %v2401_v14, %v2403_v3  ;;  %v9045_v38 = vld [vmem:[#allocation101_spill] sm:$0xff] }
 0x31a   : > { %v3628_v48 = vadd.f32 %v3627_v19, %v3515_v55 }
 0x31c   : > { %v8359_v33 = vadd.f32 %v3740_v26, %v3628_v48  ;;  %v3524_v57 = vpop.f32.mrf.mxu2 }
 0x31d   : > { %v3743_v58 = vpop.f32.mrf.mxu0 }
 0x31e   : > { %9040 = vst [vmem:[#allocation85_spill] sm:$0xff] %v8359_v33  ;;  %v3411_v34 = vpop.f32.mrf.mxu1  ;;  %4016 = vmatmul.bf16.gmra.mxu3 %v9043_v52 }
 0x31f   : > { %v3412_v51 = vadd.f32 %v3411_v34, %v9042_v21  ;;  %v2570_v34 = vrot.slane %v9035_v50, 3 }
 0x320   : > { %4129 = vmatmul.bf16.gmra.mxu0 %v2569_v54 }
 0x321   : > { %v3525_v9 = vadd.f32 %v3524_v57, %v3412_v51  ;;  %v3630_v45 = vpop.f32.mrf.mxu3  ;;  %3913 = vmatmul.bf16.gmra.mxu2 %v2404_v39  ;;  %v9047_v51 = vld [vmem:[#allocation47_spill] sm:$0xff] }
 0x322   : > { %v3631_v35 = vadd.f32 %v3630_v45, %v3518_v10  ;;  %v2405_v10 = vrot.slane %v9047_v51, 2  ;;  %v9048_v45 = vld [vmem:[#allocation102_spill] sm:$0xff] }
 0x324   : > { %v8366_v19 = vadd.f32 %v3743_v58, %v3631_v35  ;;  %v3527_v26 = vpop.f32.mrf.mxu2  ;;  %v2571_v58 = vsel %vm2558_vm1, %v2568_v46, %v2570_v34 }
 0x325   : > { %v3745_v55 = vpop.f32.mrf.mxu0 }
 0x326   : > { %9044 = vst [vmem:[#allocation71_spill] sm:$0xff] %v8366_v19  ;;  %v3414_v60 = vpop.f32.mrf.mxu1  ;;  %v9049_v19 = vld [vmem:[#allocation60_spill] sm:$0xff] }
 0x327   : > { %v3415_v48 = vadd.f32 %v3414_v60, %v9045_v38 }
 0x329   : > { %3800 = vmatmul.bf16.gmra.mxu1 %v2402_v7  ;;  %v3528_v11 = vadd.f32 %v3527_v26, %v3415_v48  ;;  %v3632_v33 = vpop.f32.mrf.mxu3  ;;  %v2406_v26 = vsel %vm2015_vm14, %v2403_v3, %v2405_v10  ;;  %v9051_v48 = vld [vmem:[#allocation103_spill] sm:$0xff] }
 0x32a   : > { %v3633_v52 = vadd.f32 %v3632_v33, %v3520_v49 }
 0x32c   : > { %v8370_v57 = vadd.f32 %v3745_v55, %v3633_v52  ;;  %v3529_v14 = vpop.f32.mrf.mxu2 }
 0x32d   : > { %v3748_v54 = vpop.f32.mrf.mxu0 }
 0x32e   : > { %9046 = vst [vmem:[#allocation77_spill] sm:$0xff] %v8370_v57  ;;  %v3416_v21 = vpop.f32.mrf.mxu1  ;;  %4021 = vmatmul.bf16.gmra.mxu3 %v9049_v19 }
 0x32f   : > { %v3417_v35 = vadd.f32 %v3416_v21, %v9048_v45  ;;  %v2572_v21 = vrot.slane %v9041_v17, 3 }
 0x330   : > { %4134 = vmatmul.bf16.gmra.mxu0 %v2571_v58 }
 0x331   : > { %v3530_v7 = vadd.f32 %v3529_v14, %v3417_v35  ;;  %v3635_v60 = vpop.f32.mrf.mxu3  ;;  %3918 = vmatmul.bf16.gmra.mxu2 %v2406_v26  ;;  %v9053_v35 = vld [vmem:[#allocation68_spill] sm:$0xff] }
 0x332   : > { %v3636_v50 = vadd.f32 %v3635_v60, %v3523_v29  ;;  %v2407_v29 = vrot.slane %v7569_v24, 2 }
 0x334   : > { %v8377_v33 = vadd.f32 %v3748_v54, %v3636_v50  ;;  %v3532_v55 = vpop.f32.mrf.mxu2  ;;  %v2573_v54 = vsel %vm2558_vm1, %v2570_v34, %v2572_v21  ;;  %v2408_v60 = vsel %vm2015_vm14, %v2405_v10, %v2407_v29 }
 0x335   : > { %v3750_v49 = vpop.f32.mrf.mxu0 }
 0x336   : > { %9050 = vst [vmem:[#allocation39_spill] sm:$0xff] %v8377_v33  ;;  %v3419_v38 = vpop.f32.mrf.mxu1 }
 0x337   : > { %v3420_v52 = vadd.f32 %v3419_v38, %v9051_v48  ;;  %v2574_v38 = vrot.slane %v9047_v51, 3 }
 0x339   : > { %3805 = vmatmul.bf16.gmra.mxu1 %v2404_v39  ;;  %v3533_v46 = vadd.f32 %v3532_v55, %v3420_v52  ;;  %v3637_v57 = vpop.f32.mrf.mxu3  ;;  %v2575_v10 = vsel %vm2558_vm1, %v2572_v21, %v2574_v38 }
 0x33a   : > { %v3638_v19 = vadd.f32 %v3637_v57, %v3525_v9 }
 0x33c   : > { %v8381_v14 = vadd.f32 %v3750_v49, %v3638_v19  ;;  %v3534_v3 = vpop.f32.mrf.mxu2 }
 0x33d   : > { %v3753_v58 = vpop.f32.mrf.mxu0 }
 0x33e   : > { %9052 = vst [vmem:[#allocation78_spill] sm:$0xff] %v8381_v14  ;;  %v3421_v45 = vpop.f32.mrf.mxu1  ;;  %4026 = vmatmul.bf16.gmra.mxu3 %v9053_v35 }
 0x33f   : > { %v9056_v45 = vld [vmem:[#allocation80_spill] sm:$0xff] }
 0x340   : > { %4139 = vmatmul.bf16.gmra.mxu0 %v2573_v54 }
 0x341   : > { %v3640_v39 = vpop.f32.mrf.mxu3  ;;  %3923 = vmatmul.bf16.gmra.mxu2 %v2408_v60 }
 0x342   : > { %v3641_v50 = vadd.f32 %v3640_v39, %v3528_v11  ;;  %v2409_v11 = vrot.slane %v6306_v2, 2 }
 0x344   : > { %v8387_v17 = vadd.f32 %v3753_v58, %v3641_v50  ;;  %v3884_v9 = vpop.f32.mrf.mxu2  ;;  %v2410_v58 = vsel %vm2015_vm14, %v2407_v29, %v2409_v11  ;;  %v9058_v29 = vld [vmem:[#allocation104_spill] sm:$0xff] }
 0x345   : > { %v3755_v55 = vpop.f32.mrf.mxu0 }
 0x346   : > { %9054 = vst [vmem:[#allocation84_spill] sm:$0xff] %v8387_v17  ;;  %v3771_v57 = vpop.f32.mrf.mxu1  ;;  %v9059_v17 = vld [vmem:[#allocation82_spill] sm:$0xff] }
 0x349   : > { %3810 = vmatmul.bf16.gmra.mxu1 %v2406_v26  ;;  %v3642_v49 = vpop.f32.mrf.mxu3 }
 0x34a   : > { %v3643_v48 = vadd.f32 %v3642_v49, %v3530_v7 }
 0x34c   : > { %v8390_v34 = vadd.f32 %v3755_v55, %v3643_v48  ;;  %v3886_v19 = vpop.f32.mrf.mxu2  ;;  %v2576_v55 = vrot.slane %v7569_v24, 3 }
 0x34d   : > { %v3758_v52 = vpop.f32.mrf.mxu0 }
 0x34e   : > { %9055 = vst [vmem:[#allocation76_spill] sm:$0xff] %v8390_v34  ;;  %v3773_v3 = vpop.f32.mrf.mxu1  ;;  %4031 = vmatmul.bf16.gmra.mxu3 %v9056_v45  ;;  %v2577_v45 = vsel %vm2558_vm1, %v2574_v38, %v2576_v55  ;;  %v3772_v34 = vadd.f32 %v3771_v57, %v9058_v29 }
 0x34f   : > { %v3774_v24 = vadd.f32 %v3773_v3, %v8114_v42  ;;  %v2413_v42 = vrot.slane %v6875_v62, 2 }
 0x350   : > { %4144 = vmatmul.bf16.gmra.mxu0 %v2575_v10  ;;  %v2411_v10 = vrot.slane %v6554_v47, 2 }
 0x351   : > { %v3645_v54 = vpop.f32.mrf.mxu3  ;;  %3928 = vmatmul.bf16.gmra.mxu2 %v2410_v58  ;;  %v3887_v38 = vadd.f32 %v3886_v19, %v3774_v24  ;;  %v9062_v19 = vld [vmem:[#allocation90_spill] sm:$0xff] }
 0x352   : > { %v3646_v26 = vadd.f32 %v3645_v54, %v3533_v46  ;;  %v2412_v46 = vsel %vm2015_vm14, %v2409_v11, %v2411_v10 }
 0x354   : > { %v8396_v51 = vadd.f32 %v3758_v52, %v3646_v26  ;;  %v3889_v7 = vpop.f32.mrf.mxu2 }
 0x355   : > { %v3760_v35 = vpop.f32.mrf.mxu0 }
 0x356   : > { %9057 = vst [vmem:[#allocation54_spill] sm:$0xff] %v8396_v51  ;;  %v3776_v39 = vpop.f32.mrf.mxu1 }
 0x359   : > { %3815 = vmatmul.bf16.gmra.mxu1 %v2408_v60  ;;  %v3647_v50 = vpop.f32.mrf.mxu3  ;;  %v3885_v60 = vadd.f32 %v3884_v9, %v3772_v34  ;;  %v3777_v9 = vadd.f32 %v3776_v39, %v8124_v30 }
 0x35c   : > { %v3891_v49 = vpop.f32.mrf.mxu2 }
 0x35d   : > { %v4110_v21 = vpop.f32.mrf.mxu0 }
 0x35e   : > { %v3778_v48 = vpop.f32.mrf.mxu1  ;;  %4036 = vmatmul.bf16.gmra.mxu3 %v9059_v17  ;;  %v2578_v17 = vrot.slane %v6306_v2, 3 }
 0x360   : > { %4149 = vmatmul.bf16.gmra.mxu0 %v2577_v45  ;;  %v2579_v3 = vsel %vm2558_vm1, %v2576_v55, %v2578_v17  ;;  %v2414_v55 = vsel %vm2015_vm14, %v2411_v10, %v2413_v42 }
 0x361   : > { %v3997_v52 = vpop.f32.mrf.mxu3  ;;  %3933 = vmatmul.bf16.gmra.mxu2 %v2412_v46 }
 0x362   : > { %v3998_v26 = vadd.f32 %v3997_v52, %v3885_v60 }
 0x364   : > { %v3894_v35 = vpop.f32.mrf.mxu2  ;;  %v4111_v51 = vadd.f32 %v4110_v21, %v3998_v26  ;;  %v3890_v21 = vadd.f32 %v3889_v7, %v3777_v9 }
 0x365   : > { %v4112_v54 = vpop.f32.mrf.mxu0 }
 0x366   : > { %v3781_v50 = vpop.f32.mrf.mxu1  ;;  %v4214_v11 = vsel %vm1576_vm5, %v4111_v51, 0.0 }
 0x367   : > { %v4383_v30 = vmul.f32 %v4214_v11, %v4214_v11 }
 0x369   : > { %3820 = vmatmul.bf16.gmra.mxu1 %v2410_v58  ;;  %v3999_v14 = vpop.f32.mrf.mxu3 }
 0x36a   : > { %v4000_v57 = vadd.f32 %v3999_v14, %v3887_v38 }
 0x36c   : > { %v4113_v34 = vadd.f32 %v4112_v54, %v4000_v57  ;;  %v3896_v52 = vpop.f32.mrf.mxu2  ;;  %v3779_v57 = vadd.f32 %v3778_v48, %v8131_v41 }
 0x36d   : > { %v4115_v29 = vpop.f32.mrf.mxu0 }
 0x36e   : > { %v3783_v60 = vpop.f32.mrf.mxu1  ;;  %v4215_v2 = vsel %vm1577_vm6, %v4113_v34, 0.0  ;;  %4041 = vmatmul.bf16.gmra.mxu3 %v9062_v19  ;;  %v3892_v7 = vadd.f32 %v3891_v49, %v3779_v57  ;;  %v9065_v49 = vld [vmem:[#allocation65_spill] sm:$0xff] }
 0x36f   : > { %v5054_v58 = vpack.c.bf16 %v4215_v2, %v4214_v11  ;;  %v4337_v51 = vadd.f32 %v4215_v2, %v4214_v11  ;;  %v4384_v39 = vmul.f32 %v4215_v2, %v4215_v2  ;;  %v2580_v2 = vrot.slane %v6554_v47, 3 }
 0x370   : > { %4154 = vmatmul.bf16.gmra.mxu0 %v2579_v3 }
 0x371   : > { %5055 = vst [vmem:[%s8416_s10] sm:$0xff] %v5054_v58   ;;  %v4424_v54 = vadd.f32 %v4384_v39, %v4383_v30  ;;  %v4002_v26 = vpop.f32.mrf.mxu3  ;;  %3938 = vmatmul.bf16.gmra.mxu2 %v2414_v55  ;;  %v3782_v39 = vadd.f32 %v3781_v50, %v8138_v20 }
 0x372   : > { %v4003_v24 = vadd.f32 %v4002_v26, %v3890_v21  ;;  %v2415_v21 = vrot.slane %v7146_v0, 2  ;;  %v2581_v26 = vsel %vm2558_vm1, %v2578_v17, %v2580_v2  ;;  %v3784_v17 = vadd.f32 %v3783_v60, %v8145_v22 }
 0x373   : > { %v3895_v57 = vadd.f32 %v3894_v35, %v3782_v39 }
 0x374   : > { %v4116_v45 = vadd.f32 %v4115_v29, %v4003_v24  ;;  %v3899_v34 = vpop.f32.mrf.mxu2  ;;  %v3897_v35 = vadd.f32 %v3896_v52, %v3784_v17  ;;  %v9070_v52 = vld [vmem:[#allocation70_spill] sm:$0xff] }
 0x375   : > { %v4117_v38 = vpop.f32.mrf.mxu0 }
 0x376   : > { %v3786_v14 = vpop.f32.mrf.mxu1  ;;  %v4216_v3 = vsel %vm1578_vm4, %v4116_v45, 0.0  ;;  %v2416_v45 = vsel %vm2015_vm14, %v2413_v42, %v2415_v21 }
 0x377   : > { %v4338_v33 = vadd.f32 %v4337_v51, %v4216_v3  ;;  %v4385_v11 = vmul.f32 %v4216_v3, %v4216_v3 }
 0x379   : > { %3825 = vmatmul.bf16.gmra.mxu1 %v2412_v46  ;;  %v4425_v9 = vadd.f32 %v4424_v54, %v4385_v11  ;;  %v4004_v10 = vpop.f32.mrf.mxu3 }
 0x37a   : > { %v4005_v30 = vadd.f32 %v4004_v10, %v3892_v7 }
 0x37c   : > { %v4118_v41 = vadd.f32 %v4117_v38, %v4005_v30  ;;  %v3901_v48 = vpop.f32.mrf.mxu2  ;;  %v9066_v30 = vld [vmem:[#allocation37_spill] sm:$0xff] }
 0x37d   : > { %v4120_v58 = vpop.f32.mrf.mxu0  ;;  %vm9067_vm6 = vcmp.eq.s32.totalorder %v9066_v30, 1 }
 0x37e   : > { %v3788_v29 = vpop.f32.mrf.mxu1  ;;  %v4217_v46 = vsel %vm1579_vm8, %v4118_v41, 0.0  ;;  %4046 = vmatmul.bf16.gmra.mxu3 %v9065_v49  ;;  %v2417_v49 = vrot.slane %v7449_v61, 2 }
 0x37f   : > { %v5059_v54 = vpack.c.bf16 %v4217_v46, %v4216_v3  ;;  %v4339_v47 = vadd.f32 %v4338_v33, %v4217_v46  ;;  %v4386_v24 = vmul.f32 %v4217_v46, %v4217_v46  ;;  %v3787_v46 = vadd.f32 %v3786_v14, %v8161_v59 }
 0x380   : > { %4159 = vmatmul.bf16.gmra.mxu0 %v2581_v26 }
 0x381   : > { %5170 = vst [vmem:[%s8416_s10 + $0x8] sm:$0xff] %v5059_v54   ;;  %v4426_v20 = vadd.f32 %v4425_v9, %v4386_v24  ;;  %v4007_v50 = vpop.f32.mrf.mxu3  ;;  %3943 = vmatmul.bf16.gmra.mxu2 %v2416_v45  ;;  %v2582_v9 = vrot.slane %v6875_v62, 3 }
 0x382   : > { %v4008_v38 = vadd.f32 %v4007_v50, %v3895_v57  ;;  %v2418_v50 = vsel %vm2015_vm14, %v2415_v21, %v2417_v49 }
 0x383   : > { %v2583_v54 = vsel %vm2558_vm1, %v2580_v2, %v2582_v9  ;;  %v3789_v2 = vadd.f32 %v3788_v29, %v8171_v56 }
 0x384   : > { %v4121_v11 = vadd.f32 %v4120_v58, %v4008_v38  ;;  %v3904_v7 = vpop.f32.mrf.mxu2 }
 0x385   : > { %v4122_v19 = vpop.f32.mrf.mxu0 }
 0x386   : > { %v3791_v10 = vpop.f32.mrf.mxu1  ;;  %v4218_v41 = vsel %vm9067_vm6, %v4121_v11, 0.0 }
 0x387   : > { %v4340_v3 = vadd.f32 %v4339_v47, %v4218_v41  ;;  %v4387_v33 = vmul.f32 %v4218_v41, %v4218_v41  ;;  %v9068_v47 = vld [vmem:[#allocation29_spill] sm:$0xff] }
 0x388   : > { %vm9069_vm5 = vcmp.eq.s32.totalorder %v9068_v47, 1 }
 0x389   : > { %3830 = vmatmul.bf16.gmra.mxu1 %v2414_v55  ;;  %v4427_v39 = vadd.f32 %v4426_v20, %v4387_v33  ;;  %v4009_v42 = vpop.f32.mrf.mxu3  ;;  %v3900_v20 = vadd.f32 %v3899_v34, %v3787_v46  ;;  %v3902_v34 = vadd.f32 %v3901_v48, %v3789_v2  ;;  %v9073_v48 = vld [vmem:[#allocation73_spill] sm:$0xff]  ;;  %v9074_v2 = vld [vmem:[#allocation2_spill] sm:$0xff] }
 0x38a   : > { %v4010_v26 = vadd.f32 %v4009_v42, %v3897_v35  ;;  %vm9075_vm8 = vcmp.eq.s32.totalorder %v9074_v2, 1  ;;  %v2588_v2 = vrot.slane %v8997_v40, 3 }
 0x38c   : > { %v4123_v22 = vadd.f32 %v4122_v19, %v4010_v26  ;;  %v3906_v60 = vpop.f32.mrf.mxu2 }
 0x38d   : > { %v4125_v51 = vpop.f32.mrf.mxu0 }
 0x38e   : > { %v3793_v58 = vpop.f32.mrf.mxu1  ;;  %v4219_v55 = vsel %vm9069_vm5, %v4123_v22, 0.0  ;;  %4051 = vmatmul.bf16.gmra.mxu3 %v9070_v52  ;;  %v3792_v22 = vadd.f32 %v3791_v10, %v8178_v18 }
 0x38f   : > { %v5064_v24 = vpack.c.bf16 %v4219_v55, %v4218_v41  ;;  %v4341_v62 = vadd.f32 %v4340_v3, %v4219_v55  ;;  %v4388_v57 = vmul.f32 %v4219_v55, %v4219_v55 }
 0x390   : > { %4164 = vmatmul.bf16.gmra.mxu0 %v2583_v54  ;;  %v2419_v54 = vrot.slane %v8997_v40, 2 }
 0x391   : > { %5171 = vst [vmem:[%s8416_s10 + $0x10] sm:$0xff] %v5064_v24   ;;  %v4428_v59 = vadd.f32 %v4427_v39, %v4388_v57  ;;  %v4012_v14 = vpop.f32.mrf.mxu3  ;;  %3948 = vmatmul.bf16.gmra.mxu2 %v2418_v50  ;;  %v2584_v39 = vrot.slane %v7146_v0, 3 }
 0x392   : > { %v4013_v38 = vadd.f32 %v4012_v14, %v3900_v20  ;;  %v2420_v57 = vsel %vm2015_vm14, %v2417_v49, %v2419_v54 }
 0x393   : > { %v2585_v47 = vsel %vm2558_vm1, %v2582_v9, %v2584_v39  ;;  %v3794_v9 = vadd.f32 %v3793_v58, %v8185_v1 }
 0x394   : > { %v4126_v17 = vadd.f32 %v4125_v51, %v4013_v38  ;;  %v3909_v11 = vpop.f32.mrf.mxu2 }
 0x395   : > { %v4127_v19 = vpop.f32.mrf.mxu0 }
 0x396   : > { %v3796_v30 = vpop.f32.mrf.mxu1  ;;  %v4220_v35 = vsel %vm1582_vm12, %v4126_v17, 0.0 }
 0x397   : > { %v4342_v41 = vadd.f32 %v4341_v62, %v4220_v35  ;;  %v4389_v3 = vmul.f32 %v4220_v35, %v4220_v35  ;;  %v3905_v62 = vadd.f32 %v3904_v7, %v3792_v22  ;;  %v3907_v7 = vadd.f32 %v3906_v60, %v3794_v9  ;;  %v9076_v22 = vld [vmem:[#allocation3_spill] sm:$0xff] }
 0x398   : > { %vm9077_vm4 = vcmp.eq.s32.totalorder %v9076_v22, 1  ;;  %v2421_v60 = vrot.slane %v9002_v16, 2 }
 0x399   : > { %3835 = vmatmul.bf16.gmra.mxu1 %v2416_v45  ;;  %v4429_v42 = vadd.f32 %v4428_v59, %v4389_v3  ;;  %v4014_v21 = vpop.f32.mrf.mxu3  ;;  %v2586_v3 = vrot.slane %v7449_v61, 3 }
 0x39a   : > { %v4015_v26 = vadd.f32 %v4014_v21, %v3902_v34  ;;  %v3797_v21 = vadd.f32 %v3796_v30, %v8192_v43 }
 0x39c   : > { %v4128_v56 = vadd.f32 %v4127_v19, %v4015_v26  ;;  %v3911_v29 = vpop.f32.mrf.mxu2 }
 0x39d   : > { %v4130_v46 = vpop.f32.mrf.mxu0 }
 0x39e   : > { %v3798_v51 = vpop.f32.mrf.mxu1  ;;  %v4221_v45 = vsel %vm1583_vm0, %v4128_v56, 0.0  ;;  %4056 = vmatmul.bf16.gmra.mxu3 %v9073_v48  ;;  %v2422_v48 = vsel %vm2015_vm14, %v2419_v54, %v2421_v60 }
 0x39f   : > { %v5069_v52 = vpack.c.bf16 %v4221_v45, %v4220_v35  ;;  %v4343_v0 = vadd.f32 %v4342_v41, %v4221_v45  ;;  %v4390_v24 = vmul.f32 %v4221_v45, %v4221_v45  ;;  %v3910_v45 = vadd.f32 %v3909_v11, %v3797_v21 }
 0x3a0   : > { %4169 = vmatmul.bf16.gmra.mxu0 %v2585_v47  ;;  %v9078_v47 = vld [vmem:[#allocation87_spill] sm:$0xff] }
 0x3a1   : > { %5172 = vst [vmem:[%s8416_s10 + $0x18] sm:$0xff] %v5069_v52   ;;  %v4430_v18 = vadd.f32 %v4429_v42, %v4390_v24  ;;  %v4017_v10 = vpop.f32.mrf.mxu3  ;;  %3953 = vmatmul.bf16.gmra.mxu2 %v2420_v57 }
 0x3a2   : > { %v4018_v20 = vadd.f32 %v4017_v10, %v3905_v62  ;;  %v9079_v10 = vld [vmem:[#allocation10_spill] sm:$0xff] }
 0x3a3   : > { %vm9080_vm12 = vcmp.eq.s32.totalorder %v9079_v10, 1 }
 0x3a4   : > { %v4131_v14 = vadd.f32 %v4130_v46, %v4018_v20  ;;  %v3914_v38 = vpop.f32.mrf.mxu2  ;;  %v2587_v46 = vsel %vm2558_vm1, %v2584_v39, %v2586_v3 }
 0x3a5   : > { %v4132_v59 = vpop.f32.mrf.mxu0 }
 0x3a6   : > { %v3801_v19 = vpop.f32.mrf.mxu1  ;;  %v4222_v17 = vsel %vm9075_vm8, %v4131_v14, 0.0 }
 0x3a7   : > { %v4344_v33 = vadd.f32 %v4343_v0, %v4222_v17  ;;  %v4391_v35 = vmul.f32 %v4222_v17, %v4222_v17  ;;  %v3799_v0 = vadd.f32 %v3798_v51, %v8205_v53 }
 0x3a9   : > { %3840 = vmatmul.bf16.gmra.mxu1 %v2418_v50  ;;  %v4431_v41 = vadd.f32 %v4430_v18, %v4391_v35  ;;  %v4019_v49 = vpop.f32.mrf.mxu3  ;;  %v3912_v11 = vadd.f32 %v3911_v29, %v3799_v0  ;;  %v3802_v35 = vadd.f32 %v3801_v19, %v8218_v31  ;;  %v9083_v29 = vld [vmem:[#allocation88_spill] sm:$0xff] }
 0x3aa   : > { %v4020_v34 = vadd.f32 %v4019_v49, %v3907_v7  ;;  %v2589_v49 = vsel %vm2558_vm1, %v2586_v3, %v2588_v2 }
 0x3ac   : > { %v4133_v1 = vadd.f32 %v4132_v59, %v4020_v34  ;;  %v3916_v58 = vpop.f32.mrf.mxu2  ;;  %v9081_v34 = vld [vmem:[#allocation9_spill] sm:$0xff] }
 0x3ad   : > { %v4135_v42 = vpop.f32.mrf.mxu0  ;;  %vm9082_vm0 = vcmp.eq.s32.totalorder %v9081_v34, 1 }
 0x3ae   : > { %v3803_v26 = vpop.f32.mrf.mxu1  ;;  %v4223_v56 = vsel %vm9077_vm4, %v4133_v1, 0.0  ;;  %4061 = vmatmul.bf16.gmra.mxu3 %v9078_v47  ;;  %v3915_v1 = vadd.f32 %v3914_v38, %v3802_v35 }
 0x3af   : > { %v5074_v50 = vpack.c.bf16 %v4223_v56, %v4222_v17  ;;  %v4345_v61 = vadd.f32 %v4344_v33, %v4223_v56  ;;  %v4392_v55 = vmul.f32 %v4223_v56, %v4223_v56  ;;  %v3804_v3 = vadd.f32 %v3803_v26, %v8225_v12 }
 0x3b0   : > { %4174 = vmatmul.bf16.gmra.mxu0 %v2587_v46 }
 0x3b1   : > { %5173 = vst [vmem:[%s8416_s10 + $0x20] sm:$0xff] %v5074_v50   ;;  %v4432_v43 = vadd.f32 %v4431_v41, %v4392_v55  ;;  %v4022_v30 = vpop.f32.mrf.mxu3  ;;  %3958 = vmatmul.bf16.gmra.mxu2 %v2422_v48  ;;  %v2423_v41 = vrot.slane %v7518_v6, 2  ;;  %v9084_v55 = vld [vmem:[#allocation13_spill] sm:$0xff]  ;;  %v3917_v38 = vadd.f32 %v3916_v58, %v3804_v3 }
 0x3b2   : > { %v4023_v52 = vadd.f32 %v4022_v30, %v3910_v45  ;;  %vm9085_vm10 = vcmp.eq.s32.totalorder %v9084_v55, 1  ;;  %v9088_v58 = vld [vmem:[#allocation89_spill] sm:$0xff] }
 0x3b3   : > { %v2424_v46 = vsel %vm2015_vm14, %v2421_v60, %v2423_v41 }
 0x3b4   : > { %v4136_v24 = vadd.f32 %v4135_v42, %v4023_v52  ;;  %v3919_v62 = vpop.f32.mrf.mxu2 }
 0x3b5   : > { %v4137_v39 = vpop.f32.mrf.mxu0 }
 0x3b6   : > { %v3806_v18 = vpop.f32.mrf.mxu1  ;;  %v4224_v20 = vsel %vm9080_vm12, %v4136_v24, 0.0  ;;  %v2590_v24 = vrot.slane %v9002_v16, 3 }
 0x3b7   : > { %v4346_v59 = vadd.f32 %v4345_v61, %v4224_v20  ;;  %v4393_v9 = vmul.f32 %v4224_v20, %v4224_v20  ;;  %v3807_v10 = vadd.f32 %v3806_v18, %v8232_v4 }
 0x3b9   : > { %3845 = vmatmul.bf16.gmra.mxu1 %v2420_v57  ;;  %v4433_v14 = vadd.f32 %v4432_v43, %v4393_v9  ;;  %v4024_v54 = vpop.f32.mrf.mxu3  ;;  %v2591_v9 = vsel %vm2558_vm1, %v2588_v2, %v2590_v24 }
 0x3ba   : > { %v4025_v17 = vadd.f32 %v4024_v54, %v3912_v11  ;;  %v9086_v11 = vld [vmem:[#allocation11_spill] sm:$0xff] }
 0x3bb   : > { %vm9087_vm2 = vcmp.eq.s32.totalorder %v9086_v11, 1 }
 0x3bc   : > { %v4138_v53 = vadd.f32 %v4137_v39, %v4025_v17  ;;  %v3921_v51 = vpop.f32.mrf.mxu2 }
 0x3bd   : > { %v4140_v33 = vpop.f32.mrf.mxu0 }
 0x3be   : > { %v3808_v7 = vpop.f32.mrf.mxu1  ;;  %v4225_v57 = vsel %vm9082_vm0, %v4138_v53, 0.0  ;;  %4066 = vmatmul.bf16.gmra.mxu3 %v9083_v29  ;;  %v9089_v29 = vld [vmem:[#allocation20_spill] sm:$0xff] }
 0x3bf   : > { %v5079_v42 = vpack.c.bf16 %v4225_v57, %v4224_v20  ;;  %v4347_v40 = vadd.f32 %v4346_v59, %v4225_v57  ;;  %v4394_v21 = vmul.f32 %v4225_v57, %v4225_v57  ;;  %v2425_v59 = vrot.slane %v7616_v27, 2 }
 0x3c0   : > { %4179 = vmatmul.bf16.gmra.mxu0 %v2589_v49  ;;  %v3809_v2 = vadd.f32 %v3808_v7, %v8239_v63  ;;  %vm9090_vm7 = vcmp.eq.s32.totalorder %v9089_v29, 1 }
 0x3c1   : > { %5174 = vst [vmem:[%s8416_s10 + $0x28] sm:$0xff] %v5079_v42   ;;  %v4434_v31 = vadd.f32 %v4433_v14, %v4394_v21  ;;  %v4027_v19 = vpop.f32.mrf.mxu3  ;;  %3963 = vmatmul.bf16.gmra.mxu2 %v2424_v46  ;;  %v2426_v16 = vsel %vm2015_vm14, %v2423_v41, %v2425_v59 }
 0x3c2   : > { %v4028_v22 = vadd.f32 %v4027_v19, %v3915_v1 }
 0x3c4   : > { %v4141_v47 = vadd.f32 %v4140_v33, %v4028_v22  ;;  %v3924_v50 = vpop.f32.mrf.mxu2  ;;  %v3920_v33 = vadd.f32 %v3919_v62, %v3807_v10  ;;  %v3922_v62 = vadd.f32 %v3921_v51, %v3809_v2 }
 0x3c5   : > { %v4142_v56 = vpop.f32.mrf.mxu0 }
 0x3c6   : > { %v3811_v61 = vpop.f32.mrf.mxu1  ;;  %v4226_v45 = vsel %vm9085_vm10, %v4141_v47, 0.0  ;;  %v8501_v47 = vrot.slane %v7997_v15, 2 }
 0x3c7   : > { %v4348_v43 = vadd.f32 %v4347_v40, %v4226_v45  ;;  %v4395_v30 = vmul.f32 %v4226_v45, %v4226_v45 }
 0x3c9   : > { %3850 = vmatmul.bf16.gmra.mxu1 %v2422_v48  ;;  %v4435_v52 = vadd.f32 %v4434_v31, %v4395_v30  ;;  %v4029_v60 = vpop.f32.mrf.mxu3  ;;  %v2592_v31 = vrot.slane %v7518_v6, 3 }
 0x3ca   : > { %v4030_v39 = vadd.f32 %v4029_v60, %v3917_v38 }
 0x3cb   : > { %v2593_v55 = vsel %vm2558_vm1, %v2590_v24, %v2592_v31 }
 0x3cc   : > { %v4143_v12 = vadd.f32 %v4142_v56, %v4030_v39  ;;  %v3926_v26 = vpop.f32.mrf.mxu2  ;;  %v3812_v56 = vadd.f32 %v3811_v61, %v8249_v25  ;;  %v2428_v25 = vsel %vm2015_vm14, %v2425_v59, %v8501_v47 }
 0x3cd   : > { %v4145_v0 = vpop.f32.mrf.mxu0 }
 0x3ce   : > { %v3813_v20 = vpop.f32.mrf.mxu1  ;;  %v4227_v48 = vsel %vm9087_vm2, %v4143_v12, 0.0  ;;  %4071 = vmatmul.bf16.gmra.mxu3 %v9088_v58  ;;  %v3925_v38 = vadd.f32 %v3924_v50, %v3812_v56 }
 0x3cf   : > { %v5084_v14 = vpack.c.bf16 %v4227_v48, %v4226_v45  ;;  %v4349_v54 = vadd.f32 %v4348_v43, %v4227_v48  ;;  %v4396_v17 = vmul.f32 %v4227_v48, %v4227_v48  ;;  %v9091_v45 = vld [vmem:[#allocation16_spill] sm:$0xff] }
 0x3d0   : > { %4184 = vmatmul.bf16.gmra.mxu0 %v2591_v9  ;;  %vm9092_vm13 = vcmp.eq.s32.totalorder %v9091_v45, 1  ;;  %v9094_v9 = vld [vmem:[#allocation27_spill] sm:$0xff] }
 0x3d1   : > { %5175 = vst [vmem:[%s8416_s10 + $0x30] sm:$0xff] %v5084_v14   ;;  %v4436_v4 = vadd.f32 %v4435_v52, %v4396_v17  ;;  %v4032_v18 = vpop.f32.mrf.mxu3  ;;  %3968 = vmatmul.bf16.gmra.mxu2 %v2426_v16  ;;  %vm9095_vm6 = vcmp.eq.s32.totalorder %v9094_v9, 1 }
 0x3d2   : > { %v4033_v35 = vadd.f32 %v4032_v18, %v3920_v33 }
 0x3d4   : > { %v4146_v49 = vadd.f32 %v4145_v0, %v4033_v35  ;;  %v3929_v34 = vpop.f32.mrf.mxu2  ;;  %v3814_v0 = vadd.f32 %v3813_v20, %v8262_v44  ;;  %v9096_v35 = vmov 0  }
 0x3d5   : > { %v4147_v53 = vpop.f32.mrf.mxu0 }
 0x3d6   : > { %v3816_v57 = vpop.f32.mrf.mxu1  ;;  %v4228_v42 = vsel %vm9090_vm7, %v4146_v49, 0.0  ;;  %v3927_v50 = vadd.f32 %v3926_v26, %v3814_v0  ;;  %v9098_v26 = vld [vmem:[#allocation97_spill] sm:$0xff]  ;;  %v9102_v0 = vld [vmem:[#allocation99_spill] sm:$0xff] }
 0x3d7   : > { %v4350_v40 = vadd.f32 %v4349_v54, %v4228_v42  ;;  %v4397_v21 = vmul.f32 %v4228_v42, %v4228_v42  ;;  %v2594_v54 = vrot.slane %v7616_v27, 3 }
 0x3d9   : > { %3855 = vmatmul.bf16.gmra.mxu1 %v2424_v46  ;;  %v4437_v1 = vadd.f32 %v4436_v4, %v4397_v21  ;;  %v4034_v41 = vpop.f32.mrf.mxu3  ;;  %v9093_v46 = vld [vmem:[#allocation92_spill] sm:$0xff]  ;;  %v3817_v4 = vadd.f32 %v3816_v57, %v8272_v28  ;;  %v2595_v2 = vsel %vm2558_vm1, %v2592_v31, %v2594_v54 }
 0x3da   : > { %v4035_v19 = vadd.f32 %v4034_v41, %v3922_v62 }
 0x3dc   : > { %v4148_v63 = vadd.f32 %v4147_v53, %v4035_v19  ;;  %v3931_v7 = vpop.f32.mrf.mxu2  ;;  %v2450_v53 = vrot.slane %v9096_v35, 2 }
 0x3dd   : > { %v4150_v22 = vpop.f32.mrf.mxu0 }
 0x3de   : > { %v3818_v3 = vpop.f32.mrf.mxu1  ;;  %v4229_v51 = vsel %vm9092_vm13, %v4148_v63, 0.0  ;;  %4076 = vmatmul.bf16.gmra.mxu3 %v9093_v46  ;;  %v2451_v28 = vsel %vm2015_vm14, %v8501_v47, %v2450_v53 }
 0x3df   : > { %v5089_v6 = vpack.c.bf16 %v4229_v51, %v4228_v42  ;;  %v4351_v43 = vadd.f32 %v4350_v40, %v4229_v51  ;;  %v4398_v30 = vmul.f32 %v4229_v51, %v4229_v51  ;;  %v3930_v40 = vadd.f32 %v3929_v34, %v3817_v4 }
 0x3e0   : > { %4189 = vmatmul.bf16.gmra.mxu0 %v2593_v55  ;;  %v3819_v41 = vadd.f32 %v3818_v3, %v8279_v32  ;;  %v2534_v4 = vrot.slane %v9096_v35, 3  ;;  %v9106_v35 = vld [vmem:[#allocation7_spill] sm:$0xff] }
 0x3e1   : > { %5176 = vst [vmem:[%s8416_s10 + $0x38] sm:$0xff] %v5089_v6   ;;  %v4438_v61 = vadd.f32 %v4437_v1, %v4398_v30  ;;  %v4037_v52 = vpop.f32.mrf.mxu3  ;;  %3973 = vmatmul.bf16.gmra.mxu2 %v2428_v25  ;;  %v2596_v6 = vrot.slane %v7997_v15, 3  ;;  %vm9107_vm14 = vcmp.eq.s32.totalorder %v9106_v35, 1 }
 0x3e2   : > { %v4038_v60 = vadd.f32 %v4037_v52, %v3925_v38  ;;  %v3932_v34 = vadd.f32 %v3931_v7, %v3819_v41  ;;  %v2535_v49 = vor.u32 %v2534_v4, %v2450_v53 }
 0x3e3   : > { %v2597_v52 = vsel %vm2558_vm1, %v2594_v54, %v2596_v6 }
 0x3e4   : > { %v4151_v24 = vadd.f32 %v4150_v22, %v4038_v60  ;;  %v3934_v10 = vpop.f32.mrf.mxu2  ;;  %v9100_v60 = vld [vmem:[#allocation36_spill] sm:$0xff] }
 0x3e5   : > { %v4152_v39 = vpop.f32.mrf.mxu0 }
 0x3e6   : > { %v3821_v12 = vpop.f32.mrf.mxu1  ;;  %v4230_v11 = vsel %vm9095_vm6, %v4151_v24, 0.0 }
 0x3e7   : > { %v4352_v48 = vadd.f32 %v4351_v43, %v4230_v11  ;;  %v4399_v58 = vmul.f32 %v4230_v11, %v4230_v11  ;;  %v3822_v38 = vadd.f32 %v3821_v12, %v8283_v5 }
 0x3e9   : > { %3860 = vmatmul.bf16.gmra.mxu1 %v2426_v16  ;;  %v4439_v14 = vadd.f32 %v4438_v61, %v4399_v58  ;;  %v4039_v59 = vpop.f32.mrf.mxu3  ;;  %v3935_v9 = vadd.f32 %v3934_v10, %v3822_v38 }
 0x3ea   : > { %v4040_v17 = vadd.f32 %v4039_v59, %v3927_v50  ;;  %v9103_v59 = vld [vmem:[#allocation5_spill] sm:$0xff] }
 0x3ec   : > { %v4153_v44 = vadd.f32 %v4152_v39, %v4040_v17  ;;  %v3936_v20 = vpop.f32.mrf.mxu2 }
 0x3ed   : > { %v4155_v33 = vpop.f32.mrf.mxu0 }
 0x3ee   : > { %v3823_v18 = vpop.f32.mrf.mxu1  ;;  %v4231_v16 = vsel %vm1593_vm9, %v4153_v44, 0.0  ;;  %4081 = vmatmul.bf16.gmra.mxu3 %v9098_v26  ;;  %vm9101_vm9 = vcmp.eq.s32.totalorder %v9100_v60, 1 }
 0x3ef   : > { %v5094_v29 = vpack.c.bf16 %v4231_v16, %v4230_v11  ;;  %v4353_v27 = vadd.f32 %v4352_v48, %v4231_v16  ;;  %v4400_v42 = vmul.f32 %v4231_v16, %v4231_v16  ;;  %v3824_v48 = vadd.f32 %v3823_v18, %v8292_v13 }
 0x3f0   : > { %4194 = vmatmul.bf16.gmra.mxu0 %v2595_v2 }
 0x3f1   : > { %5177 = vst [vmem:[%s8416_s10 + $0x40] sm:$0xff] %v5094_v29   ;;  %v4440_v57 = vadd.f32 %v4439_v14, %v4400_v42  ;;  %v4042_v21 = vpop.f32.mrf.mxu3  ;;  %3978 = vmatmul.bf16.gmra.mxu2 %v2451_v28  ;;  %v3937_v10 = vadd.f32 %v3936_v20, %v3824_v48  ;;  %v9105_v42 = vld [vmem:[#allocation95_spill] sm:$0xff]  ;;  %v2599_v28 = vsel %vm2558_vm1, %v2596_v6, %v2534_v4  ;;  %v9112_v48 = vld [vmem:[#allocation8_spill] sm:$0xff] }
 0x3f2   : > { %v4043_v62 = vadd.f32 %v4042_v21, %v3930_v40  ;;  %v2536_v40 = vsel %vm2016_vm3, %v9105_v42, %v2535_v49  ;;  %vm9113_vm5 = vcmp.eq.s32.totalorder %v9112_v48, 1 }
 0x3f4   : > { %v4156_v31 = vadd.f32 %v4155_v33, %v4043_v62  ;;  %v3939_v19 = vpop.f32.mrf.mxu2 }
 0x3f5   : > { %v4157_v1 = vpop.f32.mrf.mxu0 }
 0x3f6   : > { %v3826_v22 = vpop.f32.mrf.mxu1  ;;  %v4232_v63 = vsel %vm1594_vm15, %v4156_v31, 0.0  ;;  %vm9104_vm15 = vcmp.eq.s32.totalorder %v9103_v59, 1 }
 0x3f7   : > { %v4354_v55 = vadd.f32 %v4353_v27, %v4232_v63  ;;  %v4401_v45 = vmul.f32 %v4232_v63, %v4232_v63  ;;  %v3827_v13 = vadd.f32 %v3826_v22, %v8300_v37 }
 0x3f9   : > { %3865 = vmatmul.bf16.gmra.mxu1 %v2428_v25  ;;  %v4441_v51 = vadd.f32 %v4440_v57, %v4401_v45  ;;  %v4044_v46 = vpop.f32.mrf.mxu3  ;;  %v3940_v21 = vadd.f32 %v3939_v19, %v3827_v13 }
 0x3fa   : > { %v4045_v43 = vadd.f32 %v4044_v46, %v3932_v34 }
 0x3fc   : > { %v4158_v32 = vadd.f32 %v4157_v1, %v4045_v43  ;;  %v3941_v3 = vpop.f32.mrf.mxu2 }
 0x3fd   : > { %v4160_v30 = vpop.f32.mrf.mxu0 }
 0x3fe   : > { %v3828_v61 = vpop.f32.mrf.mxu1  ;;  %v4233_v39 = vsel %vm9101_vm9, %v4158_v32, 0.0  ;;  %4086 = vmatmul.bf16.gmra.mxu3 %v9102_v0 }
 0x3ff   : > { %v5099_v7 = vpack.c.bf16 %v4233_v39, %v4232_v63  ;;  %v4355_v25 = vadd.f32 %v4354_v55, %v4233_v39  ;;  %v4402_v24 = vmul.f32 %v4233_v39, %v4233_v39  ;;  %v3829_v31 = vadd.f32 %v3828_v61, %v8305_v36  ;;  %v9108_v55 = vld [vmem:[#allocation4_spill] sm:$0xff]  ;;  %v9110_v36 = vld [vmem:[#allocation6_spill] sm:$0xff] }
 0x400   : > { %4199 = vmatmul.bf16.gmra.mxu0 %v2597_v52  ;;  %vm9109_vm3 = vcmp.eq.s32.totalorder %v9108_v55, 1  ;;  %vm9111_vm1 = vcmp.eq.s32.totalorder %v9110_v36, 1 }
 0x401   : > { %5178 = vst [vmem:[%s8416_s10 + $0x48] sm:$0xff] %v5099_v7   ;;  %v4442_v15 = vadd.f32 %v4441_v51, %v4402_v24  ;;  %v4047_v11 = vpop.f32.mrf.mxu3  ;;  %3983 = vmatmul.bf16.gmra.mxu2 %v2450_v53  ;;  %v3942_v46 = vadd.f32 %v3941_v3, %v3829_v31 }
 0x402   : > { %v4048_v5 = vadd.f32 %v4047_v11, %v3935_v9 }
 0x404   : > { %v4161_v58 = vadd.f32 %v4160_v30, %v4048_v5  ;;  %v3944_v50 = vpop.f32.mrf.mxu2 }
 0x405   : > { %v4162_v12 = vpop.f32.mrf.mxu0 }
 0x406   : > { %v3831_v14 = vpop.f32.mrf.mxu1  ;;  %v4234_v54 = vsel %vm9104_vm15, %v4161_v58, 0.0 }
 0x407   : > { %v4356_v17 = vadd.f32 %v4355_v25, %v4234_v54  ;;  %v4403_v33 = vmul.f32 %v4234_v54, %v4234_v54  ;;  %v3832_v38 = vadd.f32 %v3831_v14, %v8310_v8 }
 0x409   : > { %3870 = vmatmul.bf16.gmra.mxu1 %v8501_v47  ;;  %v4443_v44 = vadd.f32 %v4442_v15, %v4403_v33  ;;  %v4049_v2 = vpop.f32.mrf.mxu3  ;;  %v3945_v25 = vadd.f32 %v3944_v50, %v3832_v38 }
 0x40a   : > { %v4050_v16 = vadd.f32 %v4049_v2, %v3937_v10  ;;  %v9114_v10 = vld [vmem:[#allocation66_spill] sm:$0xff] }
 0x40c   : > { %v4163_v18 = vadd.f32 %v4162_v12, %v4050_v16  ;;  %v3946_v29 = vpop.f32.mrf.mxu2 }
 0x40d   : > { %v4165_v26 = vpop.f32.mrf.mxu0 }
 0x40e   : > { %v3833_v27 = vpop.f32.mrf.mxu1  ;;  %v4235_v47 = vsel %vm9107_vm14, %v4163_v18, 0.0  ;;  %4091 = vmatmul.bf16.gmra.mxu3 %v2536_v40 }
 0x40f   : > { %v5104_v20 = vpack.c.bf16 %v4235_v47, %v4234_v54  ;;  %v4357_v53 = vadd.f32 %v4356_v17, %v4235_v47  ;;  %v4404_v57 = vmul.f32 %v4235_v47, %v4235_v47  ;;  %v3834_v11 = vadd.f32 %v3833_v27, %v8315_v23  ;;  %v9115_v23 = vld [vmem:[#allocation15_spill] sm:$0xff] }
 0x410   : > { %4204 = vmatmul.bf16.gmra.mxu0 %v2599_v28  ;;  %vm9116_vm8 = vcmp.eq.s32.totalorder %v9115_v23, 1  ;;  %v9117_v47 = vld [vmem:[#allocation67_spill] sm:$0xff] }
 0x411   : > { %5179 = vst [vmem:[%s8416_s10 + $0x50] sm:$0xff] %v5104_v20   ;;  %v4444_v62 = vadd.f32 %v4443_v44, %v4404_v57  ;;  %v4052_v37 = vpop.f32.mrf.mxu3  ;;  %v3947_v54 = vadd.f32 %v3946_v29, %v3834_v11 }
 0x412   : > { %v4053_v1 = vadd.f32 %v4052_v37, %v3940_v21 }
 0x414   : > { %v4166_v22 = vadd.f32 %v4165_v26, %v4053_v1  ;;  %v3949_v56 = vpop.f32.mrf.mxu2 }
 0x415   : > { %v4167_v41 = vpop.f32.mrf.mxu0 }
 0x416   : > { %v3836_v63 = vpop.f32.mrf.mxu1  ;;  %v4236_v45 = vsel %vm9109_vm3, %v4166_v22, 0.0 }
 0x417   : > { %v4358_v34 = vadd.f32 %v4357_v53, %v4236_v45  ;;  %v4405_v51 = vmul.f32 %v4236_v45, %v4236_v45  ;;  %v3837_v44 = vadd.f32 %v3836_v63, %v9114_v10 }
 0x419   : > { %v4445_v6 = vadd.f32 %v4444_v62, %v4405_v51  ;;  %v4054_v43 = vpop.f32.mrf.mxu3  ;;  %v3950_v42 = vadd.f32 %v3949_v56, %v3837_v44  ;;  %v9118_v62 = vld [vmem:[#allocation12_spill] sm:$0xff] }
 0x41a   : > { %v4055_v19 = vadd.f32 %v4054_v43, %v3942_v46  ;;  %vm9119_vm4 = vcmp.eq.s32.totalorder %v9118_v62, 1  ;;  %v9121_v43 = vld [vmem:[#allocation22_spill] sm:$0xff] }
 0x41b   : > { %vm9122_vm12 = vcmp.eq.s32.totalorder %v9121_v43, 1 }
 0x41c   : > { %v4168_v32 = vadd.f32 %v4167_v41, %v4055_v19  ;;  %v3951_v52 = vpop.f32.mrf.mxu2 }
 0x41d   : > { %v4170_v30 = vpop.f32.mrf.mxu0 }
 0x41e   : > { %v3838_v60 = vpop.f32.mrf.mxu1  ;;  %v4237_v61 = vsel %vm9111_vm1, %v4168_v32, 0.0  ;;  %4096 = vmatmul.bf16.gmra.mxu3 %v2535_v49 }
 0x41f   : > { %v5109_v39 = vpack.c.bf16 %v4237_v61, %v4236_v45  ;;  %v4359_v0 = vadd.f32 %v4358_v34, %v4237_v61  ;;  %v4406_v7 = vmul.f32 %v4237_v61, %v4237_v61  ;;  %v3839_v20 = vadd.f32 %v3838_v60, %v9117_v47  ;;  %v9120_v45 = vld [vmem:[#allocation55_spill] sm:$0xff] }
 0x420   : > { %4209 = vmatmul.bf16.gmra.mxu0 %v2534_v4 }
 0x421   : > { %5180 = vst [vmem:[%s8416_s10 + $0x58] sm:$0xff] %v5109_v39   ;;  %v4446_v3 = vadd.f32 %v4445_v6, %v4406_v7  ;;  %v4057_v24 = vpop.f32.mrf.mxu3  ;;  %v3952_v31 = vadd.f32 %v3951_v52, %v3839_v20 }
 0x422   : > { %v4058_v9 = vadd.f32 %v4057_v24, %v3945_v25 }
 0x424   : > { %v4171_v8 = vadd.f32 %v4170_v30, %v4058_v9  ;;  %v3954_v5 = vpop.f32.mrf.mxu2  ;;  %v9124_v9 = vld [vmem:[#allocation23_spill] sm:$0xff] }
 0x425   : > { %v4172_v15 = vpop.f32.mrf.mxu0  ;;  %vm9125_vm0 = vcmp.eq.s32.totalorder %v9124_v9, 1 }
 0x426   : > { %v3841_v12 = vpop.f32.mrf.mxu1  ;;  %v4238_v58 = vsel %vm9113_vm5, %v4171_v8, 0.0 }
 0x427   : > { %v4360_v14 = vadd.f32 %v4359_v0, %v4238_v58  ;;  %v4407_v59 = vmul.f32 %v4238_v58, %v4238_v58  ;;  %v3842_v34 = vadd.f32 %v3841_v12, %v9120_v45  ;;  %v9123_v0 = vld [vmem:[#allocation57_spill] sm:$0xff] }
 0x429   : > { %v4447_v17 = vadd.f32 %v4446_v3, %v4407_v59  ;;  %v4059_v33 = vpop.f32.mrf.mxu3  ;;  %v3955_v60 = vadd.f32 %v3954_v5, %v3842_v34  ;;  %v9126_v59 = vld [vmem:[#allocation61_spill] sm:$0xff] }
 0x42a   : > { %v4060_v50 = vadd.f32 %v4059_v33, %v3947_v54 }
 0x42c   : > { %v4173_v2 = vadd.f32 %v4172_v15, %v4060_v50  ;;  %v3956_v49 = vpop.f32.mrf.mxu2 }
 0x42d   : > { %v4175_v4 = vpop.f32.mrf.mxu0 }
 0x42e   : > { %v3843_v16 = vpop.f32.mrf.mxu1  ;;  %v4239_v26 = vsel %vm9116_vm8, %v4173_v2, 0.0  ;;  %vm4470_vm8 = vcmask 1040384  }
 0x42f   : > { %v5114_v13 = vpack.c.bf16 %v4239_v26, %v4238_v58  ;;  %v4361_v18 = vadd.f32 %v4360_v14, %v4239_v26  ;;  %v4408_v27 = vmul.f32 %v4239_v26, %v4239_v26  ;;  %v3844_v7 = vadd.f32 %v3843_v16, %v9123_v0 }
 0x431   : > { %5181 = vst [vmem:[%s8416_s10 + $0x60] sm:$0xff] %v5114_v13   ;;  %v4448_v40 = vadd.f32 %v4447_v17, %v4408_v27  ;;  %v4062_v28 = vpop.f32.mrf.mxu3  ;;  %v3957_v12 = vadd.f32 %v3956_v49, %v3844_v7  ;;  %v9129_v27 = vld [vmem:[#allocation49_spill] sm:$0xff] }
 0x432   : > { %v4063_v29 = vadd.f32 %v4062_v28, %v3950_v42 }
 0x434   : > { %v4176_v53 = vadd.f32 %v4175_v4, %v4063_v29  ;;  %v3959_v57 = vpop.f32.mrf.mxu2  ;;  %v9127_v4 = vld [vmem:[#allocation32_spill] sm:$0xff] }
 0x435   : > { %v4177_v35 = vpop.f32.mrf.mxu0  ;;  %vm9128_vm10 = vcmp.eq.s32.totalorder %v9127_v4, 1 }
 0x436   : > { %v3846_v21 = vpop.f32.mrf.mxu1  ;;  %v4240_v37 = vsel %vm9119_vm4, %v4176_v53, 0.0 }
 0x437   : > { %v4362_v1 = vadd.f32 %v4361_v18, %v4240_v37  ;;  %v4409_v41 = vmul.f32 %v4240_v37, %v4240_v37  ;;  %v3847_v54 = vadd.f32 %v3846_v21, %v9126_v59 }
 0x439   : > { %v4449_v22 = vadd.f32 %v4448_v40, %v4409_v41  ;;  %v4064_v63 = vpop.f32.mrf.mxu3  ;;  %v3960_v23 = vadd.f32 %v3959_v57, %v3847_v54  ;;  %v9132_v41 = vld [vmem:[#allocation64_spill] sm:$0xff] }
 0x43a   : > { %v4065_v56 = vadd.f32 %v4064_v63, %v3952_v31 }
 0x43c   : > { %v4178_v51 = vadd.f32 %v4177_v35, %v4065_v56  ;;  %v3961_v46 = vpop.f32.mrf.mxu2  ;;  %v9130_v35 = vld [vmem:[#allocation42_spill] sm:$0xff] }
 0x43d   : > { %v4180_v55 = vpop.f32.mrf.mxu0  ;;  %vm9131_vm2 = vcmp.eq.s32.totalorder %v9130_v35, 1 }
 0x43e   : > { %v3848_v6 = vpop.f32.mrf.mxu1  ;;  %v4241_v19 = vsel %vm9122_vm12, %v4178_v51, 0.0 }
 0x43f   : > { %v5119_v30 = vpack.c.bf16 %v4241_v19, %v4240_v37  ;;  %v4363_v38 = vadd.f32 %v4362_v1, %v4241_v19  ;;  %v4410_v32 = vmul.f32 %v4241_v19, %v4241_v19  ;;  %v3849_v42 = vadd.f32 %v3848_v6, %v9129_v27 }
 0x441   : > { %5182 = vst [vmem:[%s8416_s10 + $0x68] sm:$0xff] %v5119_v30   ;;  %v4450_v36 = vadd.f32 %v4449_v22, %v4410_v32  ;;  %v4067_v61 = vpop.f32.mrf.mxu3  ;;  %v3962_v21 = vadd.f32 %v3961_v46, %v3849_v42  ;;  %v9135_v32 = vld [vmem:[#allocation85_spill] sm:$0xff] }
 0x442   : > { %v4068_v52 = vadd.f32 %v4067_v61, %v3955_v60 }
 0x444   : > { %v4181_v25 = vadd.f32 %v4180_v55, %v4068_v52  ;;  %v3964_v3 = vpop.f32.mrf.mxu2  ;;  %v9133_v55 = vld [vmem:[#allocation40_spill] sm:$0xff] }
 0x445   : > { %v4182_v39 = vpop.f32.mrf.mxu0  ;;  %vm9134_vm7 = vcmp.eq.s32.totalorder %v9133_v55, 1 }
 0x446   : > { %v3851_v24 = vpop.f32.mrf.mxu1  ;;  %v4242_v15 = vsel %vm9125_vm0, %v4181_v25, 0.0 }
 0x447   : > { %v4364_v11 = vadd.f32 %v4363_v38, %v4242_v15  ;;  %v4411_v8 = vmul.f32 %v4242_v15, %v4242_v15  ;;  %v3852_v31 = vadd.f32 %v3851_v24, %v9132_v41 }
 0x449   : > { %v4451_v48 = vadd.f32 %v4450_v36, %v4411_v8  ;;  %v4069_v58 = vpop.f32.mrf.mxu3  ;;  %v3965_v43 = vadd.f32 %v3964_v3, %v3852_v31  ;;  %v9138_v8 = vld [vmem:[#allocation71_spill] sm:$0xff] }
 0x44a   : > { %v4070_v5 = vadd.f32 %v4069_v58, %v3957_v12 }
 0x44c   : > { %v4183_v17 = vadd.f32 %v4182_v39, %v4070_v5  ;;  %v3966_v33 = vpop.f32.mrf.mxu2  ;;  %v9136_v39 = vld [vmem:[#allocation30_spill] sm:$0xff] }
 0x44d   : > { %v4185_v14 = vpop.f32.mrf.mxu0  ;;  %vm9137_vm13 = vcmp.eq.s32.totalorder %v9136_v39, 1 }
 0x44e   : > { %v3853_v50 = vpop.f32.mrf.mxu1  ;;  %v4243_v10 = vsel %vm9128_vm10, %v4183_v17, 0.0 }
 0x44f   : > { %v5124_v44 = vpack.c.bf16 %v4243_v10, %v4242_v15  ;;  %v4365_v2 = vadd.f32 %v4364_v11, %v4243_v10  ;;  %v4412_v16 = vmul.f32 %v4243_v10, %v4243_v10  ;;  %v3854_v60 = vadd.f32 %v3853_v50, %v9135_v32 }
 0x451   : > { %5183 = vst [vmem:[%s8416_s10 + $0x70] sm:$0xff] %v5124_v44   ;;  %v4452_v26 = vadd.f32 %v4451_v48, %v4412_v16  ;;  %v4072_v13 = vpop.f32.mrf.mxu3  ;;  %v3967_v24 = vadd.f32 %v3966_v33, %v3854_v60  ;;  %v9141_v16 = vld [vmem:[#allocation77_spill] sm:$0xff] }
 0x452   : > { %v4073_v49 = vadd.f32 %v4072_v13, %v3960_v23 }
 0x454   : > { %v4186_v40 = vadd.f32 %v4185_v14, %v4073_v49  ;;  %v3969_v28 = vpop.f32.mrf.mxu2  ;;  %v9139_v14 = vld [vmem:[#allocation25_spill] sm:$0xff] }
 0x455   : > { %v4187_v18 = vpop.f32.mrf.mxu0  ;;  %vm9140_vm6 = vcmp.eq.s32.totalorder %v9139_v14, 1 }
 0x456   : > { %v3856_v29 = vpop.f32.mrf.mxu1  ;;  %v4244_v47 = vsel %vm9131_vm2, %v4186_v40, 0.0 }
 0x457   : > { %v4366_v20 = vadd.f32 %v4365_v2, %v4244_v47  ;;  %v4413_v53 = vmul.f32 %v4244_v47, %v4244_v47  ;;  %v3857_v12 = vadd.f32 %v3856_v29, %v9138_v8 }
 0x459   : > { %v4453_v62 = vadd.f32 %v4452_v26, %v4413_v53  ;;  %v4074_v37 = vpop.f32.mrf.mxu3  ;;  %v3970_v4 = vadd.f32 %v3969_v28, %v3857_v12  ;;  %v9144_v53 = vld [vmem:[#allocation39_spill] sm:$0xff] }
 0x45a   : > { %v4075_v57 = vadd.f32 %v4074_v37, %v3962_v21 }
 0x45c   : > { %v4188_v22 = vadd.f32 %v4187_v18, %v4075_v57  ;;  %v3971_v63 = vpop.f32.mrf.mxu2  ;;  %v9142_v18 = vld [vmem:[#allocation35_spill] sm:$0xff] }
 0x45d   : > { %v4190_v1 = vpop.f32.mrf.mxu0  ;;  %vm9143_vm9 = vcmp.eq.s32.totalorder %v9142_v18, 1 }
 0x45e   : > { %v3858_v56 = vpop.f32.mrf.mxu1  ;;  %v4245_v45 = vsel %vm9134_vm7, %v4188_v22, 0.0 }
 0x45f   : > { %v5129_v34 = vpack.c.bf16 %v4245_v45, %v4244_v47  ;;  %v4367_v51 = vadd.f32 %v4366_v20, %v4245_v45  ;;  %v4414_v6 = vmul.f32 %v4245_v45, %v4245_v45  ;;  %v3859_v23 = vadd.f32 %v3858_v56, %v9141_v16 }
 0x461   : > { %5184 = vst [vmem:[%s8416_s10 + $0x78] sm:$0xff] %v5129_v34   ;;  %v4454_v19 = vadd.f32 %v4453_v62, %v4414_v6  ;;  %v4077_v30 = vpop.f32.mrf.mxu3  ;;  %v3972_v29 = vadd.f32 %v3971_v63, %v3859_v23  ;;  %v9147_v6 = vld [vmem:[#allocation78_spill] sm:$0xff] }
 0x462   : > { %v4078_v46 = vadd.f32 %v4077_v30, %v3965_v43 }
 0x464   : > { %v4191_v36 = vadd.f32 %v4190_v1, %v4078_v46  ;;  %v3974_v61 = vpop.f32.mrf.mxu2  ;;  %v9145_v1 = vld [vmem:[#allocation33_spill] sm:$0xff] }
 0x465   : > { %v4192_v38 = vpop.f32.mrf.mxu0  ;;  %vm9146_vm15 = vcmp.eq.s32.totalorder %v9145_v1, 1 }
 0x466   : > { %v3861_v52 = vpop.f32.mrf.mxu1  ;;  %v4246_v0 = vsel %vm9137_vm13, %v4191_v36, 0.0 }
 0x467   : > { %v4368_v7 = vadd.f32 %v4367_v51, %v4246_v0  ;;  %v4415_v25 = vmul.f32 %v4246_v0, %v4246_v0  ;;  %v3862_v21 = vadd.f32 %v3861_v52, %v9144_v53 }
 0x469   : > { %v4455_v9 = vadd.f32 %v4454_v19, %v4415_v25  ;;  %v4079_v15 = vpop.f32.mrf.mxu3  ;;  %v3975_v55 = vadd.f32 %v3974_v61, %v3862_v21  ;;  %v9150_v25 = vld [vmem:[#allocation84_spill] sm:$0xff] }
 0x46a   : > { %v4080_v3 = vadd.f32 %v4079_v15, %v3967_v24 }
 0x46c   : > { %v4193_v48 = vadd.f32 %v4192_v38, %v4080_v3  ;;  %v3976_v58 = vpop.f32.mrf.mxu2  ;;  %v9148_v38 = vld [vmem:[#allocation34_spill] sm:$0xff] }
 0x46d   : > { %v4195_v11 = vpop.f32.mrf.mxu0  ;;  %vm9149_vm14 = vcmp.eq.s32.totalorder %v9148_v38, 1 }
 0x46e   : > { %v3863_v5 = vpop.f32.mrf.mxu1  ;;  %v4247_v59 = vsel %vm9140_vm6, %v4193_v48, 0.0 }
 0x46f   : > { %v5134_v54 = vpack.c.bf16 %v4247_v59, %v4246_v0  ;;  %v4369_v17 = vadd.f32 %v4368_v7, %v4247_v59  ;;  %v4416_v50 = vmul.f32 %v4247_v59, %v4247_v59  ;;  %v3864_v43 = vadd.f32 %v3863_v5, %v9147_v6 }
 0x471   : > { %5185 = vst [vmem:[%s8416_s10 + $0x80] sm:$0xff] %v5134_v54   ;;  %v4456_v10 = vadd.f32 %v4455_v9, %v4416_v50  ;;  %v4082_v44 = vpop.f32.mrf.mxu3  ;;  %v3977_v52 = vadd.f32 %v3976_v58, %v3864_v43  ;;  %v9153_v50 = vld [vmem:[#allocation76_spill] sm:$0xff] }
 0x472   : > { %v4083_v33 = vadd.f32 %v4082_v44, %v3970_v4  ;;  %v9154_v44 = vld [vmem:[#allocation50_spill] sm:$0xff] }
 0x473   : > { %vm9155_vm1 = vcmp.eq.s32.totalorder %v9154_v44, 1 }
 0x474   : > { %v4196_v26 = vadd.f32 %v4195_v11, %v4083_v33  ;;  %v3979_v13 = vpop.f32.mrf.mxu2  ;;  %v9151_v11 = vld [vmem:[#allocation45_spill] sm:$0xff] }
 0x475   : > { %v4197_v2 = vpop.f32.mrf.mxu0  ;;  %vm9152_vm3 = vcmp.eq.s32.totalorder %v9151_v11, 1 }
 0x476   : > { %v3866_v49 = vpop.f32.mrf.mxu1  ;;  %v4248_v27 = vsel %vm9143_vm9, %v4196_v26, 0.0 }
 0x477   : > { %v4370_v42 = vadd.f32 %v4369_v17, %v4248_v27  ;;  %v4417_v40 = vmul.f32 %v4248_v27, %v4248_v27  ;;  %v3867_v24 = vadd.f32 %v3866_v49, %v9150_v25 }
 0x479   : > { %v4457_v35 = vadd.f32 %v4456_v10, %v4417_v40  ;;  %v4084_v47 = vpop.f32.mrf.mxu3  ;;  %v3980_v14 = vadd.f32 %v3979_v13, %v3867_v24  ;;  %v9156_v13 = vld [vmem:[#allocation54_spill] sm:$0xff] }
 0x47a   : > { %v4085_v28 = vadd.f32 %v4084_v47, %v3972_v29  ;;  %v9157_v29 = vld [vmem:[#allocation51_spill] sm:$0xff] }
 0x47b   : > { %vm9158_vm5 = vcmp.eq.s32.totalorder %v9157_v29, 1 }
 0x47c   : > { %v4198_v62 = vadd.f32 %v4197_v2, %v4085_v28  ;;  %v3981_v37 = vpop.f32.mrf.mxu2 }
 0x47d   : > { %v4200_v20 = vpop.f32.mrf.mxu0 }
 0x47e   : > { %v3868_v57 = vpop.f32.mrf.mxu1  ;;  %v4249_v41 = vsel %vm9146_vm15, %v4198_v62, 0.0 }
 0x47f   : > { %v5139_v31 = vpack.c.bf16 %v4249_v41, %v4248_v27  ;;  %v4371_v22 = vadd.f32 %v4370_v42, %v4249_v41  ;;  %v4418_v56 = vmul.f32 %v4249_v41, %v4249_v41  ;;  %v3869_v4 = vadd.f32 %v3868_v57, %v9153_v50 }
 0x481   : > { %5186 = vst [vmem:[%s8416_s10 + $0x88] sm:$0xff] %v5139_v31   ;;  %v4458_v45 = vadd.f32 %v4457_v35, %v4418_v56  ;;  %v4087_v34 = vpop.f32.mrf.mxu3  ;;  %v3982_v23 = vadd.f32 %v3981_v37, %v3869_v4 }
 0x482   : > { %v4088_v63 = vadd.f32 %v4087_v34, %v3975_v55 }
 0x484   : > { %v4201_v19 = vadd.f32 %v4200_v20, %v4088_v63  ;;  %v3984_v30 = vpop.f32.mrf.mxu2 }
 0x485   : > { %v4202_v51 = vpop.f32.mrf.mxu0 }
 0x486   : > { %v3871_v46 = vpop.f32.mrf.mxu1  ;;  %v4250_v32 = vsel %vm9149_vm14, %v4201_v19, 0.0 }
 0x487   : > { %v4372_v60 = vadd.f32 %v4371_v22, %v4250_v32  ;;  %v4419_v36 = vmul.f32 %v4250_v32, %v4250_v32  ;;  %v3872_v42 = vadd.f32 %v3871_v46, %v9156_v13 }
 0x489   : > { %v4459_v39 = vadd.f32 %v4458_v45, %v4419_v36  ;;  %v4089_v0 = vpop.f32.mrf.mxu3  ;;  %v3985_v53 = vadd.f32 %v3984_v30, %v3872_v42 }
 0x48a   : > { %v4090_v61 = vadd.f32 %v4089_v0, %v3977_v52 }
 0x48c   : > { %v4203_v9 = vadd.f32 %v4202_v51, %v4090_v61  ;;  %v3986_v15 = vpop.f32.mrf.mxu2 }
 0x48d   : > { %v4205_v7 = vpop.f32.mrf.mxu0 }
 0x48e   : > { %v3873_v3 = vpop.f32.mrf.mxu1  ;;  %v4251_v8 = vsel %vm9152_vm3, %v4203_v9, 0.0 }
 0x48f   : > { %v5144_v12 = vpack.c.bf16 %v4251_v8, %v4250_v32  ;;  %v4373_v48 = vadd.f32 %v4372_v60, %v4251_v8  ;;  %v4420_v5 = vmul.f32 %v4251_v8, %v4251_v8 }
 0x491   : > { %5187 = vst [vmem:[%s8416_s10 + $0x90] sm:$0xff] %v5144_v12   ;;  %v4460_v59 = vadd.f32 %v4459_v39, %v4420_v5  ;;  %v4092_v54 = vpop.f32.mrf.mxu3 }
 0x492   : > { %v4093_v58 = vadd.f32 %v4092_v54, %v3980_v14 }
 0x494   : > { %v4206_v10 = vadd.f32 %v4205_v7, %v4093_v58 }
 0x495   : > { %v4207_v17 = vpop.f32.mrf.mxu0 }
 0x496   : > { %v4252_v33 = vsel %vm9155_vm1, %v4206_v10, 0.0 }
 0x497   : > { %v4374_v2 = vadd.f32 %v4373_v48, %v4252_v33  ;;  %v4421_v16 = vmul.f32 %v4252_v33, %v4252_v33 }
 0x499   : > { %v4461_v26 = vadd.f32 %v4460_v59, %v4421_v16  ;;  %v4094_v49 = vpop.f32.mrf.mxu3 }
 0x49a   : > { %v4095_v18 = vadd.f32 %v4094_v49, %v3982_v23 }
 0x49c   : > { %v4208_v40 = vadd.f32 %v4207_v17, %v4095_v18 }
 0x49d   : > { %v4210_v27 = vpop.f32.mrf.mxu0 }
 0x49e   : > { %v4253_v35 = vsel %vm9158_vm5, %v4208_v40, 0.0 }
 0x49f   : > { %v5149_v47 = vpack.c.bf16 %v4253_v35, %v4252_v33  ;;  %v4375_v28 = vadd.f32 %v4374_v2, %v4253_v35  ;;  %v4422_v20 = vmul.f32 %v4253_v35, %v4253_v35 }
 0x4a1   : > { %5188 = vst [vmem:[%s8416_s10 + $0x98] sm:$0xff] %v5149_v47   ;;  %v4462_v21 = vadd.f32 %v4461_v26, %v4422_v20  ;;  %v4097_v62 = vpop.f32.mrf.mxu3 }
 0x4a2   : > { %v4098_v57 = vadd.f32 %v4097_v62, %v3985_v53 }
 0x4a4   : > { %v4211_v1 = vadd.f32 %v4210_v27, %v4098_v57 }
 0x4a5   : > { %v4212_v37 = vpop.f32.mrf.mxu0 }
 0x4a6   : > { %v4254_v31 = vsel %vm1616_vm11, %v4211_v1, 0.0 }
 0x4a7   : > { %v4295_v22 = vpack.c.bf16 %v4254_v31, %v4254_v31  ;;  %v4376_v56 = vadd.f32 %v4375_v28, %v4254_v31  ;;  %v4423_v55 = vmul.f32 %v4254_v31, %v4254_v31 }
 0x4a9   : > { %4336 = vst [vmem:[%s8416_s10 + $0xa0] sm:$0xf] %v4295_v22  ;;  %v4377_v45 = vrot.slane %v4376_v56, 4  ;;  %v4463_v34 = vadd.f32 %v4462_v21, %v4423_v55  ;;  %v4099_v63 = vpop.f32.mrf.mxu3 }
 0x4ab   : > { %v4378_v51 = vadd.f32 %v4377_v45, %v4376_v56  ;;  %v4464_v6 = vrot.slane %v4463_v34, 4 }
 0x4ad   : > { %v4379_v43 = vrot.slane %v4378_v51, 2  ;;  %v4465_v19 = vadd.f32 %v4464_v6, %v4463_v34 }
 0x4af   : > { %v4380_v30 = vadd.f32 %v4379_v43, %v4378_v51  ;;  %v4466_v46 = vrot.slane %v4465_v19, 2 }
 0x4b1   : > { %v4381_v38 = vrot.slane %v4380_v30, 1  ;;  %v4467_v32 = vadd.f32 %v4466_v46, %v4465_v19 }
 0x4b3   : > { %v4468_v60 = vrot.slane %v4467_v32, 1  ;;  %v4382_v36 = vadd.f32 %v4381_v38, %v4380_v30 }
 0x4b5   : > { %v4469_v52 = vadd.f32 %v4468_v60, %v4467_v32 }
 0x4b7   : > { %v4471_v39 = vsel %vm4470_vm8, %v4382_v36, %v4469_v52 }
 0x4b8   : > { %4472 = vst [vmem:[%s334_s14] sm:$0x3] %v4471_v39 }
 0x4b9 PF: > { %s17_s25 = sadd.s32 1, %s5468_s25   ;;  %s9160_s21 = smov %s5460_s23 }
 0x4ba   : > { %p14_p7 = scmp.ge.s32.totalorder %s17_s25, 8   ;;  %s9161_s22 = smov %s5464_s24 }
 0x4bb   : > { %s9162_s23 = smov %s9165_s26  ;;  %s9163_s24 = smov %s9169_s27 }
 0x4bc   :  { %16 = sbr.rel (!%p14_p7) target bundleno = 3 (0x3), region = 88 }

</bundles_post_ra>
